<compile_context>
chip_gen: v6e
topology: v6e:2x2x1
jax: 0.10.0
libtpu: 0.0.40
codegen_flags: <defaults>
</compile_context>

<pallas_src>
import functools

import jax
import jax.numpy as jnp
from jax.experimental import pallas as pl
from jax.experimental.pallas import tpu as pltpu


def _fused_matmul_kernel(w_ref, x_ref, bias_ref, o_ref, *, negative_slope,
                         apply_act):
    # (Cout, K) @ (K, tm) -> (Cout, tm); epilogue: + bias, LeakyReLU.
    acc = jnp.dot(w_ref[...], x_ref[...], preferred_element_type=jnp.float32)
    y = acc + bias_ref[...]
    if apply_act:
        y = jnp.where(y >= 0, y, negative_slope * y)   # LeakyReLU(0.01)
    o_ref[...] = y.astype(o_ref.dtype)


def _pick_tm(m):
    """Tile of the lane (M) axis: big enough to amortize per-step pipeline
    overhead, small enough to keep >=2 parallel grid steps on big layers."""
    if m <= 256:
        return m
    tm = min(2048, m // 2)
    tm = (tm // 128) * 128
    while tm > 128 and m % tm:
        tm -= 128
    if tm <= 0 or m % tm:
        return m
    return tm


def fused_matmul(w, x, bias, *, apply_act, negative_slope=0.01):
    """act(w @ x + bias[:, None]) with w:(Cout,K), x:(K,M), bias:(Cout,)."""
    cout, k = w.shape
    k2, m = x.shape
    assert k == k2
    tm = _pick_tm(m)
    assert m % tm == 0
    kernel = functools.partial(_fused_matmul_kernel,
                               negative_slope=negative_slope,
                               apply_act=apply_act)
    return pl.pallas_call(
        kernel,
        out_shape=jax.ShapeDtypeStruct((cout, m), x.dtype),
        grid_spec=pltpu.PrefetchScalarGridSpec(
            num_scalar_prefetch=0,
            grid=(m // tm,),
            in_specs=[
                pl.BlockSpec((cout, k), lambda i: (0, 0)),   # weight (resident)
                pl.BlockSpec((k, tm), lambda i: (0, i)),     # activation tile
                pl.BlockSpec((cout, 1), lambda i: (0, 0)),   # folded bias
            ],
            out_specs=pl.BlockSpec((cout, tm), lambda i: (0, i)),
        ),
        compiler_params=pltpu.CompilerParams(
            dimension_semantics=("parallel",)),
    )(w, x, bias.reshape(cout, 1))


def _im2col(x, k=3, stride=2, pad=1):
    """(C, N, H, W) -> (C*k*k, N*Ho*Wo) patches, row order (kh, kw, C)."""
    c, n, h, w = x.shape
    ho = (h + 2 * pad - k) // stride + 1
    wo = (w + 2 * pad - k) // stride + 1
    xp = jnp.pad(x, ((0, 0), (0, 0), (pad, pad), (pad, pad)))
    rows = []
    for kh in range(k):
        for kw in range(k):
            rows.append(
                xp[:, :, kh:kh + stride * ho:stride, kw:kw + stride * wo:stride])
    patches = jnp.concatenate(rows, axis=0)            # (k*k*C, N, Ho, Wo)
    return patches.reshape(k * k * c, n * ho * wo), (n, ho, wo)


def conv_bn_lrelu(x, params):
    """Conv2d(3,s=2,p=1)+bias -> BatchNorm2d(eval) -> LeakyReLU -> Dropout2d(id).

    x: (Cin, N, H, W) feature-major; returns (Cout, N, Ho, Wo).
    """
    w, b, gamma, beta, mean, var, eps = params         # w: (Cout, Cin, 3, 3)
    cout = w.shape[0]
    patches, (n, ho, wo) = _im2col(x)
    kdim = patches.shape[0]
    # Reorder weight columns to (kh, kw, Cin) to match the im2col row order.
    w2d = jnp.transpose(w, (0, 2, 3, 1)).reshape(cout, kdim)
    bn_scale = gamma / jnp.sqrt(var + eps)
    w2d = w2d * bn_scale[:, None]                      # fold BN scale into W
    bias = (b - mean) * bn_scale + beta                # fold conv bias + BN shift
    kpad = (-kdim) % 8                                 # align reduction dim (27->32)
    if kpad:
        patches = jnp.pad(patches, ((0, kpad), (0, 0)))
        w2d = jnp.pad(w2d, ((0, 0), (0, kpad)))
    y = fused_matmul(w2d, patches, bias, apply_act=True)
    return y.reshape(cout, n, ho, wo)


def encoder_forward(x_nchw, convs, mu_params, lv_params):
    x = jnp.transpose(x_nchw, (1, 0, 2, 3))            # NCHW -> (C, N, H, W) once
    for p in convs:
        x = conv_bn_lrelu(x, p)
    c, n, h, w = x.shape
    # torch flattens NCHW, i.e. per-sample feature order (c, h, w)
    flat = jnp.transpose(x, (0, 2, 3, 1)).reshape(c * h * w, n)
    mu_w, mu_b = mu_params
    lv_w, lv_b = lv_params
    bdim = mu_w.shape[0]
    w_fused = jnp.concatenate([mu_w, lv_w], axis=0)    # fuse the two heads
    b_fused = jnp.concatenate([mu_b, lv_b], axis=0)
    out = fused_matmul(w_fused, flat, b_fused, apply_act=False)   # (2B, N)
    return out[:bdim].T, out[bdim:].T


def init_params(key, input_channels, bottleneck_dim):
    chans = [(input_channels, 32), (32, 64), (64, 64), (64, 64)]
    convs = []
    for cin, cout in chans:
        key, k1, k2, k3, k4 = jax.random.split(key, 5)
        w = 0.05 * jax.random.normal(k1, (cout, cin, 3, 3), jnp.float32)
        b = 0.05 * jax.random.normal(k2, (cout,), jnp.float32)
        gamma = 1.0 + 0.05 * jax.random.normal(k3, (cout,), jnp.float32)
        beta = 0.05 * jax.random.normal(k4, (cout,), jnp.float32)
        mean = jnp.zeros((cout,), jnp.float32)
        var = jnp.ones((cout,), jnp.float32)
        convs.append((w, b, gamma, beta, mean, var, 1e-5))
    feat = 8 * 8 * 64
    key, k1, k2, k3, k4 = jax.random.split(key, 5)
    mu_w = 0.02 * jax.random.normal(k1, (bottleneck_dim, feat), jnp.float32)
    mu_b = 0.02 * jax.random.normal(k2, (bottleneck_dim,), jnp.float32)
    lv_w = 0.02 * jax.random.normal(k3, (bottleneck_dim, feat), jnp.float32)
    lv_b = 0.02 * jax.random.normal(k4, (bottleneck_dim,), jnp.float32)
    return convs, (mu_w, mu_b), (lv_w, lv_b)


def reference_forward(x, convs, mu_params, lv_params):
    """Pure-XLA reference (PyTorch eval semantics) for a correctness check."""
    y = x
    for (w, b, gamma, beta, mean, var, eps) in convs:
        y = jax.lax.conv_general_dilated(
            y, w, window_strides=(2, 2), padding=((1, 1), (1, 1)),
            dimension_numbers=("NCHW", "OIHW", "NCHW"))
        y = y + b[None, :, None, None]
        y = (y - mean[None, :, None, None]) * (
            gamma[None, :, None, None] / jnp.sqrt(var[None, :, None, None] + eps)
        ) + beta[None, :, None, None]
        y = jnp.where(y >= 0, y, 0.01 * y)
    flat = y.reshape(y.shape[0], -1)
    mu_w, mu_b = mu_params
    lv_w, lv_b = lv_params
    return flat @ mu_w.T + mu_b, flat @ lv_w.T + lv_b


if __name__ == "__main__":
    input_channels = 3
    bottleneck_dim = 32
    batch = 2
    spatial = 128    # 128 / 2^4 = 8, matching the 8*8*64 Linear input size

    key = jax.random.PRNGKey(0)
    key, pkey, xkey = jax.random.split(key, 3)
    convs, mu_p, lv_p = init_params(pkey, input_channels, bottleneck_dim)
    x = jax.random.normal(xkey, (batch, input_channels, spatial, spatial),
                          jnp.float32)

    fwd = jax.jit(encoder_forward)
    mu, log_var = fwd(x, convs, mu_p, lv_p)
    jax.block_until_ready((mu, log_var))
    assert mu.shape == (batch, bottleneck_dim)
    assert log_var.shape == (batch, bottleneck_dim)

    mu_ref, lv_ref = jax.jit(reference_forward)(x, convs, mu_p, lv_p)
    err = max(float(jnp.max(jnp.abs(mu - mu_ref))),
              float(jnp.max(jnp.abs(log_var - lv_ref))))
    assert err < 2e-2, f"numerical mismatch vs XLA reference: {err}"
    print("KERNEL_OK")
</pallas_src>

<mosaic_0001>
module attributes {stable_mosaic.version = 11 : i64} {
  func.func @_fused_matmul_kernel(%arg0: i32, %arg1: memref<32x32xf32, #tpu.memory_space<vmem>>, %arg2: memref<32x2048xf32, #tpu.memory_space<vmem>>, %arg3: memref<32x1xf32, #tpu.memory_space<vmem>>, %arg4: memref<32x2048xf32, #tpu.memory_space<vmem>>) attributes {dimension_semantics = [#tpu.dimension_semantics<parallel>], iteration_bounds = array<i64: 4>, scalar_prefetch = 0 : i64, scratch_operands = 0 : i64, tpu.core_type = #tpu.core_type<tc>, window_params = [{pipeline_mode = #tpu.pipeline_mode<synchronous>, transform_indices = @transform_0, window_bounds = array<i64: 32, 32>}, {transform_indices = @transform_1, window_bounds = array<i64: 32, 2048>}, {pipeline_mode = #tpu.pipeline_mode<synchronous>, transform_indices = @transform_2, window_bounds = array<i64: 32, 1>}, {transform_indices = @transform_3, window_bounds = array<i64: 32, 2048>}]} {
    %c0 = arith.constant 0 : index
    %c0_0 = arith.constant 0 : index
    %0 = vector.load %arg1[%c0, %c0_0] : memref<32x32xf32, #tpu.memory_space<vmem>>, vector<32x32xf32>
    %c0_1 = arith.constant 0 : index
    %c0_2 = arith.constant 0 : index
    %1 = vector.load %arg2[%c0_1, %c0_2] : memref<32x2048xf32, #tpu.memory_space<vmem>>, vector<32x2048xf32>
    %cst = arith.constant dense<0.000000e+00> : vector<32x2048xf32>
    %2 = tpu.matmul %0, %1, %cst {dimension_numbers = #tpu.dot_dimension_numbers<[1], [0], [0], [1], [0, 0, 1, 1], [], []>} : vector<32x32xf32>, vector<32x2048xf32>, vector<32x2048xf32> -> vector<32x2048xf32>
    %c0_3 = arith.constant 0 : index
    %c0_4 = arith.constant 0 : index
    %3 = vector.load %arg3[%c0_3, %c0_4] : memref<32x1xf32, #tpu.memory_space<vmem>>, vector<32x1xf32>
    %4 = vector.broadcast %3 : vector<32x1xf32> to vector<32x2048xf32>
    %5 = arith.addf %2, %4 : vector<32x2048xf32>
    %cst_5 = arith.constant 0.000000e+00 : f32
    %6 = vector.broadcast %cst_5 : f32 to vector<32x2048xf32>
    %7 = arith.cmpf oge, %5, %6 : vector<32x2048xf32>
    %cst_6 = arith.constant 0.00999999977 : f32
    %8 = vector.broadcast %cst_6 : f32 to vector<32x2048xf32>
    %9 = arith.mulf %8, %5 : vector<32x2048xf32>
    %10 = arith.select %7, %5, %9 : vector<32x2048xi1>, vector<32x2048xf32>
    %c0_7 = arith.constant 0 : index
    %c0_8 = arith.constant 0 : index
    %11 = vector.load %arg4[%c0_7, %c0_8] : memref<32x2048xf32, #tpu.memory_space<vmem>>, vector<32x2048xf32>
    tpu.vector_store %arg4[%c0_7, %c0_8], %10 {strides = array<i32>} : memref<32x2048xf32, #tpu.memory_space<vmem>>, vector<32x2048xf32>,
    return
  }
  func.func @transform_0(%arg0: i32) -> (i32, i32) {
    %c0_i32 = arith.constant 0 : i32
    %c0_i32_0 = arith.constant 0 : i32
    %c0_i32_1 = arith.constant 0 : i32
    return %c0_i32, %c0_i32_0 : i32, i32
  }
  func.func @transform_1(%arg0: i32) -> (i32, i32) {
    %c0_i32 = arith.constant 0 : i32
    %c0_i32_0 = arith.constant 0 : i32
    return %c0_i32, %arg0 : i32, i32
  }
  func.func @transform_2(%arg0: i32) -> (i32, i32) {
    %c0_i32 = arith.constant 0 : i32
    %c0_i32_0 = arith.constant 0 : i32
    %c0_i32_1 = arith.constant 0 : i32
    return %c0_i32, %c0_i32_0 : i32, i32
  }
  func.func @transform_3(%arg0: i32) -> (i32, i32) {
    %c0_i32 = arith.constant 0 : i32
    %c0_i32_0 = arith.constant 0 : i32
    return %c0_i32, %arg0 : i32, i32
  }
}

module attributes {stable_mosaic.version = 11 : i64} {
  func.func @_fused_matmul_kernel(%arg0: i32, %arg1: memref<64x288xf32, #tpu.memory_space<vmem>>, %arg2: memref<288x1024xf32, #tpu.memory_space<vmem>>, %arg3: memref<64x1xf32, #tpu.memory_space<vmem>>, %arg4: memref<64x1024xf32, #tpu.memory_space<vmem>>) attributes {dimension_semantics = [#tpu.dimension_semantics<parallel>], iteration_bounds = array<i64: 2>, scalar_prefetch = 0 : i64, scratch_operands = 0 : i64, tpu.core_type = #tpu.core_type<tc>, window_params = [{pipeline_mode = #tpu.pipeline_mode<synchronous>, transform_indices = @transform_0, window_bounds = array<i64: 64, 288>}, {transform_indices = @transform_1, window_bounds = array<i64: 288, 1024>}, {pipeline_mode = #tpu.pipeline_mode<synchronous>, transform_indices = @transform_2, window_bounds = array<i64: 64, 1>}, {transform_indices = @transform_3, window_bounds = array<i64: 64, 1024>}]} {
    %c0 = arith.constant 0 : index
    %c0_0 = arith.constant 0 : index
    %0 = vector.load %arg1[%c0, %c0_0] : memref<64x288xf32, #tpu.memory_space<vmem>>, vector<64x288xf32>
    %c0_1 = arith.constant 0 : index
    %c0_2 = arith.constant 0 : index
    %1 = vector.load %arg2[%c0_1, %c0_2] : memref<288x1024xf32, #tpu.memory_space<vmem>>, vector<288x1024xf32>
    %cst = arith.constant dense<0.000000e+00> : vector<64x1024xf32>
    %2 = tpu.matmul %0, %1, %cst {dimension_numbers = #tpu.dot_dimension_numbers<[1], [0], [0], [1], [0, 0, 1, 1], [], []>} : vector<64x288xf32>, vector<288x1024xf32>, vector<64x1024xf32> -> vector<64x1024xf32>
    %c0_3 = arith.constant 0 : index
    %c0_4 = arith.constant 0 : index
    %3 = vector.load %arg3[%c0_3, %c0_4] : memref<64x1xf32, #tpu.memory_space<vmem>>, vector<64x1xf32>
    %4 = vector.broadcast %3 : vector<64x1xf32> to vector<64x1024xf32>
    %5 = arith.addf %2, %4 : vector<64x1024xf32>
    %cst_5 = arith.constant 0.000000e+00 : f32
    %6 = vector.broadcast %cst_5 : f32 to vector<64x1024xf32>
    %7 = arith.cmpf oge, %5, %6 : vector<64x1024xf32>
    %cst_6 = arith.constant 0.00999999977 : f32
    %8 = vector.broadcast %cst_6 : f32 to vector<64x1024xf32>
    %9 = arith.mulf %8, %5 : vector<64x1024xf32>
    %10 = arith.select %7, %5, %9 : vector<64x1024xi1>, vector<64x1024xf32>
    %c0_7 = arith.constant 0 : index
    %c0_8 = arith.constant 0 : index
    %11 = vector.load %arg4[%c0_7, %c0_8] : memref<64x1024xf32, #tpu.memory_space<vmem>>, vector<64x1024xf32>
    tpu.vector_store %arg4[%c0_7, %c0_8], %10 {strides = array<i32>} : memref<64x1024xf32, #tpu.memory_space<vmem>>, vector<64x1024xf32>,
    return
  }
  func.func @transform_0(%arg0: i32) -> (i32, i32) {
    %c0_i32 = arith.constant 0 : i32
    %c0_i32_0 = arith.constant 0 : i32
    %c0_i32_1 = arith.constant 0 : i32
    return %c0_i32, %c0_i32_0 : i32, i32
  }
  func.func @transform_1(%arg0: i32) -> (i32, i32) {
    %c0_i32 = arith.constant 0 : i32
    %c0_i32_0 = arith.constant 0 : i32
    return %c0_i32, %arg0 : i32, i32
  }
  func.func @transform_2(%arg0: i32) -> (i32, i32) {
    %c0_i32 = arith.constant 0 : i32
    %c0_i32_0 = arith.constant 0 : i32
    %c0_i32_1 = arith.constant 0 : i32
    return %c0_i32, %c0_i32_0 : i32, i32
  }
  func.func @transform_3(%arg0: i32) -> (i32, i32) {
    %c0_i32 = arith.constant 0 : i32
    %c0_i32_0 = arith.constant 0 : i32
    return %c0_i32, %arg0 : i32, i32
  }
}

module attributes {stable_mosaic.version = 11 : i64} {
  func.func @_fused_matmul_kernel(%arg0: i32, %arg1: memref<64x576xf32, #tpu.memory_space<vmem>>, %arg2: memref<576x256xf32, #tpu.memory_space<vmem>>, %arg3: memref<64x1xf32, #tpu.memory_space<vmem>>, %arg4: memref<64x256xf32, #tpu.memory_space<vmem>>) attributes {dimension_semantics = [#tpu.dimension_semantics<parallel>], iteration_bounds = array<i64: 2>, scalar_prefetch = 0 : i64, scratch_operands = 0 : i64, tpu.core_type = #tpu.core_type<tc>, window_params = [{pipeline_mode = #tpu.pipeline_mode<synchronous>, transform_indices = @transform_0, window_bounds = array<i64: 64, 576>}, {transform_indices = @transform_1, window_bounds = array<i64: 576, 256>}, {pipeline_mode = #tpu.pipeline_mode<synchronous>, transform_indices = @transform_2, window_bounds = array<i64: 64, 1>}, {transform_indices = @transform_3, window_bounds = array<i64: 64, 256>}]} {
    %c0 = arith.constant 0 : index
    %c0_0 = arith.constant 0 : index
    %0 = vector.load %arg1[%c0, %c0_0] : memref<64x576xf32, #tpu.memory_space<vmem>>, vector<64x576xf32>
    %c0_1 = arith.constant 0 : index
    %c0_2 = arith.constant 0 : index
    %1 = vector.load %arg2[%c0_1, %c0_2] : memref<576x256xf32, #tpu.memory_space<vmem>>, vector<576x256xf32>
    %cst = arith.constant dense<0.000000e+00> : vector<64x256xf32>
    %2 = tpu.matmul %0, %1, %cst {dimension_numbers = #tpu.dot_dimension_numbers<[1], [0], [0], [1], [0, 0, 1, 1], [], []>} : vector<64x576xf32>, vector<576x256xf32>, vector<64x256xf32> -> vector<64x256xf32>
    %c0_3 = arith.constant 0 : index
    %c0_4 = arith.constant 0 : index
    %3 = vector.load %arg3[%c0_3, %c0_4] : memref<64x1xf32, #tpu.memory_space<vmem>>, vector<64x1xf32>
    %4 = vector.broadcast %3 : vector<64x1xf32> to vector<64x256xf32>
    %5 = arith.addf %2, %4 : vector<64x256xf32>
    %cst_5 = arith.constant 0.000000e+00 : f32
    %6 = vector.broadcast %cst_5 : f32 to vector<64x256xf32>
    %7 = arith.cmpf oge, %5, %6 : vector<64x256xf32>
    %cst_6 = arith.constant 0.00999999977 : f32
    %8 = vector.broadcast %cst_6 : f32 to vector<64x256xf32>
    %9 = arith.mulf %8, %5 : vector<64x256xf32>
    %10 = arith.select %7, %5, %9 : vector<64x256xi1>, vector<64x256xf32>
    %c0_7 = arith.constant 0 : index
    %c0_8 = arith.constant 0 : index
    %11 = vector.load %arg4[%c0_7, %c0_8] : memref<64x256xf32, #tpu.memory_space<vmem>>, vector<64x256xf32>
    tpu.vector_store %arg4[%c0_7, %c0_8], %10 {strides = array<i32>} : memref<64x256xf32, #tpu.memory_space<vmem>>, vector<64x256xf32>,
    return
  }
  func.func @transform_0(%arg0: i32) -> (i32, i32) {
    %c0_i32 = arith.constant 0 : i32
    %c0_i32_0 = arith.constant 0 : i32
    %c0_i32_1 = arith.constant 0 : i32
    return %c0_i32, %c0_i32_0 : i32, i32
  }
  func.func @transform_1(%arg0: i32) -> (i32, i32) {
    %c0_i32 = arith.constant 0 : i32
    %c0_i32_0 = arith.constant 0 : i32
    return %c0_i32, %arg0 : i32, i32
  }
  func.func @transform_2(%arg0: i32) -> (i32, i32) {
    %c0_i32 = arith.constant 0 : i32
    %c0_i32_0 = arith.constant 0 : i32
    %c0_i32_1 = arith.constant 0 : i32
    return %c0_i32, %c0_i32_0 : i32, i32
  }
  func.func @transform_3(%arg0: i32) -> (i32, i32) {
    %c0_i32 = arith.constant 0 : i32
    %c0_i32_0 = arith.constant 0 : i32
    return %c0_i32, %arg0 : i32, i32
  }
}

module attributes {stable_mosaic.version = 11 : i64} {
  func.func @_fused_matmul_kernel(%arg0: i32, %arg1: memref<64x576xf32, #tpu.memory_space<vmem>>, %arg2: memref<576x128xf32, #tpu.memory_space<vmem>>, %arg3: memref<64x1xf32, #tpu.memory_space<vmem>>, %arg4: memref<64x128xf32, #tpu.memory_space<vmem>>) attributes {dimension_semantics = [#tpu.dimension_semantics<parallel>], iteration_bounds = array<i64: 1>, scalar_prefetch = 0 : i64, scratch_operands = 0 : i64, tpu.core_type = #tpu.core_type<tc>, window_params = [{pipeline_mode = #tpu.pipeline_mode<synchronous>, transform_indices = @transform_0, window_bounds = array<i64: 64, 576>}, {transform_indices = @transform_1, window_bounds = array<i64: 576, 128>}, {pipeline_mode = #tpu.pipeline_mode<synchronous>, transform_indices = @transform_2, window_bounds = array<i64: 64, 1>}, {transform_indices = @transform_3, window_bounds = array<i64: 64, 128>}]} {
    %c0 = arith.constant 0 : index
    %c0_0 = arith.constant 0 : index
    %0 = vector.load %arg1[%c0, %c0_0] : memref<64x576xf32, #tpu.memory_space<vmem>>, vector<64x576xf32>
    %c0_1 = arith.constant 0 : index
    %c0_2 = arith.constant 0 : index
    %1 = vector.load %arg2[%c0_1, %c0_2] : memref<576x128xf32, #tpu.memory_space<vmem>>, vector<576x128xf32>
    %cst = arith.constant dense<0.000000e+00> : vector<64x128xf32>
    %2 = tpu.matmul %0, %1, %cst {dimension_numbers = #tpu.dot_dimension_numbers<[1], [0], [0], [1], [0, 0, 1, 1], [], []>} : vector<64x576xf32>, vector<576x128xf32>, vector<64x128xf32> -> vector<64x128xf32>
    %c0_3 = arith.constant 0 : index
    %c0_4 = arith.constant 0 : index
    %3 = vector.load %arg3[%c0_3, %c0_4] : memref<64x1xf32, #tpu.memory_space<vmem>>, vector<64x1xf32>
    %4 = vector.broadcast %3 : vector<64x1xf32> to vector<64x128xf32>
    %5 = arith.addf %2, %4 : vector<64x128xf32>
    %cst_5 = arith.constant 0.000000e+00 : f32
    %6 = vector.broadcast %cst_5 : f32 to vector<64x128xf32>
    %7 = arith.cmpf oge, %5, %6 : vector<64x128xf32>
    %cst_6 = arith.constant 0.00999999977 : f32
    %8 = vector.broadcast %cst_6 : f32 to vector<64x128xf32>
    %9 = arith.mulf %8, %5 : vector<64x128xf32>
    %10 = arith.select %7, %5, %9 : vector<64x128xi1>, vector<64x128xf32>
    %c0_7 = arith.constant 0 : index
    %c0_8 = arith.constant 0 : index
    %11 = vector.load %arg4[%c0_7, %c0_8] : memref<64x128xf32, #tpu.memory_space<vmem>>, vector<64x128xf32>
    tpu.vector_store %arg4[%c0_7, %c0_8], %10 {strides = array<i32>} : memref<64x128xf32, #tpu.memory_space<vmem>>, vector<64x128xf32>,
    return
  }
  func.func @transform_0(%arg0: i32) -> (i32, i32) {
    %c0_i32 = arith.constant 0 : i32
    %c0_i32_0 = arith.constant 0 : i32
    %c0_i32_1 = arith.constant 0 : i32
    return %c0_i32, %c0_i32_0 : i32, i32
  }
  func.func @transform_1(%arg0: i32) -> (i32, i32) {
    %c0_i32 = arith.constant 0 : i32
    %c0_i32_0 = arith.constant 0 : i32
    return %c0_i32, %arg0 : i32, i32
  }
  func.func @transform_2(%arg0: i32) -> (i32, i32) {
    %c0_i32 = arith.constant 0 : i32
    %c0_i32_0 = arith.constant 0 : i32
    %c0_i32_1 = arith.constant 0 : i32
    return %c0_i32, %c0_i32_0 : i32, i32
  }
  func.func @transform_3(%arg0: i32) -> (i32, i32) {
    %c0_i32 = arith.constant 0 : i32
    %c0_i32_0 = arith.constant 0 : i32
    return %c0_i32, %arg0 : i32, i32
  }
}

module attributes {stable_mosaic.version = 11 : i64} {
  func.func @_fused_matmul_kernel(%arg0: i32, %arg1: memref<64x4096xf32, #tpu.memory_space<vmem>>, %arg2: memref<4096x2xf32, #tpu.memory_space<vmem>>, %arg3: memref<64x1xf32, #tpu.memory_space<vmem>>, %arg4: memref<64x2xf32, #tpu.memory_space<vmem>>) attributes {dimension_semantics = [#tpu.dimension_semantics<parallel>], iteration_bounds = array<i64: 1>, scalar_prefetch = 0 : i64, scratch_operands = 0 : i64, tpu.core_type = #tpu.core_type<tc>, window_params = [{pipeline_mode = #tpu.pipeline_mode<synchronous>, transform_indices = @transform_0, window_bounds = array<i64: 64, 4096>}, {transform_indices = @transform_1, window_bounds = array<i64: 4096, 2>}, {pipeline_mode = #tpu.pipeline_mode<synchronous>, transform_indices = @transform_2, window_bounds = array<i64: 64, 1>}, {transform_indices = @transform_3, window_bounds = array<i64: 64, 2>}]} {
    %c0 = arith.constant 0 : index
    %c0_0 = arith.constant 0 : index
    %0 = vector.load %arg1[%c0, %c0_0] : memref<64x4096xf32, #tpu.memory_space<vmem>>, vector<64x4096xf32>
    %c0_1 = arith.constant 0 : index
    %c0_2 = arith.constant 0 : index
    %1 = vector.load %arg2[%c0_1, %c0_2] : memref<4096x2xf32, #tpu.memory_space<vmem>>, vector<4096x2xf32>
    %cst = arith.constant dense<0.000000e+00> : vector<64x2xf32>
    %2 = tpu.matmul %0, %1, %cst {dimension_numbers = #tpu.dot_dimension_numbers<[1], [0], [0], [1], [0, 0, 1, 1], [], []>} : vector<64x4096xf32>, vector<4096x2xf32>, vector<64x2xf32> -> vector<64x2xf32>
    %c0_3 = arith.constant 0 : index
    %c0_4 = arith.constant 0 : index
    %3 = vector.load %arg3[%c0_3, %c0_4] : memref<64x1xf32, #tpu.memory_space<vmem>>, vector<64x1xf32>
    %4 = vector.broadcast %3 : vector<64x1xf32> to vector<64x2xf32>
    %5 = arith.addf %2, %4 : vector<64x2xf32>
    %c0_5 = arith.constant 0 : index
    %c0_6 = arith.constant 0 : index
    %6 = vector.load %arg4[%c0_5, %c0_6] : memref<64x2xf32, #tpu.memory_space<vmem>>, vector<64x2xf32>
    tpu.vector_store %arg4[%c0_5, %c0_6], %5 {strides = array<i32>} : memref<64x2xf32, #tpu.memory_space<vmem>>, vector<64x2xf32>,
    return
  }
  func.func @transform_0(%arg0: i32) -> (i32, i32) {
    %c0_i32 = arith.constant 0 : i32
    %c0_i32_0 = arith.constant 0 : i32
    %c0_i32_1 = arith.constant 0 : i32
    return %c0_i32, %c0_i32_0 : i32, i32
  }
  func.func @transform_1(%arg0: i32) -> (i32, i32) {
    %c0_i32 = arith.constant 0 : i32
    %c0_i32_0 = arith.constant 0 : i32
    return %c0_i32, %arg0 : i32, i32
  }
  func.func @transform_2(%arg0: i32) -> (i32, i32) {
    %c0_i32 = arith.constant 0 : i32
    %c0_i32_0 = arith.constant 0 : i32
    %c0_i32_1 = arith.constant 0 : i32
    return %c0_i32, %c0_i32_0 : i32, i32
  }
  func.func @transform_3(%arg0: i32) -> (i32, i32) {
    %c0_i32 = arith.constant 0 : i32
    %c0_i32_0 = arith.constant 0 : i32
    return %c0_i32, %arg0 : i32, i32
  }
}

</mosaic_0001>

<bundles_post_ra>
// kernel: encoder_forward.5
= control target key start
LH: loop header
LB: loop body
LE: loop exit
PB: predicated region body
PF: predicated region fallthrough
CT: control target
= control target key end

     0   :  { %s1718_s12 = smov 0   ;;  %s1720_s13 = smov 0   ;;  %s2376_s0 = inlined_call_operand.vmem [shape: f32[32,32], index: 0, kind: input, shape index: {}]   ;;  %s2377_s1 = inlined_call_operand.vmem [shape: f32[32,8192], index: 1, kind: input, shape index: {}]   ;;  %s2378_s2 = inlined_call_operand.vmem [shape: f32[32,1], index: 2, kind: input, shape index: {}]   ;;  %s2379_s3 = inlined_call_operand.vmem [shape: f32[32,8192], index: 3, kind: output, shape index: {}]  }
   0x1   :  { %s1722_s14 = smov 0  }
   0x2 LB: > { %s1595_s15 = sadd.s32 4294967295, %s1694_s14   ;;  %s1735_s16 = sadd.s32 1, %s1694_s14   ;;  %s1694_s14 = sphi %s1722_s14, %s2383_s14   ;;  %s1690_s13 = sphi %s1720_s13, %s2382_s13   ;;  %s1686_s12 = sphi %s1718_s12, %s2381_s12  }
   0x3   : > { %s38_s17 = ssub.s32 %s1694_s14, %s1735_s16  ;;  %s41_s18 = sadd.s32 1, %s1690_s13 }
   0x4   : > { %p39_p0 = scmp.eq.s32.totalorder %s38_s17, 0  ;;  %p48_p1 = scmp.ne.s32.totalorder %s1690_s13, %s1686_s12 }
   0x5   : > { %p49_p2 = scmp.eq.s32.totalorder %s1694_s14, 0  ;;  %p99_p3 = scmp.eq.s32.totalorder %s1595_s15, 3 }
   0x6   : > { %s1746_s19 = scalar_select %p39_p0, %s1690_s13, %s41_s18  }
   0x7   : > { %p50_p4 = por %p49_p2, %p48_p1  ;;  %p1748_p5 = por %p99_p3, %p48_p1 }
   0x8   : > { %p1598_p6 = scmp.ge.s32.totalorder %s1694_s14, 4 }
   0xa   : > { %127 = sbr.rel (%p1598_p6) target bundleno = 51 (0x33), region = 24 }
   0xf   : > { %130 = sbr.rel (!%p50_p4) target bundleno = 51 (0x33), region = 28  ;;  %s132_s21 = sand.u32 (%p50_p4), 1, %s1690_s13  }
  0x10   : > { %s1642_s22 = sshll.u32 (%p50_p4), %s1694_s14, 7  ;;  %s1599_s23 = sshll.u32 (%p50_p4), %s132_s21, 9 }
  0x11   : > { %s1758_s26 = scalar_lea.vmem (%p50_p4), %s2377_s1, %s1642_s22  ;;  %s1763_s27 = scalar_lea.vmem (%p50_p4), [#allocation2], %s1599_s23 }
  0x12   : > { %v150_v0 = vld [vmem:[%s1758_s26] sm:$0xff] (%p50_p4)  ;;  %v152_v1 = vld [vmem:[%s1758_s26 + $0x8] sm:$0xff] (%p50_p4)  ;;  %v154_v2 = vld [vmem:[%s1758_s26 + $0x10] sm:$0xff] (%p50_p4) }
  0x13   : > { %151 = vst [vmem:[%s1763_s27] sm:$0xff] (%p50_p4), %v150_v0  ;;  %153 = vst [vmem:[%s1763_s27 + $0x8] sm:$0xff] (%p50_p4), %v152_v1  ;;  %v156_v3 = vld [vmem:[%s1758_s26 + $0x18] sm:$0xff] (%p50_p4)  ;;  %v158_v4 = vld [vmem:[%s1758_s26 + $0x20] sm:$0xff] (%p50_p4) }
  0x14   : > { %155 = vst [vmem:[%s1763_s27 + $0x10] sm:$0xff] %v154_v2  ;;  %v160_v5 = vld [vmem:[%s1758_s26 + $0x28] sm:$0xff]  ;;  %157 = vst [vmem:[%s1763_s27 + $0x18] sm:$0xff] %v156_v3  ;;  %v162_v6 = vld [vmem:[%s1758_s26 + $0x30] sm:$0xff] }
  0x15   : > { %159 = vst [vmem:[%s1763_s27 + $0x20] sm:$0xff] %v158_v4  ;;  %161 = vst [vmem:[%s1763_s27 + $0x28] sm:$0xff] %v160_v5  ;;  %v164_v7 = vld [vmem:[%s1758_s26 + $0x38] sm:$0xff]  ;;  %v166_v8 = vld [vmem:[%s1758_s26 + $0x40] sm:$0xff] }
  0x16   : > { %163 = vst [vmem:[%s1763_s27 + $0x30] sm:$0xff] %v162_v6  ;;  %165 = vst [vmem:[%s1763_s27 + $0x38] sm:$0xff] %v164_v7  ;;  %v168_v9 = vld [vmem:[%s1758_s26 + $0x48] sm:$0xff]  ;;  %v170_v10 = vld [vmem:[%s1758_s26 + $0x50] sm:$0xff] }
  0x17   : > { %167 = vst [vmem:[%s1763_s27 + $0x40] sm:$0xff] %v166_v8  ;;  %v172_v11 = vld [vmem:[%s1758_s26 + $0x58] sm:$0xff]  ;;  %169 = vst [vmem:[%s1763_s27 + $0x48] sm:$0xff] %v168_v9  ;;  %v174_v12 = vld [vmem:[%s1758_s26 + $0x60] sm:$0xff] }
  0x18   : > { %171 = vst [vmem:[%s1763_s27 + $0x50] sm:$0xff] %v170_v10  ;;  %173 = vst [vmem:[%s1763_s27 + $0x58] sm:$0xff] %v172_v11  ;;  %v176_v13 = vld [vmem:[%s1758_s26 + $0x68] sm:$0xff]  ;;  %v178_v14 = vld [vmem:[%s1758_s26 + $0x70] sm:$0xff] }
  0x19   : > { %175 = vst [vmem:[%s1763_s27 + $0x60] sm:$0xff] %v174_v12  ;;  %177 = vst [vmem:[%s1763_s27 + $0x68] sm:$0xff] %v176_v13  ;;  %v180_v15 = vld [vmem:[%s1758_s26 + $0x78] sm:$0xff]  ;;  %v182_v16 = vld [vmem:[%s1758_s26 + $0x200] sm:$0xff] }
  0x1a   : > { %179 = vst [vmem:[%s1763_s27 + $0x70] sm:$0xff] %v178_v14  ;;  %v184_v17 = vld [vmem:[%s1758_s26 + $0x208] sm:$0xff]  ;;  %181 = vst [vmem:[%s1763_s27 + $0x78] sm:$0xff] %v180_v15  ;;  %v186_v18 = vld [vmem:[%s1758_s26 + $0x210] sm:$0xff] }
  0x1b   : > { %183 = vst [vmem:[%s1763_s27 + $0x80] sm:$0xff] %v182_v16  ;;  %185 = vst [vmem:[%s1763_s27 + $0x88] sm:$0xff] %v184_v17  ;;  %v188_v19 = vld [vmem:[%s1758_s26 + $0x218] sm:$0xff]  ;;  %v190_v20 = vld [vmem:[%s1758_s26 + $0x220] sm:$0xff] }
  0x1c   : > { %187 = vst [vmem:[%s1763_s27 + $0x90] sm:$0xff] %v186_v18  ;;  %189 = vst [vmem:[%s1763_s27 + $0x98] sm:$0xff] %v188_v19  ;;  %v192_v21 = vld [vmem:[%s1758_s26 + $0x228] sm:$0xff]  ;;  %v194_v22 = vld [vmem:[%s1758_s26 + $0x230] sm:$0xff] }
  0x1d   : > { %191 = vst [vmem:[%s1763_s27 + $0xa0] sm:$0xff] %v190_v20  ;;  %v196_v23 = vld [vmem:[%s1758_s26 + $0x238] sm:$0xff]  ;;  %193 = vst [vmem:[%s1763_s27 + $0xa8] sm:$0xff] %v192_v21  ;;  %v198_v24 = vld [vmem:[%s1758_s26 + $0x240] sm:$0xff] }
  0x1e   : > { %195 = vst [vmem:[%s1763_s27 + $0xb0] sm:$0xff] %v194_v22  ;;  %197 = vst [vmem:[%s1763_s27 + $0xb8] sm:$0xff] %v196_v23  ;;  %v200_v25 = vld [vmem:[%s1758_s26 + $0x248] sm:$0xff]  ;;  %v202_v26 = vld [vmem:[%s1758_s26 + $0x250] sm:$0xff] }
  0x1f   : > { %199 = vst [vmem:[%s1763_s27 + $0xc0] sm:$0xff] %v198_v24  ;;  %201 = vst [vmem:[%s1763_s27 + $0xc8] sm:$0xff] %v200_v25  ;;  %v204_v27 = vld [vmem:[%s1758_s26 + $0x258] sm:$0xff]  ;;  %v206_v28 = vld [vmem:[%s1758_s26 + $0x260] sm:$0xff] }
  0x20   : > { %203 = vst [vmem:[%s1763_s27 + $0xd0] sm:$0xff] %v202_v26  ;;  %v208_v29 = vld [vmem:[%s1758_s26 + $0x268] sm:$0xff]  ;;  %205 = vst [vmem:[%s1763_s27 + $0xd8] sm:$0xff] %v204_v27  ;;  %v210_v30 = vld [vmem:[%s1758_s26 + $0x270] sm:$0xff] }
  0x21   : > { %207 = vst [vmem:[%s1763_s27 + $0xe0] sm:$0xff] %v206_v28  ;;  %209 = vst [vmem:[%s1763_s27 + $0xe8] sm:$0xff] %v208_v29  ;;  %v212_v31 = vld [vmem:[%s1758_s26 + $0x278] sm:$0xff]  ;;  %v214_v32 = vld [vmem:[%s1758_s26 + $0x400] sm:$0xff] }
  0x22   : > { %211 = vst [vmem:[%s1763_s27 + $0xf0] sm:$0xff] %v210_v30  ;;  %213 = vst [vmem:[%s1763_s27 + $0xf8] sm:$0xff] %v212_v31  ;;  %v216_v33 = vld [vmem:[%s1758_s26 + $0x408] sm:$0xff]  ;;  %v218_v34 = vld [vmem:[%s1758_s26 + $0x410] sm:$0xff] }
  0x23   : > { %215 = vst [vmem:[%s1763_s27 + $0x100] sm:$0xff] %v214_v32  ;;  %v220_v35 = vld [vmem:[%s1758_s26 + $0x418] sm:$0xff]  ;;  %217 = vst [vmem:[%s1763_s27 + $0x108] sm:$0xff] %v216_v33  ;;  %v222_v36 = vld [vmem:[%s1758_s26 + $0x420] sm:$0xff] }
  0x24   : > { %219 = vst [vmem:[%s1763_s27 + $0x110] sm:$0xff] %v218_v34  ;;  %221 = vst [vmem:[%s1763_s27 + $0x118] sm:$0xff] %v220_v35  ;;  %v224_v37 = vld [vmem:[%s1758_s26 + $0x428] sm:$0xff]  ;;  %v226_v38 = vld [vmem:[%s1758_s26 + $0x430] sm:$0xff] }
  0x25   : > { %223 = vst [vmem:[%s1763_s27 + $0x120] sm:$0xff] %v222_v36  ;;  %225 = vst [vmem:[%s1763_s27 + $0x128] sm:$0xff] %v224_v37  ;;  %v228_v39 = vld [vmem:[%s1758_s26 + $0x438] sm:$0xff]  ;;  %v230_v40 = vld [vmem:[%s1758_s26 + $0x440] sm:$0xff] }
  0x26   : > { %227 = vst [vmem:[%s1763_s27 + $0x130] sm:$0xff] %v226_v38  ;;  %v232_v41 = vld [vmem:[%s1758_s26 + $0x448] sm:$0xff]  ;;  %229 = vst [vmem:[%s1763_s27 + $0x138] sm:$0xff] %v228_v39  ;;  %v234_v42 = vld [vmem:[%s1758_s26 + $0x450] sm:$0xff] }
  0x27   : > { %231 = vst [vmem:[%s1763_s27 + $0x140] sm:$0xff] %v230_v40  ;;  %233 = vst [vmem:[%s1763_s27 + $0x148] sm:$0xff] %v232_v41  ;;  %v236_v43 = vld [vmem:[%s1758_s26 + $0x458] sm:$0xff]  ;;  %v238_v44 = vld [vmem:[%s1758_s26 + $0x460] sm:$0xff] }
  0x28   : > { %235 = vst [vmem:[%s1763_s27 + $0x150] sm:$0xff] %v234_v42  ;;  %237 = vst [vmem:[%s1763_s27 + $0x158] sm:$0xff] %v236_v43  ;;  %v240_v45 = vld [vmem:[%s1758_s26 + $0x468] sm:$0xff]  ;;  %v242_v46 = vld [vmem:[%s1758_s26 + $0x470] sm:$0xff] }
  0x29   : > { %239 = vst [vmem:[%s1763_s27 + $0x160] sm:$0xff] %v238_v44  ;;  %v244_v47 = vld [vmem:[%s1758_s26 + $0x478] sm:$0xff]  ;;  %241 = vst [vmem:[%s1763_s27 + $0x168] sm:$0xff] %v240_v45  ;;  %v246_v48 = vld [vmem:[%s1758_s26 + $0x600] sm:$0xff] }
  0x2a   : > { %243 = vst [vmem:[%s1763_s27 + $0x170] sm:$0xff] %v242_v46  ;;  %245 = vst [vmem:[%s1763_s27 + $0x178] sm:$0xff] %v244_v47  ;;  %v248_v49 = vld [vmem:[%s1758_s26 + $0x608] sm:$0xff]  ;;  %v250_v50 = vld [vmem:[%s1758_s26 + $0x610] sm:$0xff] }
  0x2b   : > { %247 = vst [vmem:[%s1763_s27 + $0x180] sm:$0xff] %v246_v48  ;;  %249 = vst [vmem:[%s1763_s27 + $0x188] sm:$0xff] %v248_v49  ;;  %v252_v51 = vld [vmem:[%s1758_s26 + $0x618] sm:$0xff]  ;;  %v254_v52 = vld [vmem:[%s1758_s26 + $0x620] sm:$0xff] }
  0x2c   : > { %251 = vst [vmem:[%s1763_s27 + $0x190] sm:$0xff] %v250_v50  ;;  %v256_v53 = vld [vmem:[%s1758_s26 + $0x628] sm:$0xff]  ;;  %253 = vst [vmem:[%s1763_s27 + $0x198] sm:$0xff] %v252_v51  ;;  %v258_v54 = vld [vmem:[%s1758_s26 + $0x630] sm:$0xff] }
  0x2d   : > { %255 = vst [vmem:[%s1763_s27 + $0x1a0] sm:$0xff] %v254_v52  ;;  %257 = vst [vmem:[%s1763_s27 + $0x1a8] sm:$0xff] %v256_v53  ;;  %v260_v55 = vld [vmem:[%s1758_s26 + $0x638] sm:$0xff]  ;;  %v262_v56 = vld [vmem:[%s1758_s26 + $0x640] sm:$0xff] }
  0x2e   : > { %259 = vst [vmem:[%s1763_s27 + $0x1b0] sm:$0xff] %v258_v54  ;;  %261 = vst [vmem:[%s1763_s27 + $0x1b8] sm:$0xff] %v260_v55  ;;  %v264_v57 = vld [vmem:[%s1758_s26 + $0x648] sm:$0xff]  ;;  %v266_v58 = vld [vmem:[%s1758_s26 + $0x650] sm:$0xff] }
  0x2f   : > { %263 = vst [vmem:[%s1763_s27 + $0x1c0] sm:$0xff] %v262_v56  ;;  %v268_v59 = vld [vmem:[%s1758_s26 + $0x658] sm:$0xff]  ;;  %265 = vst [vmem:[%s1763_s27 + $0x1c8] sm:$0xff] %v264_v57  ;;  %v270_v60 = vld [vmem:[%s1758_s26 + $0x660] sm:$0xff] }
  0x30   : > { %267 = vst [vmem:[%s1763_s27 + $0x1d0] sm:$0xff] %v266_v58  ;;  %269 = vst [vmem:[%s1763_s27 + $0x1d8] sm:$0xff] %v268_v59  ;;  %v272_v61 = vld [vmem:[%s1758_s26 + $0x668] sm:$0xff]  ;;  %v274_v62 = vld [vmem:[%s1758_s26 + $0x670] sm:$0xff] }
  0x31   : > { %271 = vst [vmem:[%s1763_s27 + $0x1e0] sm:$0xff] %v270_v60  ;;  %273 = vst [vmem:[%s1763_s27 + $0x1e8] sm:$0xff] %v272_v61  ;;  %v276_v63 = vld [vmem:[%s1758_s26 + $0x678] sm:$0xff] }
  0x32   : > { %275 = vst [vmem:[%s1763_s27 + $0x1f0] sm:$0xff] %v274_v62  ;;  %277 = vst [vmem:[%s1763_s27 + $0x1f8] sm:$0xff] %v276_v63 }
  0x33 PF: > { %p1602_p7 = scmp.ge.s32.totalorder %s1694_s14, 1  ;;  %p282_p8 = scmp.lt.s32.totalorder %s1694_s14, 5 }
  0x35   : > { %p283_p9 = pnand %p1602_p7, %p282_p8 }
  0x36   : > { %s289_s28 = sand.u32 (!%p283_p9), 1, %s1686_s12  }
  0x37   : > { %286 = sbr.rel (%p283_p9) target bundleno = 361 (0x169), region = 51  ;;  %s1893_s29 = sshll.u32 (!%p283_p9), %s289_s28, 9 }
  0x38   : > { %s1904_s7 = scalar_lea.vmem (!%p283_p9), [#allocation2], %s1893_s29  ;;  %s2103_s26 = scalar_lea.vmem (!%p283_p9), [#allocation3], %s1893_s29 }
  0x3c   : > { %v1696_v0 = vmov 0.0   ;;  %v381_v1 = vld [vmem:[%s2378_s2] sm:$0xff]  ;;  %v1697_v2 = vmov 0   ;;  %v383_v3 = vld [vmem:[%s2378_s2 + $0x10] sm:$0xff]  ;;  %v366_v4 = vld [vmem:[%s1904_s7 + $0x188] sm:$0xff]  ;;  %vm405_vm0 = vcmask 261120  }
  0x3d   : > { %482 = vmatprep.mubr.f32.mxu0 %v1696_v0  ;;  %571 = vmatprep.mubr.f32.mxu1 %v1696_v0  ;;  %v368_v5 = vld [vmem:[%s1904_s7 + $0x198] sm:$0xff]  ;;  %v365_v6 = vld [vmem:[%s1904_s7 + $0x180] sm:$0xff]  ;;  %v367_v7 = vld [vmem:[%s1904_s7 + $0x190] sm:$0xff]  ;;  %s1643_s27 = sshll.u32 (%p1748_p5), %s1595_s15, 7 }
  0x3e   : > { %1670 = vset.pattern.permute.xlu0 %v1697_v2  ;;  %1671 = vset.pattern.permute.xlu1 %v1697_v2  ;;  %v350_v8 = vld [vmem:[%s1904_s7 + $0x108] sm:$0xff]  ;;  %v352_v9 = vld [vmem:[%s1904_s7 + $0x118] sm:$0xff]  ;;  %v349_v10 = vld [vmem:[%s1904_s7 + $0x100] sm:$0xff]  ;;  %s2239_s20 = scalar_lea.vmem (%p1748_p5), %s2379_s3, %s1643_s27 }
  0x3f   : > { %387 = vperm.xlu0 %1670, %v381_v1   ;;  %397 = vperm.xlu1 %1671, %v383_v3   ;;  %v351_v11 = vld [vmem:[%s1904_s7 + $0x110] sm:$0xff]  ;;  %v334_v12 = vld [vmem:[%s1904_s7 + $0x88] sm:$0xff]  ;;  %v336_v13 = vld [vmem:[%s1904_s7 + $0x98] sm:$0xff] }
  0x40   : > { %442 = vmatprep.subr.mxu0 %v366_v4  ;;  %531 = vmatprep.subr.mxu1 %v368_v5  ;;  %v333_v14 = vld [vmem:[%s1904_s7 + $0x80] sm:$0xff]  ;;  %v335_v15 = vld [vmem:[%s1904_s7 + $0x90] sm:$0xff]  ;;  %v318_v16 = vld [vmem:[%s1904_s7 + $0x8] sm:$0xff] }
  0x41   : > { %443 = vmatpush1.msra.mxu0 %v365_v6  ;;  %532 = vmatpush1.msra.mxu1 %v367_v7  ;;  %v320_v17 = vld [vmem:[%s1904_s7 + $0x18] sm:$0xff]  ;;  %v317_v18 = vld [vmem:[%s1904_s7] sm:$0xff]  ;;  %v319_v19 = vld [vmem:[%s1904_s7 + $0x10] sm:$0xff] }
  0x42   : > { %444 = vmatprep.subr.mxu0 %v350_v8  ;;  %533 = vmatprep.subr.mxu1 %v352_v9  ;;  %v1925_v20 = vld [vmem:[%s2376_s0] sm:$0xff]  ;;  %v370_v21 = vld [vmem:[%s1904_s7 + $0x1a8] sm:$0xff]  ;;  %v372_v22 = vld [vmem:[%s1904_s7 + $0x1b8] sm:$0xff] }
  0x43   : > { %445 = vmatpush1.msra.mxu0 %v349_v10  ;;  %534 = vmatpush1.msra.mxu1 %v351_v11  ;;  %v369_v23 = vld [vmem:[%s1904_s7 + $0x1a0] sm:$0xff]  ;;  %v371_v24 = vld [vmem:[%s1904_s7 + $0x1b0] sm:$0xff]  ;;  %v1938_v25 = vld [vmem:[%s2376_s0 + $0x8] sm:$0xff] }
  0x44   : > { %446 = vmatprep.subr.mxu0 %v334_v12  ;;  %535 = vmatprep.subr.mxu1 %v336_v13  ;;  %v354_v26 = vld [vmem:[%s1904_s7 + $0x128] sm:$0xff]  ;;  %v356_v27 = vld [vmem:[%s1904_s7 + $0x138] sm:$0xff]  ;;  %v353_v28 = vld [vmem:[%s1904_s7 + $0x120] sm:$0xff] }
  0x45   : > { %447 = vmatpush1.msra.mxu0 %v333_v14  ;;  %536 = vmatpush1.msra.mxu1 %v335_v15  ;;  %v355_v29 = vld [vmem:[%s1904_s7 + $0x130] sm:$0xff]  ;;  %v338_v31 = vld [vmem:[%s1904_s7 + $0xa8] sm:$0xff]  ;;  %v340_v32 = vld [vmem:[%s1904_s7 + $0xb8] sm:$0xff] }
  0x46   : > { %448 = vmatprep.subr.mxu0 %v318_v16  ;;  %537 = vmatprep.subr.mxu1 %v320_v17  ;;  %v1953_v30 = vld [vmem:[%s2376_s0 + $0x10] sm:$0xff]  ;;  %v337_v33 = vld [vmem:[%s1904_s7 + $0xa0] sm:$0xff]  ;;  %v1968_v35 = vld [vmem:[%s2376_s0 + $0x18] sm:$0xff] }
  0x47   : > { %449 = vmatpush1.msra.mxu0 %v317_v18  ;;  %538 = vmatpush1.msra.mxu1 %v319_v19  ;;  %v339_v34 = vld [vmem:[%s1904_s7 + $0xb0] sm:$0xff]  ;;  %v322_v36 = vld [vmem:[%s1904_s7 + $0x28] sm:$0xff]  ;;  %v324_v37 = vld [vmem:[%s1904_s7 + $0x38] sm:$0xff] }
  0x48   : > { %1605 = vmatmul.mubr.msk.f32.vlgmr.msra.gmra.mxu0 %vm405_vm0, %v1925_v20  ;;  %1609 = vmatmul.mubr.msk.f32.vlgmr.msra.gmra.mxu1 %vm405_vm0, %v1925_v20  ;;  %v321_v38 = vld [vmem:[%s1904_s7 + $0x20] sm:$0xff]  ;;  %v323_v39 = vld [vmem:[%s1904_s7 + $0x30] sm:$0xff]  ;;  %v374_v40 = vld [vmem:[%s1904_s7 + $0x1c8] sm:$0xff] }
  0x49   : > { %620 = vmatprep.subr.mxu0 %v370_v21  ;;  %709 = vmatprep.subr.mxu1 %v372_v22  ;;  %v376_v41 = vld [vmem:[%s1904_s7 + $0x1d8] sm:$0xff]  ;;  %v373_v42 = vld [vmem:[%s1904_s7 + $0x1c0] sm:$0xff]  ;;  %v375_v43 = vld [vmem:[%s1904_s7 + $0x1d0] sm:$0xff] }
  0x4a   : > { %621 = vmatpush1.msra.mxu0 %v369_v23  ;;  %710 = vmatpush1.msra.mxu1 %v371_v24  ;;  %v358_v44 = vld [vmem:[%s1904_s7 + $0x148] sm:$0xff]  ;;  %v360_v45 = vld [vmem:[%s1904_s7 + $0x158] sm:$0xff]  ;;  %v357_v46 = vld [vmem:[%s1904_s7 + $0x140] sm:$0xff] }
  0x4b   : > { %488 = vmatprep.mubr.f32.mxu0 %v1696_v0  ;;  %577 = vmatprep.mubr.f32.mxu1 %v1696_v0  ;;  %v359_v47 = vld [vmem:[%s1904_s7 + $0x150] sm:$0xff]  ;;  %v342_v48 = vld [vmem:[%s1904_s7 + $0xc8] sm:$0xff]  ;;  %v344_v49 = vld [vmem:[%s1904_s7 + $0xd8] sm:$0xff] }
  0x4c   : > { %1606 = vmatmul.mubr.msk.f32.gmra.mxu0 %vm405_vm0, %v1938_v25  ;;  %1610 = vmatmul.mubr.msk.f32.gmra.mxu1 %vm405_vm0, %v1938_v25  ;;  %v341_v50 = vld [vmem:[%s1904_s7 + $0xc0] sm:$0xff]  ;;  %v343_v51 = vld [vmem:[%s1904_s7 + $0xd0] sm:$0xff]  ;;  %v326_v52 = vld [vmem:[%s1904_s7 + $0x48] sm:$0xff] }
  0x4d   : > { %622 = vmatprep.subr.mxu0 %v354_v26  ;;  %711 = vmatprep.subr.mxu1 %v356_v27  ;;  %v328_v53 = vld [vmem:[%s1904_s7 + $0x58] sm:$0xff]  ;;  %v325_v54 = vld [vmem:[%s1904_s7 + $0x40] sm:$0xff]  ;;  %v327_v55 = vld [vmem:[%s1904_s7 + $0x50] sm:$0xff] }
  0x4e   : > { %623 = vmatpush1.msra.mxu0 %v353_v28  ;;  %712 = vmatpush1.msra.mxu1 %v355_v29  ;;  %v378_v56 = vld [vmem:[%s1904_s7 + $0x1e8] sm:$0xff]  ;;  %v380_v57 = vld [vmem:[%s1904_s7 + $0x1f8] sm:$0xff]  ;;  %v377_v58 = vld [vmem:[%s1904_s7 + $0x1e0] sm:$0xff] }
  0x4f   : > { %494 = vmatprep.mubr.f32.mxu0 %v1696_v0  ;;  %583 = vmatprep.mubr.f32.mxu1 %v1696_v0  ;;  %v379_v59 = vld [vmem:[%s1904_s7 + $0x1f0] sm:$0xff]  ;;  %v362_v60 = vld [vmem:[%s1904_s7 + $0x168] sm:$0xff]  ;;  %v364_v61 = vld [vmem:[%s1904_s7 + $0x178] sm:$0xff] }
  0x50   : > { %1607 = vmatmul.mubr.msk.f32.gmra.mxu0 %vm405_vm0, %v1953_v30  ;;  %1611 = vmatmul.mubr.msk.f32.gmra.mxu1 %vm405_vm0, %v1953_v30  ;;  %v361_v62 = vld [vmem:[%s1904_s7 + $0x160] sm:$0xff]  ;;  %v363_v63 = vld [vmem:[%s1904_s7 + $0x170] sm:$0xff]  ;;  %v346_v1 = vld [vmem:[%s1904_s7 + $0xe8] sm:$0xff] }
  0x51   : > { %624 = vmatprep.subr.mxu0 %v338_v31  ;;  %713 = vmatprep.subr.mxu1 %v340_v32  ;;  %v348_v2 = vld [vmem:[%s1904_s7 + $0xf8] sm:$0xff]  ;;  %v345_v3 = vld [vmem:[%s1904_s7 + $0xe0] sm:$0xff]  ;;  %v347_v4 = vld [vmem:[%s1904_s7 + $0xf0] sm:$0xff] }
  0x52   : > { %625 = vmatpush1.msra.mxu0 %v337_v33  ;;  %714 = vmatpush1.msra.mxu1 %v339_v34  ;;  %v330_v5 = vld [vmem:[%s1904_s7 + $0x68] sm:$0xff]  ;;  %v332_v6 = vld [vmem:[%s1904_s7 + $0x78] sm:$0xff]  ;;  %v329_v7 = vld [vmem:[%s1904_s7 + $0x60] sm:$0xff] }
  0x53   : > { %500 = vmatprep.mubr.f32.mxu0 %v1696_v0  ;;  %589 = vmatprep.mubr.f32.mxu1 %v1696_v0  ;;  %v331_v8 = vld [vmem:[%s1904_s7 + $0x70] sm:$0xff]  ;;  %v382_v9 = vld [vmem:[%s2378_s2 + $0x8] sm:$0xff]  ;;  %v384_v10 = vld [vmem:[%s2378_s2 + $0x18] sm:$0xff] }
  0x54   : > { %1608 = vmatmul.mubr.msk.f32.gmra.mxu0 %vm405_vm0, %v1968_v35  ;;  %1612 = vmatmul.mubr.msk.f32.gmra.mxu1 %vm405_vm0, %v1968_v35 }
  0x55   : > { %626 = vmatprep.subr.mxu0 %v322_v36  ;;  %715 = vmatprep.subr.mxu1 %v324_v37 }
  0x56   : > { %627 = vmatpush1.msra.mxu0 %v321_v38  ;;  %716 = vmatpush1.msra.mxu1 %v323_v39 }
  0x57   : > { %660 = vmatprep.mubr.f32.mxu0 %v1696_v0  ;;  %749 = vmatprep.mubr.f32.mxu1 %v1696_v0 }
  0x58   : > { %1613 = vmatmul.mubr.msk.f32.vlgmr.msra.gmra.mxu0 %vm405_vm0, %v1925_v20  ;;  %1617 = vmatmul.mubr.msk.f32.vlgmr.msra.gmra.mxu1 %vm405_vm0, %v1925_v20 }
  0x59   : > { %798 = vmatprep.subr.mxu0 %v374_v40  ;;  %887 = vmatprep.subr.mxu1 %v376_v41 }
  0x5a   : > { %799 = vmatpush1.msra.mxu0 %v373_v42  ;;  %888 = vmatpush1.msra.mxu1 %v375_v43 }
  0x5b   : > { %666 = vmatprep.mubr.f32.mxu0 %v1696_v0  ;;  %755 = vmatprep.mubr.f32.mxu1 %v1696_v0 }
  0x5c   : > { %1614 = vmatmul.mubr.msk.f32.gmra.mxu0 %vm405_vm0, %v1938_v25  ;;  %1618 = vmatmul.mubr.msk.f32.gmra.mxu1 %vm405_vm0, %v1938_v25 }
  0x5d   : > { %800 = vmatprep.subr.mxu0 %v358_v44  ;;  %889 = vmatprep.subr.mxu1 %v360_v45 }
  0x5e   : > { %801 = vmatpush1.msra.mxu0 %v357_v46  ;;  %890 = vmatpush1.msra.mxu1 %v359_v47 }
  0x5f   : > { %672 = vmatprep.mubr.f32.mxu0 %v1696_v0  ;;  %761 = vmatprep.mubr.f32.mxu1 %v1696_v0 }
  0x60   : > { %1615 = vmatmul.mubr.msk.f32.gmra.mxu0 %vm405_vm0, %v1953_v30  ;;  %1619 = vmatmul.mubr.msk.f32.gmra.mxu1 %vm405_vm0, %v1953_v30 }
  0x61   : > { %802 = vmatprep.subr.mxu0 %v342_v48  ;;  %891 = vmatprep.subr.mxu1 %v344_v49 }
  0x62   : > { %803 = vmatpush1.msra.mxu0 %v341_v50  ;;  %892 = vmatpush1.msra.mxu1 %v343_v51 }
  0x63   : > { %678 = vmatprep.mubr.f32.mxu0 %v1696_v0  ;;  %767 = vmatprep.mubr.f32.mxu1 %v1696_v0 }
  0x64   : > { %1616 = vmatmul.mubr.msk.f32.gmra.mxu0 %vm405_vm0, %v1968_v35  ;;  %1620 = vmatmul.mubr.msk.f32.gmra.mxu1 %vm405_vm0, %v1968_v35 }
  0x65   : > { %804 = vmatprep.subr.mxu0 %v326_v52  ;;  %893 = vmatprep.subr.mxu1 %v328_v53 }
  0x66   : > { %805 = vmatpush1.msra.mxu0 %v325_v54  ;;  %894 = vmatpush1.msra.mxu1 %v327_v55 }
  0x67   : > { %838 = vmatprep.mubr.f32.mxu0 %v1696_v0  ;;  %927 = vmatprep.mubr.f32.mxu1 %v1696_v0 }
  0x68   : > { %1621 = vmatmul.mubr.msk.f32.vlgmr.msra.gmra.mxu0 %vm405_vm0, %v1925_v20  ;;  %1625 = vmatmul.mubr.msk.f32.vlgmr.msra.gmra.mxu1 %vm405_vm0, %v1925_v20 }
  0x69   : > { %976 = vmatprep.subr.mxu0 %v378_v56  ;;  %1065 = vmatprep.subr.mxu1 %v380_v57 }
  0x6a   : > { %977 = vmatpush1.msra.mxu0 %v377_v58  ;;  %1066 = vmatpush1.msra.mxu1 %v379_v59 }
  0x6b   : > { %844 = vmatprep.mubr.f32.mxu0 %v1696_v0  ;;  %933 = vmatprep.mubr.f32.mxu1 %v1696_v0 }
  0x6c   : > { %1622 = vmatmul.mubr.msk.f32.gmra.mxu0 %vm405_vm0, %v1938_v25  ;;  %1626 = vmatmul.mubr.msk.f32.gmra.mxu1 %vm405_vm0, %v1938_v25 }
  0x6d   : > { %978 = vmatprep.subr.mxu0 %v362_v60  ;;  %1067 = vmatprep.subr.mxu1 %v364_v61 }
  0x6e   : > { %979 = vmatpush1.msra.mxu0 %v361_v62  ;;  %1068 = vmatpush1.msra.mxu1 %v363_v63 }
  0x6f   : > { %850 = vmatprep.mubr.f32.mxu0 %v1696_v0  ;;  %939 = vmatprep.mubr.f32.mxu1 %v1696_v0 }
  0x70   : > { %1623 = vmatmul.mubr.msk.f32.gmra.mxu0 %vm405_vm0, %v1953_v30  ;;  %1627 = vmatmul.mubr.msk.f32.gmra.mxu1 %vm405_vm0, %v1953_v30 }
  0x71   : > { %980 = vmatprep.subr.mxu0 %v346_v1  ;;  %1069 = vmatprep.subr.mxu1 %v348_v2 }
  0x72   : > { %981 = vmatpush1.msra.mxu0 %v345_v3  ;;  %1070 = vmatpush1.msra.mxu1 %v347_v4 }
  0x73   : > { %856 = vmatprep.mubr.f32.mxu0 %v1696_v0  ;;  %945 = vmatprep.mubr.f32.mxu1 %v1696_v0 }
  0x74   : > { %1624 = vmatmul.mubr.msk.f32.gmra.mxu0 %vm405_vm0, %v1968_v35  ;;  %1628 = vmatmul.mubr.msk.f32.gmra.mxu1 %vm405_vm0, %v1968_v35 }
  0x75   : > { %982 = vmatprep.subr.mxu0 %v330_v5  ;;  %1071 = vmatprep.subr.mxu1 %v332_v6 }
  0x76   : > { %983 = vmatpush1.msra.mxu0 %v329_v7  ;;  %1072 = vmatpush1.msra.mxu1 %v331_v8 }
  0x77   : > { %1016 = vmatprep.mubr.f32.mxu0 %v1696_v0  ;;  %1105 = vmatprep.mubr.f32.mxu1 %v1696_v0 }
  0x78   : > { %1629 = vmatmul.mubr.msk.f32.vlgmr.msra.gmra.mxu0 %vm405_vm0, %v1925_v20  ;;  %1633 = vmatmul.mubr.msk.f32.vlgmr.msra.gmra.mxu1 %vm405_vm0, %v1925_v20 }
  0x79   : > { %1022 = vmatprep.mubr.f32.mxu0 %v1696_v0  ;;  %1111 = vmatprep.mubr.f32.mxu1 %v1696_v0 }
  0x7a   : > { %392 = vperm.xlu0 %1670, %v382_v9   ;;  %402 = vperm.xlu1 %1671, %v384_v10  }
  0x7c   : > { %1630 = vmatmul.mubr.msk.f32.gmra.mxu0 %vm405_vm0, %v1938_v25  ;;  %1634 = vmatmul.mubr.msk.f32.gmra.mxu1 %vm405_vm0, %v1938_v25 }
  0x7d   : > { %1028 = vmatprep.mubr.f32.mxu0 %v1696_v0  ;;  %1117 = vmatprep.mubr.f32.mxu1 %v1696_v0 }
  0x80   : > { %1631 = vmatmul.mubr.msk.f32.gmra.mxu0 %vm405_vm0, %v1953_v30  ;;  %1635 = vmatmul.mubr.msk.f32.gmra.mxu1 %vm405_vm0, %v1953_v30 }
  0x81   : > { %1034 = vmatprep.mubr.f32.mxu0 %v1696_v0  ;;  %1123 = vmatprep.mubr.f32.mxu1 %v1696_v0 }
  0x84   : > { %1632 = vmatmul.mubr.msk.f32.gmra.mxu0 %vm405_vm0, %v1968_v35  ;;  %1636 = vmatmul.mubr.msk.f32.gmra.mxu1 %vm405_vm0, %v1968_v35 }
  0xba   : > { %v2090_v11 = vpop.permute.xlu0 %387  ;;  %v2096_v20 = vpop.permute.xlu1 %397 }
  0xf5   : > { %v2094_v16 = vpop.permute.xlu0 %392  ;;  %v2113_v45 = vpop.permute.xlu1 %402 }
 0x108   : > { %v484_v12 = vpop.f32.mrf.mxu0  ;;  %v573_v13 = vpop.f32.mrf.mxu1 }
 0x109   : > { %v485_v14 = vadd.f32 %v484_v12, %v2090_v11  ;;  %v574_v15 = vadd.f32 %v573_v13, %v2090_v11 }
 0x10a   : > { %v486_v17 = vpop.f32.mrf.mxu0  ;;  %v575_v18 = vpop.f32.mrf.mxu1 }
 0x10b   : > { %vm1130_vm1 = vcmp.ge.f32.partialorder %v485_v14, 0.0  ;;  %v1194_v0 = vmul.f32 0.01, %v485_v14  ;;  %vm1132_vm2 = vcmp.ge.f32.partialorder %v574_v15, 0.0  ;;  %v1196_v19 = vmul.f32 0.01, %v574_v15 }
 0x10c   : > { %v487_v21 = vadd.f32 %v486_v17, %v2090_v11  ;;  %v576_v22 = vadd.f32 %v575_v18, %v2090_v11  ;;  %v490_v23 = vpop.f32.mrf.mxu0  ;;  %v579_v24 = vpop.f32.mrf.mxu1 }
 0x10d   : > { %v1258_v25 = vsel %vm1130_vm1, %v485_v14, %v1194_v0  ;;  %v1260_v26 = vsel %vm1132_vm2, %v574_v15, %v1196_v19  ;;  %v491_v27 = vadd.f32 %v490_v23, %v2094_v16  ;;  %v580_v28 = vadd.f32 %v579_v24, %v2094_v16 }
 0x10e   : > { %1322 = vst [vmem:[%s2103_s26] sm:$0xff] %v1258_v25  ;;  %1324 = vst [vmem:[%s2103_s26 + $0x10] sm:$0xff] %v1260_v26  ;;  %vm1131_vm3 = vcmp.ge.f32.partialorder %v487_v21, 0.0  ;;  %v1195_v29 = vmul.f32 0.01, %v487_v21  ;;  %vm1133_vm4 = vcmp.ge.f32.partialorder %v576_v22, 0.0  ;;  %v492_v31 = vpop.f32.mrf.mxu0  ;;  %v581_v32 = vpop.f32.mrf.mxu1 }
 0x10f   : > { %v1197_v30 = vmul.f32 0.01, %v576_v22  ;;  %vm1146_vm5 = vcmp.ge.f32.partialorder %v491_v27, 0.0  ;;  %v1210_v33 = vmul.f32 0.01, %v491_v27  ;;  %vm1148_vm6 = vcmp.ge.f32.partialorder %v580_v28, 0.0 }
 0x110   : > { %v1212_v34 = vmul.f32 0.01, %v580_v28  ;;  %v1259_v35 = vsel %vm1131_vm3, %v487_v21, %v1195_v29  ;;  %v493_v37 = vadd.f32 %v492_v31, %v2094_v16  ;;  %v582_v38 = vadd.f32 %v581_v32, %v2094_v16  ;;  %v496_v39 = vpop.f32.mrf.mxu0  ;;  %v585_v40 = vpop.f32.mrf.mxu1 }
 0x111   : > { %v1261_v36 = vsel %vm1133_vm4, %v576_v22, %v1197_v30  ;;  %1323 = vst [vmem:[%s2103_s26 + $0x8] sm:$0xff] %v1259_v35  ;;  %v1274_v41 = vsel %vm1146_vm5, %v491_v27, %v1210_v33  ;;  %v497_v43 = vadd.f32 %v496_v39, %v2096_v20  ;;  %v586_v44 = vadd.f32 %v585_v40, %v2096_v20 }
 0x112   : > { %1325 = vst [vmem:[%s2103_s26 + $0x18] sm:$0xff] %v1261_v36  ;;  %v1276_v42 = vsel %vm1148_vm6, %v580_v28, %v1212_v34  ;;  %1338 = vst [vmem:[%s2103_s26 + $0x80] sm:$0xff] %v1274_v41  ;;  %vm1147_vm7 = vcmp.ge.f32.partialorder %v493_v37, 0.0  ;;  %v1211_v46 = vmul.f32 0.01, %v493_v37  ;;  %vm1149_vm8 = vcmp.ge.f32.partialorder %v582_v38, 0.0  ;;  %v498_v48 = vpop.f32.mrf.mxu0  ;;  %v587_v49 = vpop.f32.mrf.mxu1 }
 0x113   : > { %1340 = vst [vmem:[%s2103_s26 + $0x90] sm:$0xff] %v1276_v42  ;;  %v1213_v47 = vmul.f32 0.01, %v582_v38  ;;  %vm1162_vm9 = vcmp.ge.f32.partialorder %v497_v43, 0.0  ;;  %v1226_v50 = vmul.f32 0.01, %v497_v43  ;;  %v499_v54 = vadd.f32 %v498_v48, %v2096_v20 }
 0x114   : > { %vm1164_vm10 = vcmp.ge.f32.partialorder %v586_v44, 0.0  ;;  %v1228_v51 = vmul.f32 0.01, %v586_v44  ;;  %v1275_v52 = vsel %vm1147_vm7, %v493_v37, %v1211_v46  ;;  %v588_v55 = vadd.f32 %v587_v49, %v2096_v20  ;;  %v502_v56 = vpop.f32.mrf.mxu0  ;;  %v591_v57 = vpop.f32.mrf.mxu1 }
 0x115   : > { %v1277_v53 = vsel %vm1149_vm8, %v582_v38, %v1213_v47  ;;  %1339 = vst [vmem:[%s2103_s26 + $0x88] sm:$0xff] %v1275_v52  ;;  %v1290_v58 = vsel %vm1162_vm9, %v497_v43, %v1226_v50  ;;  %v503_v60 = vadd.f32 %v502_v56, %v2113_v45  ;;  %v592_v61 = vadd.f32 %v591_v57, %v2113_v45 }
 0x116   : > { %1341 = vst [vmem:[%s2103_s26 + $0x98] sm:$0xff] %v1277_v53  ;;  %v1292_v59 = vsel %vm1164_vm10, %v586_v44, %v1228_v51  ;;  %1354 = vst [vmem:[%s2103_s26 + $0x100] sm:$0xff] %v1290_v58  ;;  %vm1163_vm11 = vcmp.ge.f32.partialorder %v499_v54, 0.0  ;;  %v1227_v62 = vmul.f32 0.01, %v499_v54  ;;  %vm1165_vm12 = vcmp.ge.f32.partialorder %v588_v55, 0.0  ;;  %v504_v1 = vpop.f32.mrf.mxu0  ;;  %v593_v2 = vpop.f32.mrf.mxu1 }
 0x117   : > { %1356 = vst [vmem:[%s2103_s26 + $0x110] sm:$0xff] %v1292_v59  ;;  %v1229_v63 = vmul.f32 0.01, %v588_v55  ;;  %vm1178_vm13 = vcmp.ge.f32.partialorder %v503_v60, 0.0  ;;  %v1242_v3 = vmul.f32 0.01, %v503_v60  ;;  %v505_v7 = vadd.f32 %v504_v1, %v2113_v45 }
 0x118   : > { %vm1180_vm14 = vcmp.ge.f32.partialorder %v592_v61, 0.0  ;;  %v1244_v4 = vmul.f32 0.01, %v592_v61  ;;  %v1291_v5 = vsel %vm1163_vm11, %v499_v54, %v1227_v62  ;;  %v594_v8 = vadd.f32 %v593_v2, %v2113_v45  ;;  %v662_v9 = vpop.f32.mrf.mxu0  ;;  %v751_v10 = vpop.f32.mrf.mxu1 }
 0x119   : > { %v1293_v6 = vsel %vm1165_vm12, %v588_v55, %v1229_v63  ;;  %1355 = vst [vmem:[%s2103_s26 + $0x108] sm:$0xff] %v1291_v5  ;;  %v1306_v12 = vsel %vm1178_vm13, %v503_v60, %v1242_v3  ;;  %v663_v14 = vadd.f32 %v662_v9, %v2090_v11  ;;  %v752_v15 = vadd.f32 %v751_v10, %v2090_v11 }
 0x11a   : > { %1357 = vst [vmem:[%s2103_s26 + $0x118] sm:$0xff] %v1293_v6  ;;  %v1308_v13 = vsel %vm1180_vm14, %v592_v61, %v1244_v4  ;;  %1370 = vst [vmem:[%s2103_s26 + $0x180] sm:$0xff] %v1306_v12  ;;  %vm1179_vm15 = vcmp.ge.f32.partialorder %v505_v7, 0.0  ;;  %v1243_v17 = vmul.f32 0.01, %v505_v7  ;;  %vm1181_vm0 = vcmp.ge.f32.partialorder %v594_v8, 0.0  ;;  %v664_v0 = vpop.f32.mrf.mxu0  ;;  %v753_v19 = vpop.f32.mrf.mxu1 }
 0x11b   : > { %1372 = vst [vmem:[%s2103_s26 + $0x190] sm:$0xff] %v1308_v13  ;;  %v1245_v18 = vmul.f32 0.01, %v594_v8  ;;  %vm1134_vm1 = vcmp.ge.f32.partialorder %v663_v14, 0.0  ;;  %v1198_v21 = vmul.f32 0.01, %v663_v14  ;;  %v665_v25 = vadd.f32 %v664_v0, %v2090_v11 }
 0x11c   : > { %vm1136_vm2 = vcmp.ge.f32.partialorder %v752_v15, 0.0  ;;  %v1200_v22 = vmul.f32 0.01, %v752_v15  ;;  %v1307_v23 = vsel %vm1179_vm15, %v505_v7, %v1243_v17  ;;  %v754_v26 = vadd.f32 %v753_v19, %v2090_v11  ;;  %v668_v27 = vpop.f32.mrf.mxu0  ;;  %v757_v28 = vpop.f32.mrf.mxu1 }
 0x11d   : > { %v1309_v24 = vsel %vm1181_vm0, %v594_v8, %v1245_v18  ;;  %1371 = vst [vmem:[%s2103_s26 + $0x188] sm:$0xff] %v1307_v23  ;;  %v1262_v29 = vsel %vm1134_vm1, %v663_v14, %v1198_v21  ;;  %v669_v31 = vadd.f32 %v668_v27, %v2094_v16  ;;  %v758_v32 = vadd.f32 %v757_v28, %v2094_v16 }
 0x11e   : > { %1373 = vst [vmem:[%s2103_s26 + $0x198] sm:$0xff] %v1309_v24  ;;  %v1264_v30 = vsel %vm1136_vm2, %v752_v15, %v1200_v22  ;;  %1326 = vst [vmem:[%s2103_s26 + $0x20] sm:$0xff] %v1262_v29  ;;  %vm1135_vm3 = vcmp.ge.f32.partialorder %v665_v25, 0.0  ;;  %v1199_v33 = vmul.f32 0.01, %v665_v25  ;;  %vm1137_vm4 = vcmp.ge.f32.partialorder %v754_v26, 0.0  ;;  %v670_v35 = vpop.f32.mrf.mxu0  ;;  %v759_v36 = vpop.f32.mrf.mxu1 }
 0x11f   : > { %1328 = vst [vmem:[%s2103_s26 + $0x30] sm:$0xff] %v1264_v30  ;;  %v1201_v34 = vmul.f32 0.01, %v754_v26  ;;  %vm1150_vm5 = vcmp.ge.f32.partialorder %v669_v31, 0.0  ;;  %v1214_v37 = vmul.f32 0.01, %v669_v31  ;;  %v671_v41 = vadd.f32 %v670_v35, %v2094_v16 }
 0x120   : > { %vm1152_vm6 = vcmp.ge.f32.partialorder %v758_v32, 0.0  ;;  %v1216_v38 = vmul.f32 0.01, %v758_v32  ;;  %v1263_v39 = vsel %vm1135_vm3, %v665_v25, %v1199_v33  ;;  %v760_v42 = vadd.f32 %v759_v36, %v2094_v16  ;;  %v674_v43 = vpop.f32.mrf.mxu0  ;;  %v763_v44 = vpop.f32.mrf.mxu1 }
 0x121   : > { %v1265_v40 = vsel %vm1137_vm4, %v754_v26, %v1201_v34  ;;  %1327 = vst [vmem:[%s2103_s26 + $0x28] sm:$0xff] %v1263_v39  ;;  %v1278_v46 = vsel %vm1150_vm5, %v669_v31, %v1214_v37  ;;  %v675_v48 = vadd.f32 %v674_v43, %v2096_v20  ;;  %v764_v49 = vadd.f32 %v763_v44, %v2096_v20 }
 0x122   : > { %1329 = vst [vmem:[%s2103_s26 + $0x38] sm:$0xff] %v1265_v40  ;;  %v1280_v47 = vsel %vm1152_vm6, %v758_v32, %v1216_v38  ;;  %1342 = vst [vmem:[%s2103_s26 + $0xa0] sm:$0xff] %v1278_v46  ;;  %vm1151_vm7 = vcmp.ge.f32.partialorder %v671_v41, 0.0  ;;  %v1215_v50 = vmul.f32 0.01, %v671_v41  ;;  %vm1153_vm8 = vcmp.ge.f32.partialorder %v760_v42, 0.0  ;;  %v676_v52 = vpop.f32.mrf.mxu0  ;;  %v765_v53 = vpop.f32.mrf.mxu1 }
 0x123   : > { %1344 = vst [vmem:[%s2103_s26 + $0xb0] sm:$0xff] %v1280_v47  ;;  %v1217_v51 = vmul.f32 0.01, %v760_v42  ;;  %vm1166_vm9 = vcmp.ge.f32.partialorder %v675_v48, 0.0  ;;  %v1230_v54 = vmul.f32 0.01, %v675_v48  ;;  %v677_v58 = vadd.f32 %v676_v52, %v2096_v20 }
 0x124   : > { %vm1168_vm10 = vcmp.ge.f32.partialorder %v764_v49, 0.0  ;;  %v1232_v55 = vmul.f32 0.01, %v764_v49  ;;  %v1279_v56 = vsel %vm1151_vm7, %v671_v41, %v1215_v50  ;;  %v766_v59 = vadd.f32 %v765_v53, %v2096_v20  ;;  %v680_v60 = vpop.f32.mrf.mxu0  ;;  %v769_v61 = vpop.f32.mrf.mxu1 }
 0x125   : > { %v1281_v57 = vsel %vm1153_vm8, %v760_v42, %v1217_v51  ;;  %1343 = vst [vmem:[%s2103_s26 + $0xa8] sm:$0xff] %v1279_v56  ;;  %v1294_v62 = vsel %vm1166_vm9, %v675_v48, %v1230_v54  ;;  %v681_v1 = vadd.f32 %v680_v60, %v2113_v45  ;;  %v770_v2 = vadd.f32 %v769_v61, %v2113_v45 }
 0x126   : > { %1345 = vst [vmem:[%s2103_s26 + $0xb8] sm:$0xff] %v1281_v57  ;;  %v1296_v63 = vsel %vm1168_vm10, %v764_v49, %v1232_v55  ;;  %1358 = vst [vmem:[%s2103_s26 + $0x120] sm:$0xff] %v1294_v62  ;;  %vm1167_vm11 = vcmp.ge.f32.partialorder %v677_v58, 0.0  ;;  %v1231_v3 = vmul.f32 0.01, %v677_v58  ;;  %vm1169_vm12 = vcmp.ge.f32.partialorder %v766_v59, 0.0  ;;  %v682_v5 = vpop.f32.mrf.mxu0  ;;  %v771_v6 = vpop.f32.mrf.mxu1 }
 0x127   : > { %1360 = vst [vmem:[%s2103_s26 + $0x130] sm:$0xff] %v1296_v63  ;;  %v1233_v4 = vmul.f32 0.01, %v766_v59  ;;  %vm1182_vm13 = vcmp.ge.f32.partialorder %v681_v1, 0.0  ;;  %v1246_v7 = vmul.f32 0.01, %v681_v1  ;;  %v683_v12 = vadd.f32 %v682_v5, %v2113_v45 }
 0x128   : > { %vm1184_vm14 = vcmp.ge.f32.partialorder %v770_v2, 0.0  ;;  %v1248_v8 = vmul.f32 0.01, %v770_v2  ;;  %v1295_v9 = vsel %vm1167_vm11, %v677_v58, %v1231_v3  ;;  %v772_v13 = vadd.f32 %v771_v6, %v2113_v45  ;;  %v840_v14 = vpop.f32.mrf.mxu0  ;;  %v929_v15 = vpop.f32.mrf.mxu1 }
 0x129   : > { %v1297_v10 = vsel %vm1169_vm12, %v766_v59, %v1233_v4  ;;  %1359 = vst [vmem:[%s2103_s26 + $0x128] sm:$0xff] %v1295_v9  ;;  %v1310_v17 = vsel %vm1182_vm13, %v681_v1, %v1246_v7  ;;  %v841_v0 = vadd.f32 %v840_v14, %v2090_v11  ;;  %v930_v19 = vadd.f32 %v929_v15, %v2090_v11 }
 0x12a   : > { %1361 = vst [vmem:[%s2103_s26 + $0x138] sm:$0xff] %v1297_v10  ;;  %v1312_v18 = vsel %vm1184_vm14, %v770_v2, %v1248_v8  ;;  %1374 = vst [vmem:[%s2103_s26 + $0x1a0] sm:$0xff] %v1310_v17  ;;  %vm1183_vm15 = vcmp.ge.f32.partialorder %v683_v12, 0.0  ;;  %v1247_v21 = vmul.f32 0.01, %v683_v12  ;;  %vm1185_vm0 = vcmp.ge.f32.partialorder %v772_v13, 0.0  ;;  %v842_v23 = vpop.f32.mrf.mxu0  ;;  %v931_v24 = vpop.f32.mrf.mxu1 }
 0x12b   : > { %1376 = vst [vmem:[%s2103_s26 + $0x1b0] sm:$0xff] %v1312_v18  ;;  %v1249_v22 = vmul.f32 0.01, %v772_v13  ;;  %vm1138_vm1 = vcmp.ge.f32.partialorder %v841_v0, 0.0  ;;  %v1202_v25 = vmul.f32 0.01, %v841_v0  ;;  %v843_v29 = vadd.f32 %v842_v23, %v2090_v11 }
 0x12c   : > { %vm1140_vm2 = vcmp.ge.f32.partialorder %v930_v19, 0.0  ;;  %v1204_v26 = vmul.f32 0.01, %v930_v19  ;;  %v1311_v27 = vsel %vm1183_vm15, %v683_v12, %v1247_v21  ;;  %v932_v30 = vadd.f32 %v931_v24, %v2090_v11  ;;  %v846_v31 = vpop.f32.mrf.mxu0  ;;  %v935_v32 = vpop.f32.mrf.mxu1 }
 0x12d   : > { %v1313_v28 = vsel %vm1185_vm0, %v772_v13, %v1249_v22  ;;  %1375 = vst [vmem:[%s2103_s26 + $0x1a8] sm:$0xff] %v1311_v27  ;;  %v1266_v33 = vsel %vm1138_vm1, %v841_v0, %v1202_v25  ;;  %v847_v35 = vadd.f32 %v846_v31, %v2094_v16  ;;  %v936_v36 = vadd.f32 %v935_v32, %v2094_v16 }
 0x12e   : > { %1377 = vst [vmem:[%s2103_s26 + $0x1b8] sm:$0xff] %v1313_v28  ;;  %v1268_v34 = vsel %vm1140_vm2, %v930_v19, %v1204_v26  ;;  %1330 = vst [vmem:[%s2103_s26 + $0x40] sm:$0xff] %v1266_v33  ;;  %vm1139_vm3 = vcmp.ge.f32.partialorder %v843_v29, 0.0  ;;  %v1203_v37 = vmul.f32 0.01, %v843_v29  ;;  %vm1141_vm4 = vcmp.ge.f32.partialorder %v932_v30, 0.0  ;;  %v848_v39 = vpop.f32.mrf.mxu0  ;;  %v937_v40 = vpop.f32.mrf.mxu1 }
 0x12f   : > { %1332 = vst [vmem:[%s2103_s26 + $0x50] sm:$0xff] %v1268_v34  ;;  %v1205_v38 = vmul.f32 0.01, %v932_v30  ;;  %vm1154_vm5 = vcmp.ge.f32.partialorder %v847_v35, 0.0  ;;  %v1218_v41 = vmul.f32 0.01, %v847_v35  ;;  %v849_v46 = vadd.f32 %v848_v39, %v2094_v16 }
 0x130   : > { %vm1156_vm6 = vcmp.ge.f32.partialorder %v936_v36, 0.0  ;;  %v1220_v42 = vmul.f32 0.01, %v936_v36  ;;  %v1267_v43 = vsel %vm1139_vm3, %v843_v29, %v1203_v37  ;;  %v938_v47 = vadd.f32 %v937_v40, %v2094_v16  ;;  %v852_v48 = vpop.f32.mrf.mxu0  ;;  %v941_v49 = vpop.f32.mrf.mxu1 }
 0x131   : > { %v1269_v44 = vsel %vm1141_vm4, %v932_v30, %v1205_v38  ;;  %1331 = vst [vmem:[%s2103_s26 + $0x48] sm:$0xff] %v1267_v43  ;;  %v1282_v50 = vsel %vm1154_vm5, %v847_v35, %v1218_v41  ;;  %v853_v52 = vadd.f32 %v852_v48, %v2096_v20  ;;  %v942_v53 = vadd.f32 %v941_v49, %v2096_v20 }
 0x132   : > { %1333 = vst [vmem:[%s2103_s26 + $0x58] sm:$0xff] %v1269_v44  ;;  %v1284_v51 = vsel %vm1156_vm6, %v936_v36, %v1220_v42  ;;  %1346 = vst [vmem:[%s2103_s26 + $0xc0] sm:$0xff] %v1282_v50  ;;  %vm1155_vm7 = vcmp.ge.f32.partialorder %v849_v46, 0.0  ;;  %v1219_v54 = vmul.f32 0.01, %v849_v46  ;;  %vm1157_vm8 = vcmp.ge.f32.partialorder %v938_v47, 0.0  ;;  %v854_v56 = vpop.f32.mrf.mxu0  ;;  %v943_v57 = vpop.f32.mrf.mxu1 }
 0x133   : > { %1348 = vst [vmem:[%s2103_s26 + $0xd0] sm:$0xff] %v1284_v51  ;;  %v1221_v55 = vmul.f32 0.01, %v938_v47  ;;  %vm1170_vm9 = vcmp.ge.f32.partialorder %v853_v52, 0.0  ;;  %v1234_v58 = vmul.f32 0.01, %v853_v52  ;;  %v855_v62 = vadd.f32 %v854_v56, %v2096_v20 }
 0x134   : > { %vm1172_vm10 = vcmp.ge.f32.partialorder %v942_v53, 0.0  ;;  %v1236_v59 = vmul.f32 0.01, %v942_v53  ;;  %v1283_v60 = vsel %vm1155_vm7, %v849_v46, %v1219_v54  ;;  %v944_v63 = vadd.f32 %v943_v57, %v2096_v20  ;;  %v858_v1 = vpop.f32.mrf.mxu0  ;;  %v947_v2 = vpop.f32.mrf.mxu1 }
 0x135   : > { %v1285_v61 = vsel %vm1157_vm8, %v938_v47, %v1221_v55  ;;  %1347 = vst [vmem:[%s2103_s26 + $0xc8] sm:$0xff] %v1283_v60  ;;  %v1298_v3 = vsel %vm1170_vm9, %v853_v52, %v1234_v58  ;;  %v859_v5 = vadd.f32 %v858_v1, %v2113_v45  ;;  %v948_v6 = vadd.f32 %v947_v2, %v2113_v45 }
 0x136   : > { %1349 = vst [vmem:[%s2103_s26 + $0xd8] sm:$0xff] %v1285_v61  ;;  %v1300_v4 = vsel %vm1172_vm10, %v942_v53, %v1236_v59  ;;  %1362 = vst [vmem:[%s2103_s26 + $0x140] sm:$0xff] %v1298_v3  ;;  %vm1171_vm11 = vcmp.ge.f32.partialorder %v855_v62, 0.0  ;;  %v1235_v7 = vmul.f32 0.01, %v855_v62  ;;  %vm1173_vm12 = vcmp.ge.f32.partialorder %v944_v63, 0.0  ;;  %v860_v9 = vpop.f32.mrf.mxu0  ;;  %v949_v10 = vpop.f32.mrf.mxu1 }
 0x137   : > { %1364 = vst [vmem:[%s2103_s26 + $0x150] sm:$0xff] %v1300_v4  ;;  %v1237_v8 = vmul.f32 0.01, %v944_v63  ;;  %vm1186_vm13 = vcmp.ge.f32.partialorder %v859_v5, 0.0  ;;  %v1250_v12 = vmul.f32 0.01, %v859_v5  ;;  %v861_v17 = vadd.f32 %v860_v9, %v2113_v45 }
 0x138   : > { %vm1188_vm14 = vcmp.ge.f32.partialorder %v948_v6, 0.0  ;;  %v1252_v13 = vmul.f32 0.01, %v948_v6  ;;  %v1299_v14 = vsel %vm1171_vm11, %v855_v62, %v1235_v7  ;;  %v950_v18 = vadd.f32 %v949_v10, %v2113_v45  ;;  %v1018_v0 = vpop.f32.mrf.mxu0  ;;  %v1107_v19 = vpop.f32.mrf.mxu1 }
 0x139   : > { %v1301_v15 = vsel %vm1173_vm12, %v944_v63, %v1237_v8  ;;  %1363 = vst [vmem:[%s2103_s26 + $0x148] sm:$0xff] %v1299_v14  ;;  %v1314_v21 = vsel %vm1186_vm13, %v859_v5, %v1250_v12  ;;  %v1019_v23 = vadd.f32 %v1018_v0, %v2090_v11  ;;  %v1108_v24 = vadd.f32 %v1107_v19, %v2090_v11 }
 0x13a   : > { %1365 = vst [vmem:[%s2103_s26 + $0x158] sm:$0xff] %v1301_v15  ;;  %v1316_v22 = vsel %vm1188_vm14, %v948_v6, %v1252_v13  ;;  %1378 = vst [vmem:[%s2103_s26 + $0x1c0] sm:$0xff] %v1314_v21  ;;  %vm1187_vm15 = vcmp.ge.f32.partialorder %v861_v17, 0.0  ;;  %v1251_v25 = vmul.f32 0.01, %v861_v17  ;;  %vm1189_vm0 = vcmp.ge.f32.partialorder %v950_v18, 0.0  ;;  %v1020_v27 = vpop.f32.mrf.mxu0  ;;  %v1109_v28 = vpop.f32.mrf.mxu1 }
 0x13b   : > { %1380 = vst [vmem:[%s2103_s26 + $0x1d0] sm:$0xff] %v1316_v22  ;;  %v1253_v26 = vmul.f32 0.01, %v950_v18  ;;  %vm1142_vm1 = vcmp.ge.f32.partialorder %v1019_v23, 0.0  ;;  %v1206_v29 = vmul.f32 0.01, %v1019_v23  ;;  %v1021_v33 = vadd.f32 %v1020_v27, %v2090_v11 }
 0x13c   : > { %vm1144_vm2 = vcmp.ge.f32.partialorder %v1108_v24, 0.0  ;;  %v1208_v30 = vmul.f32 0.01, %v1108_v24  ;;  %v1315_v31 = vsel %vm1187_vm15, %v861_v17, %v1251_v25  ;;  %v1110_v34 = vadd.f32 %v1109_v28, %v2090_v11  ;;  %v1024_v35 = vpop.f32.mrf.mxu0  ;;  %v1113_v36 = vpop.f32.mrf.mxu1  ;;  %v1412_v27 = vld [vmem:[%s2103_s26 + $0x10] sm:$0xff] (%p1748_p5)  ;;  %v1414_v28 = vld [vmem:[%s2103_s26 + $0x18] sm:$0xff] (%p1748_p5) }
 0x13d   : > { %v1317_v32 = vsel %vm1189_vm0, %v950_v18, %v1253_v26  ;;  %1379 = vst [vmem:[%s2103_s26 + $0x1c8] sm:$0xff] %v1315_v31  ;;  %v1270_v37 = vsel %vm1142_vm1, %v1019_v23, %v1206_v29  ;;  %v1025_v39 = vadd.f32 %v1024_v35, %v2094_v16  ;;  %v1114_v40 = vadd.f32 %v1113_v36, %v2094_v16  ;;  %v1410_v26 = vld [vmem:[%s2103_s26 + $0x8] sm:$0xff] (%p1748_p5)  ;;  %v1416_v29 = vld [vmem:[%s2103_s26 + $0x20] sm:$0xff] (%p1748_p5)  ;;  %v1420_v31 = vld [vmem:[%s2103_s26 + $0x30] sm:$0xff] (%p1748_p5) }
 0x13e   : > { %1381 = vst [vmem:[%s2103_s26 + $0x1d8] sm:$0xff] %v1317_v32  ;;  %v1272_v38 = vsel %vm1144_vm2, %v1108_v24, %v1208_v30  ;;  %1334 = vst [vmem:[%s2103_s26 + $0x60] sm:$0xff] %v1270_v37  ;;  %vm1143_vm3 = vcmp.ge.f32.partialorder %v1021_v33, 0.0  ;;  %v1207_v41 = vmul.f32 0.01, %v1021_v33  ;;  %vm1145_vm4 = vcmp.ge.f32.partialorder %v1110_v34, 0.0  ;;  %v1026_v43 = vpop.f32.mrf.mxu0  ;;  %v1115_v11 = vpop.f32.mrf.mxu1 }
 0x13f   : > { %1336 = vst [vmem:[%s2103_s26 + $0x70] sm:$0xff] %v1272_v38  ;;  %v1209_v42 = vmul.f32 0.01, %v1110_v34  ;;  %vm1158_vm5 = vcmp.ge.f32.partialorder %v1025_v39, 0.0  ;;  %v1222_v44 = vmul.f32 0.01, %v1025_v39  ;;  %v1027_v49 = vadd.f32 %v1026_v43, %v2094_v16 }
 0x140   : > { %vm1160_vm6 = vcmp.ge.f32.partialorder %v1114_v40, 0.0  ;;  %v1224_v46 = vmul.f32 0.01, %v1114_v40  ;;  %v1271_v47 = vsel %vm1143_vm3, %v1021_v33, %v1207_v41  ;;  %v1116_v50 = vadd.f32 %v1115_v11, %v2094_v16  ;;  %v1030_v51 = vpop.f32.mrf.mxu0  ;;  %v1119_v52 = vpop.f32.mrf.mxu1  ;;  %v1418_v30 = vld [vmem:[%s2103_s26 + $0x28] sm:$0xff] (%p1748_p5)  ;;  %1411 = vst [vmem:[%s2239_s20 + $0x8] sm:$0xff] (%p1748_p5), %v1410_v26  ;;  %1413 = vst [vmem:[%s2239_s20 + $0x10] sm:$0xff] (%p1748_p5), %v1412_v27 }
 0x141   : > { %v1273_v48 = vsel %vm1145_vm4, %v1110_v34, %v1209_v42  ;;  %1335 = vst [vmem:[%s2103_s26 + $0x68] sm:$0xff] %v1271_v47  ;;  %v1286_v53 = vsel %vm1158_vm5, %v1025_v39, %v1222_v44  ;;  %v1031_v55 = vadd.f32 %v1030_v51, %v2096_v20  ;;  %v1120_v56 = vadd.f32 %v1119_v52, %v2096_v20  ;;  %v1422_v32 = vld [vmem:[%s2103_s26 + $0x38] sm:$0xff] (%p1748_p5)  ;;  %v1424_v33 = vld [vmem:[%s2103_s26 + $0x40] sm:$0xff] (%p1748_p5)  ;;  %v1426_v34 = vld [vmem:[%s2103_s26 + $0x48] sm:$0xff] (%p1748_p5) }
 0x142   : > { %1337 = vst [vmem:[%s2103_s26 + $0x78] sm:$0xff] %v1273_v48  ;;  %v1288_v54 = vsel %vm1160_vm6, %v1114_v40, %v1224_v46  ;;  %1350 = vst [vmem:[%s2103_s26 + $0xe0] sm:$0xff] %v1286_v53  ;;  %vm1159_vm7 = vcmp.ge.f32.partialorder %v1027_v49, 0.0  ;;  %v1223_v57 = vmul.f32 0.01, %v1027_v49  ;;  %vm1161_vm8 = vcmp.ge.f32.partialorder %v1116_v50, 0.0  ;;  %v1032_v59 = vpop.f32.mrf.mxu0  ;;  %v1121_v16 = vpop.f32.mrf.mxu1 }
 0x143   : > { %1352 = vst [vmem:[%s2103_s26 + $0xf0] sm:$0xff] %v1288_v54  ;;  %v1225_v58 = vmul.f32 0.01, %v1116_v50  ;;  %vm1174_vm9 = vcmp.ge.f32.partialorder %v1031_v55, 0.0  ;;  %v1238_v60 = vmul.f32 0.01, %v1031_v55  ;;  %v1033_v1 = vadd.f32 %v1032_v59, %v2096_v20 }
 0x144   : > { %vm1176_vm10 = vcmp.ge.f32.partialorder %v1120_v56, 0.0  ;;  %v1240_v61 = vmul.f32 0.01, %v1120_v56  ;;  %v1287_v62 = vsel %vm1159_vm7, %v1027_v49, %v1223_v57  ;;  %v1122_v2 = vadd.f32 %v1121_v16, %v2096_v20  ;;  %v1036_v3 = vpop.f32.mrf.mxu0  ;;  %v1125_v4 = vpop.f32.mrf.mxu1  ;;  %1415 = vst [vmem:[%s2239_s20 + $0x18] sm:$0xff] (%p1748_p5), %v1414_v28  ;;  %1417 = vst [vmem:[%s2239_s20 + $0x20] sm:$0xff] (%p1748_p5), %v1416_v29  ;;  %v1428_v35 = vld [vmem:[%s2103_s26 + $0x50] sm:$0xff] (%p1748_p5) }
 0x145   : > { %v1289_v63 = vsel %vm1161_vm8, %v1116_v50, %v1225_v58  ;;  %1351 = vst [vmem:[%s2103_s26 + $0xe8] sm:$0xff] %v1287_v62  ;;  %v1302_v5 = vsel %vm1174_vm9, %v1031_v55, %v1238_v60  ;;  %v1037_v7 = vadd.f32 %v1036_v3, %v2113_v45  ;;  %v1126_v8 = vadd.f32 %v1125_v4, %v2113_v45  ;;  %v1430_v36 = vld [vmem:[%s2103_s26 + $0x58] sm:$0xff] (%p1748_p5)  ;;  %v1432_v37 = vld [vmem:[%s2103_s26 + $0x60] sm:$0xff] (%p1748_p5)  ;;  %v1442_v42 = vld [vmem:[%s2103_s26 + $0x88] sm:$0xff] (%p1748_p5) }
 0x146   : > { %1353 = vst [vmem:[%s2103_s26 + $0xf8] sm:$0xff] %v1289_v63  ;;  %v1304_v6 = vsel %vm1176_vm10, %v1120_v56, %v1240_v61  ;;  %1366 = vst [vmem:[%s2103_s26 + $0x160] sm:$0xff] %v1302_v5  ;;  %vm1175_vm11 = vcmp.ge.f32.partialorder %v1033_v1, 0.0  ;;  %v1239_v9 = vmul.f32 0.01, %v1033_v1  ;;  %vm1177_vm12 = vcmp.ge.f32.partialorder %v1122_v2, 0.0  ;;  %v1038_v20 = vpop.f32.mrf.mxu0  ;;  %v1127_v12 = vpop.f32.mrf.mxu1 }
 0x147   : > { %1368 = vst [vmem:[%s2103_s26 + $0x170] sm:$0xff] %v1304_v6  ;;  %v1241_v10 = vmul.f32 0.01, %v1122_v2  ;;  %vm1190_vm13 = vcmp.ge.f32.partialorder %v1037_v7, 0.0  ;;  %v1254_v13 = vmul.f32 0.01, %v1037_v7  ;;  %v1039_v18 = vadd.f32 %v1038_v20, %v2113_v45 }
 0x148   : > { %vm1192_vm14 = vcmp.ge.f32.partialorder %v1126_v8, 0.0  ;;  %v1256_v14 = vmul.f32 0.01, %v1126_v8  ;;  %v1303_v15 = vsel %vm1175_vm11, %v1033_v1, %v1239_v9  ;;  %v1128_v0 = vadd.f32 %v1127_v12, %v2113_v45  ;;  %v1408_v45 = vld [vmem:[%s2103_s26] sm:$0xff] (%p1748_p5)  ;;  %1419 = vst [vmem:[%s2239_s20 + $0x28] sm:$0xff] (%p1748_p5), %v1418_v30  ;;  %1421 = vst [vmem:[%s2239_s20 + $0x30] sm:$0xff] (%p1748_p5), %v1420_v31 }
 0x149   : > { %v1305_v17 = vsel %vm1177_vm12, %v1122_v2, %v1241_v10  ;;  %1367 = vst [vmem:[%s2103_s26 + $0x168] sm:$0xff] %v1303_v15  ;;  %v1318_v19 = vsel %vm1190_vm13, %v1037_v7, %v1254_v13  ;;  %vm1191_vm15 = vcmp.ge.f32.partialorder %v1039_v18, 0.0  ;;  %v1255_v22 = vmul.f32 0.01, %v1039_v18  ;;  %1392 = sbr.rel (!%p1748_p5) target bundleno = 361 (0x169), region = 59  ;;  %1409 = vst [vmem:[%s2239_s20] sm:$0xff] (%p1748_p5), %v1408_v45  ;;  %v1434_v38 = vld [vmem:[%s2103_s26 + $0x68] sm:$0xff] (%p1748_p5) }
 0x14a   : > { %1369 = vst [vmem:[%s2103_s26 + $0x178] sm:$0xff] %v1305_v17  ;;  %v1320_v21 = vsel %vm1192_vm14, %v1126_v8, %v1256_v14  ;;  %1382 = vst [vmem:[%s2103_s26 + $0x1e0] sm:$0xff] %v1318_v19  ;;  %vm1193_vm0 = vcmp.ge.f32.partialorder %v1128_v0, 0.0  ;;  %v1257_v23 = vmul.f32 0.01, %v1128_v0  ;;  %v1436_v39 = vld [vmem:[%s2103_s26 + $0x70] sm:$0xff] (%p1748_p5) }
 0x14b   : > { %1384 = vst [vmem:[%s2103_s26 + $0x1f0] sm:$0xff] %v1320_v21  ;;  %v1319_v24 = vsel %vm1191_vm15, %v1039_v18, %v1255_v22  ;;  %1423 = vst [vmem:[%s2239_s20 + $0x38] sm:$0xff] (%p1748_p5), %v1422_v32  ;;  %v1438_v40 = vld [vmem:[%s2103_s26 + $0x78] sm:$0xff] (%p1748_p5)  ;;  %v1440_v41 = vld [vmem:[%s2103_s26 + $0x80] sm:$0xff] (%p1748_p5) }
 0x14c   : > { %v1321_v25 = vsel %vm1193_vm0, %v1128_v0, %v1257_v23  ;;  %1383 = vst [vmem:[%s2103_s26 + $0x1e8] sm:$0xff] %v1319_v24  ;;  %1425 = vst [vmem:[%s2239_s20 + $0x40] sm:$0xff] (%p1748_p5), %v1424_v33  ;;  %v1444_v43 = vld [vmem:[%s2103_s26 + $0x90] sm:$0xff] (%p1748_p5)  ;;  %v1446_v11 = vld [vmem:[%s2103_s26 + $0x98] sm:$0xff] (%p1748_p5) }
 0x14d   : > { %1385 = vst [vmem:[%s2103_s26 + $0x1f8] sm:$0xff] %v1321_v25  ;;  %1427 = vst [vmem:[%s2239_s20 + $0x48] sm:$0xff] (%p1748_p5), %v1426_v34  ;;  %v1448_v44 = vld [vmem:[%s2103_s26 + $0xa0] sm:$0xff] (%p1748_p5)  ;;  %v1450_v46 = vld [vmem:[%s2103_s26 + $0xa8] sm:$0xff] (%p1748_p5) }
 0x14e   : > { %1429 = vst [vmem:[%s2239_s20 + $0x50] sm:$0xff] %v1428_v35  ;;  %1431 = vst [vmem:[%s2239_s20 + $0x58] sm:$0xff] %v1430_v36  ;;  %v1452_v47 = vld [vmem:[%s2103_s26 + $0xb0] sm:$0xff]  ;;  %v1454_v48 = vld [vmem:[%s2103_s26 + $0xb8] sm:$0xff] }
 0x14f   : > { %1433 = vst [vmem:[%s2239_s20 + $0x60] sm:$0xff] %v1432_v37  ;;  %1435 = vst [vmem:[%s2239_s20 + $0x68] sm:$0xff] %v1434_v38  ;;  %v1456_v49 = vld [vmem:[%s2103_s26 + $0xc0] sm:$0xff]  ;;  %v1458_v50 = vld [vmem:[%s2103_s26 + $0xc8] sm:$0xff] }
 0x150   : > { %1437 = vst [vmem:[%s2239_s20 + $0x70] sm:$0xff] %v1436_v39  ;;  %1439 = vst [vmem:[%s2239_s20 + $0x78] sm:$0xff] %v1438_v40  ;;  %v1460_v51 = vld [vmem:[%s2103_s26 + $0xd0] sm:$0xff]  ;;  %v1462_v52 = vld [vmem:[%s2103_s26 + $0xd8] sm:$0xff] }
 0x151   : > { %1441 = vst [vmem:[%s2239_s20 + $0x200] sm:$0xff] %v1440_v41  ;;  %1443 = vst [vmem:[%s2239_s20 + $0x208] sm:$0xff] %v1442_v42  ;;  %v1464_v53 = vld [vmem:[%s2103_s26 + $0xe0] sm:$0xff]  ;;  %v1466_v54 = vld [vmem:[%s2103_s26 + $0xe8] sm:$0xff] }
 0x152   : > { %1445 = vst [vmem:[%s2239_s20 + $0x210] sm:$0xff] %v1444_v43  ;;  %1447 = vst [vmem:[%s2239_s20 + $0x218] sm:$0xff] %v1446_v11  ;;  %v1468_v55 = vld [vmem:[%s2103_s26 + $0xf0] sm:$0xff]  ;;  %v1470_v56 = vld [vmem:[%s2103_s26 + $0xf8] sm:$0xff] }
 0x153   : > { %1449 = vst [vmem:[%s2239_s20 + $0x220] sm:$0xff] %v1448_v44  ;;  %1451 = vst [vmem:[%s2239_s20 + $0x228] sm:$0xff] %v1450_v46  ;;  %v1472_v57 = vld [vmem:[%s2103_s26 + $0x100] sm:$0xff]  ;;  %v1474_v58 = vld [vmem:[%s2103_s26 + $0x108] sm:$0xff] }
 0x154   : > { %1453 = vst [vmem:[%s2239_s20 + $0x230] sm:$0xff] %v1452_v47  ;;  %1455 = vst [vmem:[%s2239_s20 + $0x238] sm:$0xff] %v1454_v48  ;;  %v1476_v59 = vld [vmem:[%s2103_s26 + $0x110] sm:$0xff]  ;;  %v1478_v16 = vld [vmem:[%s2103_s26 + $0x118] sm:$0xff] }
 0x155   : > { %1457 = vst [vmem:[%s2239_s20 + $0x240] sm:$0xff] %v1456_v49  ;;  %1459 = vst [vmem:[%s2239_s20 + $0x248] sm:$0xff] %v1458_v50  ;;  %v1480_v60 = vld [vmem:[%s2103_s26 + $0x120] sm:$0xff]  ;;  %v1482_v61 = vld [vmem:[%s2103_s26 + $0x128] sm:$0xff] }
 0x156   : > { %1461 = vst [vmem:[%s2239_s20 + $0x250] sm:$0xff] %v1460_v51  ;;  %1463 = vst [vmem:[%s2239_s20 + $0x258] sm:$0xff] %v1462_v52  ;;  %v1484_v62 = vld [vmem:[%s2103_s26 + $0x130] sm:$0xff]  ;;  %v1486_v63 = vld [vmem:[%s2103_s26 + $0x138] sm:$0xff] }
 0x157   : > { %1465 = vst [vmem:[%s2239_s20 + $0x260] sm:$0xff] %v1464_v53  ;;  %1467 = vst [vmem:[%s2239_s20 + $0x268] sm:$0xff] %v1466_v54  ;;  %v1488_v1 = vld [vmem:[%s2103_s26 + $0x140] sm:$0xff]  ;;  %v1490_v2 = vld [vmem:[%s2103_s26 + $0x148] sm:$0xff] }
 0x158   : > { %1469 = vst [vmem:[%s2239_s20 + $0x270] sm:$0xff] %v1468_v55  ;;  %1471 = vst [vmem:[%s2239_s20 + $0x278] sm:$0xff] %v1470_v56  ;;  %v1492_v3 = vld [vmem:[%s2103_s26 + $0x150] sm:$0xff]  ;;  %v1494_v4 = vld [vmem:[%s2103_s26 + $0x158] sm:$0xff] }
 0x159   : > { %1473 = vst [vmem:[%s2239_s20 + $0x400] sm:$0xff] %v1472_v57  ;;  %1475 = vst [vmem:[%s2239_s20 + $0x408] sm:$0xff] %v1474_v58  ;;  %v1496_v5 = vld [vmem:[%s2103_s26 + $0x160] sm:$0xff]  ;;  %v1498_v6 = vld [vmem:[%s2103_s26 + $0x168] sm:$0xff] }
 0x15a   : > { %1477 = vst [vmem:[%s2239_s20 + $0x410] sm:$0xff] %v1476_v59  ;;  %1479 = vst [vmem:[%s2239_s20 + $0x418] sm:$0xff] %v1478_v16  ;;  %v1500_v7 = vld [vmem:[%s2103_s26 + $0x170] sm:$0xff]  ;;  %v1502_v8 = vld [vmem:[%s2103_s26 + $0x178] sm:$0xff] }
 0x15b   : > { %1481 = vst [vmem:[%s2239_s20 + $0x420] sm:$0xff] %v1480_v60  ;;  %1483 = vst [vmem:[%s2239_s20 + $0x428] sm:$0xff] %v1482_v61  ;;  %v1504_v9 = vld [vmem:[%s2103_s26 + $0x180] sm:$0xff]  ;;  %v1506_v10 = vld [vmem:[%s2103_s26 + $0x188] sm:$0xff] }
 0x15c   : > { %1485 = vst [vmem:[%s2239_s20 + $0x430] sm:$0xff] %v1484_v62  ;;  %1487 = vst [vmem:[%s2239_s20 + $0x438] sm:$0xff] %v1486_v63  ;;  %v1508_v20 = vld [vmem:[%s2103_s26 + $0x190] sm:$0xff]  ;;  %v1510_v12 = vld [vmem:[%s2103_s26 + $0x198] sm:$0xff] }
 0x15d   : > { %1489 = vst [vmem:[%s2239_s20 + $0x440] sm:$0xff] %v1488_v1  ;;  %1491 = vst [vmem:[%s2239_s20 + $0x448] sm:$0xff] %v1490_v2  ;;  %v1512_v13 = vld [vmem:[%s2103_s26 + $0x1a0] sm:$0xff]  ;;  %v1514_v14 = vld [vmem:[%s2103_s26 + $0x1a8] sm:$0xff] }
 0x15e   : > { %1493 = vst [vmem:[%s2239_s20 + $0x450] sm:$0xff] %v1492_v3  ;;  %1495 = vst [vmem:[%s2239_s20 + $0x458] sm:$0xff] %v1494_v4  ;;  %v1516_v15 = vld [vmem:[%s2103_s26 + $0x1b0] sm:$0xff]  ;;  %v1518_v17 = vld [vmem:[%s2103_s26 + $0x1b8] sm:$0xff] }
 0x15f   : > { %1497 = vst [vmem:[%s2239_s20 + $0x460] sm:$0xff] %v1496_v5  ;;  %1499 = vst [vmem:[%s2239_s20 + $0x468] sm:$0xff] %v1498_v6  ;;  %v1520_v18 = vld [vmem:[%s2103_s26 + $0x1c0] sm:$0xff]  ;;  %v1522_v0 = vld [vmem:[%s2103_s26 + $0x1c8] sm:$0xff] }
 0x160   : > { %1501 = vst [vmem:[%s2239_s20 + $0x470] sm:$0xff] %v1500_v7  ;;  %1503 = vst [vmem:[%s2239_s20 + $0x478] sm:$0xff] %v1502_v8  ;;  %v1524_v19 = vld [vmem:[%s2103_s26 + $0x1d0] sm:$0xff]  ;;  %v1526_v21 = vld [vmem:[%s2103_s26 + $0x1d8] sm:$0xff] }
 0x161   : > { %1505 = vst [vmem:[%s2239_s20 + $0x600] sm:$0xff] %v1504_v9  ;;  %1507 = vst [vmem:[%s2239_s20 + $0x608] sm:$0xff] %v1506_v10  ;;  %v1528_v22 = vld [vmem:[%s2103_s26 + $0x1e0] sm:$0xff]  ;;  %v1530_v23 = vld [vmem:[%s2103_s26 + $0x1e8] sm:$0xff] }
 0x162   : > { %1509 = vst [vmem:[%s2239_s20 + $0x610] sm:$0xff] %v1508_v20  ;;  %1511 = vst [vmem:[%s2239_s20 + $0x618] sm:$0xff] %v1510_v12  ;;  %v1532_v24 = vld [vmem:[%s2103_s26 + $0x1f0] sm:$0xff]  ;;  %v1534_v25 = vld [vmem:[%s2103_s26 + $0x1f8] sm:$0xff] }
 0x163   : > { %1513 = vst [vmem:[%s2239_s20 + $0x620] sm:$0xff] %v1512_v13  ;;  %1515 = vst [vmem:[%s2239_s20 + $0x628] sm:$0xff] %v1514_v14 }
 0x164   : > { %1517 = vst [vmem:[%s2239_s20 + $0x630] sm:$0xff] %v1516_v15  ;;  %1519 = vst [vmem:[%s2239_s20 + $0x638] sm:$0xff] %v1518_v17 }
 0x165   : > { %1521 = vst [vmem:[%s2239_s20 + $0x640] sm:$0xff] %v1520_v18  ;;  %1523 = vst [vmem:[%s2239_s20 + $0x648] sm:$0xff] %v1522_v0 }
 0x166   : > { %1525 = vst [vmem:[%s2239_s20 + $0x650] sm:$0xff] %v1524_v19  ;;  %1527 = vst [vmem:[%s2239_s20 + $0x658] sm:$0xff] %v1526_v21 }
 0x167   : > { %1529 = vst [vmem:[%s2239_s20 + $0x660] sm:$0xff] %v1528_v22  ;;  %1531 = vst [vmem:[%s2239_s20 + $0x668] sm:$0xff] %v1530_v23 }
 0x168   : > { %1533 = vst [vmem:[%s2239_s20 + $0x670] sm:$0xff] %v1532_v24  ;;  %1535 = vst [vmem:[%s2239_s20 + $0x678] sm:$0xff] %v1534_v25 }
 0x169 PF: > { %p10_p10 = scmp.ge.s32.totalorder %s1735_s16, 6   ;;  %s2381_s12 = smov %s1690_s13 }
 0x16a   : > { %s2382_s13 = smov %s1746_s19  ;;  %s2383_s14 = smov %s1735_s16 }
 0x16b   :  { %12 = sbr.rel (!%p10_p10) target bundleno = 2 (0x2), region = 113 }

// kernel: encoder_forward.6
= control target key start
LH: loop header
LB: loop body
LE: loop exit
PB: predicated region body
PF: predicated region fallthrough
CT: control target
= control target key end

     0   :  { %s2642_s12 = smov 0   ;;  %s2644_s13 = smov 0   ;;  %s4196_s0 = inlined_call_operand.vmem [shape: f32[64,288], index: 0, kind: input, shape index: {}]   ;;  %s4197_s1 = inlined_call_operand.vmem [shape: f32[288,2048], index: 1, kind: input, shape index: {}]   ;;  %s4198_s2 = inlined_call_operand.vmem [shape: f32[64,1], index: 2, kind: input, shape index: {}]   ;;  %s4199_s3 = inlined_call_operand.vmem [shape: f32[64,2048], index: 3, kind: output, shape index: {}]  }
   0x1   :  { %s2646_s14 = smov 0  }
   0x2 LB: > { %s2515_s15 = sadd.s32 4294967295, %s2618_s14   ;;  %s2659_s16 = sadd.s32 1, %s2618_s14   ;;  %s2618_s14 = sphi %s2646_s14, %s4203_s14   ;;  %s2614_s13 = sphi %s2644_s13, %s4202_s13   ;;  %s2610_s12 = sphi %s2642_s12, %s4201_s12  }
   0x3   : > { %s38_s17 = ssub.s32 %s2618_s14, %s2659_s16  ;;  %s41_s18 = sadd.s32 1, %s2614_s13 }
   0x4   : > { %p39_p0 = scmp.eq.s32.totalorder %s38_s17, 0  ;;  %p48_p1 = scmp.ne.s32.totalorder %s2614_s13, %s2610_s12 }
   0x5   : > { %p49_p2 = scmp.eq.s32.totalorder %s2618_s14, 0  ;;  %p99_p3 = scmp.eq.s32.totalorder %s2515_s15, 1 }
   0x6   : > { %s2670_s19 = scalar_select %p39_p0, %s2614_s13, %s41_s18  }
   0x7   : > { %p50_p4 = por %p49_p2, %p48_p1  ;;  %p2672_p5 = por %p99_p3, %p48_p1 }
   0x8   : > { %p2518_p6 = scmp.ge.s32.totalorder %s2618_s14, 2 }
   0xa   : > { %127 = sbr.rel (%p2518_p6) target bundleno = 164 (0xa4), region = 24 }
   0xf   : > { %130 = sbr.rel (!%p50_p4) target bundleno = 164 (0xa4), region = 28  ;;  %s132_s21 = sand.u32 (%p50_p4), 1, %s2614_s13  }
  0x10   : > { %s2560_s22 = sshll.u32 (%p50_p4), %s2618_s14, 6  ;;  %s2562_s23 = smul.u32 (%p50_p4), 2304, %s132_s21 }
  0x11   : > { %s2682_s26 = scalar_lea.vmem (%p50_p4), %s4197_s1, %s2560_s22 }
  0x12   : > { %v150_v0 = vld [vmem:[%s2682_s26] sm:$0xff] (%p50_p4)  ;;  %v152_v1 = vld [vmem:[%s2682_s26 + $0x8] sm:$0xff] (%p50_p4)  ;;  %v154_v2 = vld [vmem:[%s2682_s26 + $0x10] sm:$0xff] (%p50_p4)  ;;  %s2690_s27 = scalar_lea.vmem (%p50_p4), [#allocation2], %s2562_s23 }
  0x13   : > { %v156_v3 = vld [vmem:[%s2682_s26 + $0x18] sm:$0xff] (%p50_p4)  ;;  %v158_v4 = vld [vmem:[%s2682_s26 + $0x20] sm:$0xff] (%p50_p4)  ;;  %v160_v5 = vld [vmem:[%s2682_s26 + $0x28] sm:$0xff] (%p50_p4)  ;;  %151 = vst [vmem:[%s2690_s27] sm:$0xff] (%p50_p4), %v150_v0 }
  0x14   : > { %153 = vst [vmem:[%s2690_s27 + $0x8] sm:$0xff] %v152_v1  ;;  %155 = vst [vmem:[%s2690_s27 + $0x10] sm:$0xff] %v154_v2  ;;  %v162_v6 = vld [vmem:[%s2682_s26 + $0x30] sm:$0xff]  ;;  %v164_v7 = vld [vmem:[%s2682_s26 + $0x38] sm:$0xff] }
  0x15   : > { %157 = vst [vmem:[%s2690_s27 + $0x18] sm:$0xff] %v156_v3  ;;  %159 = vst [vmem:[%s2690_s27 + $0x20] sm:$0xff] %v158_v4  ;;  %v166_v8 = vld [vmem:[%s2682_s26 + $0x80] sm:$0xff]  ;;  %v168_v9 = vld [vmem:[%s2682_s26 + $0x88] sm:$0xff] }
  0x16   : > { %161 = vst [vmem:[%s2690_s27 + $0x28] sm:$0xff] %v160_v5  ;;  %163 = vst [vmem:[%s2690_s27 + $0x30] sm:$0xff] %v162_v6  ;;  %v170_v10 = vld [vmem:[%s2682_s26 + $0x90] sm:$0xff]  ;;  %v172_v11 = vld [vmem:[%s2682_s26 + $0x98] sm:$0xff] }
  0x17   : > { %165 = vst [vmem:[%s2690_s27 + $0x38] sm:$0xff] %v164_v7  ;;  %167 = vst [vmem:[%s2690_s27 + $0x40] sm:$0xff] %v166_v8  ;;  %v174_v12 = vld [vmem:[%s2682_s26 + $0xa0] sm:$0xff]  ;;  %v176_v13 = vld [vmem:[%s2682_s26 + $0xa8] sm:$0xff] }
  0x18   : > { %169 = vst [vmem:[%s2690_s27 + $0x48] sm:$0xff] %v168_v9  ;;  %171 = vst [vmem:[%s2690_s27 + $0x50] sm:$0xff] %v170_v10  ;;  %v178_v14 = vld [vmem:[%s2682_s26 + $0xb0] sm:$0xff]  ;;  %v180_v15 = vld [vmem:[%s2682_s26 + $0xb8] sm:$0xff] }
  0x19   : > { %173 = vst [vmem:[%s2690_s27 + $0x58] sm:$0xff] %v172_v11  ;;  %175 = vst [vmem:[%s2690_s27 + $0x60] sm:$0xff] %v174_v12  ;;  %v182_v16 = vld [vmem:[%s2682_s26 + $0x100] sm:$0xff]  ;;  %v184_v17 = vld [vmem:[%s2682_s26 + $0x108] sm:$0xff] }
  0x1a   : > { %177 = vst [vmem:[%s2690_s27 + $0x68] sm:$0xff] %v176_v13  ;;  %179 = vst [vmem:[%s2690_s27 + $0x70] sm:$0xff] %v178_v14  ;;  %v186_v18 = vld [vmem:[%s2682_s26 + $0x110] sm:$0xff]  ;;  %v188_v19 = vld [vmem:[%s2682_s26 + $0x118] sm:$0xff] }
  0x1b   : > { %181 = vst [vmem:[%s2690_s27 + $0x78] sm:$0xff] %v180_v15  ;;  %183 = vst [vmem:[%s2690_s27 + $0x80] sm:$0xff] %v182_v16  ;;  %v190_v20 = vld [vmem:[%s2682_s26 + $0x120] sm:$0xff]  ;;  %v192_v21 = vld [vmem:[%s2682_s26 + $0x128] sm:$0xff] }
  0x1c   : > { %185 = vst [vmem:[%s2690_s27 + $0x88] sm:$0xff] %v184_v17  ;;  %187 = vst [vmem:[%s2690_s27 + $0x90] sm:$0xff] %v186_v18  ;;  %v194_v22 = vld [vmem:[%s2682_s26 + $0x130] sm:$0xff]  ;;  %v196_v23 = vld [vmem:[%s2682_s26 + $0x138] sm:$0xff] }
  0x1d   : > { %189 = vst [vmem:[%s2690_s27 + $0x98] sm:$0xff] %v188_v19  ;;  %191 = vst [vmem:[%s2690_s27 + $0xa0] sm:$0xff] %v190_v20  ;;  %v198_v24 = vld [vmem:[%s2682_s26 + $0x180] sm:$0xff]  ;;  %v200_v25 = vld [vmem:[%s2682_s26 + $0x188] sm:$0xff] }
  0x1e   : > { %193 = vst [vmem:[%s2690_s27 + $0xa8] sm:$0xff] %v192_v21  ;;  %195 = vst [vmem:[%s2690_s27 + $0xb0] sm:$0xff] %v194_v22  ;;  %v202_v26 = vld [vmem:[%s2682_s26 + $0x190] sm:$0xff]  ;;  %v204_v27 = vld [vmem:[%s2682_s26 + $0x198] sm:$0xff] }
  0x1f   : > { %197 = vst [vmem:[%s2690_s27 + $0xb8] sm:$0xff] %v196_v23  ;;  %199 = vst [vmem:[%s2690_s27 + $0xc0] sm:$0xff] %v198_v24  ;;  %v206_v28 = vld [vmem:[%s2682_s26 + $0x1a0] sm:$0xff]  ;;  %v208_v29 = vld [vmem:[%s2682_s26 + $0x1a8] sm:$0xff] }
  0x20   : > { %201 = vst [vmem:[%s2690_s27 + $0xc8] sm:$0xff] %v200_v25  ;;  %203 = vst [vmem:[%s2690_s27 + $0xd0] sm:$0xff] %v202_v26  ;;  %v210_v30 = vld [vmem:[%s2682_s26 + $0x1b0] sm:$0xff]  ;;  %v212_v31 = vld [vmem:[%s2682_s26 + $0x1b8] sm:$0xff] }
  0x21   : > { %205 = vst [vmem:[%s2690_s27 + $0xd8] sm:$0xff] %v204_v27  ;;  %207 = vst [vmem:[%s2690_s27 + $0xe0] sm:$0xff] %v206_v28  ;;  %v214_v32 = vld [vmem:[%s2682_s26 + $0x200] sm:$0xff]  ;;  %v216_v33 = vld [vmem:[%s2682_s26 + $0x208] sm:$0xff] }
  0x22   : > { %209 = vst [vmem:[%s2690_s27 + $0xe8] sm:$0xff] %v208_v29  ;;  %211 = vst [vmem:[%s2690_s27 + $0xf0] sm:$0xff] %v210_v30  ;;  %v218_v34 = vld [vmem:[%s2682_s26 + $0x210] sm:$0xff]  ;;  %v220_v35 = vld [vmem:[%s2682_s26 + $0x218] sm:$0xff] }
  0x23   : > { %213 = vst [vmem:[%s2690_s27 + $0xf8] sm:$0xff] %v212_v31  ;;  %215 = vst [vmem:[%s2690_s27 + $0x100] sm:$0xff] %v214_v32  ;;  %v222_v36 = vld [vmem:[%s2682_s26 + $0x220] sm:$0xff]  ;;  %v224_v37 = vld [vmem:[%s2682_s26 + $0x228] sm:$0xff] }
  0x24   : > { %217 = vst [vmem:[%s2690_s27 + $0x108] sm:$0xff] %v216_v33  ;;  %219 = vst [vmem:[%s2690_s27 + $0x110] sm:$0xff] %v218_v34  ;;  %v226_v38 = vld [vmem:[%s2682_s26 + $0x230] sm:$0xff]  ;;  %v228_v39 = vld [vmem:[%s2682_s26 + $0x238] sm:$0xff] }
  0x25   : > { %221 = vst [vmem:[%s2690_s27 + $0x118] sm:$0xff] %v220_v35  ;;  %223 = vst [vmem:[%s2690_s27 + $0x120] sm:$0xff] %v222_v36  ;;  %v230_v40 = vld [vmem:[%s2682_s26 + $0x280] sm:$0xff]  ;;  %v232_v41 = vld [vmem:[%s2682_s26 + $0x288] sm:$0xff] }
  0x26   : > { %225 = vst [vmem:[%s2690_s27 + $0x128] sm:$0xff] %v224_v37  ;;  %227 = vst [vmem:[%s2690_s27 + $0x130] sm:$0xff] %v226_v38  ;;  %v234_v42 = vld [vmem:[%s2682_s26 + $0x290] sm:$0xff]  ;;  %v236_v43 = vld [vmem:[%s2682_s26 + $0x298] sm:$0xff] }
  0x27   : > { %229 = vst [vmem:[%s2690_s27 + $0x138] sm:$0xff] %v228_v39  ;;  %231 = vst [vmem:[%s2690_s27 + $0x140] sm:$0xff] %v230_v40  ;;  %v238_v44 = vld [vmem:[%s2682_s26 + $0x2a0] sm:$0xff]  ;;  %v240_v45 = vld [vmem:[%s2682_s26 + $0x2a8] sm:$0xff] }
  0x28   : > { %233 = vst [vmem:[%s2690_s27 + $0x148] sm:$0xff] %v232_v41  ;;  %235 = vst [vmem:[%s2690_s27 + $0x150] sm:$0xff] %v234_v42  ;;  %v242_v46 = vld [vmem:[%s2682_s26 + $0x2b0] sm:$0xff]  ;;  %v244_v47 = vld [vmem:[%s2682_s26 + $0x2b8] sm:$0xff] }
  0x29   : > { %237 = vst [vmem:[%s2690_s27 + $0x158] sm:$0xff] %v236_v43  ;;  %239 = vst [vmem:[%s2690_s27 + $0x160] sm:$0xff] %v238_v44  ;;  %v246_v48 = vld [vmem:[%s2682_s26 + $0x300] sm:$0xff]  ;;  %v248_v49 = vld [vmem:[%s2682_s26 + $0x308] sm:$0xff] }
  0x2a   : > { %241 = vst [vmem:[%s2690_s27 + $0x168] sm:$0xff] %v240_v45  ;;  %243 = vst [vmem:[%s2690_s27 + $0x170] sm:$0xff] %v242_v46  ;;  %v250_v50 = vld [vmem:[%s2682_s26 + $0x310] sm:$0xff]  ;;  %v252_v51 = vld [vmem:[%s2682_s26 + $0x318] sm:$0xff] }
  0x2b   : > { %245 = vst [vmem:[%s2690_s27 + $0x178] sm:$0xff] %v244_v47  ;;  %247 = vst [vmem:[%s2690_s27 + $0x180] sm:$0xff] %v246_v48  ;;  %v254_v52 = vld [vmem:[%s2682_s26 + $0x320] sm:$0xff]  ;;  %v256_v53 = vld [vmem:[%s2682_s26 + $0x328] sm:$0xff] }
  0x2c   : > { %249 = vst [vmem:[%s2690_s27 + $0x188] sm:$0xff] %v248_v49  ;;  %251 = vst [vmem:[%s2690_s27 + $0x190] sm:$0xff] %v250_v50  ;;  %v258_v54 = vld [vmem:[%s2682_s26 + $0x330] sm:$0xff]  ;;  %v260_v55 = vld [vmem:[%s2682_s26 + $0x338] sm:$0xff] }
  0x2d   : > { %253 = vst [vmem:[%s2690_s27 + $0x198] sm:$0xff] %v252_v51  ;;  %255 = vst [vmem:[%s2690_s27 + $0x1a0] sm:$0xff] %v254_v52  ;;  %v262_v56 = vld [vmem:[%s2682_s26 + $0x380] sm:$0xff]  ;;  %v264_v57 = vld [vmem:[%s2682_s26 + $0x388] sm:$0xff] }
  0x2e   : > { %257 = vst [vmem:[%s2690_s27 + $0x1a8] sm:$0xff] %v256_v53  ;;  %259 = vst [vmem:[%s2690_s27 + $0x1b0] sm:$0xff] %v258_v54  ;;  %v266_v58 = vld [vmem:[%s2682_s26 + $0x390] sm:$0xff]  ;;  %v268_v59 = vld [vmem:[%s2682_s26 + $0x398] sm:$0xff] }
  0x2f   : > { %261 = vst [vmem:[%s2690_s27 + $0x1b8] sm:$0xff] %v260_v55  ;;  %263 = vst [vmem:[%s2690_s27 + $0x1c0] sm:$0xff] %v262_v56  ;;  %v270_v60 = vld [vmem:[%s2682_s26 + $0x3a0] sm:$0xff]  ;;  %v272_v61 = vld [vmem:[%s2682_s26 + $0x3a8] sm:$0xff] }
  0x30   : > { %265 = vst [vmem:[%s2690_s27 + $0x1c8] sm:$0xff] %v264_v57  ;;  %267 = vst [vmem:[%s2690_s27 + $0x1d0] sm:$0xff] %v266_v58  ;;  %v274_v62 = vld [vmem:[%s2682_s26 + $0x3b0] sm:$0xff]  ;;  %v276_v63 = vld [vmem:[%s2682_s26 + $0x3b8] sm:$0xff] }
  0x31   : > { %269 = vst [vmem:[%s2690_s27 + $0x1d8] sm:$0xff] %v268_v59  ;;  %271 = vst [vmem:[%s2690_s27 + $0x1e0] sm:$0xff] %v270_v60  ;;  %v278_v0 = vld [vmem:[%s2682_s26 + $0x400] sm:$0xff]  ;;  %v280_v1 = vld [vmem:[%s2682_s26 + $0x408] sm:$0xff] }
  0x32   : > { %273 = vst [vmem:[%s2690_s27 + $0x1e8] sm:$0xff] %v272_v61  ;;  %275 = vst [vmem:[%s2690_s27 + $0x1f0] sm:$0xff] %v274_v62  ;;  %v282_v2 = vld [vmem:[%s2682_s26 + $0x410] sm:$0xff]  ;;  %v284_v3 = vld [vmem:[%s2682_s26 + $0x418] sm:$0xff] }
  0x33   : > { %277 = vst [vmem:[%s2690_s27 + $0x1f8] sm:$0xff] %v276_v63  ;;  %279 = vst [vmem:[%s2690_s27 + $0x200] sm:$0xff] %v278_v0  ;;  %v286_v4 = vld [vmem:[%s2682_s26 + $0x420] sm:$0xff]  ;;  %v288_v5 = vld [vmem:[%s2682_s26 + $0x428] sm:$0xff] }
  0x34   : > { %281 = vst [vmem:[%s2690_s27 + $0x208] sm:$0xff] %v280_v1  ;;  %283 = vst [vmem:[%s2690_s27 + $0x210] sm:$0xff] %v282_v2  ;;  %v290_v6 = vld [vmem:[%s2682_s26 + $0x430] sm:$0xff]  ;;  %v292_v7 = vld [vmem:[%s2682_s26 + $0x438] sm:$0xff] }
  0x35   : > { %285 = vst [vmem:[%s2690_s27 + $0x218] sm:$0xff] %v284_v3  ;;  %287 = vst [vmem:[%s2690_s27 + $0x220] sm:$0xff] %v286_v4  ;;  %v294_v8 = vld [vmem:[%s2682_s26 + $0x480] sm:$0xff]  ;;  %v296_v9 = vld [vmem:[%s2682_s26 + $0x488] sm:$0xff] }
  0x36   : > { %289 = vst [vmem:[%s2690_s27 + $0x228] sm:$0xff] %v288_v5  ;;  %291 = vst [vmem:[%s2690_s27 + $0x230] sm:$0xff] %v290_v6  ;;  %v298_v10 = vld [vmem:[%s2682_s26 + $0x490] sm:$0xff]  ;;  %v300_v11 = vld [vmem:[%s2682_s26 + $0x498] sm:$0xff] }
  0x37   : > { %293 = vst [vmem:[%s2690_s27 + $0x238] sm:$0xff] %v292_v7  ;;  %295 = vst [vmem:[%s2690_s27 + $0x240] sm:$0xff] %v294_v8  ;;  %v302_v12 = vld [vmem:[%s2682_s26 + $0x4a0] sm:$0xff]  ;;  %v304_v13 = vld [vmem:[%s2682_s26 + $0x4a8] sm:$0xff] }
  0x38   : > { %297 = vst [vmem:[%s2690_s27 + $0x248] sm:$0xff] %v296_v9  ;;  %299 = vst [vmem:[%s2690_s27 + $0x250] sm:$0xff] %v298_v10  ;;  %v306_v14 = vld [vmem:[%s2682_s26 + $0x4b0] sm:$0xff]  ;;  %v308_v15 = vld [vmem:[%s2682_s26 + $0x4b8] sm:$0xff] }
  0x39   : > { %301 = vst [vmem:[%s2690_s27 + $0x258] sm:$0xff] %v300_v11  ;;  %303 = vst [vmem:[%s2690_s27 + $0x260] sm:$0xff] %v302_v12  ;;  %v310_v16 = vld [vmem:[%s2682_s26 + $0x500] sm:$0xff]  ;;  %v312_v17 = vld [vmem:[%s2682_s26 + $0x508] sm:$0xff] }
  0x3a   : > { %305 = vst [vmem:[%s2690_s27 + $0x268] sm:$0xff] %v304_v13  ;;  %307 = vst [vmem:[%s2690_s27 + $0x270] sm:$0xff] %v306_v14  ;;  %v314_v18 = vld [vmem:[%s2682_s26 + $0x510] sm:$0xff]  ;;  %v316_v19 = vld [vmem:[%s2682_s26 + $0x518] sm:$0xff] }
  0x3b   : > { %309 = vst [vmem:[%s2690_s27 + $0x278] sm:$0xff] %v308_v15  ;;  %311 = vst [vmem:[%s2690_s27 + $0x280] sm:$0xff] %v310_v16  ;;  %v318_v20 = vld [vmem:[%s2682_s26 + $0x520] sm:$0xff]  ;;  %v320_v21 = vld [vmem:[%s2682_s26 + $0x528] sm:$0xff] }
  0x3c   : > { %313 = vst [vmem:[%s2690_s27 + $0x288] sm:$0xff] %v312_v17  ;;  %315 = vst [vmem:[%s2690_s27 + $0x290] sm:$0xff] %v314_v18  ;;  %v322_v22 = vld [vmem:[%s2682_s26 + $0x530] sm:$0xff]  ;;  %v324_v23 = vld [vmem:[%s2682_s26 + $0x538] sm:$0xff] }
  0x3d   : > { %317 = vst [vmem:[%s2690_s27 + $0x298] sm:$0xff] %v316_v19  ;;  %319 = vst [vmem:[%s2690_s27 + $0x2a0] sm:$0xff] %v318_v20  ;;  %v326_v24 = vld [vmem:[%s2682_s26 + $0x580] sm:$0xff]  ;;  %v328_v25 = vld [vmem:[%s2682_s26 + $0x588] sm:$0xff] }
  0x3e   : > { %321 = vst [vmem:[%s2690_s27 + $0x2a8] sm:$0xff] %v320_v21  ;;  %323 = vst [vmem:[%s2690_s27 + $0x2b0] sm:$0xff] %v322_v22  ;;  %v330_v26 = vld [vmem:[%s2682_s26 + $0x590] sm:$0xff]  ;;  %v332_v27 = vld [vmem:[%s2682_s26 + $0x598] sm:$0xff] }
  0x3f   : > { %325 = vst [vmem:[%s2690_s27 + $0x2b8] sm:$0xff] %v324_v23  ;;  %327 = vst [vmem:[%s2690_s27 + $0x2c0] sm:$0xff] %v326_v24  ;;  %v334_v28 = vld [vmem:[%s2682_s26 + $0x5a0] sm:$0xff]  ;;  %v336_v29 = vld [vmem:[%s2682_s26 + $0x5a8] sm:$0xff] }
  0x40   : > { %329 = vst [vmem:[%s2690_s27 + $0x2c8] sm:$0xff] %v328_v25  ;;  %331 = vst [vmem:[%s2690_s27 + $0x2d0] sm:$0xff] %v330_v26  ;;  %v338_v30 = vld [vmem:[%s2682_s26 + $0x5b0] sm:$0xff]  ;;  %v340_v31 = vld [vmem:[%s2682_s26 + $0x5b8] sm:$0xff] }
  0x41   : > { %333 = vst [vmem:[%s2690_s27 + $0x2d8] sm:$0xff] %v332_v27  ;;  %335 = vst [vmem:[%s2690_s27 + $0x2e0] sm:$0xff] %v334_v28  ;;  %v342_v32 = vld [vmem:[%s2682_s26 + $0x600] sm:$0xff]  ;;  %v344_v33 = vld [vmem:[%s2682_s26 + $0x608] sm:$0xff] }
  0x42   : > { %337 = vst [vmem:[%s2690_s27 + $0x2e8] sm:$0xff] %v336_v29  ;;  %339 = vst [vmem:[%s2690_s27 + $0x2f0] sm:$0xff] %v338_v30  ;;  %v346_v34 = vld [vmem:[%s2682_s26 + $0x610] sm:$0xff]  ;;  %v348_v35 = vld [vmem:[%s2682_s26 + $0x618] sm:$0xff] }
  0x43   : > { %341 = vst [vmem:[%s2690_s27 + $0x2f8] sm:$0xff] %v340_v31  ;;  %343 = vst [vmem:[%s2690_s27 + $0x300] sm:$0xff] %v342_v32  ;;  %v350_v36 = vld [vmem:[%s2682_s26 + $0x620] sm:$0xff]  ;;  %v352_v37 = vld [vmem:[%s2682_s26 + $0x628] sm:$0xff] }
  0x44   : > { %345 = vst [vmem:[%s2690_s27 + $0x308] sm:$0xff] %v344_v33  ;;  %347 = vst [vmem:[%s2690_s27 + $0x310] sm:$0xff] %v346_v34  ;;  %v354_v38 = vld [vmem:[%s2682_s26 + $0x630] sm:$0xff]  ;;  %v356_v39 = vld [vmem:[%s2682_s26 + $0x638] sm:$0xff] }
  0x45   : > { %349 = vst [vmem:[%s2690_s27 + $0x318] sm:$0xff] %v348_v35  ;;  %351 = vst [vmem:[%s2690_s27 + $0x320] sm:$0xff] %v350_v36  ;;  %v358_v40 = vld [vmem:[%s2682_s26 + $0x680] sm:$0xff]  ;;  %v360_v41 = vld [vmem:[%s2682_s26 + $0x688] sm:$0xff] }
  0x46   : > { %353 = vst [vmem:[%s2690_s27 + $0x328] sm:$0xff] %v352_v37  ;;  %355 = vst [vmem:[%s2690_s27 + $0x330] sm:$0xff] %v354_v38  ;;  %v362_v42 = vld [vmem:[%s2682_s26 + $0x690] sm:$0xff]  ;;  %v364_v43 = vld [vmem:[%s2682_s26 + $0x698] sm:$0xff] }
  0x47   : > { %357 = vst [vmem:[%s2690_s27 + $0x338] sm:$0xff] %v356_v39  ;;  %359 = vst [vmem:[%s2690_s27 + $0x340] sm:$0xff] %v358_v40  ;;  %v366_v44 = vld [vmem:[%s2682_s26 + $0x6a0] sm:$0xff]  ;;  %v368_v45 = vld [vmem:[%s2682_s26 + $0x6a8] sm:$0xff] }
  0x48   : > { %361 = vst [vmem:[%s2690_s27 + $0x348] sm:$0xff] %v360_v41  ;;  %363 = vst [vmem:[%s2690_s27 + $0x350] sm:$0xff] %v362_v42  ;;  %v370_v46 = vld [vmem:[%s2682_s26 + $0x6b0] sm:$0xff]  ;;  %v372_v47 = vld [vmem:[%s2682_s26 + $0x6b8] sm:$0xff] }
  0x49   : > { %365 = vst [vmem:[%s2690_s27 + $0x358] sm:$0xff] %v364_v43  ;;  %367 = vst [vmem:[%s2690_s27 + $0x360] sm:$0xff] %v366_v44  ;;  %v374_v48 = vld [vmem:[%s2682_s26 + $0x700] sm:$0xff]  ;;  %v376_v49 = vld [vmem:[%s2682_s26 + $0x708] sm:$0xff] }
  0x4a   : > { %369 = vst [vmem:[%s2690_s27 + $0x368] sm:$0xff] %v368_v45  ;;  %371 = vst [vmem:[%s2690_s27 + $0x370] sm:$0xff] %v370_v46  ;;  %v378_v50 = vld [vmem:[%s2682_s26 + $0x710] sm:$0xff]  ;;  %v380_v51 = vld [vmem:[%s2682_s26 + $0x718] sm:$0xff] }
  0x4b   : > { %373 = vst [vmem:[%s2690_s27 + $0x378] sm:$0xff] %v372_v47  ;;  %375 = vst [vmem:[%s2690_s27 + $0x380] sm:$0xff] %v374_v48  ;;  %v382_v52 = vld [vmem:[%s2682_s26 + $0x720] sm:$0xff]  ;;  %v384_v53 = vld [vmem:[%s2682_s26 + $0x728] sm:$0xff] }
  0x4c   : > { %377 = vst [vmem:[%s2690_s27 + $0x388] sm:$0xff] %v376_v49  ;;  %379 = vst [vmem:[%s2690_s27 + $0x390] sm:$0xff] %v378_v50  ;;  %v386_v54 = vld [vmem:[%s2682_s26 + $0x730] sm:$0xff]  ;;  %v388_v55 = vld [vmem:[%s2682_s26 + $0x738] sm:$0xff] }
  0x4d   : > { %381 = vst [vmem:[%s2690_s27 + $0x398] sm:$0xff] %v380_v51  ;;  %383 = vst [vmem:[%s2690_s27 + $0x3a0] sm:$0xff] %v382_v52  ;;  %v390_v56 = vld [vmem:[%s2682_s26 + $0x780] sm:$0xff]  ;;  %v392_v57 = vld [vmem:[%s2682_s26 + $0x788] sm:$0xff] }
  0x4e   : > { %385 = vst [vmem:[%s2690_s27 + $0x3a8] sm:$0xff] %v384_v53  ;;  %387 = vst [vmem:[%s2690_s27 + $0x3b0] sm:$0xff] %v386_v54  ;;  %v394_v58 = vld [vmem:[%s2682_s26 + $0x790] sm:$0xff]  ;;  %v396_v59 = vld [vmem:[%s2682_s26 + $0x798] sm:$0xff] }
  0x4f   : > { %389 = vst [vmem:[%s2690_s27 + $0x3b8] sm:$0xff] %v388_v55  ;;  %391 = vst [vmem:[%s2690_s27 + $0x3c0] sm:$0xff] %v390_v56  ;;  %v398_v60 = vld [vmem:[%s2682_s26 + $0x7a0] sm:$0xff]  ;;  %v400_v61 = vld [vmem:[%s2682_s26 + $0x7a8] sm:$0xff] }
  0x50   : > { %393 = vst [vmem:[%s2690_s27 + $0x3c8] sm:$0xff] %v392_v57  ;;  %395 = vst [vmem:[%s2690_s27 + $0x3d0] sm:$0xff] %v394_v58  ;;  %v402_v62 = vld [vmem:[%s2682_s26 + $0x7b0] sm:$0xff]  ;;  %v404_v63 = vld [vmem:[%s2682_s26 + $0x7b8] sm:$0xff] }
  0x51   : > { %397 = vst [vmem:[%s2690_s27 + $0x3d8] sm:$0xff] %v396_v59  ;;  %399 = vst [vmem:[%s2690_s27 + $0x3e0] sm:$0xff] %v398_v60  ;;  %v406_v0 = vld [vmem:[%s2682_s26 + $0x800] sm:$0xff]  ;;  %v408_v1 = vld [vmem:[%s2682_s26 + $0x808] sm:$0xff] }
  0x52   : > { %401 = vst [vmem:[%s2690_s27 + $0x3e8] sm:$0xff] %v400_v61  ;;  %403 = vst [vmem:[%s2690_s27 + $0x3f0] sm:$0xff] %v402_v62  ;;  %v410_v2 = vld [vmem:[%s2682_s26 + $0x810] sm:$0xff]  ;;  %v412_v3 = vld [vmem:[%s2682_s26 + $0x818] sm:$0xff] }
  0x53   : > { %405 = vst [vmem:[%s2690_s27 + $0x3f8] sm:$0xff] %v404_v63  ;;  %407 = vst [vmem:[%s2690_s27 + $0x400] sm:$0xff] %v406_v0  ;;  %v414_v4 = vld [vmem:[%s2682_s26 + $0x820] sm:$0xff]  ;;  %v416_v5 = vld [vmem:[%s2682_s26 + $0x828] sm:$0xff] }
  0x54   : > { %409 = vst [vmem:[%s2690_s27 + $0x408] sm:$0xff] %v408_v1  ;;  %411 = vst [vmem:[%s2690_s27 + $0x410] sm:$0xff] %v410_v2  ;;  %v418_v6 = vld [vmem:[%s2682_s26 + $0x830] sm:$0xff]  ;;  %v420_v7 = vld [vmem:[%s2682_s26 + $0x838] sm:$0xff] }
  0x55   : > { %413 = vst [vmem:[%s2690_s27 + $0x418] sm:$0xff] %v412_v3  ;;  %415 = vst [vmem:[%s2690_s27 + $0x420] sm:$0xff] %v414_v4  ;;  %v422_v8 = vld [vmem:[%s2682_s26 + $0x880] sm:$0xff]  ;;  %v424_v9 = vld [vmem:[%s2682_s26 + $0x888] sm:$0xff] }
  0x56   : > { %417 = vst [vmem:[%s2690_s27 + $0x428] sm:$0xff] %v416_v5  ;;  %419 = vst [vmem:[%s2690_s27 + $0x430] sm:$0xff] %v418_v6  ;;  %v426_v10 = vld [vmem:[%s2682_s26 + $0x890] sm:$0xff]  ;;  %v428_v11 = vld [vmem:[%s2682_s26 + $0x898] sm:$0xff] }
  0x57   : > { %421 = vst [vmem:[%s2690_s27 + $0x438] sm:$0xff] %v420_v7  ;;  %423 = vst [vmem:[%s2690_s27 + $0x440] sm:$0xff] %v422_v8  ;;  %v430_v12 = vld [vmem:[%s2682_s26 + $0x8a0] sm:$0xff]  ;;  %v432_v13 = vld [vmem:[%s2682_s26 + $0x8a8] sm:$0xff] }
  0x58   : > { %425 = vst [vmem:[%s2690_s27 + $0x448] sm:$0xff] %v424_v9  ;;  %427 = vst [vmem:[%s2690_s27 + $0x450] sm:$0xff] %v426_v10  ;;  %v434_v14 = vld [vmem:[%s2682_s26 + $0x8b0] sm:$0xff]  ;;  %v436_v15 = vld [vmem:[%s2682_s26 + $0x8b8] sm:$0xff] }
  0x59   : > { %429 = vst [vmem:[%s2690_s27 + $0x458] sm:$0xff] %v428_v11  ;;  %431 = vst [vmem:[%s2690_s27 + $0x460] sm:$0xff] %v430_v12  ;;  %v438_v16 = vld [vmem:[%s2682_s26 + $0x900] sm:$0xff]  ;;  %v440_v17 = vld [vmem:[%s2682_s26 + $0x908] sm:$0xff] }
  0x5a   : > { %433 = vst [vmem:[%s2690_s27 + $0x468] sm:$0xff] %v432_v13  ;;  %435 = vst [vmem:[%s2690_s27 + $0x470] sm:$0xff] %v434_v14  ;;  %v442_v18 = vld [vmem:[%s2682_s26 + $0x910] sm:$0xff]  ;;  %v444_v19 = vld [vmem:[%s2682_s26 + $0x918] sm:$0xff] }
  0x5b   : > { %437 = vst [vmem:[%s2690_s27 + $0x478] sm:$0xff] %v436_v15  ;;  %439 = vst [vmem:[%s2690_s27 + $0x480] sm:$0xff] %v438_v16  ;;  %v446_v20 = vld [vmem:[%s2682_s26 + $0x920] sm:$0xff]  ;;  %v448_v21 = vld [vmem:[%s2682_s26 + $0x928] sm:$0xff] }
  0x5c   : > { %441 = vst [vmem:[%s2690_s27 + $0x488] sm:$0xff] %v440_v17  ;;  %443 = vst [vmem:[%s2690_s27 + $0x490] sm:$0xff] %v442_v18  ;;  %v450_v22 = vld [vmem:[%s2682_s26 + $0x930] sm:$0xff]  ;;  %v452_v23 = vld [vmem:[%s2682_s26 + $0x938] sm:$0xff] }
  0x5d   : > { %445 = vst [vmem:[%s2690_s27 + $0x498] sm:$0xff] %v444_v19  ;;  %447 = vst [vmem:[%s2690_s27 + $0x4a0] sm:$0xff] %v446_v20  ;;  %v454_v24 = vld [vmem:[%s2682_s26 + $0x980] sm:$0xff]  ;;  %v456_v25 = vld [vmem:[%s2682_s26 + $0x988] sm:$0xff] }
  0x5e   : > { %449 = vst [vmem:[%s2690_s27 + $0x4a8] sm:$0xff] %v448_v21  ;;  %451 = vst [vmem:[%s2690_s27 + $0x4b0] sm:$0xff] %v450_v22  ;;  %v458_v26 = vld [vmem:[%s2682_s26 + $0x990] sm:$0xff]  ;;  %v460_v27 = vld [vmem:[%s2682_s26 + $0x998] sm:$0xff] }
  0x5f   : > { %453 = vst [vmem:[%s2690_s27 + $0x4b8] sm:$0xff] %v452_v23  ;;  %455 = vst [vmem:[%s2690_s27 + $0x4c0] sm:$0xff] %v454_v24  ;;  %v462_v28 = vld [vmem:[%s2682_s26 + $0x9a0] sm:$0xff]  ;;  %v464_v29 = vld [vmem:[%s2682_s26 + $0x9a8] sm:$0xff] }
  0x60   : > { %457 = vst [vmem:[%s2690_s27 + $0x4c8] sm:$0xff] %v456_v25  ;;  %459 = vst [vmem:[%s2690_s27 + $0x4d0] sm:$0xff] %v458_v26  ;;  %v466_v30 = vld [vmem:[%s2682_s26 + $0x9b0] sm:$0xff]  ;;  %v468_v31 = vld [vmem:[%s2682_s26 + $0x9b8] sm:$0xff] }
  0x61   : > { %461 = vst [vmem:[%s2690_s27 + $0x4d8] sm:$0xff] %v460_v27  ;;  %463 = vst [vmem:[%s2690_s27 + $0x4e0] sm:$0xff] %v462_v28  ;;  %v470_v32 = vld [vmem:[%s2682_s26 + $0xa00] sm:$0xff]  ;;  %v472_v33 = vld [vmem:[%s2682_s26 + $0xa08] sm:$0xff] }
  0x62   : > { %465 = vst [vmem:[%s2690_s27 + $0x4e8] sm:$0xff] %v464_v29  ;;  %467 = vst [vmem:[%s2690_s27 + $0x4f0] sm:$0xff] %v466_v30  ;;  %v474_v34 = vld [vmem:[%s2682_s26 + $0xa10] sm:$0xff]  ;;  %v476_v35 = vld [vmem:[%s2682_s26 + $0xa18] sm:$0xff] }
  0x63   : > { %469 = vst [vmem:[%s2690_s27 + $0x4f8] sm:$0xff] %v468_v31  ;;  %471 = vst [vmem:[%s2690_s27 + $0x500] sm:$0xff] %v470_v32  ;;  %v478_v36 = vld [vmem:[%s2682_s26 + $0xa20] sm:$0xff]  ;;  %v480_v37 = vld [vmem:[%s2682_s26 + $0xa28] sm:$0xff] }
  0x64   : > { %473 = vst [vmem:[%s2690_s27 + $0x508] sm:$0xff] %v472_v33  ;;  %475 = vst [vmem:[%s2690_s27 + $0x510] sm:$0xff] %v474_v34  ;;  %v482_v38 = vld [vmem:[%s2682_s26 + $0xa30] sm:$0xff]  ;;  %v484_v39 = vld [vmem:[%s2682_s26 + $0xa38] sm:$0xff] }
  0x65   : > { %477 = vst [vmem:[%s2690_s27 + $0x518] sm:$0xff] %v476_v35  ;;  %479 = vst [vmem:[%s2690_s27 + $0x520] sm:$0xff] %v478_v36  ;;  %v486_v40 = vld [vmem:[%s2682_s26 + $0xa80] sm:$0xff]  ;;  %v488_v41 = vld [vmem:[%s2682_s26 + $0xa88] sm:$0xff] }
  0x66   : > { %481 = vst [vmem:[%s2690_s27 + $0x528] sm:$0xff] %v480_v37  ;;  %483 = vst [vmem:[%s2690_s27 + $0x530] sm:$0xff] %v482_v38  ;;  %v490_v42 = vld [vmem:[%s2682_s26 + $0xa90] sm:$0xff]  ;;  %v492_v43 = vld [vmem:[%s2682_s26 + $0xa98] sm:$0xff] }
  0x67   : > { %485 = vst [vmem:[%s2690_s27 + $0x538] sm:$0xff] %v484_v39  ;;  %487 = vst [vmem:[%s2690_s27 + $0x540] sm:$0xff] %v486_v40  ;;  %v494_v44 = vld [vmem:[%s2682_s26 + $0xaa0] sm:$0xff]  ;;  %v496_v45 = vld [vmem:[%s2682_s26 + $0xaa8] sm:$0xff] }
  0x68   : > { %489 = vst [vmem:[%s2690_s27 + $0x548] sm:$0xff] %v488_v41  ;;  %491 = vst [vmem:[%s2690_s27 + $0x550] sm:$0xff] %v490_v42  ;;  %v498_v46 = vld [vmem:[%s2682_s26 + $0xab0] sm:$0xff]  ;;  %v500_v47 = vld [vmem:[%s2682_s26 + $0xab8] sm:$0xff] }
  0x69   : > { %493 = vst [vmem:[%s2690_s27 + $0x558] sm:$0xff] %v492_v43  ;;  %495 = vst [vmem:[%s2690_s27 + $0x560] sm:$0xff] %v494_v44  ;;  %v502_v48 = vld [vmem:[%s2682_s26 + $0xb00] sm:$0xff]  ;;  %v504_v49 = vld [vmem:[%s2682_s26 + $0xb08] sm:$0xff] }
  0x6a   : > { %497 = vst [vmem:[%s2690_s27 + $0x568] sm:$0xff] %v496_v45  ;;  %499 = vst [vmem:[%s2690_s27 + $0x570] sm:$0xff] %v498_v46  ;;  %v506_v50 = vld [vmem:[%s2682_s26 + $0xb10] sm:$0xff]  ;;  %v508_v51 = vld [vmem:[%s2682_s26 + $0xb18] sm:$0xff] }
  0x6b   : > { %501 = vst [vmem:[%s2690_s27 + $0x578] sm:$0xff] %v500_v47  ;;  %503 = vst [vmem:[%s2690_s27 + $0x580] sm:$0xff] %v502_v48  ;;  %v510_v52 = vld [vmem:[%s2682_s26 + $0xb20] sm:$0xff]  ;;  %v512_v53 = vld [vmem:[%s2682_s26 + $0xb28] sm:$0xff] }
  0x6c   : > { %505 = vst [vmem:[%s2690_s27 + $0x588] sm:$0xff] %v504_v49  ;;  %507 = vst [vmem:[%s2690_s27 + $0x590] sm:$0xff] %v506_v50  ;;  %v514_v54 = vld [vmem:[%s2682_s26 + $0xb30] sm:$0xff]  ;;  %v516_v55 = vld [vmem:[%s2682_s26 + $0xb38] sm:$0xff] }
  0x6d   : > { %509 = vst [vmem:[%s2690_s27 + $0x598] sm:$0xff] %v508_v51  ;;  %511 = vst [vmem:[%s2690_s27 + $0x5a0] sm:$0xff] %v510_v52  ;;  %v518_v56 = vld [vmem:[%s2682_s26 + $0xb80] sm:$0xff]  ;;  %v520_v57 = vld [vmem:[%s2682_s26 + $0xb88] sm:$0xff] }
  0x6e   : > { %513 = vst [vmem:[%s2690_s27 + $0x5a8] sm:$0xff] %v512_v53  ;;  %515 = vst [vmem:[%s2690_s27 + $0x5b0] sm:$0xff] %v514_v54  ;;  %v522_v58 = vld [vmem:[%s2682_s26 + $0xb90] sm:$0xff]  ;;  %v524_v59 = vld [vmem:[%s2682_s26 + $0xb98] sm:$0xff] }
  0x6f   : > { %517 = vst [vmem:[%s2690_s27 + $0x5b8] sm:$0xff] %v516_v55  ;;  %519 = vst [vmem:[%s2690_s27 + $0x5c0] sm:$0xff] %v518_v56  ;;  %v526_v60 = vld [vmem:[%s2682_s26 + $0xba0] sm:$0xff]  ;;  %v528_v61 = vld [vmem:[%s2682_s26 + $0xba8] sm:$0xff] }
  0x70   : > { %521 = vst [vmem:[%s2690_s27 + $0x5c8] sm:$0xff] %v520_v57  ;;  %523 = vst [vmem:[%s2690_s27 + $0x5d0] sm:$0xff] %v522_v58  ;;  %v530_v62 = vld [vmem:[%s2682_s26 + $0xbb0] sm:$0xff]  ;;  %v532_v63 = vld [vmem:[%s2682_s26 + $0xbb8] sm:$0xff] }
  0x71   : > { %525 = vst [vmem:[%s2690_s27 + $0x5d8] sm:$0xff] %v524_v59  ;;  %527 = vst [vmem:[%s2690_s27 + $0x5e0] sm:$0xff] %v526_v60  ;;  %v534_v0 = vld [vmem:[%s2682_s26 + $0xc00] sm:$0xff]  ;;  %v536_v1 = vld [vmem:[%s2682_s26 + $0xc08] sm:$0xff] }
  0x72   : > { %529 = vst [vmem:[%s2690_s27 + $0x5e8] sm:$0xff] %v528_v61  ;;  %531 = vst [vmem:[%s2690_s27 + $0x5f0] sm:$0xff] %v530_v62  ;;  %v538_v2 = vld [vmem:[%s2682_s26 + $0xc10] sm:$0xff]  ;;  %v540_v3 = vld [vmem:[%s2682_s26 + $0xc18] sm:$0xff] }
  0x73   : > { %533 = vst [vmem:[%s2690_s27 + $0x5f8] sm:$0xff] %v532_v63  ;;  %535 = vst [vmem:[%s2690_s27 + $0x600] sm:$0xff] %v534_v0  ;;  %v542_v4 = vld [vmem:[%s2682_s26 + $0xc20] sm:$0xff]  ;;  %v544_v5 = vld [vmem:[%s2682_s26 + $0xc28] sm:$0xff] }
  0x74   : > { %537 = vst [vmem:[%s2690_s27 + $0x608] sm:$0xff] %v536_v1  ;;  %539 = vst [vmem:[%s2690_s27 + $0x610] sm:$0xff] %v538_v2  ;;  %v546_v6 = vld [vmem:[%s2682_s26 + $0xc30] sm:$0xff]  ;;  %v548_v7 = vld [vmem:[%s2682_s26 + $0xc38] sm:$0xff] }
  0x75   : > { %541 = vst [vmem:[%s2690_s27 + $0x618] sm:$0xff] %v540_v3  ;;  %543 = vst [vmem:[%s2690_s27 + $0x620] sm:$0xff] %v542_v4  ;;  %v550_v8 = vld [vmem:[%s2682_s26 + $0xc80] sm:$0xff]  ;;  %v552_v9 = vld [vmem:[%s2682_s26 + $0xc88] sm:$0xff] }
  0x76   : > { %545 = vst [vmem:[%s2690_s27 + $0x628] sm:$0xff] %v544_v5  ;;  %547 = vst [vmem:[%s2690_s27 + $0x630] sm:$0xff] %v546_v6  ;;  %v554_v10 = vld [vmem:[%s2682_s26 + $0xc90] sm:$0xff]  ;;  %v556_v11 = vld [vmem:[%s2682_s26 + $0xc98] sm:$0xff] }
  0x77   : > { %549 = vst [vmem:[%s2690_s27 + $0x638] sm:$0xff] %v548_v7  ;;  %551 = vst [vmem:[%s2690_s27 + $0x640] sm:$0xff] %v550_v8  ;;  %v558_v12 = vld [vmem:[%s2682_s26 + $0xca0] sm:$0xff]  ;;  %v560_v13 = vld [vmem:[%s2682_s26 + $0xca8] sm:$0xff] }
  0x78   : > { %553 = vst [vmem:[%s2690_s27 + $0x648] sm:$0xff] %v552_v9  ;;  %555 = vst [vmem:[%s2690_s27 + $0x650] sm:$0xff] %v554_v10  ;;  %v562_v14 = vld [vmem:[%s2682_s26 + $0xcb0] sm:$0xff]  ;;  %v564_v15 = vld [vmem:[%s2682_s26 + $0xcb8] sm:$0xff] }
  0x79   : > { %557 = vst [vmem:[%s2690_s27 + $0x658] sm:$0xff] %v556_v11  ;;  %559 = vst [vmem:[%s2690_s27 + $0x660] sm:$0xff] %v558_v12  ;;  %v566_v16 = vld [vmem:[%s2682_s26 + $0xd00] sm:$0xff]  ;;  %v568_v17 = vld [vmem:[%s2682_s26 + $0xd08] sm:$0xff] }
  0x7a   : > { %561 = vst [vmem:[%s2690_s27 + $0x668] sm:$0xff] %v560_v13  ;;  %563 = vst [vmem:[%s2690_s27 + $0x670] sm:$0xff] %v562_v14  ;;  %v570_v18 = vld [vmem:[%s2682_s26 + $0xd10] sm:$0xff]  ;;  %v572_v19 = vld [vmem:[%s2682_s26 + $0xd18] sm:$0xff] }
  0x7b   : > { %565 = vst [vmem:[%s2690_s27 + $0x678] sm:$0xff] %v564_v15  ;;  %567 = vst [vmem:[%s2690_s27 + $0x680] sm:$0xff] %v566_v16  ;;  %v574_v20 = vld [vmem:[%s2682_s26 + $0xd20] sm:$0xff]  ;;  %v576_v21 = vld [vmem:[%s2682_s26 + $0xd28] sm:$0xff] }
  0x7c   : > { %569 = vst [vmem:[%s2690_s27 + $0x688] sm:$0xff] %v568_v17  ;;  %571 = vst [vmem:[%s2690_s27 + $0x690] sm:$0xff] %v570_v18  ;;  %v578_v22 = vld [vmem:[%s2682_s26 + $0xd30] sm:$0xff]  ;;  %v580_v23 = vld [vmem:[%s2682_s26 + $0xd38] sm:$0xff] }
  0x7d   : > { %573 = vst [vmem:[%s2690_s27 + $0x698] sm:$0xff] %v572_v19  ;;  %575 = vst [vmem:[%s2690_s27 + $0x6a0] sm:$0xff] %v574_v20  ;;  %v582_v24 = vld [vmem:[%s2682_s26 + $0xd80] sm:$0xff]  ;;  %v584_v25 = vld [vmem:[%s2682_s26 + $0xd88] sm:$0xff] }
  0x7e   : > { %577 = vst [vmem:[%s2690_s27 + $0x6a8] sm:$0xff] %v576_v21  ;;  %579 = vst [vmem:[%s2690_s27 + $0x6b0] sm:$0xff] %v578_v22  ;;  %v586_v26 = vld [vmem:[%s2682_s26 + $0xd90] sm:$0xff]  ;;  %v588_v27 = vld [vmem:[%s2682_s26 + $0xd98] sm:$0xff] }
  0x7f   : > { %581 = vst [vmem:[%s2690_s27 + $0x6b8] sm:$0xff] %v580_v23  ;;  %583 = vst [vmem:[%s2690_s27 + $0x6c0] sm:$0xff] %v582_v24  ;;  %v590_v28 = vld [vmem:[%s2682_s26 + $0xda0] sm:$0xff]  ;;  %v592_v29 = vld [vmem:[%s2682_s26 + $0xda8] sm:$0xff] }
  0x80   : > { %585 = vst [vmem:[%s2690_s27 + $0x6c8] sm:$0xff] %v584_v25  ;;  %587 = vst [vmem:[%s2690_s27 + $0x6d0] sm:$0xff] %v586_v26  ;;  %v594_v30 = vld [vmem:[%s2682_s26 + $0xdb0] sm:$0xff]  ;;  %v596_v31 = vld [vmem:[%s2682_s26 + $0xdb8] sm:$0xff] }
  0x81   : > { %589 = vst [vmem:[%s2690_s27 + $0x6d8] sm:$0xff] %v588_v27  ;;  %591 = vst [vmem:[%s2690_s27 + $0x6e0] sm:$0xff] %v590_v28  ;;  %v598_v32 = vld [vmem:[%s2682_s26 + $0xe00] sm:$0xff]  ;;  %v600_v33 = vld [vmem:[%s2682_s26 + $0xe08] sm:$0xff] }
  0x82   : > { %593 = vst [vmem:[%s2690_s27 + $0x6e8] sm:$0xff] %v592_v29  ;;  %595 = vst [vmem:[%s2690_s27 + $0x6f0] sm:$0xff] %v594_v30  ;;  %v602_v34 = vld [vmem:[%s2682_s26 + $0xe10] sm:$0xff]  ;;  %v604_v35 = vld [vmem:[%s2682_s26 + $0xe18] sm:$0xff] }
  0x83   : > { %597 = vst [vmem:[%s2690_s27 + $0x6f8] sm:$0xff] %v596_v31  ;;  %599 = vst [vmem:[%s2690_s27 + $0x700] sm:$0xff] %v598_v32  ;;  %v606_v36 = vld [vmem:[%s2682_s26 + $0xe20] sm:$0xff]  ;;  %v608_v37 = vld [vmem:[%s2682_s26 + $0xe28] sm:$0xff] }
  0x84   : > { %601 = vst [vmem:[%s2690_s27 + $0x708] sm:$0xff] %v600_v33  ;;  %603 = vst [vmem:[%s2690_s27 + $0x710] sm:$0xff] %v602_v34  ;;  %v610_v38 = vld [vmem:[%s2682_s26 + $0xe30] sm:$0xff]  ;;  %v612_v39 = vld [vmem:[%s2682_s26 + $0xe38] sm:$0xff] }
  0x85   : > { %605 = vst [vmem:[%s2690_s27 + $0x718] sm:$0xff] %v604_v35  ;;  %607 = vst [vmem:[%s2690_s27 + $0x720] sm:$0xff] %v606_v36  ;;  %v614_v40 = vld [vmem:[%s2682_s26 + $0xe80] sm:$0xff]  ;;  %v616_v41 = vld [vmem:[%s2682_s26 + $0xe88] sm:$0xff] }
  0x86   : > { %609 = vst [vmem:[%s2690_s27 + $0x728] sm:$0xff] %v608_v37  ;;  %611 = vst [vmem:[%s2690_s27 + $0x730] sm:$0xff] %v610_v38  ;;  %v618_v42 = vld [vmem:[%s2682_s26 + $0xe90] sm:$0xff]  ;;  %v620_v43 = vld [vmem:[%s2682_s26 + $0xe98] sm:$0xff] }
  0x87   : > { %613 = vst [vmem:[%s2690_s27 + $0x738] sm:$0xff] %v612_v39  ;;  %615 = vst [vmem:[%s2690_s27 + $0x740] sm:$0xff] %v614_v40  ;;  %v622_v44 = vld [vmem:[%s2682_s26 + $0xea0] sm:$0xff]  ;;  %v624_v45 = vld [vmem:[%s2682_s26 + $0xea8] sm:$0xff] }
  0x88   : > { %617 = vst [vmem:[%s2690_s27 + $0x748] sm:$0xff] %v616_v41  ;;  %619 = vst [vmem:[%s2690_s27 + $0x750] sm:$0xff] %v618_v42  ;;  %v626_v46 = vld [vmem:[%s2682_s26 + $0xeb0] sm:$0xff]  ;;  %v628_v47 = vld [vmem:[%s2682_s26 + $0xeb8] sm:$0xff] }
  0x89   : > { %621 = vst [vmem:[%s2690_s27 + $0x758] sm:$0xff] %v620_v43  ;;  %623 = vst [vmem:[%s2690_s27 + $0x760] sm:$0xff] %v622_v44  ;;  %v630_v48 = vld [vmem:[%s2682_s26 + $0xf00] sm:$0xff]  ;;  %v632_v49 = vld [vmem:[%s2682_s26 + $0xf08] sm:$0xff] }
  0x8a   : > { %625 = vst [vmem:[%s2690_s27 + $0x768] sm:$0xff] %v624_v45  ;;  %627 = vst [vmem:[%s2690_s27 + $0x770] sm:$0xff] %v626_v46  ;;  %v634_v50 = vld [vmem:[%s2682_s26 + $0xf10] sm:$0xff]  ;;  %v636_v51 = vld [vmem:[%s2682_s26 + $0xf18] sm:$0xff] }
  0x8b   : > { %629 = vst [vmem:[%s2690_s27 + $0x778] sm:$0xff] %v628_v47  ;;  %631 = vst [vmem:[%s2690_s27 + $0x780] sm:$0xff] %v630_v48  ;;  %v638_v52 = vld [vmem:[%s2682_s26 + $0xf20] sm:$0xff]  ;;  %v640_v53 = vld [vmem:[%s2682_s26 + $0xf28] sm:$0xff] }
  0x8c   : > { %633 = vst [vmem:[%s2690_s27 + $0x788] sm:$0xff] %v632_v49  ;;  %635 = vst [vmem:[%s2690_s27 + $0x790] sm:$0xff] %v634_v50  ;;  %v642_v54 = vld [vmem:[%s2682_s26 + $0xf30] sm:$0xff]  ;;  %v644_v55 = vld [vmem:[%s2682_s26 + $0xf38] sm:$0xff] }
  0x8d   : > { %637 = vst [vmem:[%s2690_s27 + $0x798] sm:$0xff] %v636_v51  ;;  %639 = vst [vmem:[%s2690_s27 + $0x7a0] sm:$0xff] %v638_v52  ;;  %v646_v56 = vld [vmem:[%s2682_s26 + $0xf80] sm:$0xff]  ;;  %v648_v57 = vld [vmem:[%s2682_s26 + $0xf88] sm:$0xff] }
  0x8e   : > { %641 = vst [vmem:[%s2690_s27 + $0x7a8] sm:$0xff] %v640_v53  ;;  %643 = vst [vmem:[%s2690_s27 + $0x7b0] sm:$0xff] %v642_v54  ;;  %v650_v58 = vld [vmem:[%s2682_s26 + $0xf90] sm:$0xff]  ;;  %v652_v59 = vld [vmem:[%s2682_s26 + $0xf98] sm:$0xff] }
  0x8f   : > { %645 = vst [vmem:[%s2690_s27 + $0x7b8] sm:$0xff] %v644_v55  ;;  %647 = vst [vmem:[%s2690_s27 + $0x7c0] sm:$0xff] %v646_v56  ;;  %v654_v60 = vld [vmem:[%s2682_s26 + $0xfa0] sm:$0xff]  ;;  %v656_v61 = vld [vmem:[%s2682_s26 + $0xfa8] sm:$0xff] }
  0x90   : > { %649 = vst [vmem:[%s2690_s27 + $0x7c8] sm:$0xff] %v648_v57  ;;  %651 = vst [vmem:[%s2690_s27 + $0x7d0] sm:$0xff] %v650_v58  ;;  %v658_v62 = vld [vmem:[%s2682_s26 + $0xfb0] sm:$0xff]  ;;  %v660_v63 = vld [vmem:[%s2682_s26 + $0xfb8] sm:$0xff] }
  0x91   : > { %653 = vst [vmem:[%s2690_s27 + $0x7d8] sm:$0xff] %v652_v59  ;;  %655 = vst [vmem:[%s2690_s27 + $0x7e0] sm:$0xff] %v654_v60  ;;  %v662_v0 = vld [vmem:[%s2682_s26 + $0x1000] sm:$0xff]  ;;  %v664_v1 = vld [vmem:[%s2682_s26 + $0x1008] sm:$0xff] }
  0x92   : > { %657 = vst [vmem:[%s2690_s27 + $0x7e8] sm:$0xff] %v656_v61  ;;  %659 = vst [vmem:[%s2690_s27 + $0x7f0] sm:$0xff] %v658_v62  ;;  %v666_v2 = vld [vmem:[%s2682_s26 + $0x1010] sm:$0xff]  ;;  %v668_v3 = vld [vmem:[%s2682_s26 + $0x1018] sm:$0xff] }
  0x93   : > { %661 = vst [vmem:[%s2690_s27 + $0x7f8] sm:$0xff] %v660_v63  ;;  %663 = vst [vmem:[%s2690_s27 + $0x800] sm:$0xff] %v662_v0  ;;  %v670_v4 = vld [vmem:[%s2682_s26 + $0x1020] sm:$0xff]  ;;  %v672_v5 = vld [vmem:[%s2682_s26 + $0x1028] sm:$0xff] }
  0x94   : > { %665 = vst [vmem:[%s2690_s27 + $0x808] sm:$0xff] %v664_v1  ;;  %667 = vst [vmem:[%s2690_s27 + $0x810] sm:$0xff] %v666_v2  ;;  %v674_v6 = vld [vmem:[%s2682_s26 + $0x1030] sm:$0xff]  ;;  %v676_v7 = vld [vmem:[%s2682_s26 + $0x1038] sm:$0xff] }
  0x95   : > { %669 = vst [vmem:[%s2690_s27 + $0x818] sm:$0xff] %v668_v3  ;;  %671 = vst [vmem:[%s2690_s27 + $0x820] sm:$0xff] %v670_v4  ;;  %v678_v8 = vld [vmem:[%s2682_s26 + $0x1080] sm:$0xff]  ;;  %v680_v9 = vld [vmem:[%s2682_s26 + $0x1088] sm:$0xff] }
  0x96   : > { %673 = vst [vmem:[%s2690_s27 + $0x828] sm:$0xff] %v672_v5  ;;  %675 = vst [vmem:[%s2690_s27 + $0x830] sm:$0xff] %v674_v6  ;;  %v682_v10 = vld [vmem:[%s2682_s26 + $0x1090] sm:$0xff]  ;;  %v684_v11 = vld [vmem:[%s2682_s26 + $0x1098] sm:$0xff] }
  0x97   : > { %677 = vst [vmem:[%s2690_s27 + $0x838] sm:$0xff] %v676_v7  ;;  %679 = vst [vmem:[%s2690_s27 + $0x840] sm:$0xff] %v678_v8  ;;  %v686_v12 = vld [vmem:[%s2682_s26 + $0x10a0] sm:$0xff]  ;;  %v688_v13 = vld [vmem:[%s2682_s26 + $0x10a8] sm:$0xff] }
  0x98   : > { %681 = vst [vmem:[%s2690_s27 + $0x848] sm:$0xff] %v680_v9  ;;  %683 = vst [vmem:[%s2690_s27 + $0x850] sm:$0xff] %v682_v10  ;;  %v690_v14 = vld [vmem:[%s2682_s26 + $0x10b0] sm:$0xff]  ;;  %v692_v15 = vld [vmem:[%s2682_s26 + $0x10b8] sm:$0xff] }
  0x99   : > { %685 = vst [vmem:[%s2690_s27 + $0x858] sm:$0xff] %v684_v11  ;;  %687 = vst [vmem:[%s2690_s27 + $0x860] sm:$0xff] %v686_v12  ;;  %v694_v16 = vld [vmem:[%s2682_s26 + $0x1100] sm:$0xff]  ;;  %v696_v17 = vld [vmem:[%s2682_s26 + $0x1108] sm:$0xff] }
  0x9a   : > { %689 = vst [vmem:[%s2690_s27 + $0x868] sm:$0xff] %v688_v13  ;;  %691 = vst [vmem:[%s2690_s27 + $0x870] sm:$0xff] %v690_v14  ;;  %v698_v18 = vld [vmem:[%s2682_s26 + $0x1110] sm:$0xff]  ;;  %v700_v19 = vld [vmem:[%s2682_s26 + $0x1118] sm:$0xff] }
  0x9b   : > { %693 = vst [vmem:[%s2690_s27 + $0x878] sm:$0xff] %v692_v15  ;;  %695 = vst [vmem:[%s2690_s27 + $0x880] sm:$0xff] %v694_v16  ;;  %v702_v20 = vld [vmem:[%s2682_s26 + $0x1120] sm:$0xff]  ;;  %v704_v21 = vld [vmem:[%s2682_s26 + $0x1128] sm:$0xff] }
  0x9c   : > { %697 = vst [vmem:[%s2690_s27 + $0x888] sm:$0xff] %v696_v17  ;;  %699 = vst [vmem:[%s2690_s27 + $0x890] sm:$0xff] %v698_v18  ;;  %v706_v22 = vld [vmem:[%s2682_s26 + $0x1130] sm:$0xff]  ;;  %v708_v23 = vld [vmem:[%s2682_s26 + $0x1138] sm:$0xff] }
  0x9d   : > { %701 = vst [vmem:[%s2690_s27 + $0x898] sm:$0xff] %v700_v19  ;;  %703 = vst [vmem:[%s2690_s27 + $0x8a0] sm:$0xff] %v702_v20  ;;  %v710_v24 = vld [vmem:[%s2682_s26 + $0x1180] sm:$0xff]  ;;  %v712_v25 = vld [vmem:[%s2682_s26 + $0x1188] sm:$0xff] }
  0x9e   : > { %705 = vst [vmem:[%s2690_s27 + $0x8a8] sm:$0xff] %v704_v21  ;;  %707 = vst [vmem:[%s2690_s27 + $0x8b0] sm:$0xff] %v706_v22  ;;  %v714_v26 = vld [vmem:[%s2682_s26 + $0x1190] sm:$0xff]  ;;  %v716_v27 = vld [vmem:[%s2682_s26 + $0x1198] sm:$0xff] }
  0x9f   : > { %709 = vst [vmem:[%s2690_s27 + $0x8b8] sm:$0xff] %v708_v23  ;;  %711 = vst [vmem:[%s2690_s27 + $0x8c0] sm:$0xff] %v710_v24  ;;  %v718_v28 = vld [vmem:[%s2682_s26 + $0x11a0] sm:$0xff]  ;;  %v720_v29 = vld [vmem:[%s2682_s26 + $0x11a8] sm:$0xff] }
  0xa0   : > { %713 = vst [vmem:[%s2690_s27 + $0x8c8] sm:$0xff] %v712_v25  ;;  %715 = vst [vmem:[%s2690_s27 + $0x8d0] sm:$0xff] %v714_v26  ;;  %v722_v30 = vld [vmem:[%s2682_s26 + $0x11b0] sm:$0xff]  ;;  %v724_v31 = vld [vmem:[%s2682_s26 + $0x11b8] sm:$0xff] }
  0xa1   : > { %717 = vst [vmem:[%s2690_s27 + $0x8d8] sm:$0xff] %v716_v27  ;;  %719 = vst [vmem:[%s2690_s27 + $0x8e0] sm:$0xff] %v718_v28 }
  0xa2   : > { %721 = vst [vmem:[%s2690_s27 + $0x8e8] sm:$0xff] %v720_v29  ;;  %723 = vst [vmem:[%s2690_s27 + $0x8f0] sm:$0xff] %v722_v30 }
  0xa3   : > { %725 = vst [vmem:[%s2690_s27 + $0x8f8] sm:$0xff] %v724_v31 }
  0xa4 PF: > { %p2521_p7 = scmp.ge.s32.totalorder %s2618_s14, 1  ;;  %p730_p8 = scmp.lt.s32.totalorder %s2618_s14, 3 }
  0xa6   : > { %p731_p9 = pnand %p2521_p7, %p730_p8 }
  0xa7   : > { %s737_s28 = sand.u32 (!%p731_p9), 1, %s2610_s12  }
  0xa8   : > { %734 = sbr.rel (%p731_p9) target bundleno = 623 (0x26f), region = 51 }
  0xa9   : > { %s2563_s29 = smul.u32 (!%p731_p9), 2304, %s737_s28 }
  0xab   : > { %s3274_s5 = scalar_lea.vmem (!%p731_p9), [#allocation2], %s2563_s29 }
  0xad   : > { %v2620_v32 = vmov 0.0   ;;  %v3271_v33 = vld [vmem:[%s4196_s0 + $0x8] sm:$0xff]  ;;  %v905_v36 = vld [vmem:[%s3274_s5 + $0x3c0] sm:$0xff]  ;;  %v908_v51 = vld [vmem:[%s3274_s5 + $0x3d8] sm:$0xff]  ;;  %vm1121_vm0 = vcmask 261120   ;;  %s2561_s12 = sshll.u32 (%p2672_p5), %s2515_s15, 6 }
  0xae   : > { %1323 = vmatprep.mubr.f32.mxu1 %v2620_v32  ;;  %1210 = vmatprep.mubr.f32.mxu0 %v3271_v33  ;;  %v906_v34 = vld [vmem:[%s3274_s5 + $0x3c8] sm:$0xff]  ;;  %v1065_v37 = vld [vmem:[%s3274_s5 + $0x8c0] sm:$0xff]  ;;  %v3298_v53 = vld [vmem:[%s4196_s0 + $0x10] sm:$0xff]  ;;  %s4059_s20 = scalar_lea.vmem (%p2672_p5), %s4199_s3, %s2561_s12 }
  0xaf   : > { %v1066_v35 = vld [vmem:[%s3274_s5 + $0x8c8] sm:$0xff]  ;;  %1146 = vmatprep.subr.mxu0 %v906_v34  ;;  %v897_v40 = vld [vmem:[%s3274_s5 + $0x380] sm:$0xff]  ;;  %v907_v54 = vld [vmem:[%s3274_s5 + $0x3d0] sm:$0xff] }
  0xb0   : > { %1283 = vmatprep.subr.mxu1 %v1066_v35  ;;  %v898_v38 = vld [vmem:[%s3274_s5 + $0x388] sm:$0xff]  ;;  %1147 = vmatpush1.msra.mxu0 %v905_v36  ;;  %v1057_v41 = vld [vmem:[%s3274_s5 + $0x880] sm:$0xff]  ;;  %v900_v56 = vld [vmem:[%s3274_s5 + $0x398] sm:$0xff] }
  0xb1   : > { %v1058_v39 = vld [vmem:[%s3274_s5 + $0x888] sm:$0xff]  ;;  %1284 = vmatpush1.msra.mxu1 %v1065_v37  ;;  %1148 = vmatprep.subr.mxu0 %v898_v38  ;;  %v889_v44 = vld [vmem:[%s3274_s5 + $0x340] sm:$0xff]  ;;  %v899_v58 = vld [vmem:[%s3274_s5 + $0x390] sm:$0xff] }
  0xb2   : > { %v890_v42 = vld [vmem:[%s3274_s5 + $0x348] sm:$0xff]  ;;  %1285 = vmatprep.subr.mxu1 %v1058_v39  ;;  %v1049_v45 = vld [vmem:[%s3274_s5 + $0x840] sm:$0xff]  ;;  %1149 = vmatpush1.msra.mxu0 %v897_v40  ;;  %v892_v60 = vld [vmem:[%s3274_s5 + $0x358] sm:$0xff] }
  0xb3   : > { %v1050_v43 = vld [vmem:[%s3274_s5 + $0x848] sm:$0xff]  ;;  %1286 = vmatpush1.msra.mxu1 %v1057_v41  ;;  %1150 = vmatprep.subr.mxu0 %v890_v42  ;;  %v881_v48 = vld [vmem:[%s3274_s5 + $0x300] sm:$0xff]  ;;  %v891_v62 = vld [vmem:[%s3274_s5 + $0x350] sm:$0xff] }
  0xb4   : > { %v882_v46 = vld [vmem:[%s3274_s5 + $0x308] sm:$0xff]  ;;  %1287 = vmatprep.subr.mxu1 %v1050_v43  ;;  %v1041_v49 = vld [vmem:[%s3274_s5 + $0x800] sm:$0xff]  ;;  %1151 = vmatpush1.msra.mxu0 %v889_v44  ;;  %v884_v0 = vld [vmem:[%s3274_s5 + $0x318] sm:$0xff] }
  0xb5   : > { %v1042_v47 = vld [vmem:[%s3274_s5 + $0x808] sm:$0xff]  ;;  %1288 = vmatpush1.msra.mxu1 %v1049_v45  ;;  %1152 = vmatprep.subr.mxu0 %v882_v46  ;;  %v873_v52 = vld [vmem:[%s3274_s5 + $0x2c0] sm:$0xff]  ;;  %v883_v2 = vld [vmem:[%s3274_s5 + $0x310] sm:$0xff] }
  0xb6   : > { %v874_v50 = vld [vmem:[%s3274_s5 + $0x2c8] sm:$0xff]  ;;  %1289 = vmatprep.subr.mxu1 %v1042_v47  ;;  %1153 = vmatpush1.msra.mxu0 %v881_v48  ;;  %v865_v57 = vld [vmem:[%s3274_s5 + $0x280] sm:$0xff]  ;;  %v876_v4 = vld [vmem:[%s3274_s5 + $0x2d8] sm:$0xff] }
  0xb7   : > { %1290 = vmatpush1.msra.mxu1 %v1041_v49  ;;  %v866_v55 = vld [vmem:[%s3274_s5 + $0x288] sm:$0xff]  ;;  %1154 = vmatprep.subr.mxu0 %v874_v50  ;;  %v857_v61 = vld [vmem:[%s3274_s5 + $0x240] sm:$0xff]  ;;  %v875_v6 = vld [vmem:[%s3274_s5 + $0x2d0] sm:$0xff] }
  0xb8   : > { %1372 = vmatprep.subr.mxu1 %v908_v51  ;;  %1155 = vmatpush1.msra.mxu0 %v873_v52  ;;  %v858_v59 = vld [vmem:[%s3274_s5 + $0x248] sm:$0xff]  ;;  %v849_v1 = vld [vmem:[%s3274_s5 + $0x200] sm:$0xff]  ;;  %v868_v8 = vld [vmem:[%s3274_s5 + $0x298] sm:$0xff] }
  0xb9   : > { %2523 = vmatmul.mubr.msk.f32.vlgmr.msra.gmra.mxu1 %vm1121_vm0, %v3298_v53  ;;  %1156 = vmatprep.subr.mxu0 %v866_v55  ;;  %v850_v63 = vld [vmem:[%s3274_s5 + $0x208] sm:$0xff]  ;;  %v841_v5 = vld [vmem:[%s3274_s5 + $0x1c0] sm:$0xff]  ;;  %v867_v10 = vld [vmem:[%s3274_s5 + $0x290] sm:$0xff] }
  0xba   : > { %1373 = vmatpush1.msra.mxu1 %v907_v54  ;;  %1157 = vmatpush1.msra.mxu0 %v865_v57  ;;  %v842_v3 = vld [vmem:[%s3274_s5 + $0x1c8] sm:$0xff]  ;;  %v833_v9 = vld [vmem:[%s3274_s5 + $0x180] sm:$0xff]  ;;  %v860_v12 = vld [vmem:[%s3274_s5 + $0x258] sm:$0xff] }
  0xbb   : > { %1374 = vmatprep.subr.mxu1 %v900_v56  ;;  %1158 = vmatprep.subr.mxu0 %v858_v59  ;;  %v834_v7 = vld [vmem:[%s3274_s5 + $0x188] sm:$0xff]  ;;  %v825_v13 = vld [vmem:[%s3274_s5 + $0x140] sm:$0xff]  ;;  %v859_v14 = vld [vmem:[%s3274_s5 + $0x250] sm:$0xff] }
  0xbc   : > { %1375 = vmatpush1.msra.mxu1 %v899_v58  ;;  %1159 = vmatpush1.msra.mxu0 %v857_v61  ;;  %v826_v11 = vld [vmem:[%s3274_s5 + $0x148] sm:$0xff]  ;;  %v852_v16 = vld [vmem:[%s3274_s5 + $0x218] sm:$0xff]  ;;  %v817_v17 = vld [vmem:[%s3274_s5 + $0x100] sm:$0xff] }
  0xbd   : > { %1376 = vmatprep.subr.mxu1 %v892_v60  ;;  %1160 = vmatprep.subr.mxu0 %v850_v63  ;;  %v818_v15 = vld [vmem:[%s3274_s5 + $0x108] sm:$0xff]  ;;  %v851_v18 = vld [vmem:[%s3274_s5 + $0x210] sm:$0xff]  ;;  %v844_v20 = vld [vmem:[%s3274_s5 + $0x1d8] sm:$0xff] }
  0xbe   : > { %1377 = vmatpush1.msra.mxu1 %v891_v62  ;;  %1161 = vmatpush1.msra.mxu0 %v849_v1  ;;  %v810_v19 = vld [vmem:[%s3274_s5 + $0xc8] sm:$0xff]  ;;  %v809_v21 = vld [vmem:[%s3274_s5 + $0xc0] sm:$0xff]  ;;  %v843_v22 = vld [vmem:[%s3274_s5 + $0x1d0] sm:$0xff] }
  0xbf   : > { %1378 = vmatprep.subr.mxu1 %v884_v0  ;;  %1162 = vmatprep.subr.mxu0 %v842_v3  ;;  %v802_v23 = vld [vmem:[%s3274_s5 + $0x88] sm:$0xff]  ;;  %v836_v24 = vld [vmem:[%s3274_s5 + $0x198] sm:$0xff]  ;;  %v801_v25 = vld [vmem:[%s3274_s5 + $0x80] sm:$0xff] }
  0xc0   : > { %1379 = vmatpush1.msra.mxu1 %v883_v2  ;;  %1163 = vmatpush1.msra.mxu0 %v841_v5  ;;  %v835_v26 = vld [vmem:[%s3274_s5 + $0x190] sm:$0xff]  ;;  %v794_v27 = vld [vmem:[%s3274_s5 + $0x48] sm:$0xff]  ;;  %v828_v28 = vld [vmem:[%s3274_s5 + $0x158] sm:$0xff] }
  0xc1   : > { %1380 = vmatprep.subr.mxu1 %v876_v4  ;;  %1164 = vmatprep.subr.mxu0 %v834_v7  ;;  %v793_v29 = vld [vmem:[%s3274_s5 + $0x40] sm:$0xff]  ;;  %v827_v30 = vld [vmem:[%s3274_s5 + $0x150] sm:$0xff]  ;;  %v786_v31 = vld [vmem:[%s3274_s5 + $0x8] sm:$0xff] }
  0xc2   : > { %1381 = vmatpush1.msra.mxu1 %v875_v6  ;;  %1165 = vmatpush1.msra.mxu0 %v833_v9  ;;  %v820_v34 = vld [vmem:[%s3274_s5 + $0x118] sm:$0xff]  ;;  %v785_v35 = vld [vmem:[%s3274_s5] sm:$0xff]  ;;  %v819_v36 = vld [vmem:[%s3274_s5 + $0x110] sm:$0xff] }
  0xc3   : > { %1382 = vmatprep.subr.mxu1 %v868_v8  ;;  %1166 = vmatprep.subr.mxu0 %v826_v11  ;;  %v1034_v37 = vld [vmem:[%s3274_s5 + $0x7c8] sm:$0xff]  ;;  %v812_v38 = vld [vmem:[%s3274_s5 + $0xd8] sm:$0xff]  ;;  %v1033_v39 = vld [vmem:[%s3274_s5 + $0x7c0] sm:$0xff] }
  0xc4   : > { %1383 = vmatpush1.msra.mxu1 %v867_v10  ;;  %1167 = vmatpush1.msra.mxu0 %v825_v13  ;;  %v811_v40 = vld [vmem:[%s3274_s5 + $0xd0] sm:$0xff]  ;;  %v1026_v41 = vld [vmem:[%s3274_s5 + $0x788] sm:$0xff]  ;;  %v804_v42 = vld [vmem:[%s3274_s5 + $0x98] sm:$0xff] }
  0xc5   : > { %1384 = vmatprep.subr.mxu1 %v860_v12  ;;  %1168 = vmatprep.subr.mxu0 %v818_v15  ;;  %v1025_v43 = vld [vmem:[%s3274_s5 + $0x780] sm:$0xff]  ;;  %v803_v44 = vld [vmem:[%s3274_s5 + $0x90] sm:$0xff]  ;;  %v1018_v45 = vld [vmem:[%s3274_s5 + $0x748] sm:$0xff] }
  0xc6   : > { %1385 = vmatpush1.msra.mxu1 %v859_v14  ;;  %1169 = vmatpush1.msra.mxu0 %v817_v17  ;;  %v796_v46 = vld [vmem:[%s3274_s5 + $0x58] sm:$0xff]  ;;  %v1017_v47 = vld [vmem:[%s3274_s5 + $0x740] sm:$0xff]  ;;  %v795_v48 = vld [vmem:[%s3274_s5 + $0x50] sm:$0xff] }
  0xc7   : > { %1386 = vmatprep.subr.mxu1 %v852_v16  ;;  %1170 = vmatprep.subr.mxu0 %v810_v19  ;;  %v1010_v49 = vld [vmem:[%s3274_s5 + $0x708] sm:$0xff]  ;;  %v788_v50 = vld [vmem:[%s3274_s5 + $0x18] sm:$0xff]  ;;  %v1009_v51 = vld [vmem:[%s3274_s5 + $0x700] sm:$0xff] }
  0xc8   : > { %1387 = vmatpush1.msra.mxu1 %v851_v18  ;;  %1171 = vmatpush1.msra.mxu0 %v809_v21  ;;  %v787_v52 = vld [vmem:[%s3274_s5 + $0x10] sm:$0xff]  ;;  %v1002_v54 = vld [vmem:[%s3274_s5 + $0x6c8] sm:$0xff]  ;;  %v1036_v55 = vld [vmem:[%s3274_s5 + $0x7d8] sm:$0xff] }
  0xc9   : > { %1388 = vmatprep.subr.mxu1 %v844_v20  ;;  %1172 = vmatprep.subr.mxu0 %v802_v23  ;;  %v1001_v56 = vld [vmem:[%s3274_s5 + $0x6c0] sm:$0xff]  ;;  %v1035_v57 = vld [vmem:[%s3274_s5 + $0x7d0] sm:$0xff]  ;;  %v994_v58 = vld [vmem:[%s3274_s5 + $0x688] sm:$0xff] }
  0xca   : > { %1389 = vmatpush1.msra.mxu1 %v843_v22  ;;  %1173 = vmatpush1.msra.mxu0 %v801_v25  ;;  %v1028_v59 = vld [vmem:[%s3274_s5 + $0x798] sm:$0xff]  ;;  %v993_v60 = vld [vmem:[%s3274_s5 + $0x680] sm:$0xff]  ;;  %v1027_v61 = vld [vmem:[%s3274_s5 + $0x790] sm:$0xff] }
  0xcb   : > { %1390 = vmatprep.subr.mxu1 %v836_v24  ;;  %1174 = vmatprep.subr.mxu0 %v794_v27  ;;  %v986_v62 = vld [vmem:[%s3274_s5 + $0x648] sm:$0xff]  ;;  %v1020_v63 = vld [vmem:[%s3274_s5 + $0x758] sm:$0xff]  ;;  %v985_v0 = vld [vmem:[%s3274_s5 + $0x640] sm:$0xff] }
  0xcc   : > { %1391 = vmatpush1.msra.mxu1 %v835_v26  ;;  %1175 = vmatpush1.msra.mxu0 %v793_v29  ;;  %v3377_v1 = vld [vmem:[%s4196_s0 + $0x28] sm:$0xff]  ;;  %v1019_v2 = vld [vmem:[%s3274_s5 + $0x750] sm:$0xff]  ;;  %v1012_v4 = vld [vmem:[%s3274_s5 + $0x718] sm:$0xff] }
  0xcd   : > { %1392 = vmatprep.subr.mxu1 %v828_v28  ;;  %1176 = vmatprep.subr.mxu0 %v786_v31  ;;  %v978_v3 = vld [vmem:[%s3274_s5 + $0x608] sm:$0xff]  ;;  %v977_v5 = vld [vmem:[%s3274_s5 + $0x600] sm:$0xff]  ;;  %v1011_v6 = vld [vmem:[%s3274_s5 + $0x710] sm:$0xff] }
  0xce   : > { %1393 = vmatpush1.msra.mxu1 %v827_v30  ;;  %1177 = vmatpush1.msra.mxu0 %v785_v35  ;;  %v970_v7 = vld [vmem:[%s3274_s5 + $0x5c8] sm:$0xff]  ;;  %v1004_v8 = vld [vmem:[%s3274_s5 + $0x6d8] sm:$0xff]  ;;  %v969_v9 = vld [vmem:[%s3274_s5 + $0x5c0] sm:$0xff] }
  0xcf   : > { %1394 = vmatprep.subr.mxu1 %v820_v34  ;;  %1178 = vmatprep.subr.mxu0 %v1034_v37  ;;  %v3393_v10 = vld [vmem:[%s4196_s0 + $0x40] sm:$0xff]  ;;  %v1003_v11 = vld [vmem:[%s3274_s5 + $0x6d0] sm:$0xff]  ;;  %v962_v12 = vld [vmem:[%s3274_s5 + $0x588] sm:$0xff] }
  0xd0   : > { %1395 = vmatpush1.msra.mxu1 %v819_v36  ;;  %1179 = vmatpush2.msra.mxu0 %v1033_v39  ;;  %v996_v13 = vld [vmem:[%s3274_s5 + $0x698] sm:$0xff]  ;;  %v961_v14 = vld [vmem:[%s3274_s5 + $0x580] sm:$0xff]  ;;  %v995_v15 = vld [vmem:[%s3274_s5 + $0x690] sm:$0xff] }
  0xd1   : > { %1396 = vmatprep.subr.mxu1 %v812_v38  ;;  %1180 = vmatprep.subr.mxu0 %v1026_v41  ;;  %v954_v16 = vld [vmem:[%s3274_s5 + $0x548] sm:$0xff]  ;;  %v988_v17 = vld [vmem:[%s3274_s5 + $0x658] sm:$0xff]  ;;  %v953_v18 = vld [vmem:[%s3274_s5 + $0x540] sm:$0xff] }
  0xd2   : > { %1397 = vmatpush1.msra.mxu1 %v811_v40  ;;  %1181 = vmatpush2.msra.mxu0 %v1025_v43  ;;  %v3409_v19 = vld [vmem:[%s4196_s0 + $0x58] sm:$0xff]  ;;  %v987_v20 = vld [vmem:[%s3274_s5 + $0x650] sm:$0xff]  ;;  %v946_v21 = vld [vmem:[%s3274_s5 + $0x508] sm:$0xff] }
  0xd3   : > { %1398 = vmatprep.subr.mxu1 %v804_v42  ;;  %1182 = vmatprep.subr.mxu0 %v1018_v45  ;;  %v980_v22 = vld [vmem:[%s3274_s5 + $0x618] sm:$0xff]  ;;  %v945_v23 = vld [vmem:[%s3274_s5 + $0x500] sm:$0xff]  ;;  %v979_v24 = vld [vmem:[%s3274_s5 + $0x610] sm:$0xff] }
  0xd4   : > { %1399 = vmatpush1.msra.mxu1 %v803_v44  ;;  %1183 = vmatpush2.msra.mxu0 %v1017_v47  ;;  %v938_v25 = vld [vmem:[%s3274_s5 + $0x4c8] sm:$0xff]  ;;  %v972_v26 = vld [vmem:[%s3274_s5 + $0x5d8] sm:$0xff]  ;;  %v937_v27 = vld [vmem:[%s3274_s5 + $0x4c0] sm:$0xff] }
  0xd5   : > { %1400 = vmatprep.subr.mxu1 %v796_v46  ;;  %1184 = vmatprep.subr.mxu0 %v1010_v49  ;;  %v3425_v28 = vld [vmem:[%s4196_s0 + $0x70] sm:$0xff]  ;;  %v930_v30 = vld [vmem:[%s3274_s5 + $0x488] sm:$0xff]  ;;  %v964_v31 = vld [vmem:[%s3274_s5 + $0x598] sm:$0xff] }
  0xd6   : > { %1401 = vmatpush1.msra.mxu1 %v795_v48  ;;  %1185 = vmatpush2.msra.mxu0 %v1009_v51  ;;  %v971_v29 = vld [vmem:[%s3274_s5 + $0x5d0] sm:$0xff]  ;;  %v929_v34 = vld [vmem:[%s3274_s5 + $0x480] sm:$0xff]  ;;  %v922_v36 = vld [vmem:[%s3274_s5 + $0x448] sm:$0xff] }
  0xd7   : > { %1402 = vmatprep.subr.mxu1 %v788_v50  ;;  %1186 = vmatprep.subr.mxu0 %v1002_v54  ;;  %v963_v35 = vld [vmem:[%s3274_s5 + $0x590] sm:$0xff]  ;;  %v956_v37 = vld [vmem:[%s3274_s5 + $0x558] sm:$0xff]  ;;  %v921_v38 = vld [vmem:[%s3274_s5 + $0x440] sm:$0xff] }
  0xd8   : > { %1403 = vmatpush1.msra.mxu1 %v787_v52  ;;  %1187 = vmatpush2.msra.mxu0 %v1001_v56  ;;  %v3441_v39 = vld [vmem:[%s4196_s0 + $0x88] sm:$0xff]  ;;  %v955_v40 = vld [vmem:[%s3274_s5 + $0x550] sm:$0xff]  ;;  %v948_v42 = vld [vmem:[%s3274_s5 + $0x518] sm:$0xff] }
  0xd9   : > { %1404 = vmatprep.subr.mxu1 %v1036_v55  ;;  %1188 = vmatprep.subr.mxu0 %v994_v58  ;;  %v914_v41 = vld [vmem:[%s3274_s5 + $0x408] sm:$0xff]  ;;  %v913_v43 = vld [vmem:[%s3274_s5 + $0x400] sm:$0xff]  ;;  %v947_v44 = vld [vmem:[%s3274_s5 + $0x510] sm:$0xff] }
  0xda   : > { %1405 = vmatpush2.msra.mxu1 %v1035_v57  ;;  %1189 = vmatpush2.msra.mxu0 %v993_v60  ;;  %v3454_v45 = vld [vmem:[%s4196_s0] sm:$0xff]  ;;  %v940_v46 = vld [vmem:[%s3274_s5 + $0x4d8] sm:$0xff]  ;;  %v939_v49 = vld [vmem:[%s3274_s5 + $0x4d0] sm:$0xff] }
  0xdb   : > { %1406 = vmatprep.subr.mxu1 %v1028_v59  ;;  %1190 = vmatprep.subr.mxu0 %v986_v62  ;;  %v1068_v47 = vld [vmem:[%s3274_s5 + $0x8d8] sm:$0xff]  ;;  %v3461_v48 = vld [vmem:[%s4196_s0 + $0xa0] sm:$0xff]  ;;  %v1067_v50 = vld [vmem:[%s3274_s5 + $0x8d0] sm:$0xff] }
  0xdc   : > { %1407 = vmatpush2.msra.mxu1 %v1027_v61  ;;  %1329 = vmatprep.mubr.f32.mxu1 %v2620_v32  ;;  %v932_v51 = vld [vmem:[%s3274_s5 + $0x498] sm:$0xff]  ;;  %v3471_v52 = vld [vmem:[%s4196_s0 + $0x20] sm:$0xff]  ;;  %v931_v54 = vld [vmem:[%s3274_s5 + $0x490] sm:$0xff] }
  0xdd   : > { %1408 = vmatprep.subr.mxu1 %v1020_v63  ;;  %1191 = vmatpush2.msra.mxu0 %v985_v0  ;;  %v3479_v55 = vld [vmem:[%s4196_s0 + $0x18] sm:$0xff]  ;;  %v923_v59 = vld [vmem:[%s3274_s5 + $0x450] sm:$0xff]  ;;  %v910_v0 = vld [vmem:[%s3274_s5 + $0x3e8] sm:$0xff] }
  0xde   : > { %2524 = vmatmul.mubr.msk.f32.gmra.mxu1 %vm1121_vm0, %v3377_v1  ;;  %1192 = vmatprep.subr.mxu0 %v978_v3  ;;  %v924_v56 = vld [vmem:[%s3274_s5 + $0x458] sm:$0xff]  ;;  %v3500_v61 = vld [vmem:[%s4196_s0 + $0x30] sm:$0xff]  ;;  %v909_v3 = vld [vmem:[%s3274_s5 + $0x3e0] sm:$0xff] }
  0xdf   : > { %1409 = vmatpush2.msra.mxu1 %v1019_v2  ;;  %1193 = vmatpush2.msra.mxu0 %v977_v5  ;;  %v3486_v57 = vld [vmem:[%s4196_s0 + $0xb8] sm:$0xff]  ;;  %v915_v62 = vld [vmem:[%s3274_s5 + $0x410] sm:$0xff] }
  0xe0   : > { %1410 = vmatprep.subr.mxu1 %v1012_v4  ;;  %1194 = vmatprep.subr.mxu0 %v970_v7  ;;  %v3491_v58 = vld [vmem:[%s4196_s0 + $0x38] sm:$0xff]  ;;  %v1059_v2 = vld [vmem:[%s3274_s5 + $0x890] sm:$0xff]  ;;  %v902_v4 = vld [vmem:[%s3274_s5 + $0x3a8] sm:$0xff] }
  0xe1   : > { %1411 = vmatpush2.msra.mxu1 %v1011_v6  ;;  %1335 = vmatprep.mubr.f32.mxu1 %v2620_v32  ;;  %v916_v60 = vld [vmem:[%s3274_s5 + $0x418] sm:$0xff]  ;;  %v3516_v5 = vld [vmem:[%s4196_s0 + $0x50] sm:$0xff]  ;;  %v3523_v6 = vld [vmem:[%s4196_s0 + $0x48] sm:$0xff] }
  0xe2   : > { %1412 = vmatprep.subr.mxu1 %v1004_v8  ;;  %1195 = vmatpush2.msra.mxu0 %v969_v9  ;;  %v1060_v63 = vld [vmem:[%s3274_s5 + $0x898] sm:$0xff]  ;;  %v894_v7 = vld [vmem:[%s3274_s5 + $0x368] sm:$0xff]  ;;  %v893_v9 = vld [vmem:[%s3274_s5 + $0x360] sm:$0xff] }
  0xe3   : > { %2525 = vmatmul.mubr.msk.f32.gmra.mxu1 %vm1121_vm0, %v3393_v10  ;;  %1196 = vmatprep.subr.mxu0 %v962_v12  ;;  %v3529_v8 = vld [vmem:[%s4196_s0 + $0x68] sm:$0xff] }
  0xe4   : > { %1413 = vmatpush2.msra.mxu1 %v1003_v11  ;;  %1197 = vmatpush2.msra.mxu0 %v961_v14  ;;  %v1052_v11 = vld [vmem:[%s3274_s5 + $0x858] sm:$0xff]  ;;  %v886_v12 = vld [vmem:[%s3274_s5 + $0x328] sm:$0xff]  ;;  %v885_v14 = vld [vmem:[%s3274_s5 + $0x320] sm:$0xff] }
  0xe5   : > { %1414 = vmatprep.subr.mxu1 %v996_v13  ;;  %1198 = vmatprep.subr.mxu0 %v954_v16  ;;  %v1051_v13 = vld [vmem:[%s3274_s5 + $0x850] sm:$0xff]  ;;  %v878_v16 = vld [vmem:[%s3274_s5 + $0x2e8] sm:$0xff] }
  0xe6   : > { %1415 = vmatpush2.msra.mxu1 %v995_v15  ;;  %1341 = vmatprep.mubr.f32.mxu1 %v2620_v32  ;;  %v3542_v15 = vld [vmem:[%s4196_s0 + $0x60] sm:$0xff] }
  0xe7   : > { %1416 = vmatprep.subr.mxu1 %v988_v17  ;;  %1199 = vmatpush2.msra.mxu0 %v953_v18  ;;  %v3548_v17 = vld [vmem:[%s4196_s0 + $0x80] sm:$0xff] }
  0xe8   : > { %2526 = vmatmul.mubr.msk.f32.gmra.mxu1 %vm1121_vm0, %v3409_v19  ;;  %1200 = vmatprep.subr.mxu0 %v946_v21  ;;  %v877_v18 = vld [vmem:[%s3274_s5 + $0x2e0] sm:$0xff]  ;;  %v870_v21 = vld [vmem:[%s3274_s5 + $0x2a8] sm:$0xff] }
  0xe9   : > { %1417 = vmatpush2.msra.mxu1 %v987_v20  ;;  %1201 = vmatpush2.msra.mxu0 %v945_v23  ;;  %v1044_v20 = vld [vmem:[%s3274_s5 + $0x818] sm:$0xff]  ;;  %v869_v23 = vld [vmem:[%s3274_s5 + $0x2a0] sm:$0xff] }
  0xea   : > { %1418 = vmatprep.subr.mxu1 %v980_v22  ;;  %1202 = vmatprep.subr.mxu0 %v938_v25  ;;  %v1043_v22 = vld [vmem:[%s3274_s5 + $0x810] sm:$0xff]  ;;  %v862_v25 = vld [vmem:[%s3274_s5 + $0x268] sm:$0xff] }
  0xeb   : > { %1419 = vmatpush2.msra.mxu1 %v979_v24  ;;  %1347 = vmatprep.mubr.f32.mxu1 %v2620_v32  ;;  %v3560_v24 = vld [vmem:[%s4196_s0 + $0x78] sm:$0xff] }
  0xec   : > { %1420 = vmatprep.subr.mxu1 %v972_v26  ;;  %1203 = vmatpush2.msra.mxu0 %v937_v27  ;;  %v3566_v26 = vld [vmem:[%s4196_s0 + $0x98] sm:$0xff]  ;;  %v861_v27 = vld [vmem:[%s3274_s5 + $0x260] sm:$0xff] }
  0xed   : > { %2527 = vmatmul.mubr.msk.f32.gmra.mxu1 %vm1121_vm0, %v3425_v28  ;;  %1204 = vmatprep.subr.mxu0 %v930_v30  ;;  %v854_v30 = vld [vmem:[%s3274_s5 + $0x228] sm:$0xff] }
  0xee   : > { %1421 = vmatpush2.msra.mxu1 %v971_v29  ;;  %1205 = vmatpush2.msra.mxu0 %v929_v34  ;;  %v1070_v29 = vld [vmem:[%s3274_s5 + $0x8e8] sm:$0xff]  ;;  %v3577_v34 = vld [vmem:[%s4196_s0 + $0x90] sm:$0xff] }
  0xef   : > { %1422 = vmatprep.subr.mxu1 %v964_v31  ;;  %1206 = vmatprep.subr.mxu0 %v922_v36  ;;  %v853_v31 = vld [vmem:[%s3274_s5 + $0x220] sm:$0xff]  ;;  %v3583_v36 = vld [vmem:[%s4196_s0 + $0xb0] sm:$0xff] }
  0xf0   : > { %1423 = vmatpush2.msra.mxu1 %v963_v35  ;;  %1353 = vmatprep.mubr.f32.mxu1 %v2620_v32  ;;  %v846_v35 = vld [vmem:[%s3274_s5 + $0x1e8] sm:$0xff] }
  0xf1   : > { %1424 = vmatprep.subr.mxu1 %v956_v37  ;;  %1207 = vmatpush2.msra.mxu0 %v921_v38  ;;  %v845_v37 = vld [vmem:[%s3274_s5 + $0x1e0] sm:$0xff]  ;;  %v838_v38 = vld [vmem:[%s3274_s5 + $0x1a8] sm:$0xff] }
  0xf2   : > { %2528 = vmatmul.mubr.msk.f32.gmra.mxu1 %vm1121_vm0, %v3441_v39  ;;  %1208 = vmatprep.subr.mxu0 %v914_v41  ;;  %v3594_v41 = vld [vmem:[%s4196_s0 + $0xa8] sm:$0xff] }
  0xf3   : > { %1425 = vmatpush2.msra.mxu1 %v955_v40  ;;  %1209 = vmatpush2.msra.mxu0 %v913_v43  ;;  %v837_v40 = vld [vmem:[%s3274_s5 + $0x1a0] sm:$0xff]  ;;  %v2621_v43 = vmov 0  }
  0xf4   : > { %1426 = vmatprep.subr.mxu1 %v948_v42  ;;  %1211 = vmatmul.mubr.f32.vlgmr.msra.gmra.mxu0 %v3454_v45  ;;  %v830_v42 = vld [vmem:[%s3274_s5 + $0x168] sm:$0xff] }
  0xf5   : > { %1427 = vmatpush2.msra.mxu1 %v947_v44  ;;  %1359 = vmatprep.mubr.f32.mxu1 %v2620_v32  ;;  %v829_v44 = vld [vmem:[%s3274_s5 + $0x160] sm:$0xff] }
  0xf6   : > { %1428 = vmatprep.subr.mxu1 %v940_v46  ;;  %1509 = vmatprep.subr.mxu0 %v1068_v47  ;;  %v822_v46 = vld [vmem:[%s3274_s5 + $0x128] sm:$0xff]  ;;  %v821_v47 = vld [vmem:[%s3274_s5 + $0x120] sm:$0xff] }
  0xf7   : > { %2529 = vmatmul.mubr.msk.f32.gmra.mxu1 %vm1121_vm0, %v3461_v48  ;;  %1510 = vmatpush1.msra.mxu0 %v1067_v50  ;;  %v1069_v50 = vld [vmem:[%s3274_s5 + $0x8e0] sm:$0xff] }
  0xf8   : > { %1429 = vmatpush2.msra.mxu1 %v939_v49  ;;  %1216 = vmatprep.mubr.f32.mxu0 %v3471_v52  ;;  %v814_v49 = vld [vmem:[%s3274_s5 + $0xe8] sm:$0xff] }
  0xf9   : > { %1430 = vmatprep.subr.mxu1 %v932_v51  ;;  %1217 = vmatmul.mubr.f32.gmra.mxu0 %v3479_v55  ;;  %v813_v51 = vld [vmem:[%s3274_s5 + $0xe0] sm:$0xff] }
  0xfa   : > { %1431 = vmatpush2.msra.mxu1 %v931_v54  ;;  %1365 = vmatprep.mubr.f32.mxu1 %v2620_v32  ;;  %v806_v54 = vld [vmem:[%s3274_s5 + $0xa8] sm:$0xff] }
  0xfb   : > { %1432 = vmatprep.subr.mxu1 %v924_v56  ;;  %2530 = vmatmul.mubr.msk.f32.gmra.mxu1 %vm1121_vm0, %v3486_v57  ;;  %v1062_v56 = vld [vmem:[%s3274_s5 + $0x8a8] sm:$0xff] }
  0xfc   : > { %1222 = vmatprep.mubr.f32.mxu0 %v3491_v58  ;;  %1433 = vmatpush2.msra.mxu1 %v923_v59  ;;  %v805_v59 = vld [vmem:[%s3274_s5 + $0xa0] sm:$0xff] }
  0xfd   : > { %1436 = vmatprep.mubr.f32.mxu1 %v3271_v33  ;;  %1434 = vmatprep.subr.mxu1 %v916_v60  ;;  %v901_v33 = vld [vmem:[%s3274_s5 + $0x3a0] sm:$0xff]  ;;  %v798_v60 = vld [vmem:[%s3274_s5 + $0x68] sm:$0xff] }
  0xfe   : > { %1223 = vmatmul.mubr.f32.gmra.mxu0 %v3500_v61  ;;  %1435 = vmatpush2.msra.mxu1 %v915_v62  ;;  %v797_v62 = vld [vmem:[%s3274_s5 + $0x60] sm:$0xff] }
  0xff   : > { %1511 = vmatprep.subr.mxu0 %v1060_v63  ;;  %1598 = vmatprep.subr.mxu1 %v910_v0  ;;  %v790_v63 = vld [vmem:[%s3274_s5 + $0x28] sm:$0xff]  ;;  %v1061_v0 = vld [vmem:[%s3274_s5 + $0x8a0] sm:$0xff] }
 0x100   : > { %1437 = vmatmul.mubr.f32.vlgmr.msra.gmra.mxu1 %v3454_v45  ;;  %1512 = vmatpush1.msra.mxu0 %v1059_v2  ;;  %v789_v2 = vld [vmem:[%s3274_s5 + $0x20] sm:$0xff] }
 0x101   : > { %1599 = vmatpush1.msra.mxu1 %v909_v3  ;;  %1228 = vmatprep.mubr.f32.mxu0 %v3516_v5  ;;  %v1038_v3 = vld [vmem:[%s3274_s5 + $0x7e8] sm:$0xff] }
 0x102   : > { %1600 = vmatprep.subr.mxu1 %v902_v4  ;;  %1229 = vmatmul.mubr.f32.gmra.mxu0 %v3523_v6  ;;  %v1037_v4 = vld [vmem:[%s3274_s5 + $0x7e0] sm:$0xff] }
 0x103   : > { %1601 = vmatpush1.msra.mxu1 %v901_v33  ;;  %1234 = vmatprep.mubr.f32.mxu0 %v3529_v8  ;;  %v1030_v33 = vld [vmem:[%s3274_s5 + $0x7a8] sm:$0xff] }
 0x104   : > { %1602 = vmatprep.subr.mxu1 %v894_v7  ;;  %1513 = vmatprep.subr.mxu0 %v1052_v11  ;;  %v1029_v7 = vld [vmem:[%s3274_s5 + $0x7a0] sm:$0xff] }
 0x105   : > { %1603 = vmatpush1.msra.mxu1 %v893_v9  ;;  %1514 = vmatpush1.msra.mxu0 %v1051_v13  ;;  %v1022_v9 = vld [vmem:[%s3274_s5 + $0x768] sm:$0xff]  ;;  %v1021_v11 = vld [vmem:[%s3274_s5 + $0x760] sm:$0xff] }
 0x106   : > { %1604 = vmatprep.subr.mxu1 %v886_v12  ;;  %1235 = vmatmul.mubr.f32.gmra.mxu0 %v3542_v15  ;;  %v1014_v12 = vld [vmem:[%s3274_s5 + $0x728] sm:$0xff] }
 0x107   : > { %1605 = vmatpush1.msra.mxu1 %v885_v14  ;;  %1240 = vmatprep.mubr.f32.mxu0 %v3548_v17  ;;  %v1054_v13 = vld [vmem:[%s3274_s5 + $0x868] sm:$0xff]  ;;  %v1013_v14 = vld [vmem:[%s3274_s5 + $0x720] sm:$0xff] }
 0x108   : > { %1606 = vmatprep.subr.mxu1 %v878_v16  ;;  %1515 = vmatprep.subr.mxu0 %v1044_v20  ;;  %v1006_v16 = vld [vmem:[%s3274_s5 + $0x6e8] sm:$0xff]  ;;  %v1053_v20 = vld [vmem:[%s3274_s5 + $0x860] sm:$0xff] }
 0x109   : > { %1607 = vmatpush1.msra.mxu1 %v877_v18  ;;  %1516 = vmatpush1.msra.mxu0 %v1043_v22  ;;  %v1005_v18 = vld [vmem:[%s3274_s5 + $0x6e0] sm:$0xff] }
 0x10a   : > { %1608 = vmatprep.subr.mxu1 %v870_v21  ;;  %1241 = vmatmul.mubr.f32.gmra.mxu0 %v3560_v24  ;;  %v998_v21 = vld [vmem:[%s3274_s5 + $0x6a8] sm:$0xff]  ;;  %v997_v22 = vld [vmem:[%s3274_s5 + $0x6a0] sm:$0xff] }
 0x10b   : > { %1609 = vmatpush1.msra.mxu1 %v869_v23  ;;  %1246 = vmatprep.mubr.f32.mxu0 %v3566_v26  ;;  %v990_v23 = vld [vmem:[%s3274_s5 + $0x668] sm:$0xff] }
 0x10c   : > { %1610 = vmatprep.subr.mxu1 %v862_v25  ;;  %1735 = vmatprep.subr.mxu0 %v1070_v29  ;;  %v989_v25 = vld [vmem:[%s3274_s5 + $0x660] sm:$0xff] }
 0x10d   : > { %1611 = vmatpush1.msra.mxu1 %v861_v27  ;;  %1442 = vmatprep.mubr.f32.mxu1 %v3471_v52  ;;  %v982_v27 = vld [vmem:[%s3274_s5 + $0x628] sm:$0xff]  ;;  %v981_v29 = vld [vmem:[%s3274_s5 + $0x620] sm:$0xff] }
 0x10e   : > { %1612 = vmatprep.subr.mxu1 %v854_v30  ;;  %1247 = vmatmul.mubr.f32.gmra.mxu0 %v3577_v34  ;;  %v974_v30 = vld [vmem:[%s3274_s5 + $0x5e8] sm:$0xff] }
 0x10f   : > { %1613 = vmatpush1.msra.mxu1 %v853_v31  ;;  %1252 = vmatprep.mubr.f32.mxu0 %v3583_v36  ;;  %v1046_v31 = vld [vmem:[%s3274_s5 + $0x828] sm:$0xff] }
 0x110   : > { %1614 = vmatprep.subr.mxu1 %v846_v35  ;;  %2590 = vset.pattern.permute.xlu0 %v2621_v43  ;;  %v973_v35 = vld [vmem:[%s3274_s5 + $0x5e0] sm:$0xff] }
 0x111   : > { %1615 = vmatpush1.msra.mxu1 %v845_v37  ;;  %v1045_v37 = vld [vmem:[%s3274_s5 + $0x820] sm:$0xff]  ;;  %2591 = vset.pattern.permute.xlu1 %v2621_v43  ;;  %v847_v43 = vld [vmem:[%s3274_s5 + $0x1f0] sm:$0xff] }
 0x112   : > { %1616 = vmatprep.subr.mxu1 %v838_v38  ;;  %1443 = vmatmul.mubr.f32.gmra.mxu1 %v3479_v55  ;;  %v966_v38 = vld [vmem:[%s3274_s5 + $0x5a8] sm:$0xff] }
 0x113   : > { %1617 = vmatpush1.msra.mxu1 %v837_v40  ;;  %1253 = vmatmul.mubr.f32.gmra.mxu0 %v3594_v41  ;;  %v965_v40 = vld [vmem:[%s3274_s5 + $0x5a0] sm:$0xff] }
 0x114   : > { %1618 = vmatprep.subr.mxu1 %v830_v42  ;;  %1549 = vmatprep.mubr.f32.mxu0 %v2620_v32  ;;  %v958_v42 = vld [vmem:[%s3274_s5 + $0x568] sm:$0xff] }
 0x115   : > { %1619 = vmatpush1.msra.mxu1 %v829_v44  ;;  %1448 = vmatprep.mubr.f32.mxu1 %v3491_v58  ;;  %v957_v44 = vld [vmem:[%s3274_s5 + $0x560] sm:$0xff] }
 0x116   : > { %1620 = vmatprep.subr.mxu1 %v822_v46  ;;  %1449 = vmatmul.mubr.f32.gmra.mxu1 %v3500_v61  ;;  %v950_v46 = vld [vmem:[%s3274_s5 + $0x528] sm:$0xff] }
 0x117   : > { %1621 = vmatpush1.msra.mxu1 %v821_v47  ;;  %2531 = vmatmul.mubr.msk.f32.vlgmr.msra.gmra.mxu0 %vm1121_vm0, %v3298_v53  ;;  %v912_v47 = vld [vmem:[%s3274_s5 + $0x3f8] sm:$0xff] }
 0x118   : > { %1622 = vmatprep.subr.mxu1 %v814_v49  ;;  %1736 = vmatpush1.msra.mxu0 %v1069_v50  ;;  %v949_v49 = vld [vmem:[%s3274_s5 + $0x520] sm:$0xff] }
 0x119   : > { %1623 = vmatpush1.msra.mxu1 %v813_v51  ;;  %1555 = vmatprep.mubr.f32.mxu0 %v2620_v32  ;;  %v1073_v50 = vld [vmem:[%s4198_s2] sm:$0xff]  ;;  %v942_v51 = vld [vmem:[%s3274_s5 + $0x4e8] sm:$0xff] }
 0x11a   : > { %1624 = vmatprep.subr.mxu1 %v806_v54  ;;  %1737 = vmatprep.subr.mxu0 %v1062_v56  ;;  %v911_v54 = vld [vmem:[%s3274_s5 + $0x3f0] sm:$0xff]  ;;  %v941_v56 = vld [vmem:[%s3274_s5 + $0x4e0] sm:$0xff] }
 0x11b   : > { %1625 = vmatpush1.msra.mxu1 %v805_v59  ;;  %2532 = vmatmul.mubr.msk.f32.gmra.mxu0 %vm1121_vm0, %v3377_v1  ;;  %v904_v59 = vld [vmem:[%s3274_s5 + $0x3b8] sm:$0xff] }
 0x11c   : > { %1626 = vmatprep.subr.mxu1 %v798_v60  ;;  %1561 = vmatprep.mubr.f32.mxu0 %v2620_v32  ;;  %v934_v60 = vld [vmem:[%s3274_s5 + $0x4a8] sm:$0xff] }
 0x11d   : > { %1627 = vmatpush1.msra.mxu1 %v797_v62  ;;  %1454 = vmatprep.mubr.f32.mxu1 %v3516_v5  ;;  %v903_v62 = vld [vmem:[%s3274_s5 + $0x3b0] sm:$0xff] }
 0x11e   : > { %1628 = vmatprep.subr.mxu1 %v790_v63  ;;  %1738 = vmatpush1.msra.mxu0 %v1061_v0  ;;  %v933_v63 = vld [vmem:[%s3274_s5 + $0x4a0] sm:$0xff]  ;;  %v896_v0 = vld [vmem:[%s3274_s5 + $0x378] sm:$0xff] }
 0x11f   : > { %1629 = vmatpush1.msra.mxu1 %v789_v2  ;;  %2533 = vmatmul.mubr.msk.f32.gmra.mxu0 %vm1121_vm0, %v3393_v10  ;;  %v926_v2 = vld [vmem:[%s3274_s5 + $0x468] sm:$0xff] }
 0x120   : > { %1630 = vmatprep.subr.mxu1 %v1038_v3  ;;  %1455 = vmatmul.mubr.f32.gmra.mxu1 %v3523_v6  ;;  %v895_v3 = vld [vmem:[%s3274_s5 + $0x370] sm:$0xff] }
 0x121   : > { %1631 = vmatpush2.msra.mxu1 %v1037_v4  ;;  %1567 = vmatprep.mubr.f32.mxu0 %v2620_v32  ;;  %v925_v4 = vld [vmem:[%s3274_s5 + $0x460] sm:$0xff] }
 0x122   : > { %1632 = vmatprep.subr.mxu1 %v1030_v33  ;;  %1460 = vmatprep.mubr.f32.mxu1 %v3529_v8  ;;  %v888_v33 = vld [vmem:[%s3274_s5 + $0x338] sm:$0xff] }
 0x123   : > { %1633 = vmatpush2.msra.mxu1 %v1029_v7  ;;  %2534 = vmatmul.mubr.msk.f32.gmra.mxu0 %vm1121_vm0, %v3409_v19  ;;  %v918_v7 = vld [vmem:[%s3274_s5 + $0x428] sm:$0xff] }
 0x124   : > { %1634 = vmatprep.subr.mxu1 %v1022_v9  ;;  %1461 = vmatmul.mubr.f32.gmra.mxu1 %v3542_v15  ;;  %v917_v9 = vld [vmem:[%s3274_s5 + $0x420] sm:$0xff] }
 0x125   : > { %1635 = vmatpush2.msra.mxu1 %v1021_v11  ;;  %1573 = vmatprep.mubr.f32.mxu0 %v2620_v32  ;;  %v880_v11 = vld [vmem:[%s3274_s5 + $0x2f8] sm:$0xff] }
 0x126   : > { %1636 = vmatprep.subr.mxu1 %v1014_v12  ;;  %1739 = vmatprep.subr.mxu0 %v1054_v13  ;;  %v879_v12 = vld [vmem:[%s3274_s5 + $0x2f0] sm:$0xff]  ;;  %v1074_v13 = vld [vmem:[%s4198_s2 + $0x8] sm:$0xff] }
 0x127   : > { %1637 = vmatpush2.msra.mxu1 %v1013_v14  ;;  %2535 = vmatmul.mubr.msk.f32.gmra.mxu0 %vm1121_vm0, %v3425_v28  ;;  %v872_v14 = vld [vmem:[%s3274_s5 + $0x2b8] sm:$0xff] }
 0x128   : > { %1638 = vmatprep.subr.mxu1 %v1006_v16  ;;  %1466 = vmatprep.mubr.f32.mxu1 %v3548_v17  ;;  %v3709_v16 = vld [vmem:[%s4196_s0 + $0x8] sm:$0xff] }
 0x129   : > { %1639 = vmatpush2.msra.mxu1 %v1005_v18  ;;  %1740 = vmatpush1.msra.mxu0 %v1053_v20  ;;  %v871_v18 = vld [vmem:[%s3274_s5 + $0x2b0] sm:$0xff]  ;;  %v864_v20 = vld [vmem:[%s3274_s5 + $0x278] sm:$0xff] }
 0x12a   : > { %1467 = vmatmul.mubr.f32.gmra.mxu1 %v3560_v24  ;;  %1640 = vmatprep.subr.mxu1 %v998_v21  ;;  %v1075_v21 = vld [vmem:[%s4198_s2 + $0x10] sm:$0xff] }
 0x12b   : > { %1579 = vmatprep.mubr.f32.mxu0 %v2620_v32  ;;  %1641 = vmatpush2.msra.mxu1 %v997_v22  ;;  %v863_v22 = vld [vmem:[%s3274_s5 + $0x270] sm:$0xff] }
 0x12c   : > { %2536 = vmatmul.mubr.msk.f32.gmra.mxu0 %vm1121_vm0, %v3441_v39  ;;  %1642 = vmatprep.subr.mxu1 %v990_v23  ;;  %v856_v23 = vld [vmem:[%s3274_s5 + $0x238] sm:$0xff] }
 0x12d   : > { %1472 = vmatprep.mubr.f32.mxu1 %v3566_v26  ;;  %1643 = vmatpush2.msra.mxu1 %v989_v25  ;;  %v1077_v25 = vld [vmem:[%s4198_s2 + $0x20] sm:$0xff] }
 0x12e   : > { %1473 = vmatmul.mubr.f32.gmra.mxu1 %v3577_v34  ;;  %1644 = vmatprep.subr.mxu1 %v982_v27  ;;  %v855_v27 = vld [vmem:[%s3274_s5 + $0x230] sm:$0xff] }
 0x12f   : > { %1585 = vmatprep.mubr.f32.mxu0 %v2620_v32  ;;  %1645 = vmatpush2.msra.mxu1 %v981_v29  ;;  %v848_v29 = vld [vmem:[%s3274_s5 + $0x1f8] sm:$0xff] }
 0x130   : > { %2537 = vmatmul.mubr.msk.f32.gmra.mxu0 %vm1121_vm0, %v3461_v48  ;;  %1646 = vmatprep.subr.mxu1 %v974_v30  ;;  %v1076_v30 = vld [vmem:[%s4198_s2 + $0x18] sm:$0xff] }
 0x131   : > { %1741 = vmatprep.subr.mxu0 %v1046_v31  ;;  %1478 = vmatprep.mubr.f32.mxu1 %v3583_v36  ;;  %v840_v31 = vld [vmem:[%s3274_s5 + $0x1b8] sm:$0xff] }
 0x132   : > { %1647 = vmatpush2.msra.mxu1 %v973_v35  ;;  %1742 = vmatpush1.msra.mxu0 %v1045_v37  ;;  %v1079_v35 = vld [vmem:[%s4198_s2 + $0x30] sm:$0xff] }
 0x133   : > { %1479 = vmatmul.mubr.f32.gmra.mxu1 %v3594_v41  ;;  %1648 = vmatprep.subr.mxu1 %v966_v38  ;;  %v839_v37 = vld [vmem:[%s3274_s5 + $0x1b0] sm:$0xff]  ;;  %v832_v38 = vld [vmem:[%s3274_s5 + $0x178] sm:$0xff] }
 0x134   : > { %1591 = vmatprep.mubr.f32.mxu0 %v2620_v32  ;;  %1649 = vmatpush2.msra.mxu1 %v965_v40  ;;  %v1078_v40 = vld [vmem:[%s4198_s2 + $0x28] sm:$0xff] }
 0x135   : > { %2538 = vmatmul.mubr.msk.f32.gmra.mxu0 %vm1121_vm0, %v3486_v57  ;;  %1650 = vmatprep.subr.mxu1 %v958_v42  ;;  %v831_v42 = vld [vmem:[%s3274_s5 + $0x170] sm:$0xff] }
 0x136   : > { %1651 = vmatpush2.msra.mxu1 %v957_v44  ;;  %1775 = vmatprep.mubr.f32.mxu0 %v2620_v32  ;;  %v1072_v44 = vld [vmem:[%s3274_s5 + $0x8f8] sm:$0xff] }
 0x137   : > { %1652 = vmatprep.subr.mxu1 %v950_v46  ;;  %1824 = vmatprep.subr.mxu0 %v912_v47  ;;  %v824_v46 = vld [vmem:[%s3274_s5 + $0x138] sm:$0xff]  ;;  %v823_v47 = vld [vmem:[%s3274_s5 + $0x130] sm:$0xff] }
 0x138   : > { %1653 = vmatpush2.msra.mxu1 %v949_v49  ;;  %1083 = vperm.xlu0 %2590, %v1073_v50   ;;  %v816_v49 = vld [vmem:[%s3274_s5 + $0xf8] sm:$0xff] }
 0x139   : > { %1654 = vmatprep.subr.mxu1 %v942_v51  ;;  %2539 = vmatmul.mubr.msk.f32.vlgmr.msra.gmra.mxu0 %vm1121_vm0, %v3298_v53  ;;  %v887_v53 = vld [vmem:[%s3274_s5 + $0x330] sm:$0xff]  ;;  %v1080_v50 = vld [vmem:[%s4198_s2 + $0x38] sm:$0xff] }
 0x13a   : > { %1825 = vmatpush1.msra.mxu0 %v911_v54  ;;  %1655 = vmatpush2.msra.mxu1 %v941_v56  ;;  %v815_v51 = vld [vmem:[%s3274_s5 + $0xf0] sm:$0xff]  ;;  %v808_v56 = vld [vmem:[%s3274_s5 + $0xb8] sm:$0xff] }
 0x13b   : > { %1826 = vmatprep.subr.mxu0 %v904_v59  ;;  %1656 = vmatprep.subr.mxu1 %v934_v60  ;;  %v1071_v54 = vld [vmem:[%s3274_s5 + $0x8f0] sm:$0xff]  ;;  %v800_v60 = vld [vmem:[%s3274_s5 + $0x78] sm:$0xff] }
 0x13c   : > { %1827 = vmatpush1.msra.mxu0 %v903_v62  ;;  %1657 = vmatpush2.msra.mxu1 %v933_v63  ;;  %v807_v59 = vld [vmem:[%s3274_s5 + $0xb0] sm:$0xff] }
 0x13d   : > { %1828 = vmatprep.subr.mxu0 %v896_v0  ;;  %1658 = vmatprep.subr.mxu1 %v926_v2  ;;  %v799_v62 = vld [vmem:[%s3274_s5 + $0x70] sm:$0xff]  ;;  %v1040_v0 = vld [vmem:[%s3274_s5 + $0x7f8] sm:$0xff] }
 0x13e   : > { %1829 = vmatpush1.msra.mxu0 %v895_v3  ;;  %1659 = vmatpush2.msra.mxu1 %v925_v4  ;;  %v791_v63 = vld [vmem:[%s3274_s5 + $0x30] sm:$0xff]  ;;  %v1064_v3 = vld [vmem:[%s3274_s5 + $0x8b8] sm:$0xff] }
 0x13f   : > { %1830 = vmatprep.subr.mxu0 %v888_v33  ;;  %1660 = vmatprep.subr.mxu1 %v918_v7  ;;  %v1039_v2 = vld [vmem:[%s3274_s5 + $0x7f0] sm:$0xff]  ;;  %v1032_v4 = vld [vmem:[%s3274_s5 + $0x7b8] sm:$0xff] }
 0x140   : > { %1831 = vmatpush1.msra.mxu0 %v887_v53  ;;  %1661 = vmatpush2.msra.mxu1 %v917_v9  ;;  %v1031_v33 = vld [vmem:[%s3274_s5 + $0x7b0] sm:$0xff]  ;;  %v1024_v7 = vld [vmem:[%s3274_s5 + $0x778] sm:$0xff] }
 0x141   : > { %1662 = vmatprep.mubr.f32.mxu1 %v3709_v16  ;;  %1832 = vmatprep.subr.mxu0 %v880_v11  ;;  %v1023_v53 = vld [vmem:[%s3274_s5 + $0x770] sm:$0xff]  ;;  %v1016_v9 = vld [vmem:[%s3274_s5 + $0x738] sm:$0xff] }
 0x142   : > { %1663 = vmatmul.mubr.f32.vlgmr.msra.gmra.mxu1 %v3454_v45  ;;  %1833 = vmatpush1.msra.mxu0 %v879_v12  ;;  %v1015_v11 = vld [vmem:[%s3274_s5 + $0x730] sm:$0xff]  ;;  %v1008_v12 = vld [vmem:[%s3274_s5 + $0x6f8] sm:$0xff] }
 0x143   : > { %1088 = vperm.xlu0 %2590, %v1074_v13   ;;  %1834 = vmatprep.subr.mxu0 %v872_v14  ;;  %v1007_v13 = vld [vmem:[%s3274_s5 + $0x6f0] sm:$0xff]  ;;  %v1000_v14 = vld [vmem:[%s3274_s5 + $0x6b8] sm:$0xff] }
 0x144   : > { %1835 = vmatpush1.msra.mxu0 %v871_v18  ;;  %1093 = vperm.xlu1 %2591, %v1075_v21   ;;  %v999_v18 = vld [vmem:[%s3274_s5 + $0x6b0] sm:$0xff]  ;;  %v992_v21 = vld [vmem:[%s3274_s5 + $0x678] sm:$0xff] }
 0x145   : > { %1836 = vmatprep.subr.mxu0 %v864_v20  ;;  %1668 = vmatprep.mubr.f32.mxu1 %v3471_v52  ;;  %v1056_v20 = vld [vmem:[%s3274_s5 + $0x878] sm:$0xff] }
 0x146   : > { %1837 = vmatpush1.msra.mxu0 %v863_v22  ;;  %1669 = vmatmul.mubr.f32.gmra.mxu1 %v3479_v55  ;;  %v991_v22 = vld [vmem:[%s3274_s5 + $0x670] sm:$0xff] }
 0x147   : > { %1838 = vmatprep.subr.mxu0 %v856_v23  ;;  %1103 = vperm.xlu0 %2590, %v1077_v25   ;;  %v1055_v23 = vld [vmem:[%s3274_s5 + $0x870] sm:$0xff]  ;;  %v984_v25 = vld [vmem:[%s3274_s5 + $0x638] sm:$0xff] }
 0x148   : > { %1839 = vmatpush1.msra.mxu0 %v855_v27  ;;  %1098 = vperm.xlu1 %2591, %v1076_v30   ;;  %v983_v27 = vld [vmem:[%s3274_s5 + $0x630] sm:$0xff] }
 0x149   : > { %1840 = vmatprep.subr.mxu0 %v848_v29  ;;  %1781 = vmatprep.mubr.f32.mxu0 %v2620_v32  ;;  %v976_v29 = vld [vmem:[%s3274_s5 + $0x5f8] sm:$0xff]  ;;  %v975_v30 = vld [vmem:[%s3274_s5 + $0x5f0] sm:$0xff] }
 0x14a   : > { %1841 = vmatpush1.msra.mxu0 %v847_v43  ;;  %1674 = vmatprep.mubr.f32.mxu1 %v3491_v58  ;;  %v968_v43 = vld [vmem:[%s3274_s5 + $0x5b8] sm:$0xff] }
 0x14b   : > { %1842 = vmatprep.subr.mxu0 %v840_v31  ;;  %1113 = vperm.xlu0 %2590, %v1079_v35   ;;  %v967_v31 = vld [vmem:[%s3274_s5 + $0x5b0] sm:$0xff]  ;;  %v1048_v35 = vld [vmem:[%s3274_s5 + $0x838] sm:$0xff] }
 0x14c   : > { %1843 = vmatpush1.msra.mxu0 %v839_v37  ;;  %1108 = vperm.xlu1 %2591, %v1078_v40   ;;  %v960_v37 = vld [vmem:[%s3274_s5 + $0x578] sm:$0xff]  ;;  %v1047_v40 = vld [vmem:[%s3274_s5 + $0x830] sm:$0xff] }
 0x14d   : > { %1844 = vmatprep.subr.mxu0 %v832_v38  ;;  %1961 = vmatprep.subr.mxu1 %v1072_v44  ;;  %v959_v38 = vld [vmem:[%s3274_s5 + $0x570] sm:$0xff] }
 0x14e   : > { %1845 = vmatpush1.msra.mxu0 %v831_v42  ;;  %1675 = vmatmul.mubr.f32.gmra.mxu1 %v3500_v61  ;;  %v952_v42 = vld [vmem:[%s3274_s5 + $0x538] sm:$0xff]  ;;  %v951_v44 = vld [vmem:[%s3274_s5 + $0x530] sm:$0xff] }
 0x14f   : > { %1846 = vmatprep.subr.mxu0 %v824_v46  ;;  %2540 = vmatmul.mubr.msk.f32.gmra.mxu0 %vm1121_vm0, %v3377_v1  ;;  %v792_v1 = vld [vmem:[%s3274_s5 + $0x38] sm:$0xff] }
 0x150   : > { %1847 = vmatpush1.msra.mxu0 %v823_v47  ;;  %1118 = vperm.xlu1 %2591, %v1080_v50   ;;  %v944_v46 = vld [vmem:[%s3274_s5 + $0x4f8] sm:$0xff]  ;;  %v943_v47 = vld [vmem:[%s3274_s5 + $0x4f0] sm:$0xff] }
 0x151   : > { %1848 = vmatprep.subr.mxu0 %v816_v49  ;;  %1962 = vmatpush1.msra.mxu1 %v1071_v54  ;;  %v936_v49 = vld [vmem:[%s3274_s5 + $0x4b8] sm:$0xff]  ;;  %v935_v50 = vld [vmem:[%s3274_s5 + $0x4b0] sm:$0xff] }
 0x152   : > { %1849 = vmatpush1.msra.mxu0 %v815_v51  ;;  %1787 = vmatprep.mubr.f32.mxu0 %v2620_v32  ;;  %v2593_v51 = vld [vmem:[%s4196_s0 + $0x10] sm:$0xff]  ;;  %v928_v54 = vld [vmem:[%s3274_s5 + $0x478] sm:$0xff] }
 0x153   : > { %1850 = vmatprep.subr.mxu0 %v808_v56  ;;  %1680 = vmatprep.mubr.f32.mxu1 %v3516_v5  ;;  %v927_v56 = vld [vmem:[%s3274_s5 + $0x470] sm:$0xff] }
 0x154   : > { %1851 = vmatpush1.msra.mxu0 %v807_v59  ;;  %1681 = vmatmul.mubr.f32.gmra.mxu1 %v3523_v6  ;;  %v919_v59 = vld [vmem:[%s3274_s5 + $0x430] sm:$0xff] }
 0x155   : > { %1852 = vmatprep.subr.mxu0 %v800_v60  ;;  %2541 = vmatmul.mubr.msk.f32.gmra.mxu0 %vm1121_vm0, %v3393_v10  ;;  %v1063_v10 = vld [vmem:[%s3274_s5 + $0x8b0] sm:$0xff]  ;;  %v2594_v60 = vld [vmem:[%s4196_s0 + $0x28] sm:$0xff] }
 0x156   : > { %1853 = vmatpush1.msra.mxu0 %v799_v62  ;;  %1793 = vmatprep.mubr.f32.mxu0 %v2620_v32  ;;  %v2595_v62 = vld [vmem:[%s4196_s0 + $0x40] sm:$0xff] }
 0x157   : > { %1854 = vmatprep.subr.mxu0 %v792_v1  ;;  %1686 = vmatprep.mubr.f32.mxu1 %v3529_v8 }
 0x158   : > { %1855 = vmatpush1.msra.mxu0 %v791_v63  ;;  %1963 = vmatprep.subr.mxu1 %v1064_v3 }
 0x159   : > { %1856 = vmatprep.subr.mxu0 %v1040_v0  ;;  %2542 = vmatmul.mubr.msk.f32.gmra.mxu0 %vm1121_vm0, %v3409_v19 }
 0x15a   : > { %1857 = vmatpush2.msra.mxu0 %v1039_v2  ;;  %1687 = vmatmul.mubr.f32.gmra.mxu1 %v3542_v15 }
 0x15b   : > { %1858 = vmatprep.subr.mxu0 %v1032_v4  ;;  %1964 = vmatpush1.msra.mxu1 %v1063_v10 }
 0x15c   : > { %1859 = vmatpush2.msra.mxu0 %v1031_v33  ;;  %1799 = vmatprep.mubr.f32.mxu0 %v2620_v32 }
 0x15d   : > { %1860 = vmatprep.subr.mxu0 %v1024_v7  ;;  %1692 = vmatprep.mubr.f32.mxu1 %v3548_v17 }
 0x15e   : > { %1861 = vmatpush2.msra.mxu0 %v1023_v53  ;;  %1693 = vmatmul.mubr.f32.gmra.mxu1 %v3560_v24 }
 0x15f   : > { %1862 = vmatprep.subr.mxu0 %v1016_v9  ;;  %2543 = vmatmul.mubr.msk.f32.gmra.mxu0 %vm1121_vm0, %v3425_v28 }
 0x160   : > { %1863 = vmatpush2.msra.mxu0 %v1015_v11  ;;  %1805 = vmatprep.mubr.f32.mxu0 %v2620_v32 }
 0x161   : > { %1864 = vmatprep.subr.mxu0 %v1008_v12  ;;  %1698 = vmatprep.mubr.f32.mxu1 %v3566_v26 }
 0x162   : > { %1865 = vmatpush2.msra.mxu0 %v1007_v13  ;;  %1965 = vmatprep.subr.mxu1 %v1056_v20 }
 0x163   : > { %1866 = vmatprep.subr.mxu0 %v1000_v14  ;;  %2544 = vmatmul.mubr.msk.f32.gmra.mxu0 %vm1121_vm0, %v3441_v39 }
 0x164   : > { %1867 = vmatpush2.msra.mxu0 %v999_v18  ;;  %1699 = vmatmul.mubr.f32.gmra.mxu1 %v3577_v34 }
 0x165   : > { %1868 = vmatprep.subr.mxu0 %v992_v21  ;;  %1966 = vmatpush1.msra.mxu1 %v1055_v23 }
 0x166   : > { %1869 = vmatpush2.msra.mxu0 %v991_v22  ;;  %1811 = vmatprep.mubr.f32.mxu0 %v2620_v32 }
 0x167   : > { %1870 = vmatprep.subr.mxu0 %v984_v25  ;;  %1704 = vmatprep.mubr.f32.mxu1 %v3583_v36 }
 0x168   : > { %1871 = vmatpush2.msra.mxu0 %v983_v27  ;;  %1705 = vmatmul.mubr.f32.gmra.mxu1 %v3594_v41 }
 0x169   : > { %1872 = vmatprep.subr.mxu0 %v976_v29  ;;  %2545 = vmatmul.mubr.msk.f32.gmra.mxu0 %vm1121_vm0, %v3461_v48 }
 0x16a   : > { %1873 = vmatpush2.msra.mxu0 %v975_v30  ;;  %1817 = vmatprep.mubr.f32.mxu0 %v2620_v32 }
 0x16b   : > { %1874 = vmatprep.subr.mxu0 %v968_v43  ;;  %1967 = vmatprep.subr.mxu1 %v1048_v35 }
 0x16c   : > { %1875 = vmatpush2.msra.mxu0 %v967_v31  ;;  %1968 = vmatpush1.msra.mxu1 %v1047_v40 }
 0x16d   : > { %1876 = vmatprep.subr.mxu0 %v960_v37  ;;  %2546 = vmatmul.mubr.msk.f32.gmra.mxu0 %vm1121_vm0, %v3486_v57 }
 0x16e   : > { %1877 = vmatpush2.msra.mxu0 %v959_v38  ;;  %1888 = vmatprep.mubr.f32.mxu0 %v3709_v16  ;;  %v920_v16 = vld [vmem:[%s3274_s5 + $0x438] sm:$0xff]  ;;  %s2522_s5 = sshll.u32 %s737_s28, 9 }
 0x16f   : > { %1878 = vmatprep.subr.mxu0 %v952_v42  ;;  %2001 = vmatprep.mubr.f32.mxu1 %v2620_v32  ;;  %s3892_s30 = scalar_lea.vmem [#allocation3], %s2522_s5 }
 0x170   : > { %1879 = vmatpush2.msra.mxu0 %v951_v44  ;;  %2547 = vmatmul.mubr.msk.f32.vlgmr.msra.gmra.mxu1 %vm1121_vm0, %v2593_v51 }
 0x171   : > { %1880 = vmatprep.subr.mxu0 %v944_v46  ;;  %2007 = vmatprep.mubr.f32.mxu1 %v2620_v32 }
 0x172   : > { %1881 = vmatpush2.msra.mxu0 %v943_v47 }
 0x173   : > { %1882 = vmatprep.subr.mxu0 %v936_v49 }
 0x174   : > { %1883 = vmatpush2.msra.mxu0 %v935_v50  ;;  %2548 = vmatmul.mubr.msk.f32.gmra.mxu1 %vm1121_vm0, %v2594_v60 }
 0x175   : > { %1884 = vmatprep.subr.mxu0 %v928_v54  ;;  %2013 = vmatprep.mubr.f32.mxu1 %v2620_v32 }
 0x176   : > { %1885 = vmatpush2.msra.mxu0 %v927_v56 }
 0x177   : > { %1886 = vmatprep.subr.mxu0 %v920_v16 }
 0x178   : > { %1887 = vmatpush2.msra.mxu0 %v919_v59  ;;  %2549 = vmatmul.mubr.msk.f32.gmra.mxu1 %vm1121_vm0, %v2595_v62 }
 0x179   : > { %1889 = vmatmul.mubr.f32.vlgmr.msra.gmra.mxu0 %v3454_v45  ;;  %2019 = vmatprep.mubr.f32.mxu1 %v2620_v32 }
 0x17a   : > { %1894 = vmatprep.mubr.f32.mxu0 %v3471_v52 }
 0x17c   : > { %2550 = vmatmul.mubr.msk.f32.gmra.mxu1 %vm1121_vm0, %v3409_v19  ;;  %v1325_v19 = vpop.f32.mrf.mxu1 }
 0x17d   : > { %1895 = vmatmul.mubr.f32.gmra.mxu0 %v3479_v55  ;;  %2025 = vmatprep.mubr.f32.mxu1 %v2620_v32 }
 0x17e   : > { %1900 = vmatprep.mubr.f32.mxu0 %v3491_v58 }
 0x180   : > { %2551 = vmatmul.mubr.msk.f32.gmra.mxu1 %vm1121_vm0, %v3425_v28  ;;  %v1327_v28 = vpop.f32.mrf.mxu1 }
 0x181   : > { %1901 = vmatmul.mubr.f32.gmra.mxu0 %v3500_v61  ;;  %2031 = vmatprep.mubr.f32.mxu1 %v2620_v32 }
 0x182   : > { %1906 = vmatprep.mubr.f32.mxu0 %v3516_v5 }
 0x184   : > { %2552 = vmatmul.mubr.msk.f32.gmra.mxu1 %vm1121_vm0, %v3441_v39 }
 0x185   : > { %1907 = vmatmul.mubr.f32.gmra.mxu0 %v3523_v6  ;;  %2037 = vmatprep.mubr.f32.mxu1 %v2620_v32 }
 0x186   : > { %1912 = vmatprep.mubr.f32.mxu0 %v3529_v8 }
 0x188   : > { %2553 = vmatmul.mubr.msk.f32.gmra.mxu1 %vm1121_vm0, %v3461_v48 }
 0x189   : > { %1913 = vmatmul.mubr.f32.gmra.mxu0 %v3542_v15  ;;  %2043 = vmatprep.mubr.f32.mxu1 %v2620_v32 }
 0x18a   : > { %1918 = vmatprep.mubr.f32.mxu0 %v3548_v17 }
 0x18c   : > { %2554 = vmatmul.mubr.msk.f32.gmra.mxu1 %vm1121_vm0, %v3486_v57 }
 0x18d   : > { %1919 = vmatmul.mubr.f32.gmra.mxu0 %v3560_v24 }
 0x18e   : > { %1924 = vmatprep.mubr.f32.mxu0 %v3566_v26 }
 0x191   : > { %1925 = vmatmul.mubr.f32.gmra.mxu0 %v3577_v34 }
 0x192   : > { %1930 = vmatprep.mubr.f32.mxu0 %v3583_v36 }
 0x195   : > { %1931 = vmatmul.mubr.f32.gmra.mxu0 %v3594_v41 }
 0x19e   : > { %v1331_v39 = vpop.f32.mrf.mxu1 }
 0x1a0   : > { %v1333_v45 = vpop.f32.mrf.mxu1 }
 0x1a3   : > { %v1337_v48 = vpop.f32.mrf.mxu1 }
 0x1a5   : > { %v1339_v32 = vpop.f32.mrf.mxu1 }
 0x1a8   : > { %v1343_v52 = vpop.f32.mrf.mxu1 }
 0x1aa   : > { %v3874_v55 = vpop.f32.mrf.mxu1 }
 0x1ad   : > { %v3876_v58 = vpop.f32.mrf.mxu1 }
 0x1af   : > { %v3878_v57 = vpop.f32.mrf.mxu1 }
 0x1b2   : > { %v3880_v61 = vpop.f32.mrf.mxu1 }
 0x1b3   : > { %v3882_v5 = vpop.permute.xlu0 %1083 }
 0x1b4   : > { %v1212_v6 = vpop.f32.mrf.mxu0  ;;  %v3884_v8 = vpop.f32.mrf.mxu1 }
 0x1b5   : > { %v1213_v15 = vadd.f32 %v1212_v6, %v3882_v5 }
 0x1b6   : > { %v1214_v17 = vpop.f32.mrf.mxu0 }
 0x1b7   : > { %v1326_v24 = vadd.f32 %v1325_v19, %v1213_v15  ;;  %v1215_v26 = vadd.f32 %v1214_v17, %v3882_v5  ;;  %v3890_v34 = vpop.f32.mrf.mxu1 }
 0x1b9   : > { %vm2050_vm1 = vcmp.ge.f32.partialorder %v1326_v24, 0.0  ;;  %v2114_v36 = vmul.f32 0.01, %v1326_v24  ;;  %v1328_v41 = vadd.f32 %v1327_v28, %v1215_v26  ;;  %v1218_v1 = vpop.f32.mrf.mxu0  ;;  %v3895_v3 = vpop.f32.mrf.mxu1 }
 0x1bb   : > { %v2178_v63 = vsel %vm2050_vm1, %v1326_v24, %v2114_v36  ;;  %vm2051_vm2 = vcmp.ge.f32.partialorder %v1328_v41, 0.0  ;;  %v2115_v0 = vmul.f32 0.01, %v1328_v41  ;;  %v1220_v2 = vpop.f32.mrf.mxu0  ;;  %v3906_v20 = vpop.f32.mrf.mxu1 }
 0x1bc   : > { %2242 = vst [vmem:[%s3892_s30] sm:$0xff] %v2178_v63 }
 0x1bd   : > { %v2179_v4 = vsel %vm2051_vm2, %v1328_v41, %v2115_v0  ;;  %v3915_v42 = vpop.f32.mrf.mxu1 }
 0x1be   : > { %v3897_v33 = vpop.permute.xlu0 %1088  ;;  %v1224_v10 = vpop.f32.mrf.mxu0  ;;  %2243 = vst [vmem:[%s3892_s30 + $0x8] sm:$0xff] %v2179_v4 }
 0x1bf   : > { %v1219_v7 = vadd.f32 %v1218_v1, %v3897_v33  ;;  %v1221_v53 = vadd.f32 %v1220_v2, %v3897_v33  ;;  %v3902_v9 = vpop.permute.xlu1 %1093 }
 0x1c0   : > { %v1226_v11 = vpop.f32.mrf.mxu0  ;;  %v1225_v14 = vadd.f32 %v1224_v10, %v3902_v9  ;;  %v1438_v19 = vpop.f32.mrf.mxu1 }
 0x1c1   : > { %v1332_v12 = vadd.f32 %v1331_v39, %v1219_v7  ;;  %v1334_v13 = vadd.f32 %v1333_v45, %v1221_v53  ;;  %v1227_v18 = vadd.f32 %v1226_v11, %v3902_v9 }
 0x1c2   : > { %v1230_v23 = vpop.f32.mrf.mxu0  ;;  %v1338_v25 = vadd.f32 %v1337_v48, %v1225_v14  ;;  %v3911_v37 = vpop.permute.xlu0 %1103 }
 0x1c3   : > { %vm2058_vm3 = vcmp.ge.f32.partialorder %v1332_v12, 0.0  ;;  %v2122_v21 = vmul.f32 0.01, %v1332_v12  ;;  %vm2059_vm4 = vcmp.ge.f32.partialorder %v1334_v13, 0.0  ;;  %v2123_v22 = vmul.f32 0.01, %v1334_v13  ;;  %v3908_v29 = vpop.permute.xlu1 %1098  ;;  %v1440_v26 = vpop.f32.mrf.mxu1 }
 0x1c4   : > { %v1340_v27 = vadd.f32 %v1339_v32, %v1227_v18  ;;  %v1231_v31 = vadd.f32 %v1230_v23, %v3908_v29  ;;  %v1232_v35 = vpop.f32.mrf.mxu0  ;;  %vm2066_vm5 = vcmp.ge.f32.partialorder %v1338_v25, 0.0  ;;  %v2130_v38 = vmul.f32 0.01, %v1338_v25 }
 0x1c5   : > { %v2186_v30 = vsel %vm2058_vm3, %v1332_v12, %v2122_v21  ;;  %v2187_v43 = vsel %vm2059_vm4, %v1334_v13, %v2123_v22  ;;  %v1233_v46 = vadd.f32 %v1232_v35, %v3908_v29  ;;  %v1439_v13 = vadd.f32 %v1438_v19, %v3882_v5 }
 0x1c6   : > { %2250 = vst [vmem:[%s3892_s30 + $0x40] sm:$0xff] %v2186_v30  ;;  %2251 = vst [vmem:[%s3892_s30 + $0x48] sm:$0xff] %v2187_v43  ;;  %vm2067_vm6 = vcmp.ge.f32.partialorder %v1340_v27, 0.0  ;;  %v2131_v40 = vmul.f32 0.01, %v1340_v27  ;;  %v1344_v44 = vadd.f32 %v1343_v52, %v1231_v31  ;;  %v1236_v47 = vpop.f32.mrf.mxu0  ;;  %v2194_v49 = vsel %vm2066_vm5, %v1338_v25, %v2130_v38  ;;  %v3929_v15 = vpop.permute.xlu0 %1113 }
 0x1c7   : > { %v1237_v51 = vadd.f32 %v1236_v47, %v3911_v37  ;;  %2258 = vst [vmem:[%s3892_s30 + $0x80] sm:$0xff] %v2194_v49  ;;  %v1346_v56 = vadd.f32 %v3874_v55, %v1233_v46  ;;  %v3922_v59 = vpop.permute.xlu1 %1108  ;;  %v1441_v23 = vadd.f32 %v1440_v26, %v3882_v5 }
 0x1c8   : > { %v2195_v50 = vsel %vm2067_vm6, %v1340_v27, %v2131_v40  ;;  %vm2074_vm7 = vcmp.ge.f32.partialorder %v1344_v44, 0.0  ;;  %v2138_v54 = vmul.f32 0.01, %v1344_v44  ;;  %v1238_v16 = vpop.f32.mrf.mxu0 }
 0x1c9   : > { %2259 = vst [vmem:[%s3892_s30 + $0x88] sm:$0xff] %v2195_v50  ;;  %v1350_v60 = vadd.f32 %v3876_v58, %v1237_v51  ;;  %v1239_v62 = vadd.f32 %v1238_v16, %v3911_v37  ;;  %vm2075_vm8 = vcmp.ge.f32.partialorder %v1346_v56, 0.0  ;;  %v2139_v39 = vmul.f32 0.01, %v1346_v56 }
 0x1ca   : > { %v2202_v28 = vsel %vm2074_vm7, %v1344_v44, %v2138_v54  ;;  %v1242_v45 = vpop.f32.mrf.mxu0 }
 0x1cb   : > { %2266 = vst [vmem:[%s3892_s30 + $0xc0] sm:$0xff] %v2202_v28  ;;  %vm2082_vm9 = vcmp.ge.f32.partialorder %v1350_v60, 0.0  ;;  %v2146_v48 = vmul.f32 0.01, %v1350_v60  ;;  %v1352_v32 = vadd.f32 %v3878_v57, %v1239_v62  ;;  %v1243_v52 = vadd.f32 %v1242_v45, %v3922_v59  ;;  %v3938_v4 = vpop.permute.xlu1 %1118 }
 0x1cc   : > { %v2203_v55 = vsel %vm2075_vm8, %v1346_v56, %v2139_v39  ;;  %v1244_v6 = vpop.f32.mrf.mxu0 }
 0x1cd   : > { %2267 = vst [vmem:[%s3892_s30 + $0xc8] sm:$0xff] %v2203_v55  ;;  %v2210_v58 = vsel %vm2082_vm9, %v1350_v60, %v2146_v48  ;;  %vm2083_vm10 = vcmp.ge.f32.partialorder %v1352_v32, 0.0  ;;  %v2147_v17 = vmul.f32 0.01, %v1352_v32  ;;  %v1356_v24 = vadd.f32 %v3880_v61, %v1243_v52 }
 0x1ce   : > { %2274 = vst [vmem:[%s3892_s30 + $0x100] sm:$0xff] %v2210_v58  ;;  %v1245_v36 = vadd.f32 %v1244_v6, %v3922_v59  ;;  %v1248_v41 = vpop.f32.mrf.mxu0 }
 0x1cf   : > { %v2211_v57 = vsel %vm2083_vm10, %v1352_v32, %v2147_v17  ;;  %vm2090_vm11 = vcmp.ge.f32.partialorder %v1356_v24, 0.0  ;;  %v2154_v1 = vmul.f32 0.01, %v1356_v24  ;;  %v1249_v63 = vadd.f32 %v1248_v41, %v3929_v15 }
 0x1d0   : > { %2275 = vst [vmem:[%s3892_s30 + $0x108] sm:$0xff] %v2211_v57  ;;  %v1358_v0 = vadd.f32 %v3884_v8, %v1245_v36  ;;  %v1250_v2 = vpop.f32.mrf.mxu0 }
 0x1d1   : > { %v2218_v10 = vsel %vm2090_vm11, %v1356_v24, %v2154_v1  ;;  %v1362_v61 = vadd.f32 %v3890_v34, %v1249_v63  ;;  %v1251_v7 = vadd.f32 %v1250_v2, %v3929_v15 }
 0x1d2   : > { %v1444_v53 = vpop.f32.mrf.mxu1  ;;  %2282 = vst [vmem:[%s3892_s30 + $0x140] sm:$0xff] %v2218_v10  ;;  %vm2091_vm12 = vcmp.ge.f32.partialorder %v1358_v0, 0.0  ;;  %v2155_v11 = vmul.f32 0.01, %v1358_v0 }
 0x1d3   : > { %v1254_v12 = vpop.f32.mrf.mxu0  ;;  %vm2098_vm13 = vcmp.ge.f32.partialorder %v1362_v61, 0.0  ;;  %v2162_v14 = vmul.f32 0.01, %v1362_v61  ;;  %v1364_v8 = vadd.f32 %v3895_v3, %v1251_v7  ;;  %v1445_v35 = vadd.f32 %v1444_v53, %v3897_v33 }
 0x1d4   : > { %v1255_v18 = vadd.f32 %v1254_v12, %v3938_v4  ;;  %v1446_v21 = vpop.f32.mrf.mxu1  ;;  %v2219_v22 = vsel %vm2091_vm12, %v1358_v0, %v2155_v11 }
 0x1d5   : > { %v1256_v34 = vpop.f32.mrf.mxu0  ;;  %2283 = vst [vmem:[%s3892_s30 + $0x148] sm:$0xff] %v2219_v22  ;;  %v2226_v25 = vsel %vm2098_vm13, %v1362_v61, %v2162_v14  ;;  %vm2099_vm14 = vcmp.ge.f32.partialorder %v1364_v8, 0.0  ;;  %v2163_v27 = vmul.f32 0.01, %v1364_v8  ;;  %v1447_v49 = vadd.f32 %v1446_v21, %v3897_v33 }
 0x1d6   : > { %v1368_v30 = vadd.f32 %v3906_v20, %v1255_v18  ;;  %v1450_v43 = vpop.f32.mrf.mxu1  ;;  %2290 = vst [vmem:[%s3892_s30 + $0x180] sm:$0xff] %v2226_v25  ;;  %v1257_v31 = vadd.f32 %v1256_v34, %v3938_v4 }
 0x1d7   : > { %v1551_v3 = vpop.f32.mrf.mxu0  ;;  %v2227_v38 = vsel %vm2099_vm14, %v1364_v8, %v2163_v27  ;;  %v1451_v60 = vadd.f32 %v1450_v43, %v3902_v9 }
 0x1d8   : > { %vm2106_vm15 = vcmp.ge.f32.partialorder %v1368_v30, 0.0  ;;  %v2170_v40 = vmul.f32 0.01, %v1368_v30  ;;  %v1552_v44 = vadd.f32 %v1551_v3, %v1439_v13  ;;  %2291 = vst [vmem:[%s3892_s30 + $0x188] sm:$0xff] %v2227_v38  ;;  %v1370_v46 = vadd.f32 %v3915_v42, %v1257_v31  ;;  %v1452_v54 = vpop.f32.mrf.mxu1 }
 0x1d9   : > { %v1553_v47 = vpop.f32.mrf.mxu0  ;;  %v1453_v45 = vadd.f32 %v1452_v54, %v3902_v9 }
 0x1da   : > { %v2234_v20 = vsel %vm2106_vm15, %v1368_v30, %v2170_v40  ;;  %vm2052_vm0 = vcmp.ge.f32.partialorder %v1552_v44, 0.0  ;;  %v2116_v50 = vmul.f32 0.01, %v1552_v44  ;;  %v1554_v51 = vadd.f32 %v1553_v47, %v1441_v23 }
 0x1db   : > { %2298 = vst [vmem:[%s3892_s30 + $0x1c0] sm:$0xff] %v2234_v20  ;;  %vm2107_vm1 = vcmp.ge.f32.partialorder %v1370_v46, 0.0  ;;  %v2171_v56 = vmul.f32 0.01, %v1370_v46  ;;  %v1557_v16 = vpop.f32.mrf.mxu0 }
 0x1dc   : > { %v2180_v62 = vsel %vm2052_vm0, %v1552_v44, %v2116_v50  ;;  %vm2053_vm2 = vcmp.ge.f32.partialorder %v1554_v51, 0.0  ;;  %v2117_v42 = vmul.f32 0.01, %v1554_v51  ;;  %v1558_v19 = vadd.f32 %v1557_v16, %v1445_v35 }
 0x1dd   : > { %v2235_v28 = vsel %vm2107_vm1, %v1370_v46, %v2171_v56  ;;  %2244 = vst [vmem:[%s3892_s30 + $0x10] sm:$0xff] %v2180_v62  ;;  %v1559_v39 = vpop.f32.mrf.mxu0 }
 0x1de   : > { %2299 = vst [vmem:[%s3892_s30 + $0x1c8] sm:$0xff] %v2235_v28  ;;  %v2181_v48 = vsel %vm2053_vm2, %v1554_v51, %v2117_v42  ;;  %vm2060_vm3 = vcmp.ge.f32.partialorder %v1558_v19, 0.0  ;;  %v2124_v32 = vmul.f32 0.01, %v1558_v19  ;;  %v1560_v52 = vadd.f32 %v1559_v39, %v1447_v49 }
 0x1df   : > { %2245 = vst [vmem:[%s3892_s30 + $0x18] sm:$0xff] %v2181_v48  ;;  %v1563_v55 = vpop.f32.mrf.mxu0 }
 0x1e0   : > { %v2188_v6 = vsel %vm2060_vm3, %v1558_v19, %v2124_v32  ;;  %vm2061_vm4 = vcmp.ge.f32.partialorder %v1560_v52, 0.0  ;;  %v2125_v58 = vmul.f32 0.01, %v1560_v52  ;;  %v1564_v17 = vadd.f32 %v1563_v55, %v1451_v60  ;;  %v1456_v24 = vpop.f32.mrf.mxu1 }
 0x1e1   : > { %2252 = vst [vmem:[%s3892_s30 + $0x50] sm:$0xff] %v2188_v6  ;;  %v1457_v26 = vadd.f32 %v1456_v24, %v3908_v29  ;;  %v1565_v36 = vpop.f32.mrf.mxu0 }
 0x1e2   : > { %v2189_v41 = vsel %vm2061_vm4, %v1560_v52, %v2125_v58  ;;  %vm2068_vm5 = vcmp.ge.f32.partialorder %v1564_v17, 0.0  ;;  %v2132_v57 = vmul.f32 0.01, %v1564_v17  ;;  %v1566_v1 = vadd.f32 %v1565_v36, %v1453_v45  ;;  %v1458_v63 = vpop.f32.mrf.mxu1 }
 0x1e3   : > { %2253 = vst [vmem:[%s3892_s30 + $0x58] sm:$0xff] %v2189_v41  ;;  %v1459_v0 = vadd.f32 %v1458_v63, %v3908_v29  ;;  %v1569_v2 = vpop.f32.mrf.mxu0 }
 0x1e4   : > { %v2196_v10 = vsel %vm2068_vm5, %v1564_v17, %v2132_v57  ;;  %vm2069_vm6 = vcmp.ge.f32.partialorder %v1566_v1, 0.0  ;;  %v2133_v61 = vmul.f32 0.01, %v1566_v1  ;;  %v1570_v7 = vadd.f32 %v1569_v2, %v1457_v26  ;;  %v1462_v53 = vpop.f32.mrf.mxu1 }
 0x1e5   : > { %2260 = vst [vmem:[%s3892_s30 + $0x90] sm:$0xff] %v2196_v10  ;;  %v1463_v11 = vadd.f32 %v1462_v53, %v3911_v37  ;;  %v1571_v12 = vpop.f32.mrf.mxu0 }
 0x1e6   : > { %v2197_v13 = vsel %vm2069_vm6, %v1566_v1, %v2133_v61  ;;  %vm2076_vm7 = vcmp.ge.f32.partialorder %v1570_v7, 0.0  ;;  %v2140_v14 = vmul.f32 0.01, %v1570_v7  ;;  %v1572_v8 = vadd.f32 %v1571_v12, %v1459_v0  ;;  %v1464_v18 = vpop.f32.mrf.mxu1 }
 0x1e7   : > { %2261 = vst [vmem:[%s3892_s30 + $0x98] sm:$0xff] %v2197_v13  ;;  %v1465_v21 = vadd.f32 %v1464_v18, %v3911_v37  ;;  %v1575_v22 = vpop.f32.mrf.mxu0 }
 0x1e8   : > { %v2204_v34 = vsel %vm2076_vm7, %v1570_v7, %v2140_v14  ;;  %vm2077_vm8 = vcmp.ge.f32.partialorder %v1572_v8, 0.0  ;;  %v2141_v23 = vmul.f32 0.01, %v1572_v8  ;;  %v1576_v25 = vadd.f32 %v1575_v22, %v1463_v11 }
 0x1e9   : > { %2268 = vst [vmem:[%s3892_s30 + $0xd0] sm:$0xff] %v2204_v34  ;;  %v1577_v27 = vpop.f32.mrf.mxu0 }
 0x1ea   : > { %v2205_v30 = vsel %vm2077_vm8, %v1572_v8, %v2141_v23  ;;  %vm2084_vm9 = vcmp.ge.f32.partialorder %v1576_v25, 0.0  ;;  %v2148_v43 = vmul.f32 0.01, %v1576_v25  ;;  %v1468_v31 = vpop.f32.mrf.mxu1  ;;  %v1578_v3 = vadd.f32 %v1577_v27, %v1465_v21 }
 0x1eb   : > { %2269 = vst [vmem:[%s3892_s30 + $0xd8] sm:$0xff] %v2205_v30  ;;  %v1469_v35 = vadd.f32 %v1468_v31, %v3922_v59 }
 0x1ec   : > { %v2212_v38 = vsel %vm2084_vm9, %v1576_v25, %v2148_v43  ;;  %vm2085_vm10 = vcmp.ge.f32.partialorder %v1578_v3, 0.0  ;;  %v2149_v40 = vmul.f32 0.01, %v1578_v3  ;;  %v1470_v44 = vpop.f32.mrf.mxu1  ;;  %v1581_v46 = vpop.f32.mrf.mxu0 }
 0x1ed   : > { %2276 = vst [vmem:[%s3892_s30 + $0x110] sm:$0xff] %v2212_v38  ;;  %v1471_v47 = vadd.f32 %v1470_v44, %v3922_v59  ;;  %v1582_v49 = vadd.f32 %v1581_v46, %v1469_v35 }
 0x1ee   : > { %v2213_v20 = vsel %vm2085_vm10, %v1578_v3, %v2149_v40  ;;  %v1474_v50 = vpop.f32.mrf.mxu1  ;;  %v1583_v51 = vpop.f32.mrf.mxu0 }
 0x1ef   : > { %2277 = vst [vmem:[%s3892_s30 + $0x118] sm:$0xff] %v2213_v20  ;;  %vm2092_vm11 = vcmp.ge.f32.partialorder %v1582_v49, 0.0  ;;  %v2156_v54 = vmul.f32 0.01, %v1582_v49  ;;  %v1475_v56 = vadd.f32 %v1474_v50, %v3929_v15  ;;  %v1584_v16 = vadd.f32 %v1583_v51, %v1471_v47 }
 0x1f0   : > { %v1476_v60 = vpop.f32.mrf.mxu1  ;;  %v1587_v62 = vpop.f32.mrf.mxu0 }
 0x1f1   : > { %v2220_v42 = vsel %vm2092_vm11, %v1582_v49, %v2156_v54  ;;  %vm2093_vm12 = vcmp.ge.f32.partialorder %v1584_v16, 0.0  ;;  %v2157_v19 = vmul.f32 0.01, %v1584_v16  ;;  %v1477_v28 = vadd.f32 %v1476_v60, %v3929_v15 }
 0x1f2   : > { %2284 = vst [vmem:[%s3892_s30 + $0x150] sm:$0xff] %v2220_v42  ;;  %v1588_v39 = vadd.f32 %v1587_v62, %v1475_v56  ;;  %v1589_v45 = vpop.f32.mrf.mxu0 }
 0x1f3   : > { %v2221_v48 = vsel %vm2093_vm12, %v1584_v16, %v2157_v19  ;;  %v1480_v32 = vpop.f32.mrf.mxu1  ;;  %v1590_v52 = vadd.f32 %v1589_v45, %v1477_v28 }
 0x1f4   : > { %2285 = vst [vmem:[%s3892_s30 + $0x158] sm:$0xff] %v2221_v48  ;;  %vm2100_vm13 = vcmp.ge.f32.partialorder %v1588_v39, 0.0  ;;  %v2164_v55 = vmul.f32 0.01, %v1588_v39  ;;  %v1481_v6 = vadd.f32 %v1480_v32, %v3938_v4 }
 0x1f5   : > { %vm2101_vm14 = vcmp.ge.f32.partialorder %v1590_v52, 0.0  ;;  %v2165_v58 = vmul.f32 0.01, %v1590_v52  ;;  %v1482_v17 = vpop.f32.mrf.mxu1  ;;  %v1593_v24 = vpop.f32.mrf.mxu0 }
 0x1f6   : > { %v2228_v26 = vsel %vm2100_vm13, %v1588_v39, %v2164_v55  ;;  %v1483_v36 = vadd.f32 %v1482_v17, %v3938_v4  ;;  %v1594_v41 = vadd.f32 %v1593_v24, %v1481_v6 }
 0x1f7   : > { %2292 = vst [vmem:[%s3892_s30 + $0x190] sm:$0xff] %v2228_v26  ;;  %v2229_v57 = vsel %vm2101_vm14, %v1590_v52, %v2165_v58  ;;  %v1595_v1 = vpop.f32.mrf.mxu0 }
 0x1f8   : > { %2293 = vst [vmem:[%s3892_s30 + $0x198] sm:$0xff] %v2229_v57  ;;  %vm2108_vm15 = vcmp.ge.f32.partialorder %v1594_v41, 0.0  ;;  %v2172_v63 = vmul.f32 0.01, %v1594_v41  ;;  %v1596_v0 = vadd.f32 %v1595_v1, %v1483_v36 }
 0x1f9   : > { %v1777_v7 = vpop.f32.mrf.mxu0 }
 0x1fa   : > { %v2236_v2 = vsel %vm2108_vm15, %v1594_v41, %v2172_v63  ;;  %vm2109_vm0 = vcmp.ge.f32.partialorder %v1596_v0, 0.0  ;;  %v2173_v10 = vmul.f32 0.01, %v1596_v0 }
 0x1fb   : > { %2300 = vst [vmem:[%s3892_s30 + $0x1d0] sm:$0xff] %v2236_v2  ;;  %v1779_v8 = vpop.f32.mrf.mxu0 }
 0x1fc   : > { %v2237_v61 = vsel %vm2109_vm0, %v1596_v0, %v2173_v10 }
 0x1fd   : > { %2301 = vst [vmem:[%s3892_s30 + $0x1d8] sm:$0xff] %v2237_v61 }
 0x202   : > { %v1664_v53 = vpop.f32.mrf.mxu1 }
 0x203   : > { %v1665_v11 = vadd.f32 %v1664_v53, %v3882_v5 }
 0x204   : > { %v1666_v12 = vpop.f32.mrf.mxu1 }
 0x205   : > { %v1778_v13 = vadd.f32 %v1777_v7, %v1665_v11  ;;  %v1667_v14 = vadd.f32 %v1666_v12, %v3882_v5 }
 0x206   : > { %v1670_v22 = vpop.f32.mrf.mxu1 }
 0x207   : > { %vm2054_vm1 = vcmp.ge.f32.partialorder %v1778_v13, 0.0  ;;  %v2118_v18 = vmul.f32 0.01, %v1778_v13  ;;  %v1780_v21 = vadd.f32 %v1779_v8, %v1667_v14  ;;  %v1671_v30 = vadd.f32 %v1670_v22, %v3897_v33 }
 0x208   : > { %v1672_v27 = vpop.f32.mrf.mxu1 }
 0x209   : > { %v2182_v34 = vsel %vm2054_vm1, %v1778_v13, %v2118_v18  ;;  %vm2055_vm2 = vcmp.ge.f32.partialorder %v1780_v21, 0.0  ;;  %v2119_v23 = vmul.f32 0.01, %v1780_v21  ;;  %v1673_v43 = vadd.f32 %v1672_v27, %v3897_v33 }
 0x20a   : > { %2246 = vst [vmem:[%s3892_s30 + $0x20] sm:$0xff] %v2182_v34 }
 0x20b   : > { %v2183_v25 = vsel %vm2055_vm2, %v1780_v21, %v2119_v23 }
 0x20c   : > { %2247 = vst [vmem:[%s3892_s30 + $0x28] sm:$0xff] %v2183_v25 }
 0x20e   : > { %v1676_v35 = vpop.f32.mrf.mxu1 }
 0x20f   : > { %v1783_v31 = vpop.f32.mrf.mxu0  ;;  %v1677_v44 = vadd.f32 %v1676_v35, %v3902_v9 }
 0x210   : > { %v1784_v3 = vadd.f32 %v1783_v31, %v1671_v30  ;;  %v1678_v47 = vpop.f32.mrf.mxu1 }
 0x211   : > { %v1785_v38 = vpop.f32.mrf.mxu0  ;;  %v1679_v50 = vadd.f32 %v1678_v47, %v3902_v9 }
 0x212   : > { %vm2062_vm3 = vcmp.ge.f32.partialorder %v1784_v3, 0.0  ;;  %v2126_v40 = vmul.f32 0.01, %v1784_v3  ;;  %v1786_v46 = vadd.f32 %v1785_v38, %v1673_v43 }
 0x214   : > { %v2190_v49 = vsel %vm2062_vm3, %v1784_v3, %v2126_v40  ;;  %vm2063_vm4 = vcmp.ge.f32.partialorder %v1786_v46, 0.0  ;;  %v2127_v20 = vmul.f32 0.01, %v1786_v46  ;;  %v1682_v16 = vpop.f32.mrf.mxu1 }
 0x215   : > { %2254 = vst [vmem:[%s3892_s30 + $0x60] sm:$0xff] %v2190_v49  ;;  %v1789_v51 = vpop.f32.mrf.mxu0  ;;  %v1683_v60 = vadd.f32 %v1682_v16, %v3908_v29 }
 0x216   : > { %v2191_v54 = vsel %vm2063_vm4, %v1786_v46, %v2127_v20  ;;  %v1790_v56 = vadd.f32 %v1789_v51, %v1677_v44  ;;  %v1684_v28 = vpop.f32.mrf.mxu1 }
 0x217   : > { %2255 = vst [vmem:[%s3892_s30 + $0x68] sm:$0xff] %v2191_v54  ;;  %v1791_v62 = vpop.f32.mrf.mxu0  ;;  %v1685_v39 = vadd.f32 %v1684_v28, %v3908_v29 }
 0x218   : > { %vm2070_vm5 = vcmp.ge.f32.partialorder %v1790_v56, 0.0  ;;  %v2134_v42 = vmul.f32 0.01, %v1790_v56  ;;  %v1792_v19 = vadd.f32 %v1791_v62, %v1679_v50 }
 0x219   : > { %v1795_v45 = vpop.f32.mrf.mxu0 }
 0x21a   : > { %v2198_v48 = vsel %vm2070_vm5, %v1790_v56, %v2134_v42  ;;  %vm2071_vm6 = vcmp.ge.f32.partialorder %v1792_v19, 0.0  ;;  %v2135_v32 = vmul.f32 0.01, %v1792_v19  ;;  %v1796_v52 = vadd.f32 %v1795_v45, %v1683_v60  ;;  %v1688_v55 = vpop.f32.mrf.mxu1 }
 0x21b   : > { %2262 = vst [vmem:[%s3892_s30 + $0xa0] sm:$0xff] %v2198_v48  ;;  %v1797_v6 = vpop.f32.mrf.mxu0  ;;  %v1689_v24 = vadd.f32 %v1688_v55, %v3911_v37 }
 0x21c   : > { %v2199_v58 = vsel %vm2071_vm6, %v1792_v19, %v2135_v32  ;;  %vm2078_vm7 = vcmp.ge.f32.partialorder %v1796_v52, 0.0  ;;  %v2142_v17 = vmul.f32 0.01, %v1796_v52  ;;  %v1798_v26 = vadd.f32 %v1797_v6, %v1685_v39  ;;  %v1690_v36 = vpop.f32.mrf.mxu1 }
 0x21d   : > { %2263 = vst [vmem:[%s3892_s30 + $0xa8] sm:$0xff] %v2199_v58  ;;  %v1691_v57 = vadd.f32 %v1690_v36, %v3911_v37 }
 0x21e   : > { %v2206_v41 = vsel %vm2078_vm7, %v1796_v52, %v2142_v17  ;;  %vm2079_vm8 = vcmp.ge.f32.partialorder %v1798_v26, 0.0  ;;  %v2143_v1 = vmul.f32 0.01, %v1798_v26  ;;  %v1694_v2 = vpop.f32.mrf.mxu1 }
 0x21f   : > { %2270 = vst [vmem:[%s3892_s30 + $0xe0] sm:$0xff] %v2206_v41  ;;  %v1801_v63 = vpop.f32.mrf.mxu0  ;;  %v1695_v61 = vadd.f32 %v1694_v2, %v3922_v59 }
 0x220   : > { %v1802_v0 = vadd.f32 %v1801_v63, %v1689_v24  ;;  %v2207_v10 = vsel %vm2079_vm8, %v1798_v26, %v2143_v1  ;;  %v1696_v12 = vpop.f32.mrf.mxu1 }
 0x221   : > { %v1803_v7 = vpop.f32.mrf.mxu0  ;;  %2271 = vst [vmem:[%s3892_s30 + $0xe8] sm:$0xff] %v2207_v10  ;;  %v1697_v13 = vadd.f32 %v1696_v12, %v3922_v59 }
 0x222   : > { %vm2086_vm9 = vcmp.ge.f32.partialorder %v1802_v0, 0.0  ;;  %v2150_v53 = vmul.f32 0.01, %v1802_v0  ;;  %v1804_v11 = vadd.f32 %v1803_v7, %v1691_v57 }
 0x223   : > { %v1807_v14 = vpop.f32.mrf.mxu0 }
 0x224   : > { %v2214_v8 = vsel %vm2086_vm9, %v1802_v0, %v2150_v53  ;;  %vm2087_vm10 = vcmp.ge.f32.partialorder %v1804_v11, 0.0  ;;  %v2151_v18 = vmul.f32 0.01, %v1804_v11  ;;  %v1808_v21 = vadd.f32 %v1807_v14, %v1695_v61  ;;  %v1700_v22 = vpop.f32.mrf.mxu1 }
 0x225   : > { %2278 = vst [vmem:[%s3892_s30 + $0x120] sm:$0xff] %v2214_v8  ;;  %v1809_v34 = vpop.f32.mrf.mxu0  ;;  %v1701_v27 = vadd.f32 %v1700_v22, %v3929_v15 }
 0x226   : > { %v2215_v23 = vsel %vm2087_vm10, %v1804_v11, %v2151_v18  ;;  %vm2094_vm11 = vcmp.ge.f32.partialorder %v1808_v21, 0.0  ;;  %v2158_v25 = vmul.f32 0.01, %v1808_v21  ;;  %v1810_v30 = vadd.f32 %v1809_v34, %v1697_v13  ;;  %v1702_v43 = vpop.f32.mrf.mxu1 }
 0x227   : > { %2279 = vst [vmem:[%s3892_s30 + $0x128] sm:$0xff] %v2215_v23  ;;  %v1703_v3 = vadd.f32 %v1702_v43, %v3929_v15 }
 0x228   : > { %v2222_v31 = vsel %vm2094_vm11, %v1808_v21, %v2158_v25  ;;  %vm2095_vm12 = vcmp.ge.f32.partialorder %v1810_v30, 0.0  ;;  %v2159_v35 = vmul.f32 0.01, %v1810_v30  ;;  %v1706_v44 = vpop.f32.mrf.mxu1 }
 0x229   : > { %2286 = vst [vmem:[%s3892_s30 + $0x160] sm:$0xff] %v2222_v31  ;;  %v1813_v38 = vpop.f32.mrf.mxu0  ;;  %v1707_v47 = vadd.f32 %v1706_v44, %v3938_v4 }
 0x22a   : > { %v1814_v40 = vadd.f32 %v1813_v38, %v1701_v27  ;;  %v2223_v46 = vsel %vm2095_vm12, %v1810_v30, %v2159_v35  ;;  %v1708_v51 = vpop.f32.mrf.mxu1 }
 0x22b   : > { %v1815_v49 = vpop.f32.mrf.mxu0  ;;  %2287 = vst [vmem:[%s3892_s30 + $0x168] sm:$0xff] %v2223_v46  ;;  %v1709_v54 = vadd.f32 %v1708_v51, %v3938_v4 }
 0x22c   : > { %vm2102_vm13 = vcmp.ge.f32.partialorder %v1814_v40, 0.0  ;;  %v2166_v20 = vmul.f32 0.01, %v1814_v40  ;;  %v1816_v50 = vadd.f32 %v1815_v49, %v1703_v3 }
 0x22d   : > { %v1819_v56 = vpop.f32.mrf.mxu0 }
 0x22e   : > { %v2230_v16 = vsel %vm2102_vm13, %v1814_v40, %v2166_v20  ;;  %vm2103_vm14 = vcmp.ge.f32.partialorder %v1816_v50, 0.0  ;;  %v2167_v60 = vmul.f32 0.01, %v1816_v50  ;;  %v1820_v62 = vadd.f32 %v1819_v56, %v1707_v47 }
 0x22f   : > { %2294 = vst [vmem:[%s3892_s30 + $0x1a0] sm:$0xff] %v2230_v16  ;;  %v1821_v42 = vpop.f32.mrf.mxu0 }
 0x230   : > { %v2231_v19 = vsel %vm2103_vm14, %v1816_v50, %v2167_v60  ;;  %vm2110_vm15 = vcmp.ge.f32.partialorder %v1820_v62, 0.0  ;;  %v2174_v28 = vmul.f32 0.01, %v1820_v62  ;;  %v1822_v39 = vadd.f32 %v1821_v42, %v1709_v54  ;;  %v2003_v45 = vpop.f32.mrf.mxu1 }
 0x231   : > { %2295 = vst [vmem:[%s3892_s30 + $0x1a8] sm:$0xff] %v2231_v19 }
 0x232   : > { %v2238_v48 = vsel %vm2110_vm15, %v1820_v62, %v2174_v28  ;;  %vm2111_vm0 = vcmp.ge.f32.partialorder %v1822_v39, 0.0  ;;  %v2175_v32 = vmul.f32 0.01, %v1822_v39  ;;  %v2005_v52 = vpop.f32.mrf.mxu1 }
 0x233   : > { %2302 = vst [vmem:[%s3892_s30 + $0x1e0] sm:$0xff] %v2238_v48 }
 0x234   : > { %v2239_v55 = vsel %vm2111_vm0, %v1822_v39, %v2175_v32  ;;  %v2009_v6 = vpop.f32.mrf.mxu1 }
 0x235   : > { %2303 = vst [vmem:[%s3892_s30 + $0x1e8] sm:$0xff] %v2239_v55 }
 0x236   : > { %v2011_v58 = vpop.f32.mrf.mxu1 }
 0x238   : > { %v2015_v24 = vpop.f32.mrf.mxu1 }
 0x239   : > { %v1890_v17 = vpop.f32.mrf.mxu0 }
 0x23a   : > { %v1891_v26 = vadd.f32 %v1890_v17, %v3882_v5  ;;  %v2017_v41 = vpop.f32.mrf.mxu1 }
 0x23b   : > { %v1892_v36 = vpop.f32.mrf.mxu0 }
 0x23c   : > { %v2004_v57 = vadd.f32 %v2003_v45, %v1891_v26  ;;  %v1893_v1 = vadd.f32 %v1892_v36, %v3882_v5  ;;  %v2021_v0 = vpop.f32.mrf.mxu1 }
 0x23d   : > { %v1896_v63 = vpop.f32.mrf.mxu0 }
 0x23e   : > { %vm2056_vm1 = vcmp.ge.f32.partialorder %v2004_v57, 0.0  ;;  %v2120_v2 = vmul.f32 0.01, %v2004_v57  ;;  %v2006_v10 = vadd.f32 %v2005_v52, %v1893_v1  ;;  %v1897_v61 = vadd.f32 %v1896_v63, %v3897_v33  ;;  %v2023_v53 = vpop.f32.mrf.mxu1 }
 0x23f   : > { %v1898_v7 = vpop.f32.mrf.mxu0 }
 0x240   : > { %v2184_v11 = vsel %vm2056_vm1, %v2004_v57, %v2120_v2  ;;  %vm2057_vm2 = vcmp.ge.f32.partialorder %v2006_v10, 0.0  ;;  %v2121_v12 = vmul.f32 0.01, %v2006_v10  ;;  %v2010_v13 = vadd.f32 %v2009_v6, %v1897_v61  ;;  %v2027_v5 = vpop.f32.mrf.mxu1 }
 0x241   : > { %2248 = vst [vmem:[%s3892_s30 + $0x30] sm:$0xff] %v2184_v11  ;;  %v1899_v14 = vadd.f32 %v1898_v7, %v3897_v33  ;;  %v1902_v8 = vpop.f32.mrf.mxu0 }
 0x242   : > { %v2185_v18 = vsel %vm2057_vm2, %v2006_v10, %v2121_v12  ;;  %vm2064_vm3 = vcmp.ge.f32.partialorder %v2010_v13, 0.0  ;;  %v2128_v21 = vmul.f32 0.01, %v2010_v13  ;;  %v1903_v22 = vadd.f32 %v1902_v8, %v3902_v9  ;;  %v2029_v25 = vpop.f32.mrf.mxu1 }
 0x243   : > { %2249 = vst [vmem:[%s3892_s30 + $0x38] sm:$0xff] %v2185_v18  ;;  %v2012_v34 = vadd.f32 %v2011_v58, %v1899_v14  ;;  %v1904_v23 = vpop.f32.mrf.mxu0 }
 0x244   : > { %v2192_v27 = vsel %vm2064_vm3, %v2010_v13, %v2128_v21  ;;  %v2016_v30 = vadd.f32 %v2015_v24, %v1903_v22  ;;  %v1905_v43 = vadd.f32 %v1904_v23, %v3902_v9  ;;  %v2033_v40 = vpop.f32.mrf.mxu1 }
 0x245   : > { %2256 = vst [vmem:[%s3892_s30 + $0x70] sm:$0xff] %v2192_v27  ;;  %vm2065_vm4 = vcmp.ge.f32.partialorder %v2012_v34, 0.0  ;;  %v2129_v33 = vmul.f32 0.01, %v2012_v34  ;;  %v1908_v31 = vpop.f32.mrf.mxu0 }
 0x246   : > { %vm2072_vm5 = vcmp.ge.f32.partialorder %v2016_v30, 0.0  ;;  %v2136_v3 = vmul.f32 0.01, %v2016_v30  ;;  %v2018_v35 = vadd.f32 %v2017_v41, %v1905_v43  ;;  %v1909_v38 = vadd.f32 %v1908_v31, %v3908_v29  ;;  %v2035_v16 = vpop.f32.mrf.mxu1  ;;  %v2332_v31 = vld [vmem:[%s3892_s30 + $0x10] sm:$0xff] (%p2672_p5) }
 0x247   : > { %v2193_v44 = vsel %vm2065_vm4, %v2012_v34, %v2129_v33  ;;  %v1910_v46 = vpop.f32.mrf.mxu0  ;;  %v2330_v33 = vld [vmem:[%s3892_s30 + $0x8] sm:$0xff] (%p2672_p5)  ;;  %2333 = vst [vmem:[%s4059_s20 + $0x10] sm:$0xff] (%p2672_p5), %v2332_v31 }
 0x248   : > { %2257 = vst [vmem:[%s3892_s30 + $0x78] sm:$0xff] %v2193_v44  ;;  %v2200_v47 = vsel %vm2072_vm5, %v2016_v30, %v2136_v3  ;;  %vm2073_vm6 = vcmp.ge.f32.partialorder %v2018_v35, 0.0  ;;  %v2137_v49 = vmul.f32 0.01, %v2018_v35  ;;  %v2022_v9 = vadd.f32 %v2021_v0, %v1909_v38  ;;  %v2039_v52 = vpop.f32.mrf.mxu1  ;;  %v2334_v3 = vld [vmem:[%s3892_s30 + $0x18] sm:$0xff] (%p2672_p5)  ;;  %v2338_v38 = vld [vmem:[%s3892_s30 + $0x28] sm:$0xff] (%p2672_p5) }
 0x249   : > { %2264 = vst [vmem:[%s3892_s30 + $0xb0] sm:$0xff] %v2200_v47  ;;  %v1911_v20 = vadd.f32 %v1910_v46, %v3908_v29  ;;  %v1914_v50 = vpop.f32.mrf.mxu0  ;;  %2331 = vst [vmem:[%s4059_s20 + $0x8] sm:$0xff] (%p2672_p5), %v2330_v33  ;;  %v2344_v46 = vld [vmem:[%s3892_s30 + $0x40] sm:$0xff] (%p2672_p5)  ;;  %v2346_v47 = vld [vmem:[%s3892_s30 + $0x48] sm:$0xff] (%p2672_p5) }
 0x24a   : > { %v2201_v51 = vsel %vm2073_vm6, %v2018_v35, %v2137_v49  ;;  %vm2080_vm7 = vcmp.ge.f32.partialorder %v2022_v9, 0.0  ;;  %v2144_v54 = vmul.f32 0.01, %v2022_v9  ;;  %v1915_v56 = vadd.f32 %v1914_v50, %v3911_v37  ;;  %v2041_v1 = vpop.f32.mrf.mxu1  ;;  %v2336_v35 = vld [vmem:[%s3892_s30 + $0x20] sm:$0xff] (%p2672_p5)  ;;  %2335 = vst [vmem:[%s4059_s20 + $0x18] sm:$0xff] (%p2672_p5), %v2334_v3  ;;  %2339 = vst [vmem:[%s4059_s20 + $0x28] sm:$0xff] (%p2672_p5), %v2338_v38 }
 0x24b   : > { %2265 = vst [vmem:[%s3892_s30 + $0xb8] sm:$0xff] %v2201_v51  ;;  %v2024_v60 = vadd.f32 %v2023_v53, %v1911_v20  ;;  %v1916_v62 = vpop.f32.mrf.mxu0  ;;  %2337 = vst [vmem:[%s4059_s20 + $0x20] sm:$0xff] (%p2672_p5), %v2336_v35  ;;  %v2342_v44 = vld [vmem:[%s3892_s30 + $0x38] sm:$0xff] (%p2672_p5)  ;;  %v2348_v49 = vld [vmem:[%s3892_s30 + $0x50] sm:$0xff] (%p2672_p5) }
 0x24c   : > { %v2208_v42 = vsel %vm2080_vm7, %v2022_v9, %v2144_v54  ;;  %v2028_v19 = vadd.f32 %v2027_v5, %v1915_v56  ;;  %v1917_v28 = vadd.f32 %v1916_v62, %v3911_v37  ;;  %v2045_v13 = vpop.f32.mrf.mxu1  ;;  %2343 = vst [vmem:[%s4059_s20 + $0x38] sm:$0xff] (%p2672_p5), %v2342_v44  ;;  %2345 = vst [vmem:[%s4059_s20 + $0x80] sm:$0xff] (%p2672_p5), %v2344_v46  ;;  %v2350_v9 = vld [vmem:[%s3892_s30 + $0x58] sm:$0xff] (%p2672_p5)  ;;  %v2352_v20 = vld [vmem:[%s3892_s30 + $0x60] sm:$0xff] (%p2672_p5) }
 0x24d   : > { %2272 = vst [vmem:[%s3892_s30 + $0xf0] sm:$0xff] %v2208_v42  ;;  %vm2081_vm8 = vcmp.ge.f32.partialorder %v2024_v60, 0.0  ;;  %v2145_v39 = vmul.f32 0.01, %v2024_v60  ;;  %v1920_v29 = vpop.f32.mrf.mxu0  ;;  %2347 = vst [vmem:[%s4059_s20 + $0x88] sm:$0xff] (%p2672_p5), %v2346_v47  ;;  %v2354_v50 = vld [vmem:[%s3892_s30 + $0x68] sm:$0xff] (%p2672_p5) }
 0x24e   : > { %vm2088_vm9 = vcmp.ge.f32.partialorder %v2028_v19, 0.0  ;;  %v2152_v45 = vmul.f32 0.01, %v2028_v19  ;;  %v2030_v48 = vadd.f32 %v2029_v25, %v1917_v28  ;;  %v1921_v32 = vadd.f32 %v1920_v29, %v3922_v59  ;;  %v2047_v23 = vpop.f32.mrf.mxu1  ;;  %2349 = vst [vmem:[%s4059_s20 + $0x90] sm:$0xff] (%p2672_p5), %v2348_v49  ;;  %2351 = vst [vmem:[%s4059_s20 + $0x98] sm:$0xff] (%p2672_p5), %v2350_v9  ;;  %v2356_v51 = vld [vmem:[%s3892_s30 + $0x70] sm:$0xff] (%p2672_p5) }
 0x24f   : > { %v2209_v55 = vsel %vm2081_vm8, %v2024_v60, %v2145_v39  ;;  %v1922_v6 = vpop.f32.mrf.mxu0  ;;  %2353 = vst [vmem:[%s4059_s20 + $0xa0] sm:$0xff] (%p2672_p5), %v2352_v20  ;;  %2355 = vst [vmem:[%s4059_s20 + $0xa8] sm:$0xff] (%p2672_p5), %v2354_v50  ;;  %v2358_v54 = vld [vmem:[%s3892_s30 + $0x78] sm:$0xff] (%p2672_p5)  ;;  %v2360_v56 = vld [vmem:[%s3892_s30 + $0x80] sm:$0xff] (%p2672_p5) }
 0x250   : > { %2273 = vst [vmem:[%s3892_s30 + $0xf8] sm:$0xff] %v2209_v55  ;;  %v2216_v58 = vsel %vm2088_vm9, %v2028_v19, %v2152_v45  ;;  %vm2089_vm10 = vcmp.ge.f32.partialorder %v2030_v48, 0.0  ;;  %v2153_v17 = vmul.f32 0.01, %v2030_v48  ;;  %v2034_v37 = vadd.f32 %v2033_v40, %v1921_v32  ;;  %v2340_v40 = vld [vmem:[%s3892_s30 + $0x30] sm:$0xff] (%p2672_p5)  ;;  %2357 = vst [vmem:[%s4059_s20 + $0xb0] sm:$0xff] (%p2672_p5), %v2356_v51 }
 0x251   : > { %2280 = vst [vmem:[%s3892_s30 + $0x130] sm:$0xff] %v2216_v58  ;;  %v1923_v24 = vadd.f32 %v1922_v6, %v3922_v59  ;;  %v1926_v26 = vpop.f32.mrf.mxu0  ;;  %2341 = vst [vmem:[%s4059_s20 + $0x30] sm:$0xff] (%p2672_p5), %v2340_v40  ;;  %v2364_v60 = vld [vmem:[%s3892_s30 + $0x90] sm:$0xff] (%p2672_p5)  ;;  %v2366_v62 = vld [vmem:[%s3892_s30 + $0x98] sm:$0xff] (%p2672_p5) }
 0x252   : > { %v2217_v36 = vsel %vm2089_vm10, %v2030_v48, %v2153_v17  ;;  %vm2096_vm11 = vcmp.ge.f32.partialorder %v2034_v37, 0.0  ;;  %v2160_v41 = vmul.f32 0.01, %v2034_v37  ;;  %v1927_v57 = vadd.f32 %v1926_v26, %v3929_v15  ;;  %2359 = vst [vmem:[%s4059_s20 + $0xb8] sm:$0xff] (%p2672_p5), %v2358_v54  ;;  %2361 = vst [vmem:[%s4059_s20 + $0x100] sm:$0xff] (%p2672_p5), %v2360_v56  ;;  %v2368_v42 = vld [vmem:[%s3892_s30 + $0xa0] sm:$0xff] (%p2672_p5) }
 0x253   : > { %2281 = vst [vmem:[%s3892_s30 + $0x138] sm:$0xff] %v2217_v36  ;;  %v2036_v63 = vadd.f32 %v2035_v16, %v1923_v24  ;;  %v1928_v0 = vpop.f32.mrf.mxu0  ;;  %v2362_v16 = vld [vmem:[%s3892_s30 + $0x88] sm:$0xff] (%p2672_p5)  ;;  %2365 = vst [vmem:[%s4059_s20 + $0x110] sm:$0xff] (%p2672_p5), %v2364_v60  ;;  %v2372_v28 = vld [vmem:[%s3892_s30 + $0xb0] sm:$0xff] (%p2672_p5) }
 0x254   : > { %v2224_v2 = vsel %vm2096_vm11, %v2034_v37, %v2160_v41  ;;  %v2040_v10 = vadd.f32 %v2039_v52, %v1927_v57  ;;  %v1929_v61 = vadd.f32 %v1928_v0, %v3929_v15  ;;  %2363 = vst [vmem:[%s4059_s20 + $0x108] sm:$0xff] (%p2672_p5), %v2362_v16  ;;  %2367 = vst [vmem:[%s4059_s20 + $0x118] sm:$0xff] (%p2672_p5), %v2366_v62  ;;  %v2370_v19 = vld [vmem:[%s3892_s30 + $0xa8] sm:$0xff] (%p2672_p5)  ;;  %v2374_v39 = vld [vmem:[%s3892_s30 + $0xb8] sm:$0xff] (%p2672_p5) }
 0x255   : > { %2288 = vst [vmem:[%s3892_s30 + $0x170] sm:$0xff] %v2224_v2  ;;  %vm2097_vm12 = vcmp.ge.f32.partialorder %v2036_v63, 0.0  ;;  %v2161_v7 = vmul.f32 0.01, %v2036_v63  ;;  %v1932_v59 = vpop.f32.mrf.mxu0  ;;  %2369 = vst [vmem:[%s4059_s20 + $0x120] sm:$0xff] (%p2672_p5), %v2368_v42  ;;  %v2376_v29 = vld [vmem:[%s3892_s30 + $0xc0] sm:$0xff] (%p2672_p5) }
 0x256   : > { %vm2104_vm13 = vcmp.ge.f32.partialorder %v2040_v10, 0.0  ;;  %v2168_v53 = vmul.f32 0.01, %v2040_v10  ;;  %v2042_v11 = vadd.f32 %v2041_v1, %v1929_v61  ;;  %v1933_v12 = vadd.f32 %v1932_v59, %v3938_v4  ;;  %2371 = vst [vmem:[%s4059_s20 + $0x128] sm:$0xff] (%p2672_p5), %v2370_v19  ;;  %2373 = vst [vmem:[%s4059_s20 + $0x130] sm:$0xff] (%p2672_p5), %v2372_v28  ;;  %v2378_v45 = vld [vmem:[%s3892_s30 + $0xc8] sm:$0xff] (%p2672_p5) }
 0x257   : > { %v2225_v14 = vsel %vm2097_vm12, %v2036_v63, %v2161_v7  ;;  %v1934_v8 = vpop.f32.mrf.mxu0  ;;  %2375 = vst [vmem:[%s4059_s20 + $0x138] sm:$0xff] (%p2672_p5), %v2374_v39  ;;  %v2380_v48 = vld [vmem:[%s3892_s30 + $0xd0] sm:$0xff] (%p2672_p5)  ;;  %2377 = vst [vmem:[%s4059_s20 + $0x180] sm:$0xff] (%p2672_p5), %v2376_v29  ;;  %v2382_v32 = vld [vmem:[%s3892_s30 + $0xd8] sm:$0xff] (%p2672_p5) }
 0x258   : > { %2289 = vst [vmem:[%s3892_s30 + $0x178] sm:$0xff] %v2225_v14  ;;  %v2232_v5 = vsel %vm2104_vm13, %v2040_v10, %v2168_v53  ;;  %vm2105_vm14 = vcmp.ge.f32.partialorder %v2042_v11, 0.0  ;;  %v2169_v15 = vmul.f32 0.01, %v2042_v11  ;;  %v2046_v18 = vadd.f32 %v2045_v13, %v1933_v12  ;;  %2379 = vst [vmem:[%s4059_s20 + $0x188] sm:$0xff] (%p2672_p5), %v2378_v45  ;;  %v2384_v52 = vld [vmem:[%s3892_s30 + $0xe0] sm:$0xff] (%p2672_p5) }
 0x259   : > { %2296 = vst [vmem:[%s3892_s30 + $0x1b0] sm:$0xff] %v2232_v5  ;;  %v1935_v21 = vadd.f32 %v1934_v8, %v3938_v4  ;;  %v2328_v4 = vld [vmem:[%s3892_s30] sm:$0xff] (%p2672_p5)  ;;  %2381 = vst [vmem:[%s4059_s20 + $0x190] sm:$0xff] (%p2672_p5), %v2380_v48  ;;  %v2386_v55 = vld [vmem:[%s3892_s30 + $0xe8] sm:$0xff] (%p2672_p5) }
 0x25a   : > { %v2233_v22 = vsel %vm2105_vm14, %v2042_v11, %v2169_v15  ;;  %vm2112_vm15 = vcmp.ge.f32.partialorder %v2046_v18, 0.0  ;;  %v2176_v34 = vmul.f32 0.01, %v2046_v18  ;;  %2329 = vst [vmem:[%s4059_s20] sm:$0xff] (%p2672_p5), %v2328_v4  ;;  %2383 = vst [vmem:[%s4059_s20 + $0x198] sm:$0xff] (%p2672_p5), %v2382_v32  ;;  %v2388_v6 = vld [vmem:[%s3892_s30 + $0xf0] sm:$0xff] (%p2672_p5)  ;;  %v2390_v58 = vld [vmem:[%s3892_s30 + $0xf8] sm:$0xff] (%p2672_p5) }
 0x25b   : > { %2297 = vst [vmem:[%s3892_s30 + $0x1b8] sm:$0xff] %v2233_v22  ;;  %v2048_v25 = vadd.f32 %v2047_v23, %v1935_v21  ;;  %2385 = vst [vmem:[%s4059_s20 + $0x1a0] sm:$0xff] (%p2672_p5), %v2384_v52  ;;  %v2392_v17 = vld [vmem:[%s3892_s30 + $0x100] sm:$0xff] (%p2672_p5)  ;;  %v2394_v37 = vld [vmem:[%s3892_s30 + $0x108] sm:$0xff] (%p2672_p5) }
 0x25c   : > { %v2240_v27 = vsel %vm2112_vm15, %v2046_v18, %v2176_v34  ;;  %2312 = sbr.rel (!%p2672_p5) target bundleno = 623 (0x26f), region = 59  ;;  %2387 = vst [vmem:[%s4059_s20 + $0x1a8] sm:$0xff] (%p2672_p5), %v2386_v55  ;;  %2389 = vst [vmem:[%s4059_s20 + $0x1b0] sm:$0xff] (%p2672_p5), %v2388_v6  ;;  %v2396_v24 = vld [vmem:[%s3892_s30 + $0x110] sm:$0xff] (%p2672_p5)  ;;  %v2398_v26 = vld [vmem:[%s3892_s30 + $0x118] sm:$0xff] (%p2672_p5) }
 0x25d   : > { %2304 = vst [vmem:[%s3892_s30 + $0x1f0] sm:$0xff] %v2240_v27  ;;  %vm2113_vm0 = vcmp.ge.f32.partialorder %v2048_v25, 0.0  ;;  %v2177_v30 = vmul.f32 0.01, %v2048_v25  ;;  %2391 = vst [vmem:[%s4059_s20 + $0x1b8] sm:$0xff] (%p2672_p5), %v2390_v58  ;;  %v2400_v36 = vld [vmem:[%s3892_s30 + $0x120] sm:$0xff] (%p2672_p5) }
 0x25e   : > { %2393 = vst [vmem:[%s4059_s20 + $0x200] sm:$0xff] (%p2672_p5), %v2392_v17  ;;  %2395 = vst [vmem:[%s4059_s20 + $0x208] sm:$0xff] (%p2672_p5), %v2394_v37  ;;  %v2402_v41 = vld [vmem:[%s3892_s30 + $0x128] sm:$0xff] (%p2672_p5)  ;;  %v2404_v57 = vld [vmem:[%s3892_s30 + $0x130] sm:$0xff] (%p2672_p5) }
 0x25f   : > { %v2241_v43 = vsel %vm2113_vm0, %v2048_v25, %v2177_v30  ;;  %2397 = vst [vmem:[%s4059_s20 + $0x210] sm:$0xff] (%p2672_p5), %v2396_v24  ;;  %2399 = vst [vmem:[%s4059_s20 + $0x218] sm:$0xff] (%p2672_p5), %v2398_v26  ;;  %v2406_v1 = vld [vmem:[%s3892_s30 + $0x138] sm:$0xff] (%p2672_p5)  ;;  %v2408_v63 = vld [vmem:[%s3892_s30 + $0x140] sm:$0xff] (%p2672_p5) }
 0x260   : > { %2305 = vst [vmem:[%s3892_s30 + $0x1f8] sm:$0xff] %v2241_v43  ;;  %2401 = vst [vmem:[%s4059_s20 + $0x220] sm:$0xff] (%p2672_p5), %v2400_v36  ;;  %v2410_v0 = vld [vmem:[%s3892_s30 + $0x148] sm:$0xff] (%p2672_p5)  ;;  %v2412_v2 = vld [vmem:[%s3892_s30 + $0x150] sm:$0xff] (%p2672_p5) }
 0x261   : > { %2403 = vst [vmem:[%s4059_s20 + $0x228] sm:$0xff] %v2402_v41  ;;  %2405 = vst [vmem:[%s4059_s20 + $0x230] sm:$0xff] %v2404_v57  ;;  %v2414_v10 = vld [vmem:[%s3892_s30 + $0x158] sm:$0xff]  ;;  %v2416_v61 = vld [vmem:[%s3892_s30 + $0x160] sm:$0xff] }
 0x262   : > { %2407 = vst [vmem:[%s4059_s20 + $0x238] sm:$0xff] %v2406_v1  ;;  %2409 = vst [vmem:[%s4059_s20 + $0x280] sm:$0xff] %v2408_v63  ;;  %v2418_v7 = vld [vmem:[%s3892_s30 + $0x168] sm:$0xff]  ;;  %v2420_v59 = vld [vmem:[%s3892_s30 + $0x170] sm:$0xff] }
 0x263   : > { %2411 = vst [vmem:[%s4059_s20 + $0x288] sm:$0xff] %v2410_v0  ;;  %2413 = vst [vmem:[%s4059_s20 + $0x290] sm:$0xff] %v2412_v2  ;;  %v2422_v53 = vld [vmem:[%s3892_s30 + $0x178] sm:$0xff]  ;;  %v2424_v11 = vld [vmem:[%s3892_s30 + $0x180] sm:$0xff] }
 0x264   : > { %2415 = vst [vmem:[%s4059_s20 + $0x298] sm:$0xff] %v2414_v10  ;;  %2417 = vst [vmem:[%s4059_s20 + $0x2a0] sm:$0xff] %v2416_v61  ;;  %v2426_v12 = vld [vmem:[%s3892_s30 + $0x188] sm:$0xff]  ;;  %v2428_v13 = vld [vmem:[%s3892_s30 + $0x190] sm:$0xff] }
 0x265   : > { %2419 = vst [vmem:[%s4059_s20 + $0x2a8] sm:$0xff] %v2418_v7  ;;  %2421 = vst [vmem:[%s4059_s20 + $0x2b0] sm:$0xff] %v2420_v59  ;;  %v2430_v14 = vld [vmem:[%s3892_s30 + $0x198] sm:$0xff]  ;;  %v2432_v8 = vld [vmem:[%s3892_s30 + $0x1a0] sm:$0xff] }
 0x266   : > { %2423 = vst [vmem:[%s4059_s20 + $0x2b8] sm:$0xff] %v2422_v53  ;;  %2425 = vst [vmem:[%s4059_s20 + $0x300] sm:$0xff] %v2424_v11  ;;  %v2434_v5 = vld [vmem:[%s3892_s30 + $0x1a8] sm:$0xff]  ;;  %v2436_v15 = vld [vmem:[%s3892_s30 + $0x1b0] sm:$0xff] }
 0x267   : > { %2427 = vst [vmem:[%s4059_s20 + $0x308] sm:$0xff] %v2426_v12  ;;  %2429 = vst [vmem:[%s4059_s20 + $0x310] sm:$0xff] %v2428_v13  ;;  %v2438_v18 = vld [vmem:[%s3892_s30 + $0x1b8] sm:$0xff]  ;;  %v2440_v21 = vld [vmem:[%s3892_s30 + $0x1c0] sm:$0xff] }
 0x268   : > { %2431 = vst [vmem:[%s4059_s20 + $0x318] sm:$0xff] %v2430_v14  ;;  %2433 = vst [vmem:[%s4059_s20 + $0x320] sm:$0xff] %v2432_v8  ;;  %v2442_v22 = vld [vmem:[%s3892_s30 + $0x1c8] sm:$0xff]  ;;  %v2444_v34 = vld [vmem:[%s3892_s30 + $0x1d0] sm:$0xff] }
 0x269   : > { %2435 = vst [vmem:[%s4059_s20 + $0x328] sm:$0xff] %v2434_v5  ;;  %2437 = vst [vmem:[%s4059_s20 + $0x330] sm:$0xff] %v2436_v15  ;;  %v2446_v23 = vld [vmem:[%s3892_s30 + $0x1d8] sm:$0xff]  ;;  %v2448_v25 = vld [vmem:[%s3892_s30 + $0x1e0] sm:$0xff] }
 0x26a   : > { %2439 = vst [vmem:[%s4059_s20 + $0x338] sm:$0xff] %v2438_v18  ;;  %2441 = vst [vmem:[%s4059_s20 + $0x380] sm:$0xff] %v2440_v21  ;;  %v2450_v27 = vld [vmem:[%s3892_s30 + $0x1e8] sm:$0xff]  ;;  %v2452_v30 = vld [vmem:[%s3892_s30 + $0x1f0] sm:$0xff] }
 0x26b   : > { %2443 = vst [vmem:[%s4059_s20 + $0x388] sm:$0xff] %v2442_v22  ;;  %2445 = vst [vmem:[%s4059_s20 + $0x390] sm:$0xff] %v2444_v34  ;;  %v2454_v43 = vld [vmem:[%s3892_s30 + $0x1f8] sm:$0xff] }
 0x26c   : > { %2447 = vst [vmem:[%s4059_s20 + $0x398] sm:$0xff] %v2446_v23  ;;  %2449 = vst [vmem:[%s4059_s20 + $0x3a0] sm:$0xff] %v2448_v25 }
 0x26d   : > { %2451 = vst [vmem:[%s4059_s20 + $0x3a8] sm:$0xff] %v2450_v27  ;;  %2453 = vst [vmem:[%s4059_s20 + $0x3b0] sm:$0xff] %v2452_v30 }
 0x26e   : > { %2455 = vst [vmem:[%s4059_s20 + $0x3b8] sm:$0xff] %v2454_v43 }
 0x26f PF: > { %p10_p10 = scmp.ge.s32.totalorder %s2659_s16, 4   ;;  %s4201_s12 = smov %s2614_s13 }
 0x270   : > { %s4202_s13 = smov %s2670_s19  ;;  %s4203_s14 = smov %s2659_s16 }
 0x271   :  { %12 = sbr.rel (!%p10_p10) target bundleno = 2 (0x2), region = 113 }

// kernel: encoder_forward.7
= control target key start
LH: loop header
LB: loop body
LE: loop exit
PB: predicated region body
PF: predicated region fallthrough
CT: control target
= control target key end

     0   :  { %s1361_s12 = smov 0   ;;  %s1363_s13 = smov 0   ;;  %s2064_s0 = inlined_call_operand.vmem [shape: f32[64,576], index: 0, kind: input, shape index: {}]   ;;  %s2065_s1 = inlined_call_operand.vmem [shape: f32[576,512], index: 1, kind: input, shape index: {}]   ;;  %s2066_s2 = inlined_call_operand.vmem [shape: f32[64,1], index: 2, kind: input, shape index: {}]   ;;  %s2067_s3 = inlined_call_operand.vmem [shape: f32[64,512], index: 3, kind: output, shape index: {}]  }
   0x1   :  { %s1365_s14 = smov 0  }
   0x2 LB: > { %s1246_s15 = sadd.s32 4294967295, %s1337_s14   ;;  %s1378_s16 = sadd.s32 1, %s1337_s14   ;;  %s1337_s14 = sphi %s1365_s14, %s2071_s14   ;;  %s1333_s13 = sphi %s1363_s13, %s2070_s13   ;;  %s1329_s12 = sphi %s1361_s12, %s2069_s12  }
   0x3   : > { %s38_s17 = ssub.s32 %s1337_s14, %s1378_s16  ;;  %s41_s18 = sadd.s32 1, %s1333_s13 }
   0x4   : > { %p39_p0 = scmp.eq.s32.totalorder %s38_s17, 0  ;;  %p48_p1 = scmp.ne.s32.totalorder %s1333_s13, %s1329_s12 }
   0x5   : > { %p49_p2 = scmp.eq.s32.totalorder %s1337_s14, 0  ;;  %p99_p3 = scmp.eq.s32.totalorder %s1246_s15, 1 }
   0x6   : > { %s1389_s19 = scalar_select %p39_p0, %s1333_s13, %s41_s18  }
   0x7   : > { %p50_p4 = por %p49_p2, %p48_p1  ;;  %p1391_p5 = por %p99_p3, %p48_p1 }
   0x8   : > { %p1249_p6 = scmp.ge.s32.totalorder %s1337_s14, 2 }
   0xa   : > { %127 = sbr.rel (%p1249_p6) target bundleno = 91 (0x5b), region = 24 }
   0xf   : > { %130 = sbr.rel (!%p50_p4) target bundleno = 91 (0x5b), region = 28  ;;  %s132_s21 = sand.u32 (%p50_p4), 1, %s1333_s13  }
  0x10   : > { %s1267_s22 = sshll.u32 (%p50_p4), %s1337_s14, 4  ;;  %s1285_s23 = smul.u32 (%p50_p4), 1152, %s132_s21 }
  0x11   : > { %s1401_s26 = scalar_lea.vmem (%p50_p4), %s2065_s1, %s1267_s22 }
  0x12   : > { %v150_v0 = vld [vmem:[%s1401_s26] sm:$0xff] (%p50_p4)  ;;  %v152_v1 = vld [vmem:[%s1401_s26 + $0x8] sm:$0xff] (%p50_p4)  ;;  %s1409_s27 = scalar_lea.vmem (%p50_p4), [#allocation2], %s1285_s23 }
  0x13   : > { %v154_v2 = vld [vmem:[%s1401_s26 + $0x20] sm:$0xff] (%p50_p4)  ;;  %v156_v3 = vld [vmem:[%s1401_s26 + $0x28] sm:$0xff] (%p50_p4)  ;;  %151 = vst [vmem:[%s1409_s27] sm:$0xff] (%p50_p4), %v150_v0  ;;  %153 = vst [vmem:[%s1409_s27 + $0x8] sm:$0xff] (%p50_p4), %v152_v1 }
  0x14   : > { %v158_v4 = vld [vmem:[%s1401_s26 + $0x40] sm:$0xff]  ;;  %v160_v5 = vld [vmem:[%s1401_s26 + $0x48] sm:$0xff]  ;;  %155 = vst [vmem:[%s1409_s27 + $0x10] sm:$0xff] %v154_v2  ;;  %157 = vst [vmem:[%s1409_s27 + $0x18] sm:$0xff] %v156_v3 }
  0x15   : > { %159 = vst [vmem:[%s1409_s27 + $0x20] sm:$0xff] %v158_v4  ;;  %161 = vst [vmem:[%s1409_s27 + $0x28] sm:$0xff] %v160_v5  ;;  %v162_v6 = vld [vmem:[%s1401_s26 + $0x60] sm:$0xff]  ;;  %v164_v7 = vld [vmem:[%s1401_s26 + $0x68] sm:$0xff] }
  0x16   : > { %v166_v8 = vld [vmem:[%s1401_s26 + $0x80] sm:$0xff]  ;;  %163 = vst [vmem:[%s1409_s27 + $0x30] sm:$0xff] %v162_v6  ;;  %165 = vst [vmem:[%s1409_s27 + $0x38] sm:$0xff] %v164_v7  ;;  %v168_v9 = vld [vmem:[%s1401_s26 + $0x88] sm:$0xff] }
  0x17   : > { %167 = vst [vmem:[%s1409_s27 + $0x40] sm:$0xff] %v166_v8  ;;  %v170_v10 = vld [vmem:[%s1401_s26 + $0xa0] sm:$0xff]  ;;  %v172_v11 = vld [vmem:[%s1401_s26 + $0xa8] sm:$0xff]  ;;  %169 = vst [vmem:[%s1409_s27 + $0x48] sm:$0xff] %v168_v9 }
  0x18   : > { %171 = vst [vmem:[%s1409_s27 + $0x50] sm:$0xff] %v170_v10  ;;  %173 = vst [vmem:[%s1409_s27 + $0x58] sm:$0xff] %v172_v11  ;;  %v174_v12 = vld [vmem:[%s1401_s26 + $0xc0] sm:$0xff]  ;;  %v176_v13 = vld [vmem:[%s1401_s26 + $0xc8] sm:$0xff] }
  0x19   : > { %v178_v14 = vld [vmem:[%s1401_s26 + $0xe0] sm:$0xff]  ;;  %175 = vst [vmem:[%s1409_s27 + $0x60] sm:$0xff] %v174_v12  ;;  %177 = vst [vmem:[%s1409_s27 + $0x68] sm:$0xff] %v176_v13  ;;  %v180_v15 = vld [vmem:[%s1401_s26 + $0xe8] sm:$0xff] }
  0x1a   : > { %179 = vst [vmem:[%s1409_s27 + $0x70] sm:$0xff] %v178_v14  ;;  %v182_v16 = vld [vmem:[%s1401_s26 + $0x100] sm:$0xff]  ;;  %v184_v17 = vld [vmem:[%s1401_s26 + $0x108] sm:$0xff]  ;;  %181 = vst [vmem:[%s1409_s27 + $0x78] sm:$0xff] %v180_v15 }
  0x1b   : > { %183 = vst [vmem:[%s1409_s27 + $0x80] sm:$0xff] %v182_v16  ;;  %185 = vst [vmem:[%s1409_s27 + $0x88] sm:$0xff] %v184_v17  ;;  %v186_v18 = vld [vmem:[%s1401_s26 + $0x120] sm:$0xff]  ;;  %v188_v19 = vld [vmem:[%s1401_s26 + $0x128] sm:$0xff] }
  0x1c   : > { %v190_v20 = vld [vmem:[%s1401_s26 + $0x140] sm:$0xff]  ;;  %187 = vst [vmem:[%s1409_s27 + $0x90] sm:$0xff] %v186_v18  ;;  %189 = vst [vmem:[%s1409_s27 + $0x98] sm:$0xff] %v188_v19  ;;  %v192_v21 = vld [vmem:[%s1401_s26 + $0x148] sm:$0xff] }
  0x1d   : > { %191 = vst [vmem:[%s1409_s27 + $0xa0] sm:$0xff] %v190_v20  ;;  %v194_v22 = vld [vmem:[%s1401_s26 + $0x160] sm:$0xff]  ;;  %v196_v23 = vld [vmem:[%s1401_s26 + $0x168] sm:$0xff]  ;;  %193 = vst [vmem:[%s1409_s27 + $0xa8] sm:$0xff] %v192_v21 }
  0x1e   : > { %195 = vst [vmem:[%s1409_s27 + $0xb0] sm:$0xff] %v194_v22  ;;  %197 = vst [vmem:[%s1409_s27 + $0xb8] sm:$0xff] %v196_v23  ;;  %v198_v24 = vld [vmem:[%s1401_s26 + $0x180] sm:$0xff]  ;;  %v200_v25 = vld [vmem:[%s1401_s26 + $0x188] sm:$0xff] }
  0x1f   : > { %v202_v26 = vld [vmem:[%s1401_s26 + $0x1a0] sm:$0xff]  ;;  %199 = vst [vmem:[%s1409_s27 + $0xc0] sm:$0xff] %v198_v24  ;;  %201 = vst [vmem:[%s1409_s27 + $0xc8] sm:$0xff] %v200_v25  ;;  %v204_v27 = vld [vmem:[%s1401_s26 + $0x1a8] sm:$0xff] }
  0x20   : > { %203 = vst [vmem:[%s1409_s27 + $0xd0] sm:$0xff] %v202_v26  ;;  %v206_v28 = vld [vmem:[%s1401_s26 + $0x1c0] sm:$0xff]  ;;  %v208_v29 = vld [vmem:[%s1401_s26 + $0x1c8] sm:$0xff]  ;;  %205 = vst [vmem:[%s1409_s27 + $0xd8] sm:$0xff] %v204_v27 }
  0x21   : > { %207 = vst [vmem:[%s1409_s27 + $0xe0] sm:$0xff] %v206_v28  ;;  %209 = vst [vmem:[%s1409_s27 + $0xe8] sm:$0xff] %v208_v29  ;;  %v210_v30 = vld [vmem:[%s1401_s26 + $0x1e0] sm:$0xff]  ;;  %v212_v31 = vld [vmem:[%s1401_s26 + $0x1e8] sm:$0xff] }
  0x22   : > { %v214_v32 = vld [vmem:[%s1401_s26 + $0x200] sm:$0xff]  ;;  %211 = vst [vmem:[%s1409_s27 + $0xf0] sm:$0xff] %v210_v30  ;;  %213 = vst [vmem:[%s1409_s27 + $0xf8] sm:$0xff] %v212_v31  ;;  %v216_v33 = vld [vmem:[%s1401_s26 + $0x208] sm:$0xff] }
  0x23   : > { %215 = vst [vmem:[%s1409_s27 + $0x100] sm:$0xff] %v214_v32  ;;  %v218_v34 = vld [vmem:[%s1401_s26 + $0x220] sm:$0xff]  ;;  %v220_v35 = vld [vmem:[%s1401_s26 + $0x228] sm:$0xff]  ;;  %217 = vst [vmem:[%s1409_s27 + $0x108] sm:$0xff] %v216_v33 }
  0x24   : > { %219 = vst [vmem:[%s1409_s27 + $0x110] sm:$0xff] %v218_v34  ;;  %221 = vst [vmem:[%s1409_s27 + $0x118] sm:$0xff] %v220_v35  ;;  %v222_v36 = vld [vmem:[%s1401_s26 + $0x240] sm:$0xff]  ;;  %v224_v37 = vld [vmem:[%s1401_s26 + $0x248] sm:$0xff] }
  0x25   : > { %v226_v38 = vld [vmem:[%s1401_s26 + $0x260] sm:$0xff]  ;;  %223 = vst [vmem:[%s1409_s27 + $0x120] sm:$0xff] %v222_v36  ;;  %225 = vst [vmem:[%s1409_s27 + $0x128] sm:$0xff] %v224_v37  ;;  %v228_v39 = vld [vmem:[%s1401_s26 + $0x268] sm:$0xff] }
  0x26   : > { %227 = vst [vmem:[%s1409_s27 + $0x130] sm:$0xff] %v226_v38  ;;  %v230_v40 = vld [vmem:[%s1401_s26 + $0x280] sm:$0xff]  ;;  %v232_v41 = vld [vmem:[%s1401_s26 + $0x288] sm:$0xff]  ;;  %229 = vst [vmem:[%s1409_s27 + $0x138] sm:$0xff] %v228_v39 }
  0x27   : > { %231 = vst [vmem:[%s1409_s27 + $0x140] sm:$0xff] %v230_v40  ;;  %233 = vst [vmem:[%s1409_s27 + $0x148] sm:$0xff] %v232_v41  ;;  %v234_v42 = vld [vmem:[%s1401_s26 + $0x2a0] sm:$0xff]  ;;  %v236_v43 = vld [vmem:[%s1401_s26 + $0x2a8] sm:$0xff] }
  0x28   : > { %v238_v44 = vld [vmem:[%s1401_s26 + $0x2c0] sm:$0xff]  ;;  %235 = vst [vmem:[%s1409_s27 + $0x150] sm:$0xff] %v234_v42  ;;  %237 = vst [vmem:[%s1409_s27 + $0x158] sm:$0xff] %v236_v43  ;;  %v240_v45 = vld [vmem:[%s1401_s26 + $0x2c8] sm:$0xff] }
  0x29   : > { %239 = vst [vmem:[%s1409_s27 + $0x160] sm:$0xff] %v238_v44  ;;  %v242_v46 = vld [vmem:[%s1401_s26 + $0x2e0] sm:$0xff]  ;;  %v244_v47 = vld [vmem:[%s1401_s26 + $0x2e8] sm:$0xff]  ;;  %241 = vst [vmem:[%s1409_s27 + $0x168] sm:$0xff] %v240_v45 }
  0x2a   : > { %243 = vst [vmem:[%s1409_s27 + $0x170] sm:$0xff] %v242_v46  ;;  %245 = vst [vmem:[%s1409_s27 + $0x178] sm:$0xff] %v244_v47  ;;  %v246_v48 = vld [vmem:[%s1401_s26 + $0x300] sm:$0xff]  ;;  %v248_v49 = vld [vmem:[%s1401_s26 + $0x308] sm:$0xff] }
  0x2b   : > { %v250_v50 = vld [vmem:[%s1401_s26 + $0x320] sm:$0xff]  ;;  %247 = vst [vmem:[%s1409_s27 + $0x180] sm:$0xff] %v246_v48  ;;  %249 = vst [vmem:[%s1409_s27 + $0x188] sm:$0xff] %v248_v49  ;;  %v252_v51 = vld [vmem:[%s1401_s26 + $0x328] sm:$0xff] }
  0x2c   : > { %251 = vst [vmem:[%s1409_s27 + $0x190] sm:$0xff] %v250_v50  ;;  %v254_v52 = vld [vmem:[%s1401_s26 + $0x340] sm:$0xff]  ;;  %v256_v53 = vld [vmem:[%s1401_s26 + $0x348] sm:$0xff]  ;;  %253 = vst [vmem:[%s1409_s27 + $0x198] sm:$0xff] %v252_v51 }
  0x2d   : > { %255 = vst [vmem:[%s1409_s27 + $0x1a0] sm:$0xff] %v254_v52  ;;  %257 = vst [vmem:[%s1409_s27 + $0x1a8] sm:$0xff] %v256_v53  ;;  %v258_v54 = vld [vmem:[%s1401_s26 + $0x360] sm:$0xff]  ;;  %v260_v55 = vld [vmem:[%s1401_s26 + $0x368] sm:$0xff] }
  0x2e   : > { %v262_v56 = vld [vmem:[%s1401_s26 + $0x380] sm:$0xff]  ;;  %259 = vst [vmem:[%s1409_s27 + $0x1b0] sm:$0xff] %v258_v54  ;;  %261 = vst [vmem:[%s1409_s27 + $0x1b8] sm:$0xff] %v260_v55  ;;  %v264_v57 = vld [vmem:[%s1401_s26 + $0x388] sm:$0xff] }
  0x2f   : > { %263 = vst [vmem:[%s1409_s27 + $0x1c0] sm:$0xff] %v262_v56  ;;  %v266_v58 = vld [vmem:[%s1401_s26 + $0x3a0] sm:$0xff]  ;;  %v268_v59 = vld [vmem:[%s1401_s26 + $0x3a8] sm:$0xff]  ;;  %265 = vst [vmem:[%s1409_s27 + $0x1c8] sm:$0xff] %v264_v57 }
  0x30   : > { %267 = vst [vmem:[%s1409_s27 + $0x1d0] sm:$0xff] %v266_v58  ;;  %269 = vst [vmem:[%s1409_s27 + $0x1d8] sm:$0xff] %v268_v59  ;;  %v270_v60 = vld [vmem:[%s1401_s26 + $0x3c0] sm:$0xff]  ;;  %v272_v61 = vld [vmem:[%s1401_s26 + $0x3c8] sm:$0xff] }
  0x31   : > { %v274_v62 = vld [vmem:[%s1401_s26 + $0x3e0] sm:$0xff]  ;;  %271 = vst [vmem:[%s1409_s27 + $0x1e0] sm:$0xff] %v270_v60  ;;  %273 = vst [vmem:[%s1409_s27 + $0x1e8] sm:$0xff] %v272_v61  ;;  %v276_v63 = vld [vmem:[%s1401_s26 + $0x3e8] sm:$0xff] }
  0x32   : > { %275 = vst [vmem:[%s1409_s27 + $0x1f0] sm:$0xff] %v274_v62  ;;  %v278_v0 = vld [vmem:[%s1401_s26 + $0x400] sm:$0xff]  ;;  %v280_v1 = vld [vmem:[%s1401_s26 + $0x408] sm:$0xff]  ;;  %277 = vst [vmem:[%s1409_s27 + $0x1f8] sm:$0xff] %v276_v63 }
  0x33   : > { %279 = vst [vmem:[%s1409_s27 + $0x200] sm:$0xff] %v278_v0  ;;  %281 = vst [vmem:[%s1409_s27 + $0x208] sm:$0xff] %v280_v1  ;;  %v282_v2 = vld [vmem:[%s1401_s26 + $0x420] sm:$0xff]  ;;  %v284_v3 = vld [vmem:[%s1401_s26 + $0x428] sm:$0xff] }
  0x34   : > { %v286_v4 = vld [vmem:[%s1401_s26 + $0x440] sm:$0xff]  ;;  %283 = vst [vmem:[%s1409_s27 + $0x210] sm:$0xff] %v282_v2  ;;  %285 = vst [vmem:[%s1409_s27 + $0x218] sm:$0xff] %v284_v3  ;;  %v288_v5 = vld [vmem:[%s1401_s26 + $0x448] sm:$0xff] }
  0x35   : > { %287 = vst [vmem:[%s1409_s27 + $0x220] sm:$0xff] %v286_v4  ;;  %v290_v6 = vld [vmem:[%s1401_s26 + $0x460] sm:$0xff]  ;;  %v292_v7 = vld [vmem:[%s1401_s26 + $0x468] sm:$0xff]  ;;  %289 = vst [vmem:[%s1409_s27 + $0x228] sm:$0xff] %v288_v5 }
  0x36   : > { %291 = vst [vmem:[%s1409_s27 + $0x230] sm:$0xff] %v290_v6  ;;  %293 = vst [vmem:[%s1409_s27 + $0x238] sm:$0xff] %v292_v7  ;;  %v294_v8 = vld [vmem:[%s1401_s26 + $0x480] sm:$0xff]  ;;  %v296_v9 = vld [vmem:[%s1401_s26 + $0x488] sm:$0xff] }
  0x37   : > { %v298_v10 = vld [vmem:[%s1401_s26 + $0x4a0] sm:$0xff]  ;;  %295 = vst [vmem:[%s1409_s27 + $0x240] sm:$0xff] %v294_v8  ;;  %297 = vst [vmem:[%s1409_s27 + $0x248] sm:$0xff] %v296_v9  ;;  %v300_v11 = vld [vmem:[%s1401_s26 + $0x4a8] sm:$0xff] }
  0x38   : > { %299 = vst [vmem:[%s1409_s27 + $0x250] sm:$0xff] %v298_v10  ;;  %v302_v12 = vld [vmem:[%s1401_s26 + $0x4c0] sm:$0xff]  ;;  %v304_v13 = vld [vmem:[%s1401_s26 + $0x4c8] sm:$0xff]  ;;  %301 = vst [vmem:[%s1409_s27 + $0x258] sm:$0xff] %v300_v11 }
  0x39   : > { %303 = vst [vmem:[%s1409_s27 + $0x260] sm:$0xff] %v302_v12  ;;  %305 = vst [vmem:[%s1409_s27 + $0x268] sm:$0xff] %v304_v13  ;;  %v306_v14 = vld [vmem:[%s1401_s26 + $0x4e0] sm:$0xff]  ;;  %v308_v15 = vld [vmem:[%s1401_s26 + $0x4e8] sm:$0xff] }
  0x3a   : > { %v310_v16 = vld [vmem:[%s1401_s26 + $0x500] sm:$0xff]  ;;  %307 = vst [vmem:[%s1409_s27 + $0x270] sm:$0xff] %v306_v14  ;;  %309 = vst [vmem:[%s1409_s27 + $0x278] sm:$0xff] %v308_v15  ;;  %v312_v17 = vld [vmem:[%s1401_s26 + $0x508] sm:$0xff] }
  0x3b   : > { %311 = vst [vmem:[%s1409_s27 + $0x280] sm:$0xff] %v310_v16  ;;  %v314_v18 = vld [vmem:[%s1401_s26 + $0x520] sm:$0xff]  ;;  %v316_v19 = vld [vmem:[%s1401_s26 + $0x528] sm:$0xff]  ;;  %313 = vst [vmem:[%s1409_s27 + $0x288] sm:$0xff] %v312_v17 }
  0x3c   : > { %315 = vst [vmem:[%s1409_s27 + $0x290] sm:$0xff] %v314_v18  ;;  %317 = vst [vmem:[%s1409_s27 + $0x298] sm:$0xff] %v316_v19  ;;  %v318_v20 = vld [vmem:[%s1401_s26 + $0x540] sm:$0xff]  ;;  %v320_v21 = vld [vmem:[%s1401_s26 + $0x548] sm:$0xff] }
  0x3d   : > { %v322_v22 = vld [vmem:[%s1401_s26 + $0x560] sm:$0xff]  ;;  %319 = vst [vmem:[%s1409_s27 + $0x2a0] sm:$0xff] %v318_v20  ;;  %321 = vst [vmem:[%s1409_s27 + $0x2a8] sm:$0xff] %v320_v21  ;;  %v324_v23 = vld [vmem:[%s1401_s26 + $0x568] sm:$0xff] }
  0x3e   : > { %323 = vst [vmem:[%s1409_s27 + $0x2b0] sm:$0xff] %v322_v22  ;;  %v326_v24 = vld [vmem:[%s1401_s26 + $0x580] sm:$0xff]  ;;  %v328_v25 = vld [vmem:[%s1401_s26 + $0x588] sm:$0xff]  ;;  %325 = vst [vmem:[%s1409_s27 + $0x2b8] sm:$0xff] %v324_v23 }
  0x3f   : > { %327 = vst [vmem:[%s1409_s27 + $0x2c0] sm:$0xff] %v326_v24  ;;  %329 = vst [vmem:[%s1409_s27 + $0x2c8] sm:$0xff] %v328_v25  ;;  %v330_v26 = vld [vmem:[%s1401_s26 + $0x5a0] sm:$0xff]  ;;  %v332_v27 = vld [vmem:[%s1401_s26 + $0x5a8] sm:$0xff] }
  0x40   : > { %v334_v28 = vld [vmem:[%s1401_s26 + $0x5c0] sm:$0xff]  ;;  %331 = vst [vmem:[%s1409_s27 + $0x2d0] sm:$0xff] %v330_v26  ;;  %333 = vst [vmem:[%s1409_s27 + $0x2d8] sm:$0xff] %v332_v27  ;;  %v336_v29 = vld [vmem:[%s1401_s26 + $0x5c8] sm:$0xff] }
  0x41   : > { %335 = vst [vmem:[%s1409_s27 + $0x2e0] sm:$0xff] %v334_v28  ;;  %v338_v30 = vld [vmem:[%s1401_s26 + $0x5e0] sm:$0xff]  ;;  %v340_v31 = vld [vmem:[%s1401_s26 + $0x5e8] sm:$0xff]  ;;  %337 = vst [vmem:[%s1409_s27 + $0x2e8] sm:$0xff] %v336_v29 }
  0x42   : > { %339 = vst [vmem:[%s1409_s27 + $0x2f0] sm:$0xff] %v338_v30  ;;  %341 = vst [vmem:[%s1409_s27 + $0x2f8] sm:$0xff] %v340_v31  ;;  %v342_v32 = vld [vmem:[%s1401_s26 + $0x600] sm:$0xff]  ;;  %v344_v33 = vld [vmem:[%s1401_s26 + $0x608] sm:$0xff] }
  0x43   : > { %v346_v34 = vld [vmem:[%s1401_s26 + $0x620] sm:$0xff]  ;;  %343 = vst [vmem:[%s1409_s27 + $0x300] sm:$0xff] %v342_v32  ;;  %345 = vst [vmem:[%s1409_s27 + $0x308] sm:$0xff] %v344_v33  ;;  %v348_v35 = vld [vmem:[%s1401_s26 + $0x628] sm:$0xff] }
  0x44   : > { %347 = vst [vmem:[%s1409_s27 + $0x310] sm:$0xff] %v346_v34  ;;  %v350_v36 = vld [vmem:[%s1401_s26 + $0x640] sm:$0xff]  ;;  %v352_v37 = vld [vmem:[%s1401_s26 + $0x648] sm:$0xff]  ;;  %349 = vst [vmem:[%s1409_s27 + $0x318] sm:$0xff] %v348_v35 }
  0x45   : > { %351 = vst [vmem:[%s1409_s27 + $0x320] sm:$0xff] %v350_v36  ;;  %353 = vst [vmem:[%s1409_s27 + $0x328] sm:$0xff] %v352_v37  ;;  %v354_v38 = vld [vmem:[%s1401_s26 + $0x660] sm:$0xff]  ;;  %v356_v39 = vld [vmem:[%s1401_s26 + $0x668] sm:$0xff] }
  0x46   : > { %v358_v40 = vld [vmem:[%s1401_s26 + $0x680] sm:$0xff]  ;;  %355 = vst [vmem:[%s1409_s27 + $0x330] sm:$0xff] %v354_v38  ;;  %357 = vst [vmem:[%s1409_s27 + $0x338] sm:$0xff] %v356_v39  ;;  %v360_v41 = vld [vmem:[%s1401_s26 + $0x688] sm:$0xff] }
  0x47   : > { %359 = vst [vmem:[%s1409_s27 + $0x340] sm:$0xff] %v358_v40  ;;  %v362_v42 = vld [vmem:[%s1401_s26 + $0x6a0] sm:$0xff]  ;;  %v364_v43 = vld [vmem:[%s1401_s26 + $0x6a8] sm:$0xff]  ;;  %361 = vst [vmem:[%s1409_s27 + $0x348] sm:$0xff] %v360_v41 }
  0x48   : > { %363 = vst [vmem:[%s1409_s27 + $0x350] sm:$0xff] %v362_v42  ;;  %365 = vst [vmem:[%s1409_s27 + $0x358] sm:$0xff] %v364_v43  ;;  %v366_v44 = vld [vmem:[%s1401_s26 + $0x6c0] sm:$0xff]  ;;  %v368_v45 = vld [vmem:[%s1401_s26 + $0x6c8] sm:$0xff] }
  0x49   : > { %v370_v46 = vld [vmem:[%s1401_s26 + $0x6e0] sm:$0xff]  ;;  %367 = vst [vmem:[%s1409_s27 + $0x360] sm:$0xff] %v366_v44  ;;  %369 = vst [vmem:[%s1409_s27 + $0x368] sm:$0xff] %v368_v45  ;;  %v372_v47 = vld [vmem:[%s1401_s26 + $0x6e8] sm:$0xff] }
  0x4a   : > { %371 = vst [vmem:[%s1409_s27 + $0x370] sm:$0xff] %v370_v46  ;;  %v374_v48 = vld [vmem:[%s1401_s26 + $0x700] sm:$0xff]  ;;  %v376_v49 = vld [vmem:[%s1401_s26 + $0x708] sm:$0xff]  ;;  %373 = vst [vmem:[%s1409_s27 + $0x378] sm:$0xff] %v372_v47 }
  0x4b   : > { %375 = vst [vmem:[%s1409_s27 + $0x380] sm:$0xff] %v374_v48  ;;  %377 = vst [vmem:[%s1409_s27 + $0x388] sm:$0xff] %v376_v49  ;;  %v378_v50 = vld [vmem:[%s1401_s26 + $0x720] sm:$0xff]  ;;  %v380_v51 = vld [vmem:[%s1401_s26 + $0x728] sm:$0xff] }
  0x4c   : > { %v382_v52 = vld [vmem:[%s1401_s26 + $0x740] sm:$0xff]  ;;  %379 = vst [vmem:[%s1409_s27 + $0x390] sm:$0xff] %v378_v50  ;;  %381 = vst [vmem:[%s1409_s27 + $0x398] sm:$0xff] %v380_v51  ;;  %v384_v53 = vld [vmem:[%s1401_s26 + $0x748] sm:$0xff] }
  0x4d   : > { %383 = vst [vmem:[%s1409_s27 + $0x3a0] sm:$0xff] %v382_v52  ;;  %v386_v54 = vld [vmem:[%s1401_s26 + $0x760] sm:$0xff]  ;;  %v388_v55 = vld [vmem:[%s1401_s26 + $0x768] sm:$0xff]  ;;  %385 = vst [vmem:[%s1409_s27 + $0x3a8] sm:$0xff] %v384_v53 }
  0x4e   : > { %387 = vst [vmem:[%s1409_s27 + $0x3b0] sm:$0xff] %v386_v54  ;;  %389 = vst [vmem:[%s1409_s27 + $0x3b8] sm:$0xff] %v388_v55  ;;  %v390_v56 = vld [vmem:[%s1401_s26 + $0x780] sm:$0xff]  ;;  %v392_v57 = vld [vmem:[%s1401_s26 + $0x788] sm:$0xff] }
  0x4f   : > { %v394_v58 = vld [vmem:[%s1401_s26 + $0x7a0] sm:$0xff]  ;;  %391 = vst [vmem:[%s1409_s27 + $0x3c0] sm:$0xff] %v390_v56  ;;  %393 = vst [vmem:[%s1409_s27 + $0x3c8] sm:$0xff] %v392_v57  ;;  %v396_v59 = vld [vmem:[%s1401_s26 + $0x7a8] sm:$0xff] }
  0x50   : > { %395 = vst [vmem:[%s1409_s27 + $0x3d0] sm:$0xff] %v394_v58  ;;  %v398_v60 = vld [vmem:[%s1401_s26 + $0x7c0] sm:$0xff]  ;;  %v400_v61 = vld [vmem:[%s1401_s26 + $0x7c8] sm:$0xff]  ;;  %397 = vst [vmem:[%s1409_s27 + $0x3d8] sm:$0xff] %v396_v59 }
  0x51   : > { %399 = vst [vmem:[%s1409_s27 + $0x3e0] sm:$0xff] %v398_v60  ;;  %401 = vst [vmem:[%s1409_s27 + $0x3e8] sm:$0xff] %v400_v61  ;;  %v402_v62 = vld [vmem:[%s1401_s26 + $0x7e0] sm:$0xff]  ;;  %v404_v63 = vld [vmem:[%s1401_s26 + $0x7e8] sm:$0xff] }
  0x52   : > { %v406_v0 = vld [vmem:[%s1401_s26 + $0x800] sm:$0xff]  ;;  %403 = vst [vmem:[%s1409_s27 + $0x3f0] sm:$0xff] %v402_v62  ;;  %405 = vst [vmem:[%s1409_s27 + $0x3f8] sm:$0xff] %v404_v63  ;;  %v408_v1 = vld [vmem:[%s1401_s26 + $0x808] sm:$0xff] }
  0x53   : > { %407 = vst [vmem:[%s1409_s27 + $0x400] sm:$0xff] %v406_v0  ;;  %v410_v2 = vld [vmem:[%s1401_s26 + $0x820] sm:$0xff]  ;;  %v412_v3 = vld [vmem:[%s1401_s26 + $0x828] sm:$0xff]  ;;  %409 = vst [vmem:[%s1409_s27 + $0x408] sm:$0xff] %v408_v1 }
  0x54   : > { %411 = vst [vmem:[%s1409_s27 + $0x410] sm:$0xff] %v410_v2  ;;  %413 = vst [vmem:[%s1409_s27 + $0x418] sm:$0xff] %v412_v3  ;;  %v414_v4 = vld [vmem:[%s1401_s26 + $0x840] sm:$0xff]  ;;  %v416_v5 = vld [vmem:[%s1401_s26 + $0x848] sm:$0xff] }
  0x55   : > { %v418_v6 = vld [vmem:[%s1401_s26 + $0x860] sm:$0xff]  ;;  %415 = vst [vmem:[%s1409_s27 + $0x420] sm:$0xff] %v414_v4  ;;  %417 = vst [vmem:[%s1409_s27 + $0x428] sm:$0xff] %v416_v5  ;;  %v420_v7 = vld [vmem:[%s1401_s26 + $0x868] sm:$0xff] }
  0x56   : > { %419 = vst [vmem:[%s1409_s27 + $0x430] sm:$0xff] %v418_v6  ;;  %v422_v8 = vld [vmem:[%s1401_s26 + $0x880] sm:$0xff]  ;;  %v424_v9 = vld [vmem:[%s1401_s26 + $0x888] sm:$0xff]  ;;  %421 = vst [vmem:[%s1409_s27 + $0x438] sm:$0xff] %v420_v7 }
  0x57   : > { %423 = vst [vmem:[%s1409_s27 + $0x440] sm:$0xff] %v422_v8  ;;  %425 = vst [vmem:[%s1409_s27 + $0x448] sm:$0xff] %v424_v9  ;;  %v426_v10 = vld [vmem:[%s1401_s26 + $0x8a0] sm:$0xff]  ;;  %v428_v11 = vld [vmem:[%s1401_s26 + $0x8a8] sm:$0xff] }
  0x58   : > { %v430_v12 = vld [vmem:[%s1401_s26 + $0x8c0] sm:$0xff]  ;;  %427 = vst [vmem:[%s1409_s27 + $0x450] sm:$0xff] %v426_v10  ;;  %429 = vst [vmem:[%s1409_s27 + $0x458] sm:$0xff] %v428_v11  ;;  %v432_v13 = vld [vmem:[%s1401_s26 + $0x8c8] sm:$0xff] }
  0x59   : > { %431 = vst [vmem:[%s1409_s27 + $0x460] sm:$0xff] %v430_v12  ;;  %v434_v14 = vld [vmem:[%s1401_s26 + $0x8e0] sm:$0xff]  ;;  %v436_v15 = vld [vmem:[%s1401_s26 + $0x8e8] sm:$0xff]  ;;  %433 = vst [vmem:[%s1409_s27 + $0x468] sm:$0xff] %v432_v13 }
  0x5a   : > { %435 = vst [vmem:[%s1409_s27 + $0x470] sm:$0xff] %v434_v14  ;;  %437 = vst [vmem:[%s1409_s27 + $0x478] sm:$0xff] %v436_v15 }
  0x5b PF: > { %p1252_p7 = scmp.ge.s32.totalorder %s1337_s14, 1  ;;  %p442_p8 = scmp.lt.s32.totalorder %s1337_s14, 3 }
  0x5d   : > { %p443_p9 = pnand %p1252_p7, %p442_p8 }
  0x5e   : > { %s449_s28 = sand.u32 (!%p443_p9), 1, %s1329_s12  }
  0x5f   : > { %446 = sbr.rel (%p443_p9) target bundleno = 421 (0x1a5), region = 51  ;;  %s1998_s8 = sshll.u32 (!%p443_p9), %s449_s28, 7 }
  0x60   : > { %s1286_s6 = smul.u32 (!%p443_p9), 1152, %s449_s28  ;;  %s2009_s12 = scalar_lea.vmem (!%p443_p9), [#allocation3], %s1998_s8 }
  0x62   : > { %s1704_s7 = scalar_lea.vmem (!%p443_p9), [#allocation2], %s1286_s6 }
  0x64   : > { %v474_v16 = vld [vmem:[%s2064_s0 + $0x8] sm:$0xff]  ;;  %v476_v17 = vld [vmem:[%s2064_s0 + $0x18] sm:$0xff]  ;;  %v1339_v18 = vmov 0   ;;  %v543_v21 = vld [vmem:[%s1704_s7 + $0xf0] sm:$0xff]  ;;  %vm705_vm0 = vcmask 523264   ;;  %s1268_s28 = sshll.u32 (%p1391_p5), %s1246_s15, 4 }
  0x65   : > { %794 = vmatprep.mubr.f32.mxu0 %v474_v16  ;;  %907 = vmatprep.mubr.f32.mxu1 %v476_v17  ;;  %v544_v19 = vld [vmem:[%s1704_s7 + $0xf8] sm:$0xff]  ;;  %v607_v22 = vld [vmem:[%s1704_s7 + $0x2f0] sm:$0xff]  ;;  %v542_v23 = vld [vmem:[%s1704_s7 + $0xe8] sm:$0xff]  ;;  %s1142_s20 = scalar_lea.vmem (%p1391_p5), %s2067_s3, %s1268_s28 }
  0x66   : > { %1313 = vset.pattern.permute.xlu0 %v1339_v18  ;;  %1314 = vset.pattern.permute.xlu1 %v1339_v18  ;;  %v608_v20 = vld [vmem:[%s1704_s7 + $0x2f8] sm:$0xff]  ;;  %v606_v24 = vld [vmem:[%s1704_s7 + $0x2e8] sm:$0xff]  ;;  %v541_v25 = vld [vmem:[%s1704_s7 + $0xe0] sm:$0xff] }
  0x67   : > { %730 = vmatprep.subr.mxu0 %v544_v19  ;;  %843 = vmatprep.subr.mxu1 %v608_v20  ;;  %v605_v26 = vld [vmem:[%s1704_s7 + $0x2e0] sm:$0xff]  ;;  %v540_v27 = vld [vmem:[%s1704_s7 + $0xd8] sm:$0xff]  ;;  %v539_v29 = vld [vmem:[%s1704_s7 + $0xd0] sm:$0xff] }
  0x68   : > { %731 = vmatpush1.msra.mxu0 %v543_v21  ;;  %844 = vmatpush1.msra.mxu1 %v607_v22  ;;  %v604_v28 = vld [vmem:[%s1704_s7 + $0x2d8] sm:$0xff]  ;;  %v603_v30 = vld [vmem:[%s1704_s7 + $0x2d0] sm:$0xff]  ;;  %v538_v31 = vld [vmem:[%s1704_s7 + $0xc8] sm:$0xff] }
  0x69   : > { %732 = vmatprep.subr.mxu0 %v542_v23  ;;  %845 = vmatprep.subr.mxu1 %v606_v24  ;;  %v602_v32 = vld [vmem:[%s1704_s7 + $0x2c8] sm:$0xff]  ;;  %v537_v33 = vld [vmem:[%s1704_s7 + $0xc0] sm:$0xff]  ;;  %v536_v35 = vld [vmem:[%s1704_s7 + $0xb8] sm:$0xff] }
  0x6a   : > { %733 = vmatpush1.msra.mxu0 %v541_v25  ;;  %846 = vmatpush1.msra.mxu1 %v605_v26  ;;  %v601_v34 = vld [vmem:[%s1704_s7 + $0x2c0] sm:$0xff]  ;;  %v600_v36 = vld [vmem:[%s1704_s7 + $0x2b8] sm:$0xff]  ;;  %v535_v37 = vld [vmem:[%s1704_s7 + $0xb0] sm:$0xff] }
  0x6b   : > { %734 = vmatprep.subr.mxu0 %v540_v27  ;;  %847 = vmatprep.subr.mxu1 %v604_v28  ;;  %v599_v38 = vld [vmem:[%s1704_s7 + $0x2b0] sm:$0xff]  ;;  %v534_v39 = vld [vmem:[%s1704_s7 + $0xa8] sm:$0xff]  ;;  %v533_v41 = vld [vmem:[%s1704_s7 + $0xa0] sm:$0xff] }
  0x6c   : > { %735 = vmatpush1.msra.mxu0 %v539_v29  ;;  %848 = vmatpush1.msra.mxu1 %v603_v30  ;;  %v598_v40 = vld [vmem:[%s1704_s7 + $0x2a8] sm:$0xff]  ;;  %v597_v42 = vld [vmem:[%s1704_s7 + $0x2a0] sm:$0xff]  ;;  %v532_v43 = vld [vmem:[%s1704_s7 + $0x98] sm:$0xff] }
  0x6d   : > { %736 = vmatprep.subr.mxu0 %v538_v31  ;;  %849 = vmatprep.subr.mxu1 %v602_v32  ;;  %v596_v44 = vld [vmem:[%s1704_s7 + $0x298] sm:$0xff]  ;;  %v531_v45 = vld [vmem:[%s1704_s7 + $0x90] sm:$0xff]  ;;  %v530_v47 = vld [vmem:[%s1704_s7 + $0x88] sm:$0xff] }
  0x6e   : > { %737 = vmatpush1.msra.mxu0 %v537_v33  ;;  %850 = vmatpush1.msra.mxu1 %v601_v34  ;;  %v595_v46 = vld [vmem:[%s1704_s7 + $0x290] sm:$0xff]  ;;  %v594_v48 = vld [vmem:[%s1704_s7 + $0x288] sm:$0xff]  ;;  %v529_v49 = vld [vmem:[%s1704_s7 + $0x80] sm:$0xff] }
  0x6f   : > { %738 = vmatprep.subr.mxu0 %v536_v35  ;;  %851 = vmatprep.subr.mxu1 %v600_v36  ;;  %v593_v50 = vld [vmem:[%s1704_s7 + $0x280] sm:$0xff]  ;;  %v528_v51 = vld [vmem:[%s1704_s7 + $0x78] sm:$0xff]  ;;  %v527_v53 = vld [vmem:[%s1704_s7 + $0x70] sm:$0xff] }
  0x70   : > { %739 = vmatpush1.msra.mxu0 %v535_v37  ;;  %852 = vmatpush1.msra.mxu1 %v599_v38  ;;  %v592_v52 = vld [vmem:[%s1704_s7 + $0x278] sm:$0xff]  ;;  %v591_v54 = vld [vmem:[%s1704_s7 + $0x270] sm:$0xff]  ;;  %v526_v55 = vld [vmem:[%s1704_s7 + $0x68] sm:$0xff] }
  0x71   : > { %740 = vmatprep.subr.mxu0 %v534_v39  ;;  %853 = vmatprep.subr.mxu1 %v598_v40  ;;  %v590_v56 = vld [vmem:[%s1704_s7 + $0x268] sm:$0xff]  ;;  %v525_v57 = vld [vmem:[%s1704_s7 + $0x60] sm:$0xff]  ;;  %v524_v59 = vld [vmem:[%s1704_s7 + $0x58] sm:$0xff] }
  0x72   : > { %741 = vmatpush1.msra.mxu0 %v533_v41  ;;  %854 = vmatpush1.msra.mxu1 %v597_v42  ;;  %v589_v58 = vld [vmem:[%s1704_s7 + $0x260] sm:$0xff]  ;;  %v588_v60 = vld [vmem:[%s1704_s7 + $0x258] sm:$0xff]  ;;  %v523_v61 = vld [vmem:[%s1704_s7 + $0x50] sm:$0xff] }
  0x73   : > { %742 = vmatprep.subr.mxu0 %v532_v43  ;;  %855 = vmatprep.subr.mxu1 %v596_v44  ;;  %v587_v62 = vld [vmem:[%s1704_s7 + $0x250] sm:$0xff]  ;;  %v522_v63 = vld [vmem:[%s1704_s7 + $0x48] sm:$0xff]  ;;  %v521_v1 = vld [vmem:[%s1704_s7 + $0x40] sm:$0xff] }
  0x74   : > { %743 = vmatpush1.msra.mxu0 %v531_v45  ;;  %856 = vmatpush1.msra.mxu1 %v595_v46  ;;  %v586_v0 = vld [vmem:[%s1704_s7 + $0x248] sm:$0xff]  ;;  %v585_v2 = vld [vmem:[%s1704_s7 + $0x240] sm:$0xff]  ;;  %v520_v3 = vld [vmem:[%s1704_s7 + $0x38] sm:$0xff] }
  0x75   : > { %744 = vmatprep.subr.mxu0 %v530_v47  ;;  %857 = vmatprep.subr.mxu1 %v594_v48  ;;  %v584_v4 = vld [vmem:[%s1704_s7 + $0x238] sm:$0xff]  ;;  %v519_v5 = vld [vmem:[%s1704_s7 + $0x30] sm:$0xff]  ;;  %v518_v7 = vld [vmem:[%s1704_s7 + $0x28] sm:$0xff] }
  0x76   : > { %745 = vmatpush1.msra.mxu0 %v529_v49  ;;  %858 = vmatpush1.msra.mxu1 %v593_v50  ;;  %v583_v6 = vld [vmem:[%s1704_s7 + $0x230] sm:$0xff]  ;;  %v582_v8 = vld [vmem:[%s1704_s7 + $0x228] sm:$0xff]  ;;  %v517_v9 = vld [vmem:[%s1704_s7 + $0x20] sm:$0xff] }
  0x77   : > { %746 = vmatprep.subr.mxu0 %v528_v51  ;;  %859 = vmatprep.subr.mxu1 %v592_v52  ;;  %v581_v10 = vld [vmem:[%s1704_s7 + $0x220] sm:$0xff]  ;;  %v516_v11 = vld [vmem:[%s1704_s7 + $0x18] sm:$0xff]  ;;  %v515_v13 = vld [vmem:[%s1704_s7 + $0x10] sm:$0xff] }
  0x78   : > { %747 = vmatpush1.msra.mxu0 %v527_v53  ;;  %860 = vmatpush1.msra.mxu1 %v591_v54  ;;  %v580_v12 = vld [vmem:[%s1704_s7 + $0x218] sm:$0xff]  ;;  %v579_v14 = vld [vmem:[%s1704_s7 + $0x210] sm:$0xff]  ;;  %v514_v15 = vld [vmem:[%s1704_s7 + $0x8] sm:$0xff] }
  0x79   : > { %748 = vmatprep.subr.mxu0 %v526_v55  ;;  %861 = vmatprep.subr.mxu1 %v590_v56  ;;  %v578_v16 = vld [vmem:[%s1704_s7 + $0x208] sm:$0xff]  ;;  %v513_v17 = vld [vmem:[%s1704_s7] sm:$0xff]  ;;  %v576_v19 = vld [vmem:[%s1704_s7 + $0x1f8] sm:$0xff] }
  0x7a   : > { %749 = vmatpush1.msra.mxu0 %v525_v57  ;;  %862 = vmatpush1.msra.mxu1 %v589_v58  ;;  %v577_v18 = vld [vmem:[%s1704_s7 + $0x200] sm:$0xff]  ;;  %v640_v20 = vld [vmem:[%s1704_s7 + $0x3f8] sm:$0xff]  ;;  %v575_v21 = vld [vmem:[%s1704_s7 + $0x1f0] sm:$0xff] }
  0x7b   : > { %750 = vmatprep.subr.mxu0 %v524_v59  ;;  %863 = vmatprep.subr.mxu1 %v588_v60  ;;  %v639_v22 = vld [vmem:[%s1704_s7 + $0x3f0] sm:$0xff]  ;;  %v574_v23 = vld [vmem:[%s1704_s7 + $0x1e8] sm:$0xff]  ;;  %v573_v25 = vld [vmem:[%s1704_s7 + $0x1e0] sm:$0xff] }
  0x7c   : > { %751 = vmatpush1.msra.mxu0 %v523_v61  ;;  %864 = vmatpush1.msra.mxu1 %v587_v62  ;;  %v638_v24 = vld [vmem:[%s1704_s7 + $0x3e8] sm:$0xff]  ;;  %v637_v26 = vld [vmem:[%s1704_s7 + $0x3e0] sm:$0xff]  ;;  %v572_v27 = vld [vmem:[%s1704_s7 + $0x1d8] sm:$0xff] }
  0x7d   : > { %752 = vmatprep.subr.mxu0 %v522_v63  ;;  %865 = vmatprep.subr.mxu1 %v586_v0  ;;  %v636_v28 = vld [vmem:[%s1704_s7 + $0x3d8] sm:$0xff]  ;;  %v571_v29 = vld [vmem:[%s1704_s7 + $0x1d0] sm:$0xff]  ;;  %v570_v31 = vld [vmem:[%s1704_s7 + $0x1c8] sm:$0xff] }
  0x7e   : > { %753 = vmatpush1.msra.mxu0 %v521_v1  ;;  %866 = vmatpush1.msra.mxu1 %v585_v2  ;;  %v635_v30 = vld [vmem:[%s1704_s7 + $0x3d0] sm:$0xff]  ;;  %v634_v32 = vld [vmem:[%s1704_s7 + $0x3c8] sm:$0xff]  ;;  %v569_v33 = vld [vmem:[%s1704_s7 + $0x1c0] sm:$0xff] }
  0x7f   : > { %754 = vmatprep.subr.mxu0 %v520_v3  ;;  %867 = vmatprep.subr.mxu1 %v584_v4  ;;  %v633_v34 = vld [vmem:[%s1704_s7 + $0x3c0] sm:$0xff]  ;;  %v568_v35 = vld [vmem:[%s1704_s7 + $0x1b8] sm:$0xff]  ;;  %v567_v37 = vld [vmem:[%s1704_s7 + $0x1b0] sm:$0xff] }
  0x80   : > { %755 = vmatpush1.msra.mxu0 %v519_v5  ;;  %868 = vmatpush1.msra.mxu1 %v583_v6  ;;  %v632_v36 = vld [vmem:[%s1704_s7 + $0x3b8] sm:$0xff]  ;;  %v631_v38 = vld [vmem:[%s1704_s7 + $0x3b0] sm:$0xff]  ;;  %v566_v39 = vld [vmem:[%s1704_s7 + $0x1a8] sm:$0xff] }
  0x81   : > { %756 = vmatprep.subr.mxu0 %v518_v7  ;;  %869 = vmatprep.subr.mxu1 %v582_v8  ;;  %v630_v40 = vld [vmem:[%s1704_s7 + $0x3a8] sm:$0xff]  ;;  %v565_v41 = vld [vmem:[%s1704_s7 + $0x1a0] sm:$0xff]  ;;  %v564_v43 = vld [vmem:[%s1704_s7 + $0x198] sm:$0xff] }
  0x82   : > { %757 = vmatpush1.msra.mxu0 %v517_v9  ;;  %870 = vmatpush1.msra.mxu1 %v581_v10  ;;  %v629_v42 = vld [vmem:[%s1704_s7 + $0x3a0] sm:$0xff]  ;;  %v628_v44 = vld [vmem:[%s1704_s7 + $0x398] sm:$0xff]  ;;  %v563_v45 = vld [vmem:[%s1704_s7 + $0x190] sm:$0xff] }
  0x83   : > { %758 = vmatprep.subr.mxu0 %v516_v11  ;;  %871 = vmatprep.subr.mxu1 %v580_v12  ;;  %v627_v46 = vld [vmem:[%s1704_s7 + $0x390] sm:$0xff]  ;;  %v562_v47 = vld [vmem:[%s1704_s7 + $0x188] sm:$0xff]  ;;  %v561_v49 = vld [vmem:[%s1704_s7 + $0x180] sm:$0xff] }
  0x84   : > { %759 = vmatpush1.msra.mxu0 %v515_v13  ;;  %872 = vmatpush1.msra.mxu1 %v579_v14  ;;  %v626_v48 = vld [vmem:[%s1704_s7 + $0x388] sm:$0xff]  ;;  %v625_v50 = vld [vmem:[%s1704_s7 + $0x380] sm:$0xff]  ;;  %v560_v51 = vld [vmem:[%s1704_s7 + $0x178] sm:$0xff] }
  0x85   : > { %760 = vmatprep.subr.mxu0 %v514_v15  ;;  %873 = vmatprep.subr.mxu1 %v578_v16  ;;  %v624_v52 = vld [vmem:[%s1704_s7 + $0x378] sm:$0xff]  ;;  %v559_v53 = vld [vmem:[%s1704_s7 + $0x170] sm:$0xff]  ;;  %v558_v55 = vld [vmem:[%s1704_s7 + $0x168] sm:$0xff] }
  0x86   : > { %761 = vmatpush1.msra.mxu0 %v513_v17  ;;  %874 = vmatpush1.msra.mxu1 %v577_v18  ;;  %v623_v54 = vld [vmem:[%s1704_s7 + $0x370] sm:$0xff]  ;;  %v622_v56 = vld [vmem:[%s1704_s7 + $0x368] sm:$0xff]  ;;  %v557_v57 = vld [vmem:[%s1704_s7 + $0x160] sm:$0xff] }
  0x87   : > { %762 = vmatprep.subr.mxu0 %v576_v19  ;;  %875 = vmatprep.subr.mxu1 %v640_v20  ;;  %v621_v58 = vld [vmem:[%s1704_s7 + $0x360] sm:$0xff]  ;;  %v556_v59 = vld [vmem:[%s1704_s7 + $0x158] sm:$0xff]  ;;  %v555_v61 = vld [vmem:[%s1704_s7 + $0x150] sm:$0xff] }
  0x88   : > { %763 = vmatpush2.msra.mxu0 %v575_v21  ;;  %876 = vmatpush2.msra.mxu1 %v639_v22  ;;  %v620_v60 = vld [vmem:[%s1704_s7 + $0x358] sm:$0xff]  ;;  %v619_v62 = vld [vmem:[%s1704_s7 + $0x350] sm:$0xff]  ;;  %v554_v63 = vld [vmem:[%s1704_s7 + $0x148] sm:$0xff] }
  0x89   : > { %764 = vmatprep.subr.mxu0 %v574_v23  ;;  %877 = vmatprep.subr.mxu1 %v638_v24  ;;  %v618_v0 = vld [vmem:[%s1704_s7 + $0x348] sm:$0xff]  ;;  %v553_v1 = vld [vmem:[%s1704_s7 + $0x140] sm:$0xff]  ;;  %v552_v3 = vld [vmem:[%s1704_s7 + $0x138] sm:$0xff] }
  0x8a   : > { %765 = vmatpush2.msra.mxu0 %v573_v25  ;;  %878 = vmatpush2.msra.mxu1 %v637_v26  ;;  %v617_v2 = vld [vmem:[%s1704_s7 + $0x340] sm:$0xff]  ;;  %v616_v4 = vld [vmem:[%s1704_s7 + $0x338] sm:$0xff]  ;;  %v551_v5 = vld [vmem:[%s1704_s7 + $0x130] sm:$0xff] }
  0x8b   : > { %766 = vmatprep.subr.mxu0 %v572_v27  ;;  %879 = vmatprep.subr.mxu1 %v636_v28  ;;  %v615_v6 = vld [vmem:[%s1704_s7 + $0x330] sm:$0xff]  ;;  %v550_v7 = vld [vmem:[%s1704_s7 + $0x128] sm:$0xff]  ;;  %v549_v9 = vld [vmem:[%s1704_s7 + $0x120] sm:$0xff] }
  0x8c   : > { %767 = vmatpush2.msra.mxu0 %v571_v29  ;;  %880 = vmatpush2.msra.mxu1 %v635_v30  ;;  %v614_v8 = vld [vmem:[%s1704_s7 + $0x328] sm:$0xff]  ;;  %v613_v10 = vld [vmem:[%s1704_s7 + $0x320] sm:$0xff]  ;;  %v548_v11 = vld [vmem:[%s1704_s7 + $0x118] sm:$0xff] }
  0x8d   : > { %768 = vmatprep.subr.mxu0 %v570_v31  ;;  %881 = vmatprep.subr.mxu1 %v634_v32  ;;  %v612_v12 = vld [vmem:[%s1704_s7 + $0x318] sm:$0xff]  ;;  %v547_v13 = vld [vmem:[%s1704_s7 + $0x110] sm:$0xff]  ;;  %v546_v15 = vld [vmem:[%s1704_s7 + $0x108] sm:$0xff] }
  0x8e   : > { %769 = vmatpush2.msra.mxu0 %v569_v33  ;;  %882 = vmatpush2.msra.mxu1 %v633_v34  ;;  %v611_v14 = vld [vmem:[%s1704_s7 + $0x310] sm:$0xff]  ;;  %v610_v16 = vld [vmem:[%s1704_s7 + $0x308] sm:$0xff]  ;;  %v545_v17 = vld [vmem:[%s1704_s7 + $0x100] sm:$0xff] }
  0x8f   : > { %770 = vmatprep.subr.mxu0 %v568_v35  ;;  %883 = vmatprep.subr.mxu1 %v632_v36  ;;  %v609_v18 = vld [vmem:[%s1704_s7 + $0x300] sm:$0xff]  ;;  %v475_v20 = vld [vmem:[%s2064_s0 + $0x10] sm:$0xff]  ;;  %v656_v21 = vld [vmem:[%s1704_s7 + $0x478] sm:$0xff] }
  0x90   : > { %771 = vmatpush2.msra.mxu0 %v567_v37  ;;  %884 = vmatpush2.msra.mxu1 %v631_v38  ;;  %v473_v19 = vld [vmem:[%s2064_s0] sm:$0xff]  ;;  %v655_v22 = vld [vmem:[%s1704_s7 + $0x470] sm:$0xff]  ;;  %v478_v25 = vld [vmem:[%s2064_s0 + $0x28] sm:$0xff] }
  0x91   : > { %772 = vmatprep.subr.mxu0 %v566_v39  ;;  %885 = vmatprep.subr.mxu1 %v630_v40  ;;  %v479_v23 = vld [vmem:[%s2064_s0 + $0x30] sm:$0xff]  ;;  %v481_v24 = vld [vmem:[%s2064_s0 + $0x40] sm:$0xff]  ;;  %v480_v26 = vld [vmem:[%s2064_s0 + $0x38] sm:$0xff] }
  0x92   : > { %773 = vmatpush2.msra.mxu0 %v565_v41  ;;  %886 = vmatpush2.msra.mxu1 %v629_v42  ;;  %v654_v27 = vld [vmem:[%s1704_s7 + $0x468] sm:$0xff]  ;;  %v653_v28 = vld [vmem:[%s1704_s7 + $0x460] sm:$0xff]  ;;  %v484_v29 = vld [vmem:[%s2064_s0 + $0x58] sm:$0xff] }
  0x93   : > { %774 = vmatprep.subr.mxu0 %v564_v43  ;;  %887 = vmatprep.subr.mxu1 %v628_v44  ;;  %v486_v30 = vld [vmem:[%s2064_s0 + $0x68] sm:$0xff]  ;;  %v483_v31 = vld [vmem:[%s2064_s0 + $0x50] sm:$0xff]  ;;  %v485_v32 = vld [vmem:[%s2064_s0 + $0x60] sm:$0xff] }
  0x94   : > { %775 = vmatpush2.msra.mxu0 %v563_v45  ;;  %888 = vmatpush2.msra.mxu1 %v627_v46  ;;  %v652_v33 = vld [vmem:[%s1704_s7 + $0x458] sm:$0xff]  ;;  %v651_v34 = vld [vmem:[%s1704_s7 + $0x450] sm:$0xff]  ;;  %v489_v35 = vld [vmem:[%s2064_s0 + $0x80] sm:$0xff] }
  0x95   : > { %776 = vmatprep.subr.mxu0 %v562_v47  ;;  %889 = vmatprep.subr.mxu1 %v626_v48  ;;  %v491_v36 = vld [vmem:[%s2064_s0 + $0x90] sm:$0xff]  ;;  %v488_v37 = vld [vmem:[%s2064_s0 + $0x78] sm:$0xff]  ;;  %v490_v38 = vld [vmem:[%s2064_s0 + $0x88] sm:$0xff] }
  0x96   : > { %777 = vmatpush2.msra.mxu0 %v561_v49  ;;  %890 = vmatpush2.msra.mxu1 %v625_v50  ;;  %v650_v39 = vld [vmem:[%s1704_s7 + $0x448] sm:$0xff]  ;;  %v649_v40 = vld [vmem:[%s1704_s7 + $0x440] sm:$0xff]  ;;  %v496_v42 = vld [vmem:[%s2064_s0 + $0xb8] sm:$0xff] }
  0x97   : > { %778 = vmatprep.subr.mxu0 %v560_v51  ;;  %891 = vmatprep.subr.mxu1 %v624_v52  ;;  %v494_v41 = vld [vmem:[%s2064_s0 + $0xa8] sm:$0xff]  ;;  %v493_v43 = vld [vmem:[%s2064_s0 + $0xa0] sm:$0xff]  ;;  %v495_v44 = vld [vmem:[%s2064_s0 + $0xb0] sm:$0xff] }
  0x98   : > { %779 = vmatpush2.msra.mxu0 %v559_v53  ;;  %892 = vmatpush2.msra.mxu1 %v623_v54  ;;  %v648_v45 = vld [vmem:[%s1704_s7 + $0x438] sm:$0xff]  ;;  %v647_v46 = vld [vmem:[%s1704_s7 + $0x430] sm:$0xff]  ;;  %v501_v48 = vld [vmem:[%s2064_s0 + $0xe0] sm:$0xff] }
  0x99   : > { %780 = vmatprep.subr.mxu0 %v558_v55  ;;  %893 = vmatprep.subr.mxu1 %v622_v56  ;;  %v499_v47 = vld [vmem:[%s2064_s0 + $0xd0] sm:$0xff]  ;;  %v498_v49 = vld [vmem:[%s2064_s0 + $0xc8] sm:$0xff]  ;;  %v500_v50 = vld [vmem:[%s2064_s0 + $0xd8] sm:$0xff] }
  0x9a   : > { %781 = vmatpush2.msra.mxu0 %v557_v57  ;;  %894 = vmatpush2.msra.mxu1 %v621_v58  ;;  %v646_v51 = vld [vmem:[%s1704_s7 + $0x428] sm:$0xff]  ;;  %v645_v52 = vld [vmem:[%s1704_s7 + $0x420] sm:$0xff]  ;;  %v504_v53 = vld [vmem:[%s2064_s0 + $0xf8] sm:$0xff] }
  0x9b   : > { %782 = vmatprep.subr.mxu0 %v556_v59  ;;  %895 = vmatprep.subr.mxu1 %v620_v60  ;;  %v506_v54 = vld [vmem:[%s2064_s0 + $0x108] sm:$0xff]  ;;  %v503_v55 = vld [vmem:[%s2064_s0 + $0xf0] sm:$0xff]  ;;  %v505_v56 = vld [vmem:[%s2064_s0 + $0x100] sm:$0xff] }
  0x9c   : > { %783 = vmatpush2.msra.mxu0 %v555_v61  ;;  %896 = vmatpush2.msra.mxu1 %v619_v62  ;;  %v644_v57 = vld [vmem:[%s1704_s7 + $0x418] sm:$0xff]  ;;  %v643_v58 = vld [vmem:[%s1704_s7 + $0x410] sm:$0xff]  ;;  %v509_v59 = vld [vmem:[%s2064_s0 + $0x120] sm:$0xff] }
  0x9d   : > { %784 = vmatprep.subr.mxu0 %v554_v63  ;;  %897 = vmatprep.subr.mxu1 %v618_v0  ;;  %v511_v60 = vld [vmem:[%s2064_s0 + $0x130] sm:$0xff]  ;;  %v508_v61 = vld [vmem:[%s2064_s0 + $0x118] sm:$0xff]  ;;  %v510_v62 = vld [vmem:[%s2064_s0 + $0x128] sm:$0xff] }
  0x9e   : > { %785 = vmatpush2.msra.mxu0 %v553_v1  ;;  %898 = vmatpush2.msra.mxu1 %v617_v2  ;;  %v642_v63 = vld [vmem:[%s1704_s7 + $0x408] sm:$0xff]  ;;  %v641_v0 = vld [vmem:[%s1704_s7 + $0x400] sm:$0xff] }
  0x9f   : > { %786 = vmatprep.subr.mxu0 %v552_v3  ;;  %899 = vmatprep.subr.mxu1 %v616_v4  ;;  %v477_v1 = vld [vmem:[%s2064_s0 + $0x20] sm:$0xff]  ;;  %v1340_v3 = vmov 0.0  }
  0xa0   : > { %787 = vmatpush2.msra.mxu0 %v551_v5  ;;  %900 = vmatpush2.msra.mxu1 %v615_v6  ;;  %v497_v2 = vld [vmem:[%s2064_s0 + $0xc0] sm:$0xff]  ;;  %v659_v5 = vld [vmem:[%s2066_s2 + $0x10] sm:$0xff]  ;;  %v482_v6 = vld [vmem:[%s2064_s0 + $0x48] sm:$0xff] }
  0xa1   : > { %788 = vmatprep.subr.mxu0 %v550_v7  ;;  %901 = vmatprep.subr.mxu1 %v614_v8  ;;  %v657_v4 = vld [vmem:[%s2066_s2] sm:$0xff]  ;;  %v502_v7 = vld [vmem:[%s2064_s0 + $0xe8] sm:$0xff] }
  0xa2   : > { %789 = vmatpush2.msra.mxu0 %v549_v9  ;;  %902 = vmatpush2.msra.mxu1 %v613_v10  ;;  %v658_v8 = vld [vmem:[%s2066_s2 + $0x8] sm:$0xff]  ;;  %v660_v9 = vld [vmem:[%s2066_s2 + $0x18] sm:$0xff]  ;;  %v487_v10 = vld [vmem:[%s2064_s0 + $0x70] sm:$0xff] }
  0xa3   : > { %790 = vmatprep.subr.mxu0 %v548_v11  ;;  %903 = vmatprep.subr.mxu1 %v612_v12  ;;  %v507_v11 = vld [vmem:[%s2064_s0 + $0x110] sm:$0xff]  ;;  %v661_v12 = vld [vmem:[%s2066_s2 + $0x20] sm:$0xff] }
  0xa4   : > { %791 = vmatpush2.msra.mxu0 %v547_v13  ;;  %904 = vmatpush2.msra.mxu1 %v611_v14  ;;  %v662_v13 = vld [vmem:[%s2066_s2 + $0x28] sm:$0xff]  ;;  %v492_v14 = vld [vmem:[%s2064_s0 + $0x98] sm:$0xff] }
  0xa5   : > { %792 = vmatprep.subr.mxu0 %v546_v15  ;;  %905 = vmatprep.subr.mxu1 %v610_v16  ;;  %v512_v15 = vld [vmem:[%s2064_s0 + $0x138] sm:$0xff]  ;;  %v663_v16 = vld [vmem:[%s2066_s2 + $0x30] sm:$0xff] }
  0xa6   : > { %793 = vmatpush2.msra.mxu0 %v545_v17  ;;  %906 = vmatpush2.msra.mxu1 %v609_v18  ;;  %v664_v17 = vld [vmem:[%s2066_s2 + $0x38] sm:$0xff] }
  0xa7   : > { %795 = vmatmul.mubr.f32.vlgmr.msra.gmra.mxu0 %v473_v19  ;;  %908 = vmatmul.mubr.f32.vlgmr.msra.gmra.mxu1 %v475_v20 }
  0xa8   : > { %972 = vmatprep.subr.mxu0 %v656_v21  ;;  %1269 = vmatprep.subr.mxu1 %v656_v21 }
  0xa9   : > { %973 = vmatpush1.msra.mxu0 %v655_v22  ;;  %1277 = vmatpush1.msra.mxu1 %v655_v22 }
  0xaa   : > { %800 = vmatprep.mubr.f32.mxu0 %v479_v23  ;;  %913 = vmatprep.mubr.f32.mxu1 %v481_v24 }
  0xab   : > { %801 = vmatmul.mubr.f32.gmra.mxu0 %v478_v25  ;;  %914 = vmatmul.mubr.f32.gmra.mxu1 %v480_v26 }
  0xac   : > { %974 = vmatprep.subr.mxu0 %v654_v27  ;;  %1270 = vmatprep.subr.mxu1 %v654_v27 }
  0xad   : > { %975 = vmatpush1.msra.mxu0 %v653_v28  ;;  %1278 = vmatpush1.msra.mxu1 %v653_v28 }
  0xae   : > { %806 = vmatprep.mubr.f32.mxu0 %v484_v29  ;;  %919 = vmatprep.mubr.f32.mxu1 %v486_v30 }
  0xaf   : > { %807 = vmatmul.mubr.f32.gmra.mxu0 %v483_v31  ;;  %920 = vmatmul.mubr.f32.gmra.mxu1 %v485_v32 }
  0xb0   : > { %976 = vmatprep.subr.mxu0 %v652_v33  ;;  %1271 = vmatprep.subr.mxu1 %v652_v33 }
  0xb1   : > { %977 = vmatpush1.msra.mxu0 %v651_v34  ;;  %1279 = vmatpush1.msra.mxu1 %v651_v34 }
  0xb2   : > { %812 = vmatprep.mubr.f32.mxu0 %v489_v35  ;;  %925 = vmatprep.mubr.f32.mxu1 %v491_v36 }
  0xb3   : > { %813 = vmatmul.mubr.f32.gmra.mxu0 %v488_v37  ;;  %926 = vmatmul.mubr.f32.gmra.mxu1 %v490_v38 }
  0xb4   : > { %978 = vmatprep.subr.mxu0 %v650_v39  ;;  %1272 = vmatprep.subr.mxu1 %v650_v39 }
  0xb5   : > { %979 = vmatpush1.msra.mxu0 %v649_v40  ;;  %1280 = vmatpush1.msra.mxu1 %v649_v40 }
  0xb6   : > { %818 = vmatprep.mubr.f32.mxu0 %v494_v41  ;;  %931 = vmatprep.mubr.f32.mxu1 %v496_v42 }
  0xb7   : > { %819 = vmatmul.mubr.f32.gmra.mxu0 %v493_v43  ;;  %932 = vmatmul.mubr.f32.gmra.mxu1 %v495_v44 }
  0xb8   : > { %980 = vmatprep.subr.mxu0 %v648_v45  ;;  %1273 = vmatprep.subr.mxu1 %v648_v45 }
  0xb9   : > { %981 = vmatpush1.msra.mxu0 %v647_v46  ;;  %1281 = vmatpush1.msra.mxu1 %v647_v46 }
  0xba   : > { %824 = vmatprep.mubr.f32.mxu0 %v499_v47  ;;  %937 = vmatprep.mubr.f32.mxu1 %v501_v48 }
  0xbb   : > { %825 = vmatmul.mubr.f32.gmra.mxu0 %v498_v49  ;;  %938 = vmatmul.mubr.f32.gmra.mxu1 %v500_v50 }
  0xbc   : > { %982 = vmatprep.subr.mxu0 %v646_v51  ;;  %1274 = vmatprep.subr.mxu1 %v646_v51 }
  0xbd   : > { %983 = vmatpush1.msra.mxu0 %v645_v52  ;;  %1282 = vmatpush1.msra.mxu1 %v645_v52 }
  0xbe   : > { %830 = vmatprep.mubr.f32.mxu0 %v504_v53  ;;  %943 = vmatprep.mubr.f32.mxu1 %v506_v54 }
  0xbf   : > { %831 = vmatmul.mubr.f32.gmra.mxu0 %v503_v55  ;;  %944 = vmatmul.mubr.f32.gmra.mxu1 %v505_v56 }
  0xc0   : > { %984 = vmatprep.subr.mxu0 %v644_v57  ;;  %1275 = vmatprep.subr.mxu1 %v644_v57 }
  0xc1   : > { %985 = vmatpush1.msra.mxu0 %v643_v58  ;;  %1283 = vmatpush1.msra.mxu1 %v643_v58 }
  0xc2   : > { %836 = vmatprep.mubr.f32.mxu0 %v509_v59  ;;  %949 = vmatprep.mubr.f32.mxu1 %v511_v60 }
  0xc3   : > { %837 = vmatmul.mubr.f32.gmra.mxu0 %v508_v61  ;;  %950 = vmatmul.mubr.f32.gmra.mxu1 %v510_v62 }
  0xc4   : > { %986 = vmatprep.subr.mxu0 %v642_v63  ;;  %1276 = vmatprep.subr.mxu1 %v642_v63 }
  0xc5   : > { %987 = vmatpush1.msra.mxu0 %v641_v0  ;;  %1284 = vmatpush1.msra.mxu1 %v641_v0 }
  0xc6   : > { %1020 = vmatprep.mubr.f32.mxu0 %v1340_v3  ;;  %1044 = vmatprep.mubr.f32.mxu1 %v1340_v3 }
  0xc7   : > { %1254 = vmatmul.mubr.msk.f32.vlgmr.msra.gmra.mxu0 %vm705_vm0, %v477_v1  ;;  %1258 = vmatmul.mubr.msk.f32.vlgmr.msra.gmra.mxu1 %vm705_vm0, %v497_v2 }
  0xc8   : > { %1026 = vmatprep.mubr.f32.mxu0 %v1340_v3  ;;  %1050 = vmatprep.mubr.f32.mxu1 %v1340_v3 }
  0xc9   : > { %667 = vperm.xlu0 %1313, %v657_v4   ;;  %677 = vperm.xlu1 %1314, %v659_v5  }
  0xcb   : > { %1255 = vmatmul.mubr.msk.f32.gmra.mxu0 %vm705_vm0, %v482_v6  ;;  %1259 = vmatmul.mubr.msk.f32.gmra.mxu1 %vm705_vm0, %v502_v7 }
  0xcc   : > { %1032 = vmatprep.mubr.f32.mxu0 %v1340_v3  ;;  %1056 = vmatprep.mubr.f32.mxu1 %v1340_v3 }
  0xcd   : > { %672 = vperm.xlu0 %1313, %v658_v8   ;;  %682 = vperm.xlu1 %1314, %v660_v9  }
  0xcf   : > { %1256 = vmatmul.mubr.msk.f32.gmra.mxu0 %vm705_vm0, %v487_v10  ;;  %1260 = vmatmul.mubr.msk.f32.gmra.mxu1 %vm705_vm0, %v507_v11 }
  0xd0   : > { %1038 = vmatprep.mubr.f32.mxu0 %v1340_v3  ;;  %1062 = vmatprep.mubr.f32.mxu1 %v1340_v3 }
  0xd1   : > { %687 = vperm.xlu0 %1313, %v661_v12   ;;  %692 = vperm.xlu1 %1314, %v662_v13  }
  0xd3   : > { %1257 = vmatmul.mubr.msk.f32.gmra.mxu0 %vm705_vm0, %v492_v14  ;;  %1261 = vmatmul.mubr.msk.f32.gmra.mxu1 %vm705_vm0, %v512_v15 }
  0xd5   : > { %697 = vperm.xlu0 %1313, %v663_v16   ;;  %702 = vperm.xlu1 %1314, %v664_v17  }
 0x144   : > { %v668_v32 = vpop.permute.xlu0 %667  ;;  %v678_v35 = vpop.permute.xlu1 %677 }
 0x148   : > { %v673_v40 = vpop.permute.xlu0 %672  ;;  %v683_v43 = vpop.permute.xlu1 %682 }
 0x14c   : > { %v688_v46 = vpop.permute.xlu0 %687  ;;  %v693_v51 = vpop.permute.xlu1 %692 }
 0x150   : > { %v698_v58 = vpop.permute.xlu0 %697  ;;  %v703_v3 = vpop.permute.xlu1 %702 }
 0x167   : > { %v796_v18 = vpop.f32.mrf.mxu0  ;;  %v909_v19 = vpop.f32.mrf.mxu1 }
 0x168   : > { %v797_v49 = vadd.f32 %v796_v18, %v668_v32 }
 0x169   : > { %v798_v20 = vpop.f32.mrf.mxu0  ;;  %v911_v21 = vpop.f32.mrf.mxu1 }
 0x16a   : > { %v799_v50 = vadd.f32 %v798_v20, %v668_v32  ;;  %v910_v63 = vadd.f32 %v909_v19, %v797_v49 }
 0x16b   : > { %v802_v22 = vpop.f32.mrf.mxu0  ;;  %v915_v23 = vpop.f32.mrf.mxu1 }
 0x16c   : > { %v803_v54 = vadd.f32 %v802_v22, %v673_v40  ;;  %v912_v0 = vadd.f32 %v911_v21, %v799_v50 }
 0x16d   : > { %v804_v24 = vpop.f32.mrf.mxu0  ;;  %v917_v25 = vpop.f32.mrf.mxu1 }
 0x16e   : > { %v805_v55 = vadd.f32 %v804_v24, %v673_v40  ;;  %v916_v10 = vadd.f32 %v915_v23, %v803_v54 }
 0x16f   : > { %v808_v26 = vpop.f32.mrf.mxu0  ;;  %v921_v27 = vpop.f32.mrf.mxu1 }
 0x170   : > { %v809_v56 = vadd.f32 %v808_v26, %v678_v35  ;;  %v918_v11 = vadd.f32 %v917_v25, %v805_v55 }
 0x171   : > { %v810_v28 = vpop.f32.mrf.mxu0  ;;  %v923_v29 = vpop.f32.mrf.mxu1 }
 0x172   : > { %v811_v59 = vadd.f32 %v810_v28, %v678_v35  ;;  %v922_v12 = vadd.f32 %v921_v27, %v809_v56 }
 0x173   : > { %v814_v30 = vpop.f32.mrf.mxu0  ;;  %v927_v31 = vpop.f32.mrf.mxu1 }
 0x174   : > { %v815_v60 = vadd.f32 %v814_v30, %v683_v43  ;;  %v2000_v14 = vadd.f32 %v923_v29, %v811_v59 }
 0x175   : > { %v816_v33 = vpop.f32.mrf.mxu0  ;;  %v929_v34 = vpop.f32.mrf.mxu1 }
 0x176   : > { %v817_v1 = vadd.f32 %v816_v33, %v683_v43  ;;  %v2002_v15 = vadd.f32 %v927_v31, %v815_v60 }
 0x177   : > { %v820_v36 = vpop.f32.mrf.mxu0  ;;  %v933_v37 = vpop.f32.mrf.mxu1 }
 0x178   : > { %v821_v57 = vadd.f32 %v820_v36, %v688_v46  ;;  %v2004_v20 = vadd.f32 %v929_v34, %v817_v1 }
 0x179   : > { %v822_v38 = vpop.f32.mrf.mxu0  ;;  %v935_v39 = vpop.f32.mrf.mxu1 }
 0x17a   : > { %v823_v2 = vadd.f32 %v822_v38, %v688_v46  ;;  %v934_v13 = vadd.f32 %v933_v37, %v821_v57 }
 0x17b   : > { %v826_v41 = vpop.f32.mrf.mxu0  ;;  %v939_v42 = vpop.f32.mrf.mxu1 }
 0x17c   : > { %v827_v4 = vadd.f32 %v826_v41, %v693_v51  ;;  %v936_v21 = vadd.f32 %v935_v39, %v823_v2 }
 0x17d   : > { %v828_v44 = vpop.f32.mrf.mxu0  ;;  %v941_v45 = vpop.f32.mrf.mxu1 }
 0x17e   : > { %v829_v5 = vadd.f32 %v828_v44, %v693_v51  ;;  %v940_v23 = vadd.f32 %v939_v42, %v827_v4 }
 0x17f   : > { %v832_v47 = vpop.f32.mrf.mxu0  ;;  %v945_v48 = vpop.f32.mrf.mxu1 }
 0x180   : > { %v833_v6 = vadd.f32 %v832_v47, %v698_v58  ;;  %v942_v25 = vadd.f32 %v941_v45, %v829_v5 }
 0x181   : > { %v834_v52 = vpop.f32.mrf.mxu0  ;;  %v947_v53 = vpop.f32.mrf.mxu1 }
 0x182   : > { %v835_v7 = vadd.f32 %v834_v52, %v698_v58  ;;  %v946_v26 = vadd.f32 %v945_v48, %v833_v6 }
 0x183   : > { %v838_v61 = vpop.f32.mrf.mxu0  ;;  %v951_v62 = vpop.f32.mrf.mxu1 }
 0x184   : > { %v839_v16 = vadd.f32 %v838_v61, %v703_v3  ;;  %v948_v27 = vadd.f32 %v947_v53, %v835_v7 }
 0x185   : > { %v840_v8 = vpop.f32.mrf.mxu0  ;;  %v953_v9 = vpop.f32.mrf.mxu1 }
 0x186   : > { %v841_v17 = vadd.f32 %v840_v8, %v703_v3  ;;  %v952_v32 = vadd.f32 %v951_v62, %v839_v16 }
 0x187   : > { %v1022_v18 = vpop.f32.mrf.mxu0  ;;  %v1046_v19 = vpop.f32.mrf.mxu1 }
 0x188   : > { %v1023_v22 = vadd.f32 %v1022_v18, %v910_v63  ;;  %v1047_v24 = vadd.f32 %v1046_v19, %v934_v13  ;;  %v2006_v33 = vadd.f32 %v953_v9, %v841_v17 }
 0x189   : > { %v1024_v28 = vpop.f32.mrf.mxu0  ;;  %v1048_v30 = vpop.f32.mrf.mxu1 }
 0x18a   : > { %vm1069_vm1 = vcmp.ge.f32.partialorder %v1023_v22, 0.0  ;;  %v1085_v29 = vmul.f32 0.01, %v1023_v22  ;;  %vm1077_vm2 = vcmp.ge.f32.partialorder %v1047_v24, 0.0  ;;  %v1093_v31 = vmul.f32 0.01, %v1047_v24 }
 0x18b   : > { %v1025_v35 = vadd.f32 %v1024_v28, %v912_v0  ;;  %v1049_v34 = vadd.f32 %v1048_v30, %v936_v21  ;;  %v1028_v36 = vpop.f32.mrf.mxu0  ;;  %v1052_v37 = vpop.f32.mrf.mxu1 }
 0x18c   : > { %v1101_v38 = vsel %vm1069_vm1, %v1023_v22, %v1085_v29  ;;  %v1109_v39 = vsel %vm1077_vm2, %v1047_v24, %v1093_v31  ;;  %v1029_v40 = vadd.f32 %v1028_v36, %v916_v10  ;;  %v1053_v41 = vadd.f32 %v1052_v37, %v940_v23 }
 0x18d   : > { %1117 = vst [vmem:[%s2009_s12] sm:$0xff] %v1101_v38  ;;  %1125 = vst [vmem:[%s2009_s12 + $0x40] sm:$0xff] %v1109_v39  ;;  %vm1070_vm3 = vcmp.ge.f32.partialorder %v1025_v35, 0.0  ;;  %v1086_v42 = vmul.f32 0.01, %v1025_v35  ;;  %vm1078_vm4 = vcmp.ge.f32.partialorder %v1049_v34, 0.0  ;;  %v1030_v44 = vpop.f32.mrf.mxu0  ;;  %v1054_v45 = vpop.f32.mrf.mxu1 }
 0x18e   : > { %v1094_v43 = vmul.f32 0.01, %v1049_v34  ;;  %vm1071_vm5 = vcmp.ge.f32.partialorder %v1029_v40, 0.0  ;;  %v1087_v46 = vmul.f32 0.01, %v1029_v40  ;;  %vm1079_vm6 = vcmp.ge.f32.partialorder %v1053_v41, 0.0 }
 0x18f   : > { %v1095_v47 = vmul.f32 0.01, %v1053_v41  ;;  %v1102_v48 = vsel %vm1070_vm3, %v1025_v35, %v1086_v42  ;;  %v1031_v50 = vadd.f32 %v1030_v44, %v918_v11  ;;  %v1055_v51 = vadd.f32 %v1054_v45, %v942_v25  ;;  %v1034_v52 = vpop.f32.mrf.mxu0  ;;  %v1058_v53 = vpop.f32.mrf.mxu1 }
 0x190   : > { %v1110_v49 = vsel %vm1078_vm4, %v1049_v34, %v1094_v43  ;;  %1118 = vst [vmem:[%s2009_s12 + $0x8] sm:$0xff] %v1102_v48  ;;  %v1103_v54 = vsel %vm1071_vm5, %v1029_v40, %v1087_v46  ;;  %v1035_v56 = vadd.f32 %v1034_v52, %v922_v12  ;;  %v1059_v57 = vadd.f32 %v1058_v53, %v946_v26 }
 0x191   : > { %1126 = vst [vmem:[%s2009_s12 + $0x48] sm:$0xff] %v1110_v49  ;;  %v1111_v55 = vsel %vm1079_vm6, %v1053_v41, %v1095_v47  ;;  %1119 = vst [vmem:[%s2009_s12 + $0x10] sm:$0xff] %v1103_v54  ;;  %vm1072_vm7 = vcmp.ge.f32.partialorder %v1031_v50, 0.0  ;;  %v1088_v58 = vmul.f32 0.01, %v1031_v50  ;;  %vm1080_vm8 = vcmp.ge.f32.partialorder %v1055_v51, 0.0  ;;  %v1036_v60 = vpop.f32.mrf.mxu0  ;;  %v1060_v61 = vpop.f32.mrf.mxu1 }
 0x192   : > { %1127 = vst [vmem:[%s2009_s12 + $0x50] sm:$0xff] %v1111_v55  ;;  %v1096_v59 = vmul.f32 0.01, %v1055_v51  ;;  %vm1073_vm9 = vcmp.ge.f32.partialorder %v1035_v56, 0.0  ;;  %v1089_v62 = vmul.f32 0.01, %v1035_v56  ;;  %v1037_v2 = vadd.f32 %v1036_v60, %v2000_v14 }
 0x193   : > { %vm1081_vm10 = vcmp.ge.f32.partialorder %v1059_v57, 0.0  ;;  %v1097_v63 = vmul.f32 0.01, %v1059_v57  ;;  %v1104_v0 = vsel %vm1072_vm7, %v1031_v50, %v1088_v58  ;;  %v1061_v3 = vadd.f32 %v1060_v61, %v948_v27  ;;  %v1040_v4 = vpop.f32.mrf.mxu0  ;;  %v1064_v5 = vpop.f32.mrf.mxu1 }
 0x194   : > { %v1112_v1 = vsel %vm1080_vm8, %v1055_v51, %v1096_v59  ;;  %1120 = vst [vmem:[%s2009_s12 + $0x18] sm:$0xff] %v1104_v0  ;;  %v1105_v6 = vsel %vm1073_vm9, %v1035_v56, %v1089_v62  ;;  %v1041_v8 = vadd.f32 %v1040_v4, %v2002_v15  ;;  %v1065_v9 = vadd.f32 %v1064_v5, %v952_v32  ;;  %v1171_v35 = vld [vmem:[%s2009_s12 + $0x40] sm:$0xff] (%p1391_p5) }
 0x195   : > { %1128 = vst [vmem:[%s2009_s12 + $0x58] sm:$0xff] %v1112_v1  ;;  %v1113_v7 = vsel %vm1081_vm10, %v1059_v57, %v1097_v63  ;;  %1121 = vst [vmem:[%s2009_s12 + $0x20] sm:$0xff] %v1105_v6  ;;  %vm1074_vm11 = vcmp.ge.f32.partialorder %v1037_v2, 0.0  ;;  %v1090_v10 = vmul.f32 0.01, %v1037_v2  ;;  %vm1082_vm12 = vcmp.ge.f32.partialorder %v1061_v3, 0.0  ;;  %v1042_v12 = vpop.f32.mrf.mxu0  ;;  %v1066_v13 = vpop.f32.mrf.mxu1 }
 0x196   : > { %1129 = vst [vmem:[%s2009_s12 + $0x60] sm:$0xff] %v1113_v7  ;;  %v1098_v11 = vmul.f32 0.01, %v1061_v3  ;;  %vm1075_vm13 = vcmp.ge.f32.partialorder %v1041_v8, 0.0  ;;  %v1091_v14 = vmul.f32 0.01, %v1041_v8  ;;  %v1043_v18 = vadd.f32 %v1042_v12, %v2004_v20 }
 0x197   : > { %vm1083_vm14 = vcmp.ge.f32.partialorder %v1065_v9, 0.0  ;;  %v1099_v16 = vmul.f32 0.01, %v1065_v9  ;;  %v1106_v17 = vsel %vm1074_vm11, %v1037_v2, %v1090_v10  ;;  %v1067_v19 = vadd.f32 %v1066_v13, %v2006_v33  ;;  %v1155_v20 = vld [vmem:[%s2009_s12] sm:$0xff] (%p1391_p5)  ;;  %v1157_v27 = vld [vmem:[%s2009_s12 + $0x8] sm:$0xff] (%p1391_p5)  ;;  %1172 = vst [vmem:[%s1142_s20 + $0x80] sm:$0xff] (%p1391_p5), %v1171_v35 }
 0x198   : > { %v1114_v15 = vsel %vm1082_vm12, %v1061_v3, %v1098_v11  ;;  %1122 = vst [vmem:[%s2009_s12 + $0x28] sm:$0xff] %v1106_v17  ;;  %v1107_v21 = vsel %vm1075_vm13, %v1041_v8, %v1091_v14  ;;  %vm1076_vm15 = vcmp.ge.f32.partialorder %v1043_v18, 0.0  ;;  %v1092_v24 = vmul.f32 0.01, %v1043_v18  ;;  %1139 = sbr.rel (!%p1391_p5) target bundleno = 421 (0x1a5), region = 59  ;;  %v1159_v28 = vld [vmem:[%s2009_s12 + $0x10] sm:$0xff] (%p1391_p5)  ;;  %1156 = vst [vmem:[%s1142_s20] sm:$0xff] (%p1391_p5), %v1155_v20 }
 0x199   : > { %1130 = vst [vmem:[%s2009_s12 + $0x68] sm:$0xff] %v1114_v15  ;;  %v1115_v22 = vsel %vm1083_vm14, %v1065_v9, %v1099_v16  ;;  %1123 = vst [vmem:[%s2009_s12 + $0x30] sm:$0xff] %v1107_v21  ;;  %vm1084_vm0 = vcmp.ge.f32.partialorder %v1067_v19, 0.0  ;;  %v1100_v23 = vmul.f32 0.01, %v1067_v19  ;;  %v1173_v34 = vld [vmem:[%s2009_s12 + $0x48] sm:$0xff] (%p1391_p5) }
 0x19a   : > { %1131 = vst [vmem:[%s2009_s12 + $0x70] sm:$0xff] %v1115_v22  ;;  %v1108_v25 = vsel %vm1076_vm15, %v1043_v18, %v1092_v24  ;;  %1158 = vst [vmem:[%s1142_s20 + $0x8] sm:$0xff] (%p1391_p5), %v1157_v27  ;;  %v1175_v36 = vld [vmem:[%s2009_s12 + $0x50] sm:$0xff] (%p1391_p5) }
 0x19b   : > { %v1116_v26 = vsel %vm1084_vm0, %v1067_v19, %v1100_v23  ;;  %1124 = vst [vmem:[%s2009_s12 + $0x38] sm:$0xff] %v1108_v25  ;;  %v1161_v30 = vld [vmem:[%s2009_s12 + $0x18] sm:$0xff] (%p1391_p5)  ;;  %1160 = vst [vmem:[%s1142_s20 + $0x20] sm:$0xff] (%p1391_p5), %v1159_v28 }
 0x19c   : > { %1132 = vst [vmem:[%s2009_s12 + $0x78] sm:$0xff] %v1116_v26  ;;  %v1163_v29 = vld [vmem:[%s2009_s12 + $0x20] sm:$0xff] (%p1391_p5)  ;;  %1162 = vst [vmem:[%s1142_s20 + $0x28] sm:$0xff] (%p1391_p5), %v1161_v30  ;;  %v1177_v37 = vld [vmem:[%s2009_s12 + $0x58] sm:$0xff] (%p1391_p5) }
 0x19d   : > { %1164 = vst [vmem:[%s1142_s20 + $0x40] sm:$0xff] %v1163_v29  ;;  %1174 = vst [vmem:[%s1142_s20 + $0x88] sm:$0xff] %v1173_v34  ;;  %v1179_v38 = vld [vmem:[%s2009_s12 + $0x60] sm:$0xff] }
 0x19e   : > { %1176 = vst [vmem:[%s1142_s20 + $0xa0] sm:$0xff] %v1175_v36  ;;  %1178 = vst [vmem:[%s1142_s20 + $0xa8] sm:$0xff] %v1177_v37 }
 0x19f   : > { %v1165_v31 = vld [vmem:[%s2009_s12 + $0x28] sm:$0xff]  ;;  %1180 = vst [vmem:[%s1142_s20 + $0xc0] sm:$0xff] %v1179_v38 }
 0x1a0   : > { %1166 = vst [vmem:[%s1142_s20 + $0x48] sm:$0xff] %v1165_v31  ;;  %v1167_v32 = vld [vmem:[%s2009_s12 + $0x30] sm:$0xff]  ;;  %v1181_v39 = vld [vmem:[%s2009_s12 + $0x68] sm:$0xff] }
 0x1a1   : > { %1168 = vst [vmem:[%s1142_s20 + $0x60] sm:$0xff] %v1167_v32  ;;  %v1183_v40 = vld [vmem:[%s2009_s12 + $0x70] sm:$0xff]  ;;  %1182 = vst [vmem:[%s1142_s20 + $0xc8] sm:$0xff] %v1181_v39 }
 0x1a2   : > { %v1169_v33 = vld [vmem:[%s2009_s12 + $0x38] sm:$0xff]  ;;  %1184 = vst [vmem:[%s1142_s20 + $0xe0] sm:$0xff] %v1183_v40 }
 0x1a3   : > { %1170 = vst [vmem:[%s1142_s20 + $0x68] sm:$0xff] %v1169_v33  ;;  %v1185_v41 = vld [vmem:[%s2009_s12 + $0x78] sm:$0xff] }
 0x1a4   : > { %1186 = vst [vmem:[%s1142_s20 + $0xe8] sm:$0xff] %v1185_v41 }
 0x1a5 PF: > { %p10_p10 = scmp.ge.s32.totalorder %s1378_s16, 4   ;;  %s2069_s12 = smov %s1333_s13 }
 0x1a6   : > { %s2070_s13 = smov %s1389_s19  ;;  %s2071_s14 = smov %s1378_s16 }
 0x1a7   :  { %12 = sbr.rel (!%p10_p10) target bundleno = 2 (0x2), region = 113 }

// kernel: encoder_forward.8
= control target key start
LH: loop header
LB: loop body
LE: loop exit
PB: predicated region body
PF: predicated region fallthrough
CT: control target
= control target key end

     0   :  { %v733_v3 = vmov 0   ;;  %vm174_vm0 = vcmask 523264   ;;  %s1146_s1 = inlined_call_operand.vmem [shape: f32[576,128], index: 1, kind: input, shape index: {}]   ;;  %s1147_s0 = inlined_call_operand.vmem [shape: f32[64,576], index: 0, kind: input, shape index: {}]   ;;  %s1148_s2 = inlined_call_operand.vmem [shape: f32[64,1], index: 2, kind: input, shape index: {}]   ;;  %s1149_s3 = inlined_call_operand.vmem [shape: f32[64,128], index: 3, kind: output, shape index: {}]  }
   0x1   :  { %v85_v0 = vld [vmem:[%s1146_s1 + $0xf8] sm:$0xff]  ;;  %731 = vset.pattern.permute.xlu0 %v733_v3  ;;  %732 = vset.pattern.permute.xlu1 %v733_v3  ;;  %v84_v5 = vld [vmem:[%s1146_s1 + $0xf0] sm:$0xff]  ;;  %v83_v9 = vld [vmem:[%s1146_s1 + $0xe8] sm:$0xff] }
   0x2   :  { %v117_v1 = vld [vmem:[%s1146_s1 + $0x1f8] sm:$0xff]  ;;  %558 = vmatprep.subr.mxu0 %v85_v0  ;;  %v116_v6 = vld [vmem:[%s1146_s1 + $0x1f0] sm:$0xff]  ;;  %v115_v10 = vld [vmem:[%s1146_s1 + $0x1e8] sm:$0xff] }
   0x3   :  { %v69_v2 = vld [vmem:[%s1146_s1 + $0x78] sm:$0xff]  ;;  %614 = vmatprep.subr.mxu1 %v117_v1  ;;  %v68_v7 = vld [vmem:[%s1146_s1 + $0x70] sm:$0xff]  ;;  %v67_v11 = vld [vmem:[%s1146_s1 + $0x68] sm:$0xff] }
   0x4   :  { %v101_v4 = vld [vmem:[%s1146_s1 + $0x178] sm:$0xff]  ;;  %559 = vmatpush3.msra.mxu0 %v69_v2  ;;  %v100_v8 = vld [vmem:[%s1146_s1 + $0x170] sm:$0xff]  ;;  %v99_v12 = vld [vmem:[%s1146_s1 + $0x168] sm:$0xff] }
   0x5   :  { %615 = vmatpush3.msra.mxu1 %v101_v4  ;;  %560 = vmatprep.subr.mxu0 %v84_v5  ;;  %v82_v13 = vld [vmem:[%s1146_s1 + $0xe0] sm:$0xff]  ;;  %v81_v17 = vld [vmem:[%s1146_s1 + $0xd8] sm:$0xff]  ;;  %v80_v21 = vld [vmem:[%s1146_s1 + $0xd0] sm:$0xff] }
   0x6   :  { %616 = vmatprep.subr.mxu1 %v116_v6  ;;  %561 = vmatpush3.msra.mxu0 %v68_v7  ;;  %v114_v14 = vld [vmem:[%s1146_s1 + $0x1e0] sm:$0xff]  ;;  %v113_v18 = vld [vmem:[%s1146_s1 + $0x1d8] sm:$0xff]  ;;  %v112_v22 = vld [vmem:[%s1146_s1 + $0x1d0] sm:$0xff] }
   0x7   :  { %617 = vmatpush3.msra.mxu1 %v100_v8  ;;  %562 = vmatprep.subr.mxu0 %v83_v9  ;;  %v66_v15 = vld [vmem:[%s1146_s1 + $0x60] sm:$0xff]  ;;  %v65_v19 = vld [vmem:[%s1146_s1 + $0x58] sm:$0xff]  ;;  %v64_v23 = vld [vmem:[%s1146_s1 + $0x50] sm:$0xff] }
   0x8   :  { %618 = vmatprep.subr.mxu1 %v115_v10  ;;  %v98_v16 = vld [vmem:[%s1146_s1 + $0x160] sm:$0xff]  ;;  %563 = vmatpush3.msra.mxu0 %v67_v11  ;;  %v97_v20 = vld [vmem:[%s1146_s1 + $0x158] sm:$0xff]  ;;  %v96_v24 = vld [vmem:[%s1146_s1 + $0x150] sm:$0xff] }
   0x9   :  { %619 = vmatpush3.msra.mxu1 %v99_v12  ;;  %564 = vmatprep.subr.mxu0 %v82_v13  ;;  %v79_v25 = vld [vmem:[%s1146_s1 + $0xc8] sm:$0xff]  ;;  %v78_v29 = vld [vmem:[%s1146_s1 + $0xc0] sm:$0xff]  ;;  %v77_v33 = vld [vmem:[%s1146_s1 + $0xb8] sm:$0xff] }
   0xa   :  { %620 = vmatprep.subr.mxu1 %v114_v14  ;;  %565 = vmatpush3.msra.mxu0 %v66_v15  ;;  %v111_v26 = vld [vmem:[%s1146_s1 + $0x1c8] sm:$0xff]  ;;  %v110_v30 = vld [vmem:[%s1146_s1 + $0x1c0] sm:$0xff]  ;;  %v109_v34 = vld [vmem:[%s1146_s1 + $0x1b8] sm:$0xff] }
   0xb   :  { %621 = vmatpush3.msra.mxu1 %v98_v16  ;;  %566 = vmatprep.subr.mxu0 %v81_v17  ;;  %v63_v27 = vld [vmem:[%s1146_s1 + $0x48] sm:$0xff]  ;;  %v62_v31 = vld [vmem:[%s1146_s1 + $0x40] sm:$0xff]  ;;  %v61_v35 = vld [vmem:[%s1146_s1 + $0x38] sm:$0xff] }
   0xc   :  { %622 = vmatprep.subr.mxu1 %v113_v18  ;;  %567 = vmatpush3.msra.mxu0 %v65_v19  ;;  %v95_v28 = vld [vmem:[%s1146_s1 + $0x148] sm:$0xff]  ;;  %v94_v32 = vld [vmem:[%s1146_s1 + $0x140] sm:$0xff]  ;;  %v93_v36 = vld [vmem:[%s1146_s1 + $0x138] sm:$0xff] }
   0xd   :  { %623 = vmatpush3.msra.mxu1 %v97_v20  ;;  %568 = vmatprep.subr.mxu0 %v80_v21  ;;  %v76_v37 = vld [vmem:[%s1146_s1 + $0xb0] sm:$0xff]  ;;  %v75_v41 = vld [vmem:[%s1146_s1 + $0xa8] sm:$0xff]  ;;  %v74_v45 = vld [vmem:[%s1146_s1 + $0xa0] sm:$0xff] }
   0xe   :  { %624 = vmatprep.subr.mxu1 %v112_v22  ;;  %569 = vmatpush3.msra.mxu0 %v64_v23  ;;  %v108_v38 = vld [vmem:[%s1146_s1 + $0x1b0] sm:$0xff]  ;;  %v107_v42 = vld [vmem:[%s1146_s1 + $0x1a8] sm:$0xff]  ;;  %v106_v46 = vld [vmem:[%s1146_s1 + $0x1a0] sm:$0xff] }
   0xf   :  { %625 = vmatpush3.msra.mxu1 %v96_v24  ;;  %570 = vmatprep.subr.mxu0 %v79_v25  ;;  %v60_v39 = vld [vmem:[%s1146_s1 + $0x30] sm:$0xff]  ;;  %v59_v43 = vld [vmem:[%s1146_s1 + $0x28] sm:$0xff]  ;;  %v58_v47 = vld [vmem:[%s1146_s1 + $0x20] sm:$0xff] }
  0x10   :  { %626 = vmatprep.subr.mxu1 %v111_v26  ;;  %571 = vmatpush3.msra.mxu0 %v63_v27  ;;  %v92_v40 = vld [vmem:[%s1146_s1 + $0x130] sm:$0xff]  ;;  %v91_v44 = vld [vmem:[%s1146_s1 + $0x128] sm:$0xff]  ;;  %v90_v48 = vld [vmem:[%s1146_s1 + $0x120] sm:$0xff] }
  0x11   :  { %627 = vmatpush3.msra.mxu1 %v95_v28  ;;  %572 = vmatprep.subr.mxu0 %v78_v29  ;;  %v73_v49 = vld [vmem:[%s1146_s1 + $0x98] sm:$0xff]  ;;  %v72_v53 = vld [vmem:[%s1146_s1 + $0x90] sm:$0xff]  ;;  %v71_v57 = vld [vmem:[%s1146_s1 + $0x88] sm:$0xff] }
  0x12   :  { %628 = vmatprep.subr.mxu1 %v110_v30  ;;  %573 = vmatpush3.msra.mxu0 %v62_v31  ;;  %v105_v50 = vld [vmem:[%s1146_s1 + $0x198] sm:$0xff]  ;;  %v104_v54 = vld [vmem:[%s1146_s1 + $0x190] sm:$0xff]  ;;  %v103_v58 = vld [vmem:[%s1146_s1 + $0x188] sm:$0xff] }
  0x13   :  { %629 = vmatpush3.msra.mxu1 %v94_v32  ;;  %574 = vmatprep.subr.mxu0 %v77_v33  ;;  %v57_v51 = vld [vmem:[%s1146_s1 + $0x18] sm:$0xff]  ;;  %v56_v55 = vld [vmem:[%s1146_s1 + $0x10] sm:$0xff]  ;;  %v55_v59 = vld [vmem:[%s1146_s1 + $0x8] sm:$0xff] }
  0x14   :  { %630 = vmatprep.subr.mxu1 %v109_v34  ;;  %575 = vmatpush3.msra.mxu0 %v61_v35  ;;  %v89_v52 = vld [vmem:[%s1146_s1 + $0x118] sm:$0xff]  ;;  %v88_v56 = vld [vmem:[%s1146_s1 + $0x110] sm:$0xff]  ;;  %v87_v60 = vld [vmem:[%s1146_s1 + $0x108] sm:$0xff] }
  0x15   :  { %631 = vmatpush3.msra.mxu1 %v93_v36  ;;  %576 = vmatprep.subr.mxu0 %v76_v37  ;;  %v70_v61 = vld [vmem:[%s1146_s1 + $0x80] sm:$0xff]  ;;  %v15_v0 = vld [vmem:[%s1147_s0 + $0x8] sm:$0xff]  ;;  %v17_v2 = vld [vmem:[%s1147_s0 + $0x18] sm:$0xff] }
  0x16   :  { %632 = vmatprep.subr.mxu1 %v108_v38  ;;  %577 = vmatpush3.msra.mxu0 %v60_v39  ;;  %v102_v62 = vld [vmem:[%s1146_s1 + $0x180] sm:$0xff]  ;;  %v16_v4 = vld [vmem:[%s1147_s0 + $0x10] sm:$0xff]  ;;  %v125_v5 = vld [vmem:[%s1146_s1 + $0x238] sm:$0xff] }
  0x17   :  { %633 = vmatpush3.msra.mxu1 %v92_v40  ;;  %578 = vmatprep.subr.mxu0 %v75_v41  ;;  %v54_v63 = vld [vmem:[%s1146_s1] sm:$0xff]  ;;  %v20_v6 = vld [vmem:[%s1147_s0 + $0x30] sm:$0xff]  ;;  %v19_v8 = vld [vmem:[%s1147_s0 + $0x28] sm:$0xff] }
  0x18   :  { %634 = vmatprep.subr.mxu1 %v107_v42  ;;  %579 = vmatpush3.msra.mxu0 %v59_v43  ;;  %v86_v1 = vld [vmem:[%s1146_s1 + $0x100] sm:$0xff]  ;;  %v21_v9 = vld [vmem:[%s1147_s0 + $0x38] sm:$0xff]  ;;  %v124_v10 = vld [vmem:[%s1146_s1 + $0x230] sm:$0xff] }
  0x19   :  { %635 = vmatpush3.msra.mxu1 %v91_v44  ;;  %580 = vmatprep.subr.mxu0 %v74_v45  ;;  %v14_v3 = vld [vmem:[%s1147_s0] sm:$0xff]  ;;  %v25_v11 = vld [vmem:[%s1147_s0 + $0x58] sm:$0xff]  ;;  %v27_v12 = vld [vmem:[%s1147_s0 + $0x68] sm:$0xff] }
  0x1a   :  { %636 = vmatprep.subr.mxu1 %v106_v46  ;;  %581 = vmatpush3.msra.mxu0 %v58_v47  ;;  %v22_v7 = vld [vmem:[%s1147_s0 + $0x40] sm:$0xff]  ;;  %v24_v13 = vld [vmem:[%s1147_s0 + $0x50] sm:$0xff]  ;;  %v123_v15 = vld [vmem:[%s1146_s1 + $0x228] sm:$0xff] }
  0x1b   :  { %637 = vmatpush3.msra.mxu1 %v90_v48  ;;  %582 = vmatprep.subr.mxu0 %v73_v49  ;;  %v26_v14 = vld [vmem:[%s1147_s0 + $0x60] sm:$0xff]  ;;  %v32_v17 = vld [vmem:[%s1147_s0 + $0x90] sm:$0xff]  ;;  %v29_v18 = vld [vmem:[%s1147_s0 + $0x78] sm:$0xff] }
  0x1c   :  { %638 = vmatprep.subr.mxu1 %v105_v50  ;;  %583 = vmatpush3.msra.mxu0 %v57_v51  ;;  %v30_v16 = vld [vmem:[%s1147_s0 + $0x80] sm:$0xff]  ;;  %v31_v19 = vld [vmem:[%s1147_s0 + $0x88] sm:$0xff]  ;;  %v37_v22 = vld [vmem:[%s1147_s0 + $0xb8] sm:$0xff] }
  0x1d   :  { %639 = vmatpush3.msra.mxu1 %v89_v52  ;;  %584 = vmatprep.subr.mxu0 %v72_v53  ;;  %v122_v20 = vld [vmem:[%s1146_s1 + $0x220] sm:$0xff]  ;;  %v35_v21 = vld [vmem:[%s1147_s0 + $0xa8] sm:$0xff]  ;;  %v36_v24 = vld [vmem:[%s1147_s0 + $0xb0] sm:$0xff] }
  0x1e   :  { %640 = vmatprep.subr.mxu1 %v104_v54  ;;  %585 = vmatpush3.msra.mxu0 %v56_v55  ;;  %v34_v23 = vld [vmem:[%s1147_s0 + $0xa0] sm:$0xff]  ;;  %v121_v25 = vld [vmem:[%s1146_s1 + $0x218] sm:$0xff]  ;;  %v40_v26 = vld [vmem:[%s1147_s0 + $0xd0] sm:$0xff] }
  0x1f   :  { %641 = vmatpush3.msra.mxu1 %v88_v56  ;;  %586 = vmatprep.subr.mxu0 %v71_v57  ;;  %v42_v27 = vld [vmem:[%s1147_s0 + $0xe0] sm:$0xff]  ;;  %v39_v28 = vld [vmem:[%s1147_s0 + $0xc8] sm:$0xff]  ;;  %v41_v29 = vld [vmem:[%s1147_s0 + $0xd8] sm:$0xff] }
  0x20   :  { %642 = vmatprep.subr.mxu1 %v103_v58  ;;  %587 = vmatpush3.msra.mxu0 %v55_v59  ;;  %v120_v30 = vld [vmem:[%s1146_s1 + $0x210] sm:$0xff]  ;;  %v45_v31 = vld [vmem:[%s1147_s0 + $0xf8] sm:$0xff]  ;;  %v47_v32 = vld [vmem:[%s1147_s0 + $0x108] sm:$0xff] }
  0x21   :  { %643 = vmatpush3.msra.mxu1 %v87_v60  ;;  %588 = vmatprep.subr.mxu0 %v70_v61  ;;  %v44_v33 = vld [vmem:[%s1147_s0 + $0xf0] sm:$0xff]  ;;  %v46_v34 = vld [vmem:[%s1147_s0 + $0x100] sm:$0xff]  ;;  %v119_v35 = vld [vmem:[%s1146_s1 + $0x208] sm:$0xff] }
  0x22   :  { %644 = vmatprep.subr.mxu1 %v102_v62  ;;  %589 = vmatpush3.msra.mxu0 %v54_v63  ;;  %v50_v36 = vld [vmem:[%s1147_s0 + $0x120] sm:$0xff]  ;;  %v52_v37 = vld [vmem:[%s1147_s0 + $0x130] sm:$0xff]  ;;  %v49_v38 = vld [vmem:[%s1147_s0 + $0x118] sm:$0xff] }
  0x23   :  { %263 = vmatprep.mubr.f32.mxu0 %v15_v0  ;;  %645 = vmatpush3.msra.mxu1 %v86_v1  ;;  %v51_v39 = vld [vmem:[%s1147_s0 + $0x128] sm:$0xff]  ;;  %v118_v40 = vld [vmem:[%s1146_s1 + $0x200] sm:$0xff]  ;;  %v28_v45 = vld [vmem:[%s1147_s0 + $0x70] sm:$0xff] }
  0x24   :  { %368 = vmatprep.mubr.f32.mxu1 %v17_v2  ;;  %264 = vmatmul.mubr.f32.vlgmr.msra.gmra.mxu0 %v14_v3  ;;  %v18_v41 = vld [vmem:[%s1147_s0 + $0x20] sm:$0xff]  ;;  %v23_v43 = vld [vmem:[%s1147_s0 + $0x48] sm:$0xff]  ;;  %v48_v46 = vld [vmem:[%s1147_s0 + $0x110] sm:$0xff] }
  0x25   :  { %369 = vmatmul.mubr.f32.vlgmr.msra.gmra.mxu1 %v16_v4  ;;  %686 = vmatprep.subr.mxu0 %v125_v5  ;;  %v38_v42 = vld [vmem:[%s1147_s0 + $0xc0] sm:$0xff]  ;;  %v43_v44 = vld [vmem:[%s1147_s0 + $0xe8] sm:$0xff]  ;;  %v128_v48 = vld [vmem:[%s1148_s2 + $0x10] sm:$0xff] }
  0x26   :  { %714 = vmatprep.subr.mxu1 %v125_v5  ;;  %687 = vmatpush3.msra.mxu0 %v125_v5  ;;  %v126_v47 = vld [vmem:[%s1148_s2] sm:$0xff]  ;;  %v33_v49 = vld [vmem:[%s1147_s0 + $0x98] sm:$0xff]  ;;  %v127_v51 = vld [vmem:[%s1148_s2 + $0x8] sm:$0xff] }
  0x27   :  { %722 = vmatpush3.msra.mxu1 %v125_v5  ;;  %268 = vmatprep.mubr.f32.mxu0 %v20_v6  ;;  %v53_v50 = vld [vmem:[%s1147_s0 + $0x138] sm:$0xff]  ;;  %v131_v53 = vld [vmem:[%s1148_s2 + $0x28] sm:$0xff]  ;;  %v130_v54 = vld [vmem:[%s1148_s2 + $0x20] sm:$0xff] }
  0x28   :  { %373 = vmatprep.mubr.f32.mxu1 %v22_v7  ;;  %269 = vmatmul.mubr.f32.gmra.mxu0 %v19_v8  ;;  %v129_v52 = vld [vmem:[%s1148_s2 + $0x18] sm:$0xff]  ;;  %v132_v56 = vld [vmem:[%s1148_s2 + $0x30] sm:$0xff] }
  0x29   :  { %374 = vmatmul.mubr.f32.gmra.mxu1 %v21_v9  ;;  %688 = vmatprep.subr.mxu0 %v124_v10  ;;  %v133_v55 = vld [vmem:[%s1148_s2 + $0x38] sm:$0xff] }
  0x2a   :  { %715 = vmatprep.subr.mxu1 %v124_v10  ;;  %689 = vmatpush3.msra.mxu0 %v124_v10 }
  0x2b   :  { %723 = vmatpush3.msra.mxu1 %v124_v10  ;;  %273 = vmatprep.mubr.f32.mxu0 %v25_v11 }
  0x2c   :  { %378 = vmatprep.mubr.f32.mxu1 %v27_v12  ;;  %274 = vmatmul.mubr.f32.gmra.mxu0 %v24_v13 }
  0x2d   :  { %379 = vmatmul.mubr.f32.gmra.mxu1 %v26_v14  ;;  %690 = vmatprep.subr.mxu0 %v123_v15 }
  0x2e   :  { %716 = vmatprep.subr.mxu1 %v123_v15  ;;  %691 = vmatpush3.msra.mxu0 %v123_v15 }
  0x2f   :  { %724 = vmatpush3.msra.mxu1 %v123_v15  ;;  %278 = vmatprep.mubr.f32.mxu0 %v30_v16 }
  0x30   :  { %383 = vmatprep.mubr.f32.mxu1 %v32_v17  ;;  %279 = vmatmul.mubr.f32.gmra.mxu0 %v29_v18 }
  0x31   :  { %384 = vmatmul.mubr.f32.gmra.mxu1 %v31_v19  ;;  %692 = vmatprep.subr.mxu0 %v122_v20 }
  0x32   :  { %717 = vmatprep.subr.mxu1 %v122_v20  ;;  %693 = vmatpush3.msra.mxu0 %v122_v20 }
  0x33   :  { %725 = vmatpush3.msra.mxu1 %v122_v20  ;;  %283 = vmatprep.mubr.f32.mxu0 %v35_v21 }
  0x34   :  { %388 = vmatprep.mubr.f32.mxu1 %v37_v22  ;;  %284 = vmatmul.mubr.f32.gmra.mxu0 %v34_v23 }
  0x35   :  { %389 = vmatmul.mubr.f32.gmra.mxu1 %v36_v24  ;;  %694 = vmatprep.subr.mxu0 %v121_v25 }
  0x36   :  { %718 = vmatprep.subr.mxu1 %v121_v25  ;;  %695 = vmatpush3.msra.mxu0 %v121_v25 }
  0x37   :  { %726 = vmatpush3.msra.mxu1 %v121_v25  ;;  %288 = vmatprep.mubr.f32.mxu0 %v40_v26 }
  0x38   :  { %393 = vmatprep.mubr.f32.mxu1 %v42_v27  ;;  %289 = vmatmul.mubr.f32.gmra.mxu0 %v39_v28 }
  0x39   :  { %394 = vmatmul.mubr.f32.gmra.mxu1 %v41_v29  ;;  %696 = vmatprep.subr.mxu0 %v120_v30 }
  0x3a   :  { %719 = vmatprep.subr.mxu1 %v120_v30  ;;  %697 = vmatpush3.msra.mxu0 %v120_v30 }
  0x3b   :  { %727 = vmatpush3.msra.mxu1 %v120_v30  ;;  %293 = vmatprep.mubr.f32.mxu0 %v45_v31 }
  0x3c   :  { %398 = vmatprep.mubr.f32.mxu1 %v47_v32  ;;  %294 = vmatmul.mubr.f32.gmra.mxu0 %v44_v33 }
  0x3d   :  { %399 = vmatmul.mubr.f32.gmra.mxu1 %v46_v34  ;;  %698 = vmatprep.subr.mxu0 %v119_v35 }
  0x3e   :  { %720 = vmatprep.subr.mxu1 %v119_v35  ;;  %699 = vmatpush3.msra.mxu0 %v119_v35 }
  0x3f   :  { %728 = vmatpush3.msra.mxu1 %v119_v35  ;;  %298 = vmatprep.mubr.f32.mxu0 %v50_v36 }
  0x40   :  { %403 = vmatprep.mubr.f32.mxu1 %v52_v37  ;;  %299 = vmatmul.mubr.f32.gmra.mxu0 %v49_v38 }
  0x41   :  { %404 = vmatmul.mubr.f32.gmra.mxu1 %v51_v39  ;;  %700 = vmatprep.subr.mxu0 %v118_v40 }
  0x42   :  { %721 = vmatprep.subr.mxu1 %v118_v40  ;;  %701 = vmatpush3.msra.mxu0 %v118_v40 }
  0x43   :  { %729 = vmatpush3.msra.mxu1 %v118_v40  ;;  %702 = vmatprep.mubr.msk.f32.mxu0 %vm174_vm0, %v18_v41 }
  0x44   :  { %708 = vmatprep.mubr.msk.f32.mxu1 %vm174_vm0, %v38_v42  ;;  %703 = vmatmul.mubr.msk.f32.vlgmr.msra.gmra.mxu0 %vm174_vm0, %v23_v43 }
  0x45   :  { %709 = vmatmul.mubr.msk.f32.vlgmr.msra.gmra.mxu1 %vm174_vm0, %v43_v44  ;;  %705 = vmatprep.mubr.msk.f32.mxu0 %vm174_vm0, %v28_v45 }
  0x46   :  { %711 = vmatprep.mubr.msk.f32.mxu1 %vm174_vm0, %v48_v46  ;;  %136 = vperm.xlu0 %731, %v126_v47  }
  0x47   :  { %146 = vperm.xlu1 %732, %v128_v48  }
  0x48   :  { %706 = vmatmul.mubr.msk.f32.gmra.mxu0 %vm174_vm0, %v33_v49 }
  0x49   :  { %712 = vmatmul.mubr.msk.f32.gmra.mxu1 %vm174_vm0, %v53_v50 }
  0x4a   :  { %141 = vperm.xlu0 %731, %v127_v51  }
  0x4b   :  { %151 = vperm.xlu1 %732, %v129_v52  }
  0x4e   :  { %156 = vperm.xlu0 %731, %v130_v54  }
  0x4f   :  { %161 = vperm.xlu1 %732, %v131_v53  }
  0x52   :  { %166 = vperm.xlu0 %731, %v132_v56  }
  0x53   :  { %171 = vperm.xlu1 %732, %v133_v55  }
  0xc1   :  { %v137_v10 = vpop.permute.xlu0 %136 }
  0xc2   :  { %v147_v7 = vpop.permute.xlu1 %146 }
  0xc5   :  { %v142_v18 = vpop.permute.xlu0 %141 }
  0xc6   :  { %v152_v15 = vpop.permute.xlu1 %151 }
  0xc9   :  { %v157_v27 = vpop.permute.xlu0 %156 }
  0xca   :  { %v162_v26 = vpop.permute.xlu1 %161 }
  0xcd   :  { %v167_v47 = vpop.permute.xlu0 %166 }
  0xce   :  { %v172_v46 = vpop.permute.xlu1 %171 }
  0xe4   :  { %v590_v57 = vpop.f32.mrf.mxu0 }
  0xe5   :  { %v646_v58 = vpop.f32.mrf.mxu1 }
  0xe6   :  { %v591_v59 = vpop.f32.mrf.mxu0 }
  0xe7   :  { %v647_v60 = vpop.f32.mrf.mxu1  ;;  %v592_v21 = vadd.f32 %v591_v59, %v590_v57 }
  0xe8   :  { %v593_v61 = vpop.f32.mrf.mxu0  ;;  %v648_v38 = vadd.f32 %v647_v60, %v646_v58 }
  0xe9   :  { %v649_v62 = vpop.f32.mrf.mxu1  ;;  %v266_v32 = vadd.f32 %v592_v21, %v137_v10 }
  0xea   :  { %v594_v63 = vpop.f32.mrf.mxu0 }
  0xeb   :  { %v650_v0 = vpop.f32.mrf.mxu1  ;;  %v595_v22 = vadd.f32 %v594_v63, %v593_v61  ;;  %v371_v51 = vadd.f32 %v648_v38, %v266_v32 }
  0xec   :  { %v596_v1 = vpop.f32.mrf.mxu0  ;;  %v651_v39 = vadd.f32 %v650_v0, %v649_v62 }
  0xed   :  { %v652_v2 = vpop.f32.mrf.mxu1  ;;  %v271_v33 = vadd.f32 %v595_v22, %v142_v18 }
  0xee   :  { %v597_v3 = vpop.f32.mrf.mxu0 }
  0xef   :  { %v653_v4 = vpop.f32.mrf.mxu1  ;;  %v598_v35 = vadd.f32 %v597_v3, %v596_v1  ;;  %v376_v49 = vadd.f32 %v651_v39, %v271_v33 }
  0xf0   :  { %v599_v5 = vpop.f32.mrf.mxu0  ;;  %v654_v52 = vadd.f32 %v653_v4, %v652_v2 }
  0xf1   :  { %v655_v6 = vpop.f32.mrf.mxu1  ;;  %v276_v53 = vadd.f32 %v598_v35, %v147_v7 }
  0xf2   :  { %v600_v8 = vpop.f32.mrf.mxu0 }
  0xf3   :  { %v656_v9 = vpop.f32.mrf.mxu1  ;;  %v601_v28 = vadd.f32 %v600_v8, %v599_v5 }
  0xf4   :  { %v602_v11 = vpop.f32.mrf.mxu0  ;;  %v657_v54 = vadd.f32 %v656_v9, %v655_v6 }
  0xf5   :  { %v658_v12 = vpop.f32.mrf.mxu1  ;;  %v281_v42 = vadd.f32 %v601_v28, %v152_v15 }
  0xf6   :  { %v603_v13 = vpop.f32.mrf.mxu0 }
  0xf7   :  { %v659_v14 = vpop.f32.mrf.mxu1  ;;  %v604_v29 = vadd.f32 %v603_v13, %v602_v11  ;;  %v386_v5 = vadd.f32 %v657_v54, %v281_v42  ;;  %v381_v11 = vadd.f32 %v654_v52, %v276_v53 }
  0xf8   :  { %v605_v16 = vpop.f32.mrf.mxu0  ;;  %v660_v55 = vadd.f32 %v659_v14, %v658_v12 }
  0xf9   :  { %v661_v17 = vpop.f32.mrf.mxu1  ;;  %v286_v43 = vadd.f32 %v604_v29, %v157_v27 }
  0xfa   :  { %v606_v19 = vpop.f32.mrf.mxu0 }
  0xfb   :  { %v662_v20 = vpop.f32.mrf.mxu1  ;;  %v607_v23 = vadd.f32 %v606_v19, %v605_v16  ;;  %v391_v1 = vadd.f32 %v660_v55, %v286_v43 }
  0xfc   :  { %v608_v24 = vpop.f32.mrf.mxu0  ;;  %v663_v40 = vadd.f32 %v662_v20, %v661_v17 }
  0xfd   :  { %v664_v25 = vpop.f32.mrf.mxu1  ;;  %v291_v34 = vadd.f32 %v607_v23, %v162_v26 }
  0xfe   :  { %v609_v30 = vpop.f32.mrf.mxu0 }
  0xff   :  { %v665_v31 = vpop.f32.mrf.mxu1  ;;  %v610_v41 = vadd.f32 %v609_v30, %v608_v24  ;;  %v396_v50 = vadd.f32 %v663_v40, %v291_v34 }
 0x100   :  { %v611_v36 = vpop.f32.mrf.mxu0  ;;  %v666_v62 = vadd.f32 %v665_v31, %v664_v25 }
 0x101   :  { %v667_v37 = vpop.f32.mrf.mxu1  ;;  %v296_v58 = vadd.f32 %v610_v41, %v167_v47 }
 0x102   :  { %v612_v44 = vpop.f32.mrf.mxu0 }
 0x103   :  { %v668_v45 = vpop.f32.mrf.mxu1  ;;  %v613_v48 = vadd.f32 %v612_v44, %v611_v36  ;;  %v401_v15 = vadd.f32 %v666_v62, %v296_v58 }
 0x104   :  { %v704_v56 = vpop.f32.mrf.mxu0  ;;  %v669_v63 = vadd.f32 %v668_v45, %v667_v37 }
 0x105   :  { %v710_v57 = vpop.f32.mrf.mxu1  ;;  %v301_v59 = vadd.f32 %v613_v48, %v172_v46  ;;  %v481_v60 = vadd.f32 %v704_v56, %v376_v49 }
 0x106   :  { %v501_v61 = vadd.f32 %v710_v57, %v396_v50  ;;  %v475_v0 = vpop.f32.mrf.mxu0 }
 0x107   :  { %v495_v3 = vpop.f32.mrf.mxu1  ;;  %vm515_vm1 = vcmp.ge.f32.partialorder %v481_v60, 0.0  ;;  %v523_v8 = vmul.f32 0.01, %v481_v60  ;;  %v476_v2 = vadd.f32 %v475_v0, %v371_v51  ;;  %v406_v7 = vadd.f32 %v669_v63, %v301_v59 }
 0x108   :  { %vm519_vm2 = vcmp.ge.f32.partialorder %v501_v61, 0.0  ;;  %v527_v10 = vmul.f32 0.01, %v501_v61  ;;  %v496_v4 = vadd.f32 %v495_v3, %v391_v1  ;;  %v707_v6 = vpop.f32.mrf.mxu0 }
 0x109   :  { %v713_v9 = vpop.f32.mrf.mxu1  ;;  %v531_v12 = vsel %vm515_vm1, %v481_v60, %v523_v8  ;;  %v491_v14 = vadd.f32 %v707_v6, %v386_v5  ;;  %vm514_vm3 = vcmp.ge.f32.partialorder %v476_v2, 0.0  ;;  %v522_v16 = vmul.f32 0.01, %v476_v2 }
 0x10a   :  { %v535_v13 = vsel %vm519_vm2, %v501_v61, %v527_v10  ;;  %539 = vst [vmem:[%s1149_s3 + $0x8] sm:$0xff] %v531_v12  ;;  %vm518_vm4 = vcmp.ge.f32.partialorder %v496_v4, 0.0  ;;  %v526_v17 = vmul.f32 0.01, %v496_v4  ;;  %v485_v18 = vpop.f32.mrf.mxu0  ;;  %v511_v21 = vadd.f32 %v713_v9, %v406_v7 }
 0x10b   :  { %543 = vst [vmem:[%s1149_s3 + $0x28] sm:$0xff] %v535_v13  ;;  %v505_v19 = vpop.f32.mrf.mxu1  ;;  %vm517_vm5 = vcmp.ge.f32.partialorder %v491_v14, 0.0  ;;  %v525_v20 = vmul.f32 0.01, %v491_v14  ;;  %v486_v22 = vadd.f32 %v485_v18, %v381_v11  ;;  %v530_v23 = vsel %vm514_vm3, %v476_v2, %v522_v16 }
 0x10c   :  { %v534_v24 = vsel %vm518_vm4, %v496_v4, %v526_v17  ;;  %v506_v25 = vadd.f32 %v505_v19, %v401_v15  ;;  %538 = vst [vmem:[%s1149_s3] sm:$0xff] %v530_v23  ;;  %vm521_vm6 = vcmp.ge.f32.partialorder %v511_v21, 0.0  ;;  %v529_v27 = vmul.f32 0.01, %v511_v21 }
 0x10d   :  { %542 = vst [vmem:[%s1149_s3 + $0x20] sm:$0xff] %v534_v24  ;;  %v533_v26 = vsel %vm517_vm5, %v491_v14, %v525_v20  ;;  %vm516_vm7 = vcmp.ge.f32.partialorder %v486_v22, 0.0  ;;  %v524_v28 = vmul.f32 0.01, %v486_v22 }
 0x10e   :  { %541 = vst [vmem:[%s1149_s3 + $0x18] sm:$0xff] %v533_v26  ;;  %vm520_vm8 = vcmp.ge.f32.partialorder %v506_v25, 0.0  ;;  %v528_v29 = vmul.f32 0.01, %v506_v25  ;;  %v537_v30 = vsel %vm521_vm6, %v511_v21, %v529_v27 }
 0x10f   :  { %545 = vst [vmem:[%s1149_s3 + $0x38] sm:$0xff] %v537_v30  ;;  %v532_v31 = vsel %vm516_vm7, %v486_v22, %v524_v28 }
 0x110   :  { %v536_v32 = vsel %vm520_vm8, %v506_v25, %v528_v29  ;;  %540 = vst [vmem:[%s1149_s3 + $0x10] sm:$0xff] %v532_v31 }
 0x111   :  { %544 = vst [vmem:[%s1149_s3 + $0x30] sm:$0xff] %v536_v32 }

// kernel: encoder_forward.9
= control target key start
LH: loop header
LB: loop body
LE: loop exit
PB: predicated region body
PF: predicated region fallthrough
CT: control target
= control target key end

     0   :  { %vm2510_vm0 = vcmask 15360   ;;  %s6115_s1 = inlined_call_operand.vmem [shape: f32[4096,2], index: 1, kind: input, shape index: {}]   ;;  %s6116_s0 = inlined_call_operand.vmem [shape: f32[64,4096], index: 0, kind: input, shape index: {}]   ;;  %s6117_s2 = inlined_call_operand.vmem [shape: f32[64,1], index: 2, kind: input, shape index: {}]   ;;  %s6118_s3 = inlined_call_operand.vmem [shape: f32[64,2], index: 3, kind: output, shape index: {}]  }
   0x1   :  { %v301_v0 = vld [vmem:[%s6115_s1 + $0xf8] sm:$0xff]  ;;  %v300_v3 = vld [vmem:[%s6115_s1 + $0xf0] sm:$0xff]  ;;  %v299_v7 = vld [vmem:[%s6115_s1 + $0xe8] sm:$0xff] }
   0x2   :  { %v285_v1 = vld [vmem:[%s6115_s1 + $0x78] sm:$0xff]  ;;  %2523 = vmatprep.subr.mxu0 %v301_v0  ;;  %v284_v5 = vld [vmem:[%s6115_s1 + $0x70] sm:$0xff]  ;;  %v283_v9 = vld [vmem:[%s6115_s1 + $0x68] sm:$0xff] }
   0x3   :  { %v333_v2 = vld [vmem:[%s6115_s1 + $0x1f8] sm:$0xff]  ;;  %2524 = vmatpush3.msra.mxu0 %v285_v1  ;;  %v332_v6 = vld [vmem:[%s6115_s1 + $0x1f0] sm:$0xff]  ;;  %v331_v10 = vld [vmem:[%s6115_s1 + $0x1e8] sm:$0xff] }
   0x4   :  { %2579 = vmatprep.subr.mxu1 %v333_v2  ;;  %v317_v4 = vld [vmem:[%s6115_s1 + $0x178] sm:$0xff]  ;;  %v316_v8 = vld [vmem:[%s6115_s1 + $0x170] sm:$0xff]  ;;  %2525 = vmatprep.subr.mxu0 %v300_v3  ;;  %v298_v11 = vld [vmem:[%s6115_s1 + $0xe0] sm:$0xff] }
   0x5   :  { %2580 = vmatpush3.msra.mxu1 %v317_v4  ;;  %2526 = vmatpush3.msra.mxu0 %v284_v5  ;;  %v315_v12 = vld [vmem:[%s6115_s1 + $0x168] sm:$0xff]  ;;  %v330_v13 = vld [vmem:[%s6115_s1 + $0x1e0] sm:$0xff]  ;;  %v297_v16 = vld [vmem:[%s6115_s1 + $0xd8] sm:$0xff] }
   0x6   :  { %2581 = vmatprep.subr.mxu1 %v332_v6  ;;  %2527 = vmatprep.subr.mxu0 %v299_v7  ;;  %v282_v14 = vld [vmem:[%s6115_s1 + $0x60] sm:$0xff]  ;;  %v329_v17 = vld [vmem:[%s6115_s1 + $0x1d8] sm:$0xff]  ;;  %v296_v20 = vld [vmem:[%s6115_s1 + $0xd0] sm:$0xff] }
   0x7   :  { %2582 = vmatpush3.msra.mxu1 %v316_v8  ;;  %v314_v15 = vld [vmem:[%s6115_s1 + $0x160] sm:$0xff]  ;;  %2528 = vmatpush3.msra.mxu0 %v283_v9  ;;  %v281_v18 = vld [vmem:[%s6115_s1 + $0x58] sm:$0xff]  ;;  %v328_v21 = vld [vmem:[%s6115_s1 + $0x1d0] sm:$0xff] }
   0x8   :  { %2583 = vmatprep.subr.mxu1 %v331_v10  ;;  %2529 = vmatprep.subr.mxu0 %v298_v11  ;;  %v313_v19 = vld [vmem:[%s6115_s1 + $0x158] sm:$0xff]  ;;  %v280_v22 = vld [vmem:[%s6115_s1 + $0x50] sm:$0xff]  ;;  %v295_v24 = vld [vmem:[%s6115_s1 + $0xc8] sm:$0xff] }
   0x9   :  { %2584 = vmatpush3.msra.mxu1 %v315_v12  ;;  %2530 = vmatpush3.msra.mxu0 %v282_v14  ;;  %v312_v23 = vld [vmem:[%s6115_s1 + $0x150] sm:$0xff]  ;;  %v327_v25 = vld [vmem:[%s6115_s1 + $0x1c8] sm:$0xff]  ;;  %v294_v28 = vld [vmem:[%s6115_s1 + $0xc0] sm:$0xff] }
   0xa   :  { %2585 = vmatprep.subr.mxu1 %v330_v13  ;;  %2531 = vmatprep.subr.mxu0 %v297_v16  ;;  %v279_v26 = vld [vmem:[%s6115_s1 + $0x48] sm:$0xff]  ;;  %v326_v29 = vld [vmem:[%s6115_s1 + $0x1c0] sm:$0xff]  ;;  %v293_v32 = vld [vmem:[%s6115_s1 + $0xb8] sm:$0xff] }
   0xb   :  { %2586 = vmatpush3.msra.mxu1 %v314_v15  ;;  %2532 = vmatpush3.msra.mxu0 %v281_v18  ;;  %v311_v27 = vld [vmem:[%s6115_s1 + $0x148] sm:$0xff]  ;;  %v278_v30 = vld [vmem:[%s6115_s1 + $0x40] sm:$0xff]  ;;  %v325_v33 = vld [vmem:[%s6115_s1 + $0x1b8] sm:$0xff] }
   0xc   :  { %2587 = vmatprep.subr.mxu1 %v329_v17  ;;  %2533 = vmatprep.subr.mxu0 %v296_v20  ;;  %v310_v31 = vld [vmem:[%s6115_s1 + $0x140] sm:$0xff]  ;;  %v277_v34 = vld [vmem:[%s6115_s1 + $0x38] sm:$0xff]  ;;  %v292_v36 = vld [vmem:[%s6115_s1 + $0xb0] sm:$0xff] }
   0xd   :  { %2588 = vmatpush3.msra.mxu1 %v313_v19  ;;  %2534 = vmatpush3.msra.mxu0 %v280_v22  ;;  %v309_v35 = vld [vmem:[%s6115_s1 + $0x138] sm:$0xff]  ;;  %v324_v37 = vld [vmem:[%s6115_s1 + $0x1b0] sm:$0xff]  ;;  %v291_v40 = vld [vmem:[%s6115_s1 + $0xa8] sm:$0xff] }
   0xe   :  { %2589 = vmatprep.subr.mxu1 %v328_v21  ;;  %2535 = vmatprep.subr.mxu0 %v295_v24  ;;  %v276_v38 = vld [vmem:[%s6115_s1 + $0x30] sm:$0xff]  ;;  %v323_v41 = vld [vmem:[%s6115_s1 + $0x1a8] sm:$0xff]  ;;  %v290_v44 = vld [vmem:[%s6115_s1 + $0xa0] sm:$0xff] }
   0xf   :  { %2590 = vmatpush3.msra.mxu1 %v312_v23  ;;  %2536 = vmatpush3.msra.mxu0 %v279_v26  ;;  %v308_v39 = vld [vmem:[%s6115_s1 + $0x130] sm:$0xff]  ;;  %v275_v42 = vld [vmem:[%s6115_s1 + $0x28] sm:$0xff]  ;;  %v322_v45 = vld [vmem:[%s6115_s1 + $0x1a0] sm:$0xff] }
  0x10   :  { %2591 = vmatprep.subr.mxu1 %v327_v25  ;;  %2537 = vmatprep.subr.mxu0 %v294_v28  ;;  %v307_v43 = vld [vmem:[%s6115_s1 + $0x128] sm:$0xff]  ;;  %v274_v46 = vld [vmem:[%s6115_s1 + $0x20] sm:$0xff]  ;;  %v289_v48 = vld [vmem:[%s6115_s1 + $0x98] sm:$0xff] }
  0x11   :  { %2592 = vmatpush3.msra.mxu1 %v311_v27  ;;  %2538 = vmatpush3.msra.mxu0 %v278_v30  ;;  %v306_v47 = vld [vmem:[%s6115_s1 + $0x120] sm:$0xff]  ;;  %v321_v49 = vld [vmem:[%s6115_s1 + $0x198] sm:$0xff]  ;;  %v288_v52 = vld [vmem:[%s6115_s1 + $0x90] sm:$0xff] }
  0x12   :  { %2593 = vmatprep.subr.mxu1 %v326_v29  ;;  %2539 = vmatprep.subr.mxu0 %v293_v32  ;;  %v273_v50 = vld [vmem:[%s6115_s1 + $0x18] sm:$0xff]  ;;  %v320_v53 = vld [vmem:[%s6115_s1 + $0x190] sm:$0xff]  ;;  %v287_v56 = vld [vmem:[%s6115_s1 + $0x88] sm:$0xff] }
  0x13   :  { %2594 = vmatpush3.msra.mxu1 %v310_v31  ;;  %2540 = vmatpush3.msra.mxu0 %v277_v34  ;;  %v305_v51 = vld [vmem:[%s6115_s1 + $0x118] sm:$0xff]  ;;  %v272_v54 = vld [vmem:[%s6115_s1 + $0x10] sm:$0xff]  ;;  %v319_v57 = vld [vmem:[%s6115_s1 + $0x188] sm:$0xff] }
  0x14   :  { %2595 = vmatprep.subr.mxu1 %v325_v33  ;;  %2541 = vmatprep.subr.mxu0 %v292_v36  ;;  %v304_v55 = vld [vmem:[%s6115_s1 + $0x110] sm:$0xff]  ;;  %v271_v58 = vld [vmem:[%s6115_s1 + $0x8] sm:$0xff]  ;;  %v286_v60 = vld [vmem:[%s6115_s1 + $0x80] sm:$0xff] }
  0x15   :  { %2596 = vmatpush3.msra.mxu1 %v309_v35  ;;  %2542 = vmatpush3.msra.mxu0 %v276_v38  ;;  %v303_v59 = vld [vmem:[%s6115_s1 + $0x108] sm:$0xff]  ;;  %v270_v62 = vld [vmem:[%s6115_s1] sm:$0xff]  ;;  %v17_v2 = vld [vmem:[%s6116_s0 + $0x18] sm:$0xff] }
  0x16   :  { %2597 = vmatprep.subr.mxu1 %v324_v37  ;;  %2543 = vmatprep.subr.mxu0 %v291_v40  ;;  %v15_v61 = vld [vmem:[%s6116_s0 + $0x8] sm:$0xff]  ;;  %v318_v63 = vld [vmem:[%s6115_s1 + $0x180] sm:$0xff]  ;;  %v365_v3 = vld [vmem:[%s6115_s1 + $0x2f8] sm:$0xff] }
  0x17   :  { %2598 = vmatpush3.msra.mxu1 %v308_v39  ;;  %2544 = vmatpush3.msra.mxu0 %v275_v42  ;;  %v14_v0 = vld [vmem:[%s6116_s0] sm:$0xff]  ;;  %v16_v4 = vld [vmem:[%s6116_s0 + $0x10] sm:$0xff]  ;;  %v349_v5 = vld [vmem:[%s6115_s1 + $0x278] sm:$0xff] }
  0x18   :  { %2599 = vmatprep.subr.mxu1 %v323_v41  ;;  %2545 = vmatprep.subr.mxu0 %v290_v44  ;;  %v302_v1 = vld [vmem:[%s6115_s1 + $0x100] sm:$0xff]  ;;  %v397_v6 = vld [vmem:[%s6115_s1 + $0x3f8] sm:$0xff]  ;;  %v364_v7 = vld [vmem:[%s6115_s1 + $0x2f0] sm:$0xff] }
  0x19   :  { %2600 = vmatpush3.msra.mxu1 %v307_v43  ;;  %2546 = vmatpush3.msra.mxu0 %v274_v46  ;;  %v381_v8 = vld [vmem:[%s6115_s1 + $0x378] sm:$0xff]  ;;  %v47_v9 = vld [vmem:[%s6116_s0 + $0x108] sm:$0xff]  ;;  %v348_v10 = vld [vmem:[%s6115_s1 + $0x270] sm:$0xff] }
  0x1a   :  { %2601 = vmatprep.subr.mxu1 %v322_v45  ;;  %2547 = vmatprep.subr.mxu0 %v289_v48  ;;  %v396_v11 = vld [vmem:[%s6115_s1 + $0x3f0] sm:$0xff]  ;;  %v46_v12 = vld [vmem:[%s6116_s0 + $0x100] sm:$0xff]  ;;  %v49_v13 = vld [vmem:[%s6116_s0 + $0x118] sm:$0xff] }
  0x1b   :  { %2602 = vmatpush3.msra.mxu1 %v306_v47  ;;  %2548 = vmatpush3.msra.mxu0 %v273_v50  ;;  %v363_v14 = vld [vmem:[%s6115_s1 + $0x2e8] sm:$0xff]  ;;  %v380_v15 = vld [vmem:[%s6115_s1 + $0x370] sm:$0xff]  ;;  %v362_v19 = vld [vmem:[%s6115_s1 + $0x2e0] sm:$0xff] }
  0x1c   :  { %2603 = vmatprep.subr.mxu1 %v321_v49  ;;  %2549 = vmatprep.subr.mxu0 %v288_v52  ;;  %v48_v16 = vld [vmem:[%s6116_s0 + $0x110] sm:$0xff]  ;;  %v347_v17 = vld [vmem:[%s6115_s1 + $0x268] sm:$0xff]  ;;  %v346_v22 = vld [vmem:[%s6115_s1 + $0x260] sm:$0xff] }
  0x1d   :  { %2604 = vmatpush3.msra.mxu1 %v305_v51  ;;  %2550 = vmatpush3.msra.mxu0 %v272_v54  ;;  %v395_v18 = vld [vmem:[%s6115_s1 + $0x3e8] sm:$0xff]  ;;  %v394_v23 = vld [vmem:[%s6115_s1 + $0x3e0] sm:$0xff]  ;;  %v81_v25 = vld [vmem:[%s6116_s0 + $0x218] sm:$0xff] }
  0x1e   :  { %2605 = vmatprep.subr.mxu1 %v320_v53  ;;  %2551 = vmatprep.subr.mxu0 %v287_v56  ;;  %v379_v20 = vld [vmem:[%s6115_s1 + $0x368] sm:$0xff]  ;;  %v78_v24 = vld [vmem:[%s6116_s0 + $0x200] sm:$0xff]  ;;  %v361_v26 = vld [vmem:[%s6115_s1 + $0x2d8] sm:$0xff] }
  0x1f   :  { %2606 = vmatpush3.msra.mxu1 %v304_v55  ;;  %2552 = vmatpush3.msra.mxu0 %v271_v58  ;;  %v79_v21 = vld [vmem:[%s6116_s0 + $0x208] sm:$0xff]  ;;  %v378_v27 = vld [vmem:[%s6115_s1 + $0x360] sm:$0xff]  ;;  %v80_v28 = vld [vmem:[%s6116_s0 + $0x210] sm:$0xff] }
  0x20   :  { %2607 = vmatprep.subr.mxu1 %v319_v57  ;;  %2553 = vmatprep.subr.mxu0 %v286_v60  ;;  %v345_v29 = vld [vmem:[%s6115_s1 + $0x258] sm:$0xff]  ;;  %v360_v31 = vld [vmem:[%s6115_s1 + $0x2d0] sm:$0xff]  ;;  %v111_v33 = vld [vmem:[%s6116_s0 + $0x308] sm:$0xff] }
  0x21   :  { %2608 = vmatpush3.msra.mxu1 %v303_v59  ;;  %894 = vmatprep.mubr.f32.mxu0 %v15_v61  ;;  %v393_v30 = vld [vmem:[%s6115_s1 + $0x3d8] sm:$0xff]  ;;  %v344_v34 = vld [vmem:[%s6115_s1 + $0x250] sm:$0xff]  ;;  %v110_v36 = vld [vmem:[%s6116_s0 + $0x300] sm:$0xff] }
  0x22   :  { %2554 = vmatpush3.msra.mxu0 %v270_v62  ;;  %2609 = vmatprep.subr.mxu1 %v318_v63  ;;  %v377_v32 = vld [vmem:[%s6115_s1 + $0x358] sm:$0xff]  ;;  %v392_v35 = vld [vmem:[%s6115_s1 + $0x3d0] sm:$0xff]  ;;  %v359_v38 = vld [vmem:[%s6115_s1 + $0x2c8] sm:$0xff] }
  0x23   :  { %895 = vmatmul.mubr.f32.vlgmr.msra.gmra.mxu0 %v14_v0  ;;  %2610 = vmatpush3.msra.mxu1 %v302_v1  ;;  %v113_v37 = vld [vmem:[%s6116_s0 + $0x318] sm:$0xff]  ;;  %v376_v39 = vld [vmem:[%s6115_s1 + $0x350] sm:$0xff]  ;;  %v343_v41 = vld [vmem:[%s6115_s1 + $0x248] sm:$0xff] }
  0x24   :  { %999 = vmatprep.mubr.f32.mxu1 %v17_v2  ;;  %2635 = vmatprep.subr.mxu0 %v365_v3  ;;  %v112_v40 = vld [vmem:[%s6116_s0 + $0x310] sm:$0xff]  ;;  %v391_v42 = vld [vmem:[%s6115_s1 + $0x3c8] sm:$0xff]  ;;  %v358_v43 = vld [vmem:[%s6115_s1 + $0x2c0] sm:$0xff] }
  0x25   :  { %1000 = vmatmul.mubr.f32.vlgmr.msra.gmra.mxu1 %v16_v4  ;;  %2636 = vmatpush3.msra.mxu0 %v349_v5  ;;  %v375_v44 = vld [vmem:[%s6115_s1 + $0x348] sm:$0xff]  ;;  %v342_v46 = vld [vmem:[%s6115_s1 + $0x240] sm:$0xff]  ;;  %v145_v49 = vld [vmem:[%s6116_s0 + $0x418] sm:$0xff] }
  0x26   :  { %2691 = vmatprep.subr.mxu1 %v397_v6  ;;  %2637 = vmatprep.subr.mxu0 %v364_v7  ;;  %v143_v45 = vld [vmem:[%s6116_s0 + $0x408] sm:$0xff]  ;;  %v390_v47 = vld [vmem:[%s6115_s1 + $0x3c0] sm:$0xff]  ;;  %v357_v50 = vld [vmem:[%s6115_s1 + $0x2b8] sm:$0xff] }
  0x27   :  { %2692 = vmatpush3.msra.mxu1 %v381_v8  ;;  %899 = vmatprep.mubr.f32.mxu0 %v47_v9  ;;  %v142_v48 = vld [vmem:[%s6116_s0 + $0x400] sm:$0xff]  ;;  %v144_v52 = vld [vmem:[%s6116_s0 + $0x410] sm:$0xff]  ;;  %v341_v53 = vld [vmem:[%s6115_s1 + $0x238] sm:$0xff] }
  0x28   :  { %2638 = vmatpush3.msra.mxu0 %v348_v10  ;;  %2693 = vmatprep.subr.mxu1 %v396_v11  ;;  %v374_v51 = vld [vmem:[%s6115_s1 + $0x340] sm:$0xff]  ;;  %v389_v54 = vld [vmem:[%s6115_s1 + $0x3b8] sm:$0xff]  ;;  %v356_v55 = vld [vmem:[%s6115_s1 + $0x2b0] sm:$0xff] }
  0x29   :  { %900 = vmatmul.mubr.f32.gmra.mxu0 %v46_v12  ;;  %1004 = vmatprep.mubr.f32.mxu1 %v49_v13  ;;  %v373_v56 = vld [vmem:[%s6115_s1 + $0x338] sm:$0xff]  ;;  %v175_v57 = vld [vmem:[%s6116_s0 + $0x508] sm:$0xff]  ;;  %v340_v58 = vld [vmem:[%s6115_s1 + $0x230] sm:$0xff] }
  0x2a   :  { %2639 = vmatprep.subr.mxu0 %v363_v14  ;;  %2694 = vmatpush3.msra.mxu1 %v380_v15  ;;  %v388_v59 = vld [vmem:[%s6115_s1 + $0x3b0] sm:$0xff]  ;;  %v174_v60 = vld [vmem:[%s6116_s0 + $0x500] sm:$0xff]  ;;  %v177_v61 = vld [vmem:[%s6116_s0 + $0x518] sm:$0xff] }
  0x2b   :  { %1005 = vmatmul.mubr.f32.gmra.mxu1 %v48_v16  ;;  %2640 = vmatpush3.msra.mxu0 %v347_v17  ;;  %v355_v62 = vld [vmem:[%s6115_s1 + $0x2a8] sm:$0xff]  ;;  %v372_v63 = vld [vmem:[%s6115_s1 + $0x330] sm:$0xff]  ;;  %v354_v3 = vld [vmem:[%s6115_s1 + $0x2a0] sm:$0xff] }
  0x2c   :  { %2695 = vmatprep.subr.mxu1 %v395_v18  ;;  %2641 = vmatprep.subr.mxu0 %v362_v19  ;;  %v176_v0 = vld [vmem:[%s6116_s0 + $0x510] sm:$0xff]  ;;  %v339_v1 = vld [vmem:[%s6115_s1 + $0x228] sm:$0xff]  ;;  %v338_v6 = vld [vmem:[%s6115_s1 + $0x220] sm:$0xff] }
  0x2d   :  { %2696 = vmatpush3.msra.mxu1 %v379_v20  ;;  %904 = vmatprep.mubr.f32.mxu0 %v79_v21  ;;  %v387_v2 = vld [vmem:[%s6115_s1 + $0x3a8] sm:$0xff]  ;;  %v386_v7 = vld [vmem:[%s6115_s1 + $0x3a0] sm:$0xff]  ;;  %v209_v9 = vld [vmem:[%s6116_s0 + $0x618] sm:$0xff] }
  0x2e   :  { %2642 = vmatpush3.msra.mxu0 %v346_v22  ;;  %2697 = vmatprep.subr.mxu1 %v394_v23  ;;  %v371_v4 = vld [vmem:[%s6115_s1 + $0x328] sm:$0xff]  ;;  %v206_v8 = vld [vmem:[%s6116_s0 + $0x600] sm:$0xff]  ;;  %v353_v10 = vld [vmem:[%s6115_s1 + $0x298] sm:$0xff] }
  0x2f   :  { %905 = vmatmul.mubr.f32.gmra.mxu0 %v78_v24  ;;  %1009 = vmatprep.mubr.f32.mxu1 %v81_v25  ;;  %v207_v5 = vld [vmem:[%s6116_s0 + $0x608] sm:$0xff]  ;;  %v370_v11 = vld [vmem:[%s6115_s1 + $0x320] sm:$0xff]  ;;  %v208_v12 = vld [vmem:[%s6116_s0 + $0x610] sm:$0xff] }
  0x30   :  { %2643 = vmatprep.subr.mxu0 %v361_v26  ;;  %2698 = vmatpush3.msra.mxu1 %v378_v27  ;;  %v337_v13 = vld [vmem:[%s6115_s1 + $0x218] sm:$0xff]  ;;  %v352_v15 = vld [vmem:[%s6115_s1 + $0x290] sm:$0xff]  ;;  %v239_v17 = vld [vmem:[%s6116_s0 + $0x708] sm:$0xff] }
  0x31   :  { %1010 = vmatmul.mubr.f32.gmra.mxu1 %v80_v28  ;;  %2644 = vmatpush3.msra.mxu0 %v345_v29  ;;  %v385_v14 = vld [vmem:[%s6115_s1 + $0x398] sm:$0xff]  ;;  %v336_v18 = vld [vmem:[%s6115_s1 + $0x210] sm:$0xff]  ;;  %v238_v20 = vld [vmem:[%s6116_s0 + $0x700] sm:$0xff] }
  0x32   :  { %2699 = vmatprep.subr.mxu1 %v393_v30  ;;  %2645 = vmatprep.subr.mxu0 %v360_v31  ;;  %v369_v16 = vld [vmem:[%s6115_s1 + $0x318] sm:$0xff]  ;;  %v384_v19 = vld [vmem:[%s6115_s1 + $0x390] sm:$0xff]  ;;  %v351_v22 = vld [vmem:[%s6115_s1 + $0x288] sm:$0xff] }
  0x33   :  { %2700 = vmatpush3.msra.mxu1 %v377_v32  ;;  %909 = vmatprep.mubr.f32.mxu0 %v111_v33  ;;  %v241_v21 = vld [vmem:[%s6116_s0 + $0x718] sm:$0xff]  ;;  %v368_v23 = vld [vmem:[%s6115_s1 + $0x310] sm:$0xff]  ;;  %v335_v25 = vld [vmem:[%s6115_s1 + $0x208] sm:$0xff] }
  0x34   :  { %2646 = vmatpush3.msra.mxu0 %v344_v34  ;;  %2701 = vmatprep.subr.mxu1 %v392_v35  ;;  %v240_v24 = vld [vmem:[%s6116_s0 + $0x710] sm:$0xff]  ;;  %v383_v26 = vld [vmem:[%s6115_s1 + $0x388] sm:$0xff]  ;;  %v350_v27 = vld [vmem:[%s6115_s1 + $0x280] sm:$0xff] }
  0x35   :  { %910 = vmatmul.mubr.f32.gmra.mxu0 %v110_v36  ;;  %1014 = vmatprep.mubr.f32.mxu1 %v113_v37  ;;  %v367_v28 = vld [vmem:[%s6115_s1 + $0x308] sm:$0xff]  ;;  %v334_v29 = vld [vmem:[%s6115_s1 + $0x200] sm:$0xff]  ;;  %v21_v34 = vld [vmem:[%s6116_s0 + $0x38] sm:$0xff] }
  0x36   :  { %2647 = vmatprep.subr.mxu0 %v359_v38  ;;  %2702 = vmatpush3.msra.mxu1 %v376_v39  ;;  %v19_v30 = vld [vmem:[%s6116_s0 + $0x28] sm:$0xff]  ;;  %v382_v31 = vld [vmem:[%s6115_s1 + $0x380] sm:$0xff]  ;;  %v429_v35 = vld [vmem:[%s6115_s1 + $0x4f8] sm:$0xff] }
  0x37   :  { %1015 = vmatmul.mubr.f32.gmra.mxu1 %v112_v40  ;;  %2648 = vmatpush3.msra.mxu0 %v343_v41  ;;  %v18_v32 = vld [vmem:[%s6116_s0 + $0x20] sm:$0xff]  ;;  %v20_v36 = vld [vmem:[%s6116_s0 + $0x30] sm:$0xff]  ;;  %v413_v37 = vld [vmem:[%s6115_s1 + $0x478] sm:$0xff] }
  0x38   :  { %2703 = vmatprep.subr.mxu1 %v391_v42  ;;  %2649 = vmatprep.subr.mxu0 %v358_v43  ;;  %v366_v33 = vld [vmem:[%s6115_s1 + $0x300] sm:$0xff]  ;;  %v461_v38 = vld [vmem:[%s6115_s1 + $0x5f8] sm:$0xff]  ;;  %v428_v39 = vld [vmem:[%s6115_s1 + $0x4f0] sm:$0xff] }
  0x39   :  { %2704 = vmatpush3.msra.mxu1 %v375_v44  ;;  %914 = vmatprep.mubr.f32.mxu0 %v143_v45  ;;  %v445_v40 = vld [vmem:[%s6115_s1 + $0x578] sm:$0xff]  ;;  %v51_v41 = vld [vmem:[%s6116_s0 + $0x128] sm:$0xff]  ;;  %v412_v42 = vld [vmem:[%s6115_s1 + $0x470] sm:$0xff] }
  0x3a   :  { %2650 = vmatpush3.msra.mxu0 %v342_v46  ;;  %2705 = vmatprep.subr.mxu1 %v390_v47  ;;  %v460_v43 = vld [vmem:[%s6115_s1 + $0x5f0] sm:$0xff]  ;;  %v50_v44 = vld [vmem:[%s6116_s0 + $0x120] sm:$0xff]  ;;  %v53_v45 = vld [vmem:[%s6116_s0 + $0x138] sm:$0xff] }
  0x3b   :  { %915 = vmatmul.mubr.f32.gmra.mxu0 %v142_v48  ;;  %1019 = vmatprep.mubr.f32.mxu1 %v145_v49  ;;  %v427_v46 = vld [vmem:[%s6115_s1 + $0x4e8] sm:$0xff]  ;;  %v444_v47 = vld [vmem:[%s6115_s1 + $0x570] sm:$0xff] }
  0x3c   :  { %2651 = vmatprep.subr.mxu0 %v357_v50  ;;  %2706 = vmatpush3.msra.mxu1 %v374_v51  ;;  %v52_v48 = vld [vmem:[%s6116_s0 + $0x130] sm:$0xff]  ;;  %v411_v49 = vld [vmem:[%s6115_s1 + $0x468] sm:$0xff]  ;;  %v426_v51 = vld [vmem:[%s6115_s1 + $0x4e0] sm:$0xff] }
  0x3d   :  { %1020 = vmatmul.mubr.f32.gmra.mxu1 %v144_v52  ;;  %2652 = vmatpush3.msra.mxu0 %v341_v53  ;;  %v459_v50 = vld [vmem:[%s6115_s1 + $0x5e8] sm:$0xff] }
  0x3e   :  { %2707 = vmatprep.subr.mxu1 %v389_v54  ;;  %2653 = vmatprep.subr.mxu0 %v356_v55  ;;  %v443_v52 = vld [vmem:[%s6115_s1 + $0x568] sm:$0xff]  ;;  %v410_v54 = vld [vmem:[%s6115_s1 + $0x460] sm:$0xff] }
  0x3f   :  { %2708 = vmatpush3.msra.mxu1 %v373_v56  ;;  %919 = vmatprep.mubr.f32.mxu0 %v175_v57  ;;  %v83_v53 = vld [vmem:[%s6116_s0 + $0x228] sm:$0xff]  ;;  %v458_v55 = vld [vmem:[%s6115_s1 + $0x5e0] sm:$0xff]  ;;  %v85_v57 = vld [vmem:[%s6116_s0 + $0x238] sm:$0xff] }
  0x40   :  { %2654 = vmatpush3.msra.mxu0 %v340_v58  ;;  %2709 = vmatprep.subr.mxu1 %v388_v59  ;;  %v82_v56 = vld [vmem:[%s6116_s0 + $0x220] sm:$0xff]  ;;  %v425_v58 = vld [vmem:[%s6115_s1 + $0x4d8] sm:$0xff] }
  0x41   :  { %920 = vmatmul.mubr.f32.gmra.mxu0 %v174_v60  ;;  %1024 = vmatprep.mubr.f32.mxu1 %v177_v61  ;;  %v442_v59 = vld [vmem:[%s6115_s1 + $0x560] sm:$0xff]  ;;  %v84_v60 = vld [vmem:[%s6116_s0 + $0x230] sm:$0xff]  ;;  %v409_v61 = vld [vmem:[%s6115_s1 + $0x458] sm:$0xff] }
  0x42   :  { %2655 = vmatprep.subr.mxu0 %v355_v62  ;;  %2710 = vmatpush3.msra.mxu1 %v372_v63  ;;  %v457_v62 = vld [vmem:[%s6115_s1 + $0x5d8] sm:$0xff]  ;;  %v424_v63 = vld [vmem:[%s6115_s1 + $0x4d0] sm:$0xff] }
  0x43   :  { %1025 = vmatmul.mubr.f32.gmra.mxu1 %v176_v0  ;;  %2656 = vmatpush3.msra.mxu0 %v339_v1  ;;  %v441_v0 = vld [vmem:[%s6115_s1 + $0x558] sm:$0xff]  ;;  %v115_v1 = vld [vmem:[%s6116_s0 + $0x328] sm:$0xff] }
  0x44   :  { %2711 = vmatprep.subr.mxu1 %v387_v2  ;;  %2657 = vmatprep.subr.mxu0 %v354_v3  ;;  %v408_v2 = vld [vmem:[%s6115_s1 + $0x450] sm:$0xff] }
  0x45   :  { %2712 = vmatpush3.msra.mxu1 %v371_v4  ;;  %924 = vmatprep.mubr.f32.mxu0 %v207_v5  ;;  %v456_v3 = vld [vmem:[%s6115_s1 + $0x5d0] sm:$0xff]  ;;  %v114_v4 = vld [vmem:[%s6116_s0 + $0x320] sm:$0xff]  ;;  %v117_v5 = vld [vmem:[%s6116_s0 + $0x338] sm:$0xff] }
  0x46   :  { %2658 = vmatpush3.msra.mxu0 %v338_v6  ;;  %2713 = vmatprep.subr.mxu1 %v386_v7  ;;  %v423_v6 = vld [vmem:[%s6115_s1 + $0x4c8] sm:$0xff]  ;;  %v440_v7 = vld [vmem:[%s6115_s1 + $0x550] sm:$0xff] }
  0x47   :  { %925 = vmatmul.mubr.f32.gmra.mxu0 %v206_v8  ;;  %1029 = vmatprep.mubr.f32.mxu1 %v209_v9  ;;  %v116_v8 = vld [vmem:[%s6116_s0 + $0x330] sm:$0xff]  ;;  %v407_v9 = vld [vmem:[%s6115_s1 + $0x448] sm:$0xff] }
  0x48   :  { %2659 = vmatprep.subr.mxu0 %v353_v10  ;;  %2714 = vmatpush3.msra.mxu1 %v370_v11  ;;  %v455_v10 = vld [vmem:[%s6115_s1 + $0x5c8] sm:$0xff]  ;;  %v422_v11 = vld [vmem:[%s6115_s1 + $0x4c0] sm:$0xff] }
  0x49   :  { %1030 = vmatmul.mubr.f32.gmra.mxu1 %v208_v12  ;;  %2660 = vmatpush3.msra.mxu0 %v337_v13  ;;  %v439_v12 = vld [vmem:[%s6115_s1 + $0x548] sm:$0xff] }
  0x4a   :  { %2715 = vmatprep.subr.mxu1 %v385_v14  ;;  %2661 = vmatprep.subr.mxu0 %v352_v15  ;;  %v147_v13 = vld [vmem:[%s6116_s0 + $0x428] sm:$0xff]  ;;  %v406_v14 = vld [vmem:[%s6115_s1 + $0x440] sm:$0xff] }
  0x4b   :  { %2716 = vmatpush3.msra.mxu1 %v369_v16  ;;  %929 = vmatprep.mubr.f32.mxu0 %v239_v17  ;;  %v454_v15 = vld [vmem:[%s6115_s1 + $0x5c0] sm:$0xff]  ;;  %v149_v17 = vld [vmem:[%s6116_s0 + $0x438] sm:$0xff] }
  0x4c   :  { %2662 = vmatpush3.msra.mxu0 %v336_v18  ;;  %2717 = vmatprep.subr.mxu1 %v384_v19  ;;  %v146_v16 = vld [vmem:[%s6116_s0 + $0x420] sm:$0xff]  ;;  %v421_v18 = vld [vmem:[%s6115_s1 + $0x4b8] sm:$0xff] }
  0x4d   :  { %930 = vmatmul.mubr.f32.gmra.mxu0 %v238_v20  ;;  %1034 = vmatprep.mubr.f32.mxu1 %v241_v21  ;;  %v438_v19 = vld [vmem:[%s6115_s1 + $0x540] sm:$0xff]  ;;  %v148_v20 = vld [vmem:[%s6116_s0 + $0x430] sm:$0xff]  ;;  %v405_v21 = vld [vmem:[%s6115_s1 + $0x438] sm:$0xff] }
  0x4e   :  { %2663 = vmatprep.subr.mxu0 %v351_v22  ;;  %2718 = vmatpush3.msra.mxu1 %v368_v23  ;;  %v453_v22 = vld [vmem:[%s6115_s1 + $0x5b8] sm:$0xff]  ;;  %v420_v23 = vld [vmem:[%s6115_s1 + $0x4b0] sm:$0xff] }
  0x4f   :  { %1035 = vmatmul.mubr.f32.gmra.mxu1 %v240_v24  ;;  %2664 = vmatpush3.msra.mxu0 %v335_v25  ;;  %v437_v24 = vld [vmem:[%s6115_s1 + $0x538] sm:$0xff]  ;;  %v179_v25 = vld [vmem:[%s6116_s0 + $0x528] sm:$0xff] }
  0x50   :  { %2719 = vmatprep.subr.mxu1 %v383_v26  ;;  %2665 = vmatprep.subr.mxu0 %v350_v27  ;;  %v404_v26 = vld [vmem:[%s6115_s1 + $0x430] sm:$0xff] }
  0x51   :  { %2720 = vmatpush3.msra.mxu1 %v367_v28  ;;  %2666 = vmatpush3.msra.mxu0 %v334_v29  ;;  %v452_v27 = vld [vmem:[%s6115_s1 + $0x5b0] sm:$0xff]  ;;  %v178_v28 = vld [vmem:[%s6116_s0 + $0x520] sm:$0xff]  ;;  %v181_v29 = vld [vmem:[%s6116_s0 + $0x538] sm:$0xff] }
  0x52   :  { %1104 = vmatprep.mubr.f32.mxu0 %v19_v30  ;;  %2721 = vmatprep.subr.mxu1 %v382_v31  ;;  %v419_v30 = vld [vmem:[%s6115_s1 + $0x4a8] sm:$0xff]  ;;  %v436_v31 = vld [vmem:[%s6115_s1 + $0x530] sm:$0xff] }
  0x53   :  { %1105 = vmatmul.mubr.f32.vlgmr.msra.gmra.mxu0 %v18_v32  ;;  %2722 = vmatpush3.msra.mxu1 %v366_v33  ;;  %v180_v32 = vld [vmem:[%s6116_s0 + $0x530] sm:$0xff]  ;;  %v403_v33 = vld [vmem:[%s6115_s1 + $0x428] sm:$0xff] }
  0x54   :  { %1209 = vmatprep.mubr.f32.mxu1 %v21_v34  ;;  %2747 = vmatprep.subr.mxu0 %v429_v35  ;;  %v451_v34 = vld [vmem:[%s6115_s1 + $0x5a8] sm:$0xff]  ;;  %v418_v35 = vld [vmem:[%s6115_s1 + $0x4a0] sm:$0xff] }
  0x55   :  { %1210 = vmatmul.mubr.f32.vlgmr.msra.gmra.mxu1 %v20_v36  ;;  %2748 = vmatpush3.msra.mxu0 %v413_v37  ;;  %v435_v36 = vld [vmem:[%s6115_s1 + $0x528] sm:$0xff] }
  0x56   :  { %2803 = vmatprep.subr.mxu1 %v461_v38  ;;  %2749 = vmatprep.subr.mxu0 %v428_v39  ;;  %v211_v37 = vld [vmem:[%s6116_s0 + $0x628] sm:$0xff]  ;;  %v402_v38 = vld [vmem:[%s6115_s1 + $0x420] sm:$0xff] }
  0x57   :  { %2804 = vmatpush3.msra.mxu1 %v445_v40  ;;  %1109 = vmatprep.mubr.f32.mxu0 %v51_v41  ;;  %v450_v39 = vld [vmem:[%s6115_s1 + $0x5a0] sm:$0xff]  ;;  %v213_v41 = vld [vmem:[%s6116_s0 + $0x638] sm:$0xff] }
  0x58   :  { %2750 = vmatpush3.msra.mxu0 %v412_v42  ;;  %2805 = vmatprep.subr.mxu1 %v460_v43  ;;  %v210_v40 = vld [vmem:[%s6116_s0 + $0x620] sm:$0xff]  ;;  %v417_v42 = vld [vmem:[%s6115_s1 + $0x498] sm:$0xff] }
  0x59   :  { %1110 = vmatmul.mubr.f32.gmra.mxu0 %v50_v44  ;;  %1214 = vmatprep.mubr.f32.mxu1 %v53_v45  ;;  %v434_v43 = vld [vmem:[%s6115_s1 + $0x520] sm:$0xff]  ;;  %v212_v44 = vld [vmem:[%s6116_s0 + $0x630] sm:$0xff]  ;;  %v401_v45 = vld [vmem:[%s6115_s1 + $0x418] sm:$0xff] }
  0x5a   :  { %2751 = vmatprep.subr.mxu0 %v427_v46  ;;  %2806 = vmatpush3.msra.mxu1 %v444_v47  ;;  %v449_v46 = vld [vmem:[%s6115_s1 + $0x598] sm:$0xff]  ;;  %v416_v47 = vld [vmem:[%s6115_s1 + $0x490] sm:$0xff] }
  0x5b   :  { %1215 = vmatmul.mubr.f32.gmra.mxu1 %v52_v48  ;;  %2752 = vmatpush3.msra.mxu0 %v411_v49  ;;  %v433_v48 = vld [vmem:[%s6115_s1 + $0x518] sm:$0xff]  ;;  %v243_v49 = vld [vmem:[%s6116_s0 + $0x728] sm:$0xff] }
  0x5c   :  { %2807 = vmatprep.subr.mxu1 %v459_v50  ;;  %2753 = vmatprep.subr.mxu0 %v426_v51  ;;  %v400_v50 = vld [vmem:[%s6115_s1 + $0x410] sm:$0xff] }
  0x5d   :  { %2808 = vmatpush3.msra.mxu1 %v443_v52  ;;  %1114 = vmatprep.mubr.f32.mxu0 %v83_v53  ;;  %v448_v51 = vld [vmem:[%s6115_s1 + $0x590] sm:$0xff]  ;;  %v242_v52 = vld [vmem:[%s6116_s0 + $0x720] sm:$0xff]  ;;  %v245_v53 = vld [vmem:[%s6116_s0 + $0x738] sm:$0xff] }
  0x5e   :  { %2754 = vmatpush3.msra.mxu0 %v410_v54  ;;  %2809 = vmatprep.subr.mxu1 %v458_v55  ;;  %v415_v54 = vld [vmem:[%s6115_s1 + $0x488] sm:$0xff]  ;;  %v432_v55 = vld [vmem:[%s6115_s1 + $0x510] sm:$0xff] }
  0x5f   :  { %1115 = vmatmul.mubr.f32.gmra.mxu0 %v82_v56  ;;  %1219 = vmatprep.mubr.f32.mxu1 %v85_v57  ;;  %v244_v56 = vld [vmem:[%s6116_s0 + $0x730] sm:$0xff]  ;;  %v399_v57 = vld [vmem:[%s6115_s1 + $0x408] sm:$0xff] }
  0x60   :  { %2755 = vmatprep.subr.mxu0 %v425_v58  ;;  %2810 = vmatpush3.msra.mxu1 %v442_v59  ;;  %v447_v58 = vld [vmem:[%s6115_s1 + $0x588] sm:$0xff]  ;;  %v414_v59 = vld [vmem:[%s6115_s1 + $0x480] sm:$0xff] }
  0x61   :  { %1220 = vmatmul.mubr.f32.gmra.mxu1 %v84_v60  ;;  %2756 = vmatpush3.msra.mxu0 %v409_v61  ;;  %v431_v60 = vld [vmem:[%s6115_s1 + $0x508] sm:$0xff]  ;;  %v398_v61 = vld [vmem:[%s6115_s1 + $0x400] sm:$0xff] }
  0x62   :  { %2811 = vmatprep.subr.mxu1 %v457_v62  ;;  %2757 = vmatprep.subr.mxu0 %v424_v63  ;;  %v23_v62 = vld [vmem:[%s6116_s0 + $0x48] sm:$0xff]  ;;  %v446_v63 = vld [vmem:[%s6115_s1 + $0x580] sm:$0xff] }
  0x63   :  { %2812 = vmatpush3.msra.mxu1 %v441_v0  ;;  %1119 = vmatprep.mubr.f32.mxu0 %v115_v1  ;;  %v22_v0 = vld [vmem:[%s6116_s0 + $0x40] sm:$0xff] }
  0x64   :  { %2758 = vmatpush3.msra.mxu0 %v408_v2  ;;  %2813 = vmatprep.subr.mxu1 %v456_v3  ;;  %v430_v1 = vld [vmem:[%s6115_s1 + $0x500] sm:$0xff]  ;;  %v25_v2 = vld [vmem:[%s6116_s0 + $0x58] sm:$0xff] }
  0x65   :  { %1120 = vmatmul.mubr.f32.gmra.mxu0 %v114_v4  ;;  %1224 = vmatprep.mubr.f32.mxu1 %v117_v5  ;;  %v493_v3 = vld [vmem:[%s6115_s1 + $0x6f8] sm:$0xff]  ;;  %v24_v4 = vld [vmem:[%s6116_s0 + $0x50] sm:$0xff] }
  0x66   :  { %2759 = vmatprep.subr.mxu0 %v423_v6  ;;  %2814 = vmatpush3.msra.mxu1 %v440_v7  ;;  %v477_v5 = vld [vmem:[%s6115_s1 + $0x678] sm:$0xff]  ;;  %v492_v7 = vld [vmem:[%s6115_s1 + $0x6f0] sm:$0xff] }
  0x67   :  { %1225 = vmatmul.mubr.f32.gmra.mxu1 %v116_v8  ;;  %2760 = vmatpush3.msra.mxu0 %v407_v9  ;;  %v525_v6 = vld [vmem:[%s6115_s1 + $0x7f8] sm:$0xff]  ;;  %v55_v9 = vld [vmem:[%s6116_s0 + $0x148] sm:$0xff] }
  0x68   :  { %2815 = vmatprep.subr.mxu1 %v455_v10  ;;  %2761 = vmatprep.subr.mxu0 %v422_v11  ;;  %v509_v8 = vld [vmem:[%s6115_s1 + $0x778] sm:$0xff]  ;;  %v476_v10 = vld [vmem:[%s6115_s1 + $0x670] sm:$0xff] }
  0x69   :  { %2816 = vmatpush3.msra.mxu1 %v439_v12  ;;  %1124 = vmatprep.mubr.f32.mxu0 %v147_v13  ;;  %v524_v11 = vld [vmem:[%s6115_s1 + $0x7f0] sm:$0xff]  ;;  %v54_v12 = vld [vmem:[%s6116_s0 + $0x140] sm:$0xff]  ;;  %v57_v13 = vld [vmem:[%s6116_s0 + $0x158] sm:$0xff] }
  0x6a   :  { %2762 = vmatpush3.msra.mxu0 %v406_v14  ;;  %2817 = vmatprep.subr.mxu1 %v454_v15  ;;  %v491_v14 = vld [vmem:[%s6115_s1 + $0x6e8] sm:$0xff]  ;;  %v508_v15 = vld [vmem:[%s6115_s1 + $0x770] sm:$0xff] }
  0x6b   :  { %1125 = vmatmul.mubr.f32.gmra.mxu0 %v146_v16  ;;  %1229 = vmatprep.mubr.f32.mxu1 %v149_v17  ;;  %v56_v16 = vld [vmem:[%s6116_s0 + $0x150] sm:$0xff]  ;;  %v475_v17 = vld [vmem:[%s6115_s1 + $0x668] sm:$0xff] }
  0x6c   :  { %2763 = vmatprep.subr.mxu0 %v421_v18  ;;  %2818 = vmatpush3.msra.mxu1 %v438_v19  ;;  %v523_v18 = vld [vmem:[%s6115_s1 + $0x7e8] sm:$0xff]  ;;  %v490_v19 = vld [vmem:[%s6115_s1 + $0x6e0] sm:$0xff] }
  0x6d   :  { %1230 = vmatmul.mubr.f32.gmra.mxu1 %v148_v20  ;;  %2764 = vmatpush3.msra.mxu0 %v405_v21  ;;  %v507_v20 = vld [vmem:[%s6115_s1 + $0x768] sm:$0xff] }
  0x6e   :  { %2819 = vmatprep.subr.mxu1 %v453_v22  ;;  %2765 = vmatprep.subr.mxu0 %v420_v23  ;;  %v87_v21 = vld [vmem:[%s6116_s0 + $0x248] sm:$0xff]  ;;  %v474_v22 = vld [vmem:[%s6115_s1 + $0x660] sm:$0xff] }
  0x6f   :  { %2820 = vmatpush3.msra.mxu1 %v437_v24  ;;  %1129 = vmatprep.mubr.f32.mxu0 %v179_v25  ;;  %v522_v23 = vld [vmem:[%s6115_s1 + $0x7e0] sm:$0xff]  ;;  %v89_v25 = vld [vmem:[%s6116_s0 + $0x258] sm:$0xff] }
  0x70   :  { %2766 = vmatpush3.msra.mxu0 %v404_v26  ;;  %2821 = vmatprep.subr.mxu1 %v452_v27  ;;  %v86_v24 = vld [vmem:[%s6116_s0 + $0x240] sm:$0xff]  ;;  %v489_v26 = vld [vmem:[%s6115_s1 + $0x6d8] sm:$0xff] }
  0x71   :  { %1130 = vmatmul.mubr.f32.gmra.mxu0 %v178_v28  ;;  %1234 = vmatprep.mubr.f32.mxu1 %v181_v29  ;;  %v506_v27 = vld [vmem:[%s6115_s1 + $0x760] sm:$0xff]  ;;  %v3422_v29 = vmov 0  }
  0x72   :  { %2767 = vmatprep.subr.mxu0 %v419_v30  ;;  %2822 = vmatpush3.msra.mxu1 %v436_v31  ;;  %v782_v28 = vld [vmem:[%s6117_s2] sm:$0xff]  ;;  %v88_v30 = vld [vmem:[%s6116_s0 + $0x250] sm:$0xff]  ;;  %v473_v31 = vld [vmem:[%s6115_s1 + $0x658] sm:$0xff] }
  0x73   :  { %1235 = vmatmul.mubr.f32.gmra.mxu1 %v180_v32  ;;  %2768 = vmatpush3.msra.mxu0 %v403_v33  ;;  %v521_v32 = vld [vmem:[%s6115_s1 + $0x7d8] sm:$0xff]  ;;  %v488_v33 = vld [vmem:[%s6115_s1 + $0x6d0] sm:$0xff] }
  0x74   :  { %2823 = vmatprep.subr.mxu1 %v451_v34  ;;  %2769 = vmatprep.subr.mxu0 %v418_v35  ;;  %v505_v34 = vld [vmem:[%s6115_s1 + $0x758] sm:$0xff]  ;;  %v119_v35 = vld [vmem:[%s6116_s0 + $0x348] sm:$0xff] }
  0x75   :  { %2824 = vmatpush3.msra.mxu1 %v435_v36  ;;  %1134 = vmatprep.mubr.f32.mxu0 %v211_v37  ;;  %v472_v36 = vld [vmem:[%s6115_s1 + $0x650] sm:$0xff] }
  0x76   :  { %2770 = vmatpush3.msra.mxu0 %v402_v38  ;;  %2825 = vmatprep.subr.mxu1 %v450_v39  ;;  %v520_v37 = vld [vmem:[%s6115_s1 + $0x7d0] sm:$0xff]  ;;  %v118_v38 = vld [vmem:[%s6116_s0 + $0x340] sm:$0xff]  ;;  %v121_v39 = vld [vmem:[%s6116_s0 + $0x358] sm:$0xff] }
  0x77   :  { %1135 = vmatmul.mubr.f32.gmra.mxu0 %v210_v40  ;;  %1239 = vmatprep.mubr.f32.mxu1 %v213_v41  ;;  %v487_v40 = vld [vmem:[%s6115_s1 + $0x6c8] sm:$0xff]  ;;  %v504_v41 = vld [vmem:[%s6115_s1 + $0x750] sm:$0xff] }
  0x78   :  { %2771 = vmatprep.subr.mxu0 %v417_v42  ;;  %2826 = vmatpush3.msra.mxu1 %v434_v43  ;;  %v783_v42 = vld [vmem:[%s6117_s2 + $0x8] sm:$0xff]  ;;  %v120_v43 = vld [vmem:[%s6116_s0 + $0x350] sm:$0xff] }
  0x79   :  { %1240 = vmatmul.mubr.f32.gmra.mxu1 %v212_v44  ;;  %2772 = vmatpush3.msra.mxu0 %v401_v45  ;;  %v471_v44 = vld [vmem:[%s6115_s1 + $0x648] sm:$0xff] }
  0x7a   :  { %2827 = vmatprep.subr.mxu1 %v449_v46  ;;  %2773 = vmatprep.subr.mxu0 %v416_v47  ;;  %v519_v45 = vld [vmem:[%s6115_s1 + $0x7c8] sm:$0xff]  ;;  %v486_v46 = vld [vmem:[%s6115_s1 + $0x6c0] sm:$0xff] }
  0x7b   :  { %2828 = vmatpush3.msra.mxu1 %v433_v48  ;;  %1139 = vmatprep.mubr.f32.mxu0 %v243_v49  ;;  %v503_v47 = vld [vmem:[%s6115_s1 + $0x748] sm:$0xff]  ;;  %v470_v49 = vld [vmem:[%s6115_s1 + $0x640] sm:$0xff] }
  0x7c   :  { %2774 = vmatpush3.msra.mxu0 %v400_v50  ;;  %2829 = vmatprep.subr.mxu1 %v448_v51  ;;  %v151_v48 = vld [vmem:[%s6116_s0 + $0x448] sm:$0xff]  ;;  %v518_v50 = vld [vmem:[%s6115_s1 + $0x7c0] sm:$0xff] }
  0x7d   :  { %1140 = vmatmul.mubr.f32.gmra.mxu0 %v242_v52  ;;  %1244 = vmatprep.mubr.f32.mxu1 %v245_v53  ;;  %v150_v51 = vld [vmem:[%s6116_s0 + $0x440] sm:$0xff]  ;;  %v153_v52 = vld [vmem:[%s6116_s0 + $0x458] sm:$0xff] }
  0x7e   :  { %2775 = vmatprep.subr.mxu0 %v415_v54  ;;  %2830 = vmatpush3.msra.mxu1 %v432_v55  ;;  %v485_v53 = vld [vmem:[%s6115_s1 + $0x6b8] sm:$0xff]  ;;  %v502_v54 = vld [vmem:[%s6115_s1 + $0x740] sm:$0xff]  ;;  %v784_v55 = vld [vmem:[%s6117_s2 + $0x10] sm:$0xff] }
  0x7f   :  { %1245 = vmatmul.mubr.f32.gmra.mxu1 %v244_v56  ;;  %2776 = vmatpush3.msra.mxu0 %v399_v57  ;;  %v152_v56 = vld [vmem:[%s6116_s0 + $0x450] sm:$0xff]  ;;  %v469_v57 = vld [vmem:[%s6115_s1 + $0x638] sm:$0xff] }
  0x80   :  { %2831 = vmatprep.subr.mxu1 %v447_v58  ;;  %2777 = vmatprep.subr.mxu0 %v414_v59  ;;  %v517_v58 = vld [vmem:[%s6115_s1 + $0x7b8] sm:$0xff]  ;;  %v484_v59 = vld [vmem:[%s6115_s1 + $0x6b0] sm:$0xff] }
  0x81   :  { %2832 = vmatpush3.msra.mxu1 %v431_v60  ;;  %2778 = vmatpush3.msra.mxu0 %v398_v61  ;;  %v501_v60 = vld [vmem:[%s6115_s1 + $0x738] sm:$0xff]  ;;  %v183_v61 = vld [vmem:[%s6116_s0 + $0x548] sm:$0xff] }
  0x82   :  { %1314 = vmatprep.mubr.f32.mxu0 %v23_v62  ;;  %2833 = vmatprep.subr.mxu1 %v446_v63  ;;  %v468_v62 = vld [vmem:[%s6115_s1 + $0x630] sm:$0xff] }
  0x83   :  { %1315 = vmatmul.mubr.f32.vlgmr.msra.gmra.mxu0 %v22_v0  ;;  %2834 = vmatpush3.msra.mxu1 %v430_v1  ;;  %v516_v63 = vld [vmem:[%s6115_s1 + $0x7b0] sm:$0xff]  ;;  %v182_v0 = vld [vmem:[%s6116_s0 + $0x540] sm:$0xff]  ;;  %v185_v1 = vld [vmem:[%s6116_s0 + $0x558] sm:$0xff] }
  0x84   :  { %1419 = vmatprep.mubr.f32.mxu1 %v25_v2  ;;  %2859 = vmatprep.subr.mxu0 %v493_v3  ;;  %v483_v2 = vld [vmem:[%s6115_s1 + $0x6a8] sm:$0xff]  ;;  %v500_v3 = vld [vmem:[%s6115_s1 + $0x730] sm:$0xff] }
  0x85   :  { %1420 = vmatmul.mubr.f32.vlgmr.msra.gmra.mxu1 %v24_v4  ;;  %2860 = vmatpush3.msra.mxu0 %v477_v5  ;;  %v785_v4 = vld [vmem:[%s6117_s2 + $0x18] sm:$0xff]  ;;  %v184_v5 = vld [vmem:[%s6116_s0 + $0x550] sm:$0xff] }
  0x86   :  { %2915 = vmatprep.subr.mxu1 %v525_v6  ;;  %2861 = vmatprep.subr.mxu0 %v492_v7  ;;  %v467_v6 = vld [vmem:[%s6115_s1 + $0x628] sm:$0xff] }
  0x87   :  { %2916 = vmatpush3.msra.mxu1 %v509_v8  ;;  %1319 = vmatprep.mubr.f32.mxu0 %v55_v9  ;;  %v515_v7 = vld [vmem:[%s6115_s1 + $0x7a8] sm:$0xff]  ;;  %v482_v8 = vld [vmem:[%s6115_s1 + $0x6a0] sm:$0xff] }
  0x88   :  { %2862 = vmatpush3.msra.mxu0 %v476_v10  ;;  %2917 = vmatprep.subr.mxu1 %v524_v11  ;;  %v499_v9 = vld [vmem:[%s6115_s1 + $0x728] sm:$0xff]  ;;  %v466_v11 = vld [vmem:[%s6115_s1 + $0x620] sm:$0xff] }
  0x89   :  { %1320 = vmatmul.mubr.f32.gmra.mxu0 %v54_v12  ;;  %1424 = vmatprep.mubr.f32.mxu1 %v57_v13  ;;  %v215_v10 = vld [vmem:[%s6116_s0 + $0x648] sm:$0xff]  ;;  %v514_v12 = vld [vmem:[%s6115_s1 + $0x7a0] sm:$0xff] }
  0x8a   :  { %2863 = vmatprep.subr.mxu0 %v491_v14  ;;  %2918 = vmatpush3.msra.mxu1 %v508_v15  ;;  %v214_v13 = vld [vmem:[%s6116_s0 + $0x640] sm:$0xff]  ;;  %v217_v14 = vld [vmem:[%s6116_s0 + $0x658] sm:$0xff] }
  0x8b   :  { %1425 = vmatmul.mubr.f32.gmra.mxu1 %v56_v16  ;;  %2864 = vmatpush3.msra.mxu0 %v475_v17  ;;  %v481_v15 = vld [vmem:[%s6115_s1 + $0x698] sm:$0xff]  ;;  %v498_v16 = vld [vmem:[%s6115_s1 + $0x720] sm:$0xff] }
  0x8c   :  { %2919 = vmatprep.subr.mxu1 %v523_v18  ;;  %2865 = vmatprep.subr.mxu0 %v490_v19  ;;  %v786_v17 = vld [vmem:[%s6117_s2 + $0x20] sm:$0xff]  ;;  %v216_v18 = vld [vmem:[%s6116_s0 + $0x650] sm:$0xff]  ;;  %v465_v19 = vld [vmem:[%s6115_s1 + $0x618] sm:$0xff] }
  0x8d   :  { %2920 = vmatpush3.msra.mxu1 %v507_v20  ;;  %1324 = vmatprep.mubr.f32.mxu0 %v87_v21  ;;  %v513_v20 = vld [vmem:[%s6115_s1 + $0x798] sm:$0xff]  ;;  %v480_v21 = vld [vmem:[%s6115_s1 + $0x690] sm:$0xff] }
  0x8e   :  { %2866 = vmatpush3.msra.mxu0 %v474_v22  ;;  %2921 = vmatprep.subr.mxu1 %v522_v23  ;;  %v497_v22 = vld [vmem:[%s6115_s1 + $0x718] sm:$0xff]  ;;  %v247_v23 = vld [vmem:[%s6116_s0 + $0x748] sm:$0xff] }
  0x8f   :  { %3420 = vset.pattern.permute.xlu0 %v3422_v29  ;;  %1325 = vmatmul.mubr.f32.gmra.mxu0 %v86_v24  ;;  %v464_v24 = vld [vmem:[%s6115_s1 + $0x610] sm:$0xff] }
  0x90   :  { %1429 = vmatprep.mubr.f32.mxu1 %v89_v25  ;;  %2867 = vmatprep.subr.mxu0 %v489_v26  ;;  %v512_v25 = vld [vmem:[%s6115_s1 + $0x790] sm:$0xff]  ;;  %v246_v26 = vld [vmem:[%s6116_s0 + $0x740] sm:$0xff] }
  0x91   :  { %2922 = vmatpush3.msra.mxu1 %v506_v27  ;;  %792 = vperm.xlu0 %3420, %v782_v28   ;;  %v249_v27 = vld [vmem:[%s6116_s0 + $0x758] sm:$0xff]  ;;  %v479_v28 = vld [vmem:[%s6115_s1 + $0x688] sm:$0xff] }
  0x92   :  { %1430 = vmatmul.mubr.f32.gmra.mxu1 %v88_v30  ;;  %2868 = vmatpush3.msra.mxu0 %v473_v31  ;;  %v787_v30 = vld [vmem:[%s6117_s2 + $0x28] sm:$0xff]  ;;  %v248_v31 = vld [vmem:[%s6116_s0 + $0x750] sm:$0xff] }
  0x93   :  { %2923 = vmatprep.subr.mxu1 %v521_v32  ;;  %2869 = vmatprep.subr.mxu0 %v488_v33  ;;  %v463_v32 = vld [vmem:[%s6115_s1 + $0x608] sm:$0xff] }
  0x94   :  { %2924 = vmatpush3.msra.mxu1 %v505_v34  ;;  %1329 = vmatprep.mubr.f32.mxu0 %v119_v35  ;;  %v511_v33 = vld [vmem:[%s6115_s1 + $0x788] sm:$0xff]  ;;  %v478_v34 = vld [vmem:[%s6115_s1 + $0x680] sm:$0xff] }
  0x95   :  { %2870 = vmatpush3.msra.mxu0 %v472_v36  ;;  %2925 = vmatprep.subr.mxu1 %v520_v37  ;;  %v495_v35 = vld [vmem:[%s6115_s1 + $0x708] sm:$0xff]  ;;  %v462_v36 = vld [vmem:[%s6115_s1 + $0x600] sm:$0xff] }
  0x96   :  { %1330 = vmatmul.mubr.f32.gmra.mxu0 %v118_v38  ;;  %1434 = vmatprep.mubr.f32.mxu1 %v121_v39  ;;  %v27_v37 = vld [vmem:[%s6116_s0 + $0x68] sm:$0xff]  ;;  %v510_v38 = vld [vmem:[%s6115_s1 + $0x780] sm:$0xff] }
  0x97   :  { %2871 = vmatprep.subr.mxu0 %v487_v40  ;;  %2926 = vmatpush3.msra.mxu1 %v504_v41  ;;  %v26_v39 = vld [vmem:[%s6116_s0 + $0x60] sm:$0xff]  ;;  %v29_v41 = vld [vmem:[%s6116_s0 + $0x78] sm:$0xff] }
  0x98   :  { %797 = vperm.xlu0 %3420, %v783_v42   ;;  %1435 = vmatmul.mubr.f32.gmra.mxu1 %v120_v43  ;;  %v494_v40 = vld [vmem:[%s6115_s1 + $0x700] sm:$0xff]  ;;  %v557_v42 = vld [vmem:[%s6115_s1 + $0x8f8] sm:$0xff]  ;;  %v788_v43 = vld [vmem:[%s6117_s2 + $0x30] sm:$0xff] }
  0x99   :  { %2872 = vmatpush3.msra.mxu0 %v471_v44  ;;  %2927 = vmatprep.subr.mxu1 %v519_v45  ;;  %v28_v44 = vld [vmem:[%s6116_s0 + $0x70] sm:$0xff]  ;;  %v541_v45 = vld [vmem:[%s6115_s1 + $0x878] sm:$0xff] }
  0x9a   :  { %2873 = vmatprep.subr.mxu0 %v486_v46  ;;  %2928 = vmatpush3.msra.mxu1 %v503_v47  ;;  %v589_v46 = vld [vmem:[%s6115_s1 + $0x9f8] sm:$0xff]  ;;  %v556_v47 = vld [vmem:[%s6115_s1 + $0x8f0] sm:$0xff] }
  0x9b   :  { %1334 = vmatprep.mubr.f32.mxu0 %v151_v48  ;;  %2874 = vmatpush3.msra.mxu0 %v470_v49  ;;  %v573_v48 = vld [vmem:[%s6115_s1 + $0x978] sm:$0xff]  ;;  %v59_v49 = vld [vmem:[%s6116_s0 + $0x168] sm:$0xff] }
  0x9c   :  { %2929 = vmatprep.subr.mxu1 %v518_v50  ;;  %3421 = vset.pattern.permute.xlu1 %v3422_v29  ;;  %v496_v29 = vld [vmem:[%s6115_s1 + $0x710] sm:$0xff] }
  0x9d   :  { %1335 = vmatmul.mubr.f32.gmra.mxu0 %v150_v51  ;;  %1439 = vmatprep.mubr.f32.mxu1 %v153_v52  ;;  %v540_v50 = vld [vmem:[%s6115_s1 + $0x870] sm:$0xff]  ;;  %v58_v52 = vld [vmem:[%s6116_s0 + $0x160] sm:$0xff] }
  0x9e   :  { %2875 = vmatprep.subr.mxu0 %v485_v53  ;;  %2930 = vmatpush3.msra.mxu1 %v502_v54  ;;  %v588_v51 = vld [vmem:[%s6115_s1 + $0x9f0] sm:$0xff]  ;;  %v61_v53 = vld [vmem:[%s6116_s0 + $0x178] sm:$0xff]  ;;  %v555_v54 = vld [vmem:[%s6115_s1 + $0x8e8] sm:$0xff] }
  0x9f   :  { %802 = vperm.xlu1 %3421, %v784_v55   ;;  %1440 = vmatmul.mubr.f32.gmra.mxu1 %v152_v56  ;;  %v572_v55 = vld [vmem:[%s6115_s1 + $0x970] sm:$0xff]  ;;  %v789_v56 = vld [vmem:[%s6117_s2 + $0x38] sm:$0xff] }
  0xa0   :  { %2876 = vmatpush3.msra.mxu0 %v469_v57  ;;  %2931 = vmatprep.subr.mxu1 %v517_v58  ;;  %v60_v57 = vld [vmem:[%s6116_s0 + $0x170] sm:$0xff]  ;;  %v539_v58 = vld [vmem:[%s6115_s1 + $0x868] sm:$0xff] }
  0xa1   :  { %2877 = vmatprep.subr.mxu0 %v484_v59  ;;  %2932 = vmatpush3.msra.mxu1 %v501_v60  ;;  %v587_v59 = vld [vmem:[%s6115_s1 + $0x9e8] sm:$0xff]  ;;  %v554_v60 = vld [vmem:[%s6115_s1 + $0x8e0] sm:$0xff] }
  0xa2   :  { %1339 = vmatprep.mubr.f32.mxu0 %v183_v61  ;;  %2878 = vmatpush3.msra.mxu0 %v468_v62  ;;  %v571_v61 = vld [vmem:[%s6115_s1 + $0x968] sm:$0xff] }
  0xa3   :  { %2933 = vmatprep.subr.mxu1 %v516_v63  ;;  %1340 = vmatmul.mubr.f32.gmra.mxu0 %v182_v0  ;;  %v91_v62 = vld [vmem:[%s6116_s0 + $0x268] sm:$0xff]  ;;  %v538_v63 = vld [vmem:[%s6115_s1 + $0x860] sm:$0xff] }
  0xa4   :  { %1444 = vmatprep.mubr.f32.mxu1 %v185_v1  ;;  %2879 = vmatprep.subr.mxu0 %v483_v2  ;;  %v586_v0 = vld [vmem:[%s6115_s1 + $0x9e0] sm:$0xff]  ;;  %v93_v2 = vld [vmem:[%s6116_s0 + $0x278] sm:$0xff] }
  0xa5   :  { %2934 = vmatpush3.msra.mxu1 %v500_v3  ;;  %807 = vperm.xlu1 %3421, %v785_v4   ;;  %v90_v1 = vld [vmem:[%s6116_s0 + $0x260] sm:$0xff]  ;;  %v553_v3 = vld [vmem:[%s6115_s1 + $0x8d8] sm:$0xff] }
  0xa6   :  { %1445 = vmatmul.mubr.f32.gmra.mxu1 %v184_v5  ;;  %2880 = vmatpush3.msra.mxu0 %v467_v6  ;;  %v570_v4 = vld [vmem:[%s6115_s1 + $0x960] sm:$0xff]  ;;  %v92_v5 = vld [vmem:[%s6116_s0 + $0x270] sm:$0xff]  ;;  %v537_v6 = vld [vmem:[%s6115_s1 + $0x858] sm:$0xff] }
  0xa7   :  { %2935 = vmatprep.subr.mxu1 %v515_v7  ;;  %2881 = vmatprep.subr.mxu0 %v482_v8  ;;  %v585_v7 = vld [vmem:[%s6115_s1 + $0x9d8] sm:$0xff]  ;;  %v552_v8 = vld [vmem:[%s6115_s1 + $0x8d0] sm:$0xff] }
  0xa8   :  { %2936 = vmatpush3.msra.mxu1 %v499_v9  ;;  %1344 = vmatprep.mubr.f32.mxu0 %v215_v10  ;;  %v569_v9 = vld [vmem:[%s6115_s1 + $0x958] sm:$0xff]  ;;  %v123_v10 = vld [vmem:[%s6116_s0 + $0x368] sm:$0xff] }
  0xa9   :  { %2882 = vmatpush3.msra.mxu0 %v466_v11  ;;  %2937 = vmatprep.subr.mxu1 %v514_v12  ;;  %v536_v11 = vld [vmem:[%s6115_s1 + $0x850] sm:$0xff] }
  0xaa   :  { %1345 = vmatmul.mubr.f32.gmra.mxu0 %v214_v13  ;;  %1449 = vmatprep.mubr.f32.mxu1 %v217_v14  ;;  %v584_v12 = vld [vmem:[%s6115_s1 + $0x9d0] sm:$0xff]  ;;  %v122_v13 = vld [vmem:[%s6116_s0 + $0x360] sm:$0xff]  ;;  %v125_v14 = vld [vmem:[%s6116_s0 + $0x378] sm:$0xff] }
  0xab   :  { %2883 = vmatprep.subr.mxu0 %v481_v15  ;;  %2938 = vmatpush3.msra.mxu1 %v498_v16  ;;  %v551_v15 = vld [vmem:[%s6115_s1 + $0x8c8] sm:$0xff]  ;;  %v568_v16 = vld [vmem:[%s6115_s1 + $0x950] sm:$0xff] }
  0xac   :  { %812 = vperm.xlu0 %3420, %v786_v17   ;;  %1450 = vmatmul.mubr.f32.gmra.mxu1 %v216_v18  ;;  %v124_v17 = vld [vmem:[%s6116_s0 + $0x370] sm:$0xff]  ;;  %v535_v18 = vld [vmem:[%s6115_s1 + $0x848] sm:$0xff] }
  0xad   :  { %2884 = vmatpush3.msra.mxu0 %v465_v19  ;;  %2939 = vmatprep.subr.mxu1 %v513_v20  ;;  %v583_v19 = vld [vmem:[%s6115_s1 + $0x9c8] sm:$0xff]  ;;  %v550_v20 = vld [vmem:[%s6115_s1 + $0x8c0] sm:$0xff] }
  0xae   :  { %2885 = vmatprep.subr.mxu0 %v480_v21  ;;  %2940 = vmatpush3.msra.mxu1 %v497_v22  ;;  %v567_v21 = vld [vmem:[%s6115_s1 + $0x948] sm:$0xff] }
  0xaf   :  { %1349 = vmatprep.mubr.f32.mxu0 %v247_v23  ;;  %2886 = vmatpush3.msra.mxu0 %v464_v24  ;;  %v155_v22 = vld [vmem:[%s6116_s0 + $0x468] sm:$0xff]  ;;  %v534_v23 = vld [vmem:[%s6115_s1 + $0x840] sm:$0xff] }
  0xb0   :  { %2941 = vmatprep.subr.mxu1 %v512_v25  ;;  %1350 = vmatmul.mubr.f32.gmra.mxu0 %v246_v26  ;;  %v582_v24 = vld [vmem:[%s6115_s1 + $0x9c0] sm:$0xff]  ;;  %v157_v26 = vld [vmem:[%s6116_s0 + $0x478] sm:$0xff] }
  0xb1   :  { %1454 = vmatprep.mubr.f32.mxu1 %v249_v27  ;;  %2887 = vmatprep.subr.mxu0 %v479_v28  ;;  %v154_v25 = vld [vmem:[%s6116_s0 + $0x460] sm:$0xff]  ;;  %v549_v27 = vld [vmem:[%s6115_s1 + $0x8b8] sm:$0xff] }
  0xb2   :  { %2942 = vmatpush3.msra.mxu1 %v496_v29  ;;  %817 = vperm.xlu1 %3421, %v787_v30   ;;  %v566_v28 = vld [vmem:[%s6115_s1 + $0x940] sm:$0xff]  ;;  %v156_v29 = vld [vmem:[%s6116_s0 + $0x470] sm:$0xff]  ;;  %v533_v30 = vld [vmem:[%s6115_s1 + $0x838] sm:$0xff] }
  0xb3   :  { %1455 = vmatmul.mubr.f32.gmra.mxu1 %v248_v31  ;;  %2888 = vmatpush3.msra.mxu0 %v463_v32  ;;  %v581_v31 = vld [vmem:[%s6115_s1 + $0x9b8] sm:$0xff]  ;;  %v548_v32 = vld [vmem:[%s6115_s1 + $0x8b0] sm:$0xff] }
  0xb4   :  { %2943 = vmatprep.subr.mxu1 %v511_v33  ;;  %2889 = vmatprep.subr.mxu0 %v478_v34  ;;  %v565_v33 = vld [vmem:[%s6115_s1 + $0x938] sm:$0xff]  ;;  %v187_v34 = vld [vmem:[%s6116_s0 + $0x568] sm:$0xff] }
  0xb5   :  { %2944 = vmatpush3.msra.mxu1 %v495_v35  ;;  %2890 = vmatpush3.msra.mxu0 %v462_v36  ;;  %v532_v35 = vld [vmem:[%s6115_s1 + $0x830] sm:$0xff] }
  0xb6   :  { %1524 = vmatprep.mubr.f32.mxu0 %v27_v37  ;;  %2945 = vmatprep.subr.mxu1 %v510_v38  ;;  %v580_v36 = vld [vmem:[%s6115_s1 + $0x9b0] sm:$0xff]  ;;  %v186_v37 = vld [vmem:[%s6116_s0 + $0x560] sm:$0xff]  ;;  %v189_v38 = vld [vmem:[%s6116_s0 + $0x578] sm:$0xff] }
  0xb7   :  { %1525 = vmatmul.mubr.f32.vlgmr.msra.gmra.mxu0 %v26_v39  ;;  %2946 = vmatpush3.msra.mxu1 %v494_v40  ;;  %v547_v39 = vld [vmem:[%s6115_s1 + $0x8a8] sm:$0xff]  ;;  %v564_v40 = vld [vmem:[%s6115_s1 + $0x930] sm:$0xff] }
  0xb8   :  { %1629 = vmatprep.mubr.f32.mxu1 %v29_v41  ;;  %2971 = vmatprep.subr.mxu0 %v557_v42  ;;  %v188_v41 = vld [vmem:[%s6116_s0 + $0x570] sm:$0xff]  ;;  %v531_v42 = vld [vmem:[%s6115_s1 + $0x828] sm:$0xff] }
  0xb9   :  { %822 = vperm.xlu0 %3420, %v788_v43   ;;  %1630 = vmatmul.mubr.f32.vlgmr.msra.gmra.mxu1 %v28_v44  ;;  %v579_v43 = vld [vmem:[%s6115_s1 + $0x9a8] sm:$0xff]  ;;  %v546_v44 = vld [vmem:[%s6115_s1 + $0x8a0] sm:$0xff] }
  0xba   :  { %2972 = vmatpush3.msra.mxu0 %v541_v45  ;;  %3027 = vmatprep.subr.mxu1 %v589_v46  ;;  %v563_v45 = vld [vmem:[%s6115_s1 + $0x928] sm:$0xff] }
  0xbb   :  { %2973 = vmatprep.subr.mxu0 %v556_v47  ;;  %3028 = vmatpush3.msra.mxu1 %v573_v48  ;;  %v219_v46 = vld [vmem:[%s6116_s0 + $0x668] sm:$0xff]  ;;  %v530_v47 = vld [vmem:[%s6115_s1 + $0x820] sm:$0xff] }
  0xbc   :  { %1529 = vmatprep.mubr.f32.mxu0 %v59_v49  ;;  %2974 = vmatpush3.msra.mxu0 %v540_v50  ;;  %v578_v48 = vld [vmem:[%s6115_s1 + $0x9a0] sm:$0xff]  ;;  %v221_v50 = vld [vmem:[%s6116_s0 + $0x678] sm:$0xff] }
  0xbd   :  { %3029 = vmatprep.subr.mxu1 %v588_v51  ;;  %1530 = vmatmul.mubr.f32.gmra.mxu0 %v58_v52  ;;  %v218_v49 = vld [vmem:[%s6116_s0 + $0x660] sm:$0xff]  ;;  %v545_v51 = vld [vmem:[%s6115_s1 + $0x898] sm:$0xff] }
  0xbe   :  { %1634 = vmatprep.mubr.f32.mxu1 %v61_v53  ;;  %2975 = vmatprep.subr.mxu0 %v555_v54  ;;  %v562_v52 = vld [vmem:[%s6115_s1 + $0x920] sm:$0xff]  ;;  %v220_v53 = vld [vmem:[%s6116_s0 + $0x670] sm:$0xff]  ;;  %v529_v54 = vld [vmem:[%s6115_s1 + $0x818] sm:$0xff] }
  0xbf   :  { %3030 = vmatpush3.msra.mxu1 %v572_v55  ;;  %827 = vperm.xlu1 %3421, %v789_v56   ;;  %v577_v55 = vld [vmem:[%s6115_s1 + $0x998] sm:$0xff]  ;;  %v544_v56 = vld [vmem:[%s6115_s1 + $0x890] sm:$0xff] }
  0xc0   :  { %1635 = vmatmul.mubr.f32.gmra.mxu1 %v60_v57  ;;  %2976 = vmatpush3.msra.mxu0 %v539_v58  ;;  %v561_v57 = vld [vmem:[%s6115_s1 + $0x918] sm:$0xff]  ;;  %v251_v58 = vld [vmem:[%s6116_s0 + $0x768] sm:$0xff] }
  0xc1   :  { %3031 = vmatprep.subr.mxu1 %v587_v59  ;;  %2977 = vmatprep.subr.mxu0 %v554_v60  ;;  %v528_v59 = vld [vmem:[%s6115_s1 + $0x810] sm:$0xff] }
  0xc2   :  { %3032 = vmatpush3.msra.mxu1 %v571_v61  ;;  %1534 = vmatprep.mubr.f32.mxu0 %v91_v62  ;;  %v576_v60 = vld [vmem:[%s6115_s1 + $0x990] sm:$0xff]  ;;  %v250_v61 = vld [vmem:[%s6116_s0 + $0x760] sm:$0xff]  ;;  %v253_v62 = vld [vmem:[%s6116_s0 + $0x778] sm:$0xff] }
  0xc3   :  { %2978 = vmatpush3.msra.mxu0 %v538_v63  ;;  %3033 = vmatprep.subr.mxu1 %v586_v0  ;;  %v543_v63 = vld [vmem:[%s6115_s1 + $0x888] sm:$0xff]  ;;  %v560_v0 = vld [vmem:[%s6115_s1 + $0x910] sm:$0xff] }
  0xc4   :  { %1535 = vmatmul.mubr.f32.gmra.mxu0 %v90_v1  ;;  %1639 = vmatprep.mubr.f32.mxu1 %v93_v2  ;;  %v252_v1 = vld [vmem:[%s6116_s0 + $0x770] sm:$0xff]  ;;  %v527_v2 = vld [vmem:[%s6115_s1 + $0x808] sm:$0xff] }
  0xc5   :  { %2979 = vmatprep.subr.mxu0 %v553_v3  ;;  %3034 = vmatpush3.msra.mxu1 %v570_v4  ;;  %v575_v3 = vld [vmem:[%s6115_s1 + $0x988] sm:$0xff]  ;;  %v542_v4 = vld [vmem:[%s6115_s1 + $0x880] sm:$0xff] }
  0xc6   :  { %1640 = vmatmul.mubr.f32.gmra.mxu1 %v92_v5  ;;  %2980 = vmatpush3.msra.mxu0 %v537_v6  ;;  %v559_v5 = vld [vmem:[%s6115_s1 + $0x908] sm:$0xff]  ;;  %v526_v6 = vld [vmem:[%s6115_s1 + $0x800] sm:$0xff] }
  0xc7   :  { %3035 = vmatprep.subr.mxu1 %v585_v7  ;;  %2981 = vmatprep.subr.mxu0 %v552_v8  ;;  %v31_v8 = vld [vmem:[%s6116_s0 + $0x88] sm:$0xff] }
  0xc8   :  { %3036 = vmatpush3.msra.mxu1 %v569_v9  ;;  %1539 = vmatprep.mubr.f32.mxu0 %v123_v10  ;;  %v574_v9 = vld [vmem:[%s6115_s1 + $0x980] sm:$0xff] }
  0xc9   :  { %2982 = vmatpush3.msra.mxu0 %v536_v11  ;;  %3037 = vmatprep.subr.mxu1 %v584_v12  ;;  %v30_v10 = vld [vmem:[%s6116_s0 + $0x80] sm:$0xff] }
  0xca   :  { %1540 = vmatmul.mubr.f32.gmra.mxu0 %v122_v13  ;;  %1644 = vmatprep.mubr.f32.mxu1 %v125_v14  ;;  %v558_v11 = vld [vmem:[%s6115_s1 + $0x900] sm:$0xff]  ;;  %v33_v14 = vld [vmem:[%s6116_s0 + $0x98] sm:$0xff] }
  0xcb   :  { %2983 = vmatprep.subr.mxu0 %v551_v15  ;;  %3038 = vmatpush3.msra.mxu1 %v568_v16  ;;  %v621_v15 = vld [vmem:[%s6115_s1 + $0xaf8] sm:$0xff]  ;;  %v32_v16 = vld [vmem:[%s6116_s0 + $0x90] sm:$0xff] }
  0xcc   :  { %1645 = vmatmul.mubr.f32.gmra.mxu1 %v124_v17  ;;  %2984 = vmatpush3.msra.mxu0 %v535_v18  ;;  %v605_v17 = vld [vmem:[%s6115_s1 + $0xa78] sm:$0xff] }
  0xcd   :  { %3039 = vmatprep.subr.mxu1 %v583_v19  ;;  %2985 = vmatprep.subr.mxu0 %v550_v20  ;;  %v653_v19 = vld [vmem:[%s6115_s1 + $0xbf8] sm:$0xff]  ;;  %v620_v20 = vld [vmem:[%s6115_s1 + $0xaf0] sm:$0xff] }
  0xce   :  { %3040 = vmatpush3.msra.mxu1 %v567_v21  ;;  %1544 = vmatprep.mubr.f32.mxu0 %v155_v22  ;;  %v637_v21 = vld [vmem:[%s6115_s1 + $0xb78] sm:$0xff]  ;;  %v63_v22 = vld [vmem:[%s6116_s0 + $0x188] sm:$0xff] }
  0xcf   :  { %2986 = vmatpush3.msra.mxu0 %v534_v23  ;;  %3041 = vmatprep.subr.mxu1 %v582_v24  ;;  %v604_v24 = vld [vmem:[%s6115_s1 + $0xa70] sm:$0xff] }
  0xd0   :  { %1545 = vmatmul.mubr.f32.gmra.mxu0 %v154_v25  ;;  %1649 = vmatprep.mubr.f32.mxu1 %v157_v26  ;;  %v652_v25 = vld [vmem:[%s6115_s1 + $0xbf0] sm:$0xff]  ;;  %v62_v26 = vld [vmem:[%s6116_s0 + $0x180] sm:$0xff] }
  0xd1   :  { %2987 = vmatprep.subr.mxu0 %v549_v27  ;;  %3042 = vmatpush3.msra.mxu1 %v566_v28  ;;  %v65_v27 = vld [vmem:[%s6116_s0 + $0x198] sm:$0xff] }
  0xd2   :  { %1650 = vmatmul.mubr.f32.gmra.mxu1 %v156_v29  ;;  %2988 = vmatpush3.msra.mxu0 %v533_v30  ;;  %v619_v30 = vld [vmem:[%s6115_s1 + $0xae8] sm:$0xff] }
  0xd3   :  { %3043 = vmatprep.subr.mxu1 %v581_v31  ;;  %2989 = vmatprep.subr.mxu0 %v548_v32  ;;  %v636_v31 = vld [vmem:[%s6115_s1 + $0xb70] sm:$0xff] }
  0xd4   :  { %3044 = vmatpush3.msra.mxu1 %v565_v33  ;;  %1549 = vmatprep.mubr.f32.mxu0 %v187_v34  ;;  %v64_v32 = vld [vmem:[%s6116_s0 + $0x190] sm:$0xff]  ;;  %v603_v33 = vld [vmem:[%s6115_s1 + $0xa68] sm:$0xff] }
  0xd5   :  { %2990 = vmatpush3.msra.mxu0 %v532_v35  ;;  %3045 = vmatprep.subr.mxu1 %v580_v36  ;;  %v651_v35 = vld [vmem:[%s6115_s1 + $0xbe8] sm:$0xff]  ;;  %v618_v36 = vld [vmem:[%s6115_s1 + $0xae0] sm:$0xff] }
  0xd6   :  { %1550 = vmatmul.mubr.f32.gmra.mxu0 %v186_v37  ;;  %1654 = vmatprep.mubr.f32.mxu1 %v189_v38  ;;  %v635_v37 = vld [vmem:[%s6115_s1 + $0xb68] sm:$0xff] }
  0xd7   :  { %2991 = vmatprep.subr.mxu0 %v547_v39  ;;  %3046 = vmatpush3.msra.mxu1 %v564_v40  ;;  %v95_v38 = vld [vmem:[%s6116_s0 + $0x288] sm:$0xff]  ;;  %v602_v40 = vld [vmem:[%s6115_s1 + $0xa60] sm:$0xff] }
  0xd8   :  { %1655 = vmatmul.mubr.f32.gmra.mxu1 %v188_v41  ;;  %2992 = vmatpush3.msra.mxu0 %v531_v42  ;;  %v650_v41 = vld [vmem:[%s6115_s1 + $0xbe0] sm:$0xff] }
  0xd9   :  { %3047 = vmatprep.subr.mxu1 %v579_v43  ;;  %2993 = vmatprep.subr.mxu0 %v546_v44  ;;  %v94_v42 = vld [vmem:[%s6116_s0 + $0x280] sm:$0xff]  ;;  %v97_v43 = vld [vmem:[%s6116_s0 + $0x298] sm:$0xff] }
  0xda   :  { %3048 = vmatpush3.msra.mxu1 %v563_v45  ;;  %1554 = vmatprep.mubr.f32.mxu0 %v219_v46  ;;  %v617_v46 = vld [vmem:[%s6115_s1 + $0xad8] sm:$0xff] }
  0xdb   :  { %2994 = vmatpush3.msra.mxu0 %v530_v47  ;;  %3049 = vmatprep.subr.mxu1 %v578_v48  ;;  %v634_v47 = vld [vmem:[%s6115_s1 + $0xb60] sm:$0xff]  ;;  %v96_v48 = vld [vmem:[%s6116_s0 + $0x290] sm:$0xff] }
  0xdc   :  { %1555 = vmatmul.mubr.f32.gmra.mxu0 %v218_v49  ;;  %1659 = vmatprep.mubr.f32.mxu1 %v221_v50  ;;  %v601_v49 = vld [vmem:[%s6115_s1 + $0xa58] sm:$0xff] }
  0xdd   :  { %2995 = vmatprep.subr.mxu0 %v545_v51  ;;  %3050 = vmatpush3.msra.mxu1 %v562_v52  ;;  %v649_v51 = vld [vmem:[%s6115_s1 + $0xbd8] sm:$0xff]  ;;  %v616_v52 = vld [vmem:[%s6115_s1 + $0xad0] sm:$0xff] }
  0xde   :  { %1660 = vmatmul.mubr.f32.gmra.mxu1 %v220_v53  ;;  %2996 = vmatpush3.msra.mxu0 %v529_v54  ;;  %v633_v53 = vld [vmem:[%s6115_s1 + $0xb58] sm:$0xff]  ;;  %v127_v54 = vld [vmem:[%s6116_s0 + $0x388] sm:$0xff] }
  0xdf   :  { %3051 = vmatprep.subr.mxu1 %v577_v55  ;;  %2997 = vmatprep.subr.mxu0 %v544_v56  ;;  %v600_v56 = vld [vmem:[%s6115_s1 + $0xa50] sm:$0xff] }
  0xe0   :  { %3052 = vmatpush3.msra.mxu1 %v561_v57  ;;  %1559 = vmatprep.mubr.f32.mxu0 %v251_v58  ;;  %v648_v57 = vld [vmem:[%s6115_s1 + $0xbd0] sm:$0xff]  ;;  %v126_v58 = vld [vmem:[%s6116_s0 + $0x380] sm:$0xff] }
  0xe1   :  { %2998 = vmatpush3.msra.mxu0 %v528_v59  ;;  %3053 = vmatprep.subr.mxu1 %v576_v60  ;;  %v129_v59 = vld [vmem:[%s6116_s0 + $0x398] sm:$0xff] }
  0xe2   :  { %1560 = vmatmul.mubr.f32.gmra.mxu0 %v250_v61  ;;  %1664 = vmatprep.mubr.f32.mxu1 %v253_v62  ;;  %v615_v62 = vld [vmem:[%s6115_s1 + $0xac8] sm:$0xff] }
  0xe3   :  { %2999 = vmatprep.subr.mxu0 %v543_v63  ;;  %3054 = vmatpush3.msra.mxu1 %v560_v0  ;;  %v4805_v7 = vpop.f32.mrf.mxu0  ;;  %v632_v63 = vld [vmem:[%s6115_s1 + $0xb50] sm:$0xff] }
  0xe4   :  { %1665 = vmatmul.mubr.f32.gmra.mxu1 %v252_v1  ;;  %3000 = vmatpush3.msra.mxu0 %v527_v2  ;;  %v128_v0 = vld [vmem:[%s6116_s0 + $0x390] sm:$0xff]  ;;  %v599_v1 = vld [vmem:[%s6115_s1 + $0xa48] sm:$0xff] }
  0xe5   :  { %3055 = vmatprep.subr.mxu1 %v575_v3  ;;  %3001 = vmatprep.subr.mxu0 %v542_v4  ;;  %v4819_v12 = vpop.f32.mrf.mxu1  ;;  %v4821_v13 = vpop.f32.mrf.mxu0  ;;  %v647_v3 = vld [vmem:[%s6115_s1 + $0xbc8] sm:$0xff]  ;;  %v614_v4 = vld [vmem:[%s6115_s1 + $0xac0] sm:$0xff] }
  0xe6   :  { %3056 = vmatpush3.msra.mxu1 %v559_v5  ;;  %3002 = vmatpush3.msra.mxu0 %v526_v6  ;;  %v631_v5 = vld [vmem:[%s6115_s1 + $0xb48] sm:$0xff] }
  0xe7   :  { %1734 = vmatprep.mubr.f32.mxu0 %v31_v8  ;;  %3057 = vmatprep.subr.mxu1 %v574_v9  ;;  %v4835_v18 = vpop.f32.mrf.mxu1  ;;  %v159_v6 = vld [vmem:[%s6116_s0 + $0x488] sm:$0xff]  ;;  %v598_v9 = vld [vmem:[%s6115_s1 + $0xa40] sm:$0xff] }
  0xe8   :  { %1735 = vmatmul.mubr.f32.vlgmr.msra.gmra.mxu0 %v30_v10  ;;  %3058 = vmatpush3.msra.mxu1 %v558_v11  ;;  %v646_v10 = vld [vmem:[%s6115_s1 + $0xbc0] sm:$0xff] }
  0xe9   :  { %1839 = vmatprep.mubr.f32.mxu1 %v33_v14  ;;  %3083 = vmatprep.subr.mxu0 %v621_v15  ;;  %v4849_v23 = vpop.f32.mrf.mxu0  ;;  %v158_v11 = vld [vmem:[%s6116_s0 + $0x480] sm:$0xff]  ;;  %v161_v14 = vld [vmem:[%s6116_s0 + $0x498] sm:$0xff] }
  0xea   :  { %1840 = vmatmul.mubr.f32.vlgmr.msra.gmra.mxu1 %v32_v16  ;;  %3084 = vmatpush3.msra.mxu0 %v605_v17  ;;  %v613_v17 = vld [vmem:[%s6115_s1 + $0xab8] sm:$0xff] }
  0xeb   :  { %3139 = vmatprep.subr.mxu1 %v653_v19  ;;  %3085 = vmatprep.subr.mxu0 %v620_v20  ;;  %v4863_v28 = vpop.f32.mrf.mxu1  ;;  %v4865_v29 = vpop.f32.mrf.mxu0  ;;  %v630_v19 = vld [vmem:[%s6115_s1 + $0xb40] sm:$0xff]  ;;  %v160_v20 = vld [vmem:[%s6116_s0 + $0x490] sm:$0xff] }
  0xec   :  { %3140 = vmatpush3.msra.mxu1 %v637_v21  ;;  %1739 = vmatprep.mubr.f32.mxu0 %v63_v22  ;;  %v597_v21 = vld [vmem:[%s6115_s1 + $0xa38] sm:$0xff] }
  0xed   :  { %3086 = vmatpush3.msra.mxu0 %v604_v24  ;;  %3141 = vmatprep.subr.mxu1 %v652_v25  ;;  %v4879_v34 = vpop.f32.mrf.mxu1  ;;  %v645_v24 = vld [vmem:[%s6115_s1 + $0xbb8] sm:$0xff]  ;;  %v612_v25 = vld [vmem:[%s6115_s1 + $0xab0] sm:$0xff] }
  0xee   :  { %1740 = vmatmul.mubr.f32.gmra.mxu0 %v62_v26  ;;  %1844 = vmatprep.mubr.f32.mxu1 %v65_v27  ;;  %v629_v26 = vld [vmem:[%s6115_s1 + $0xb38] sm:$0xff]  ;;  %v191_v27 = vld [vmem:[%s6116_s0 + $0x588] sm:$0xff] }
  0xef   :  { %3087 = vmatprep.subr.mxu0 %v619_v30  ;;  %3142 = vmatpush3.msra.mxu1 %v636_v31  ;;  %v4893_v39 = vpop.f32.mrf.mxu0  ;;  %v596_v31 = vld [vmem:[%s6115_s1 + $0xa30] sm:$0xff] }
  0xf0   :  { %1845 = vmatmul.mubr.f32.gmra.mxu1 %v64_v32  ;;  %3088 = vmatpush3.msra.mxu0 %v603_v33  ;;  %v644_v32 = vld [vmem:[%s6115_s1 + $0xbb0] sm:$0xff]  ;;  %v190_v33 = vld [vmem:[%s6116_s0 + $0x580] sm:$0xff] }
  0xf1   :  { %3143 = vmatprep.subr.mxu1 %v651_v35  ;;  %3089 = vmatprep.subr.mxu0 %v618_v36  ;;  %v4907_v44 = vpop.f32.mrf.mxu1  ;;  %v4909_v45 = vpop.f32.mrf.mxu0  ;;  %v193_v35 = vld [vmem:[%s6116_s0 + $0x598] sm:$0xff] }
  0xf2   :  { %3144 = vmatpush3.msra.mxu1 %v635_v37  ;;  %1744 = vmatprep.mubr.f32.mxu0 %v95_v38  ;;  %v611_v38 = vld [vmem:[%s6115_s1 + $0xaa8] sm:$0xff] }
  0xf3   :  { %3090 = vmatpush3.msra.mxu0 %v602_v40  ;;  %3145 = vmatprep.subr.mxu1 %v650_v41  ;;  %v4923_v50 = vpop.f32.mrf.mxu1  ;;  %v628_v40 = vld [vmem:[%s6115_s1 + $0xb30] sm:$0xff] }
  0xf4   :  { %1745 = vmatmul.mubr.f32.gmra.mxu0 %v94_v42  ;;  %1849 = vmatprep.mubr.f32.mxu1 %v97_v43  ;;  %v192_v41 = vld [vmem:[%s6116_s0 + $0x590] sm:$0xff]  ;;  %v595_v42 = vld [vmem:[%s6115_s1 + $0xa28] sm:$0xff] }
  0xf5   :  { %3091 = vmatprep.subr.mxu0 %v617_v46  ;;  %3146 = vmatpush3.msra.mxu1 %v634_v47  ;;  %v4937_v55 = vpop.f32.mrf.mxu0  ;;  %v643_v46 = vld [vmem:[%s6115_s1 + $0xba8] sm:$0xff]  ;;  %v610_v47 = vld [vmem:[%s6115_s1 + $0xaa0] sm:$0xff] }
  0xf6   :  { %1850 = vmatmul.mubr.f32.gmra.mxu1 %v96_v48  ;;  %3092 = vmatpush3.msra.mxu0 %v601_v49  ;;  %v627_v48 = vld [vmem:[%s6115_s1 + $0xb28] sm:$0xff] }
  0xf7   :  { %3147 = vmatprep.subr.mxu1 %v649_v51  ;;  %3093 = vmatprep.subr.mxu0 %v616_v52  ;;  %v4951_v60 = vpop.f32.mrf.mxu1  ;;  %v4953_v61 = vpop.f32.mrf.mxu0  ;;  %v223_v49 = vld [vmem:[%s6116_s0 + $0x688] sm:$0xff]  ;;  %v594_v52 = vld [vmem:[%s6115_s1 + $0xa20] sm:$0xff] }
  0xf8   :  { %3148 = vmatpush3.msra.mxu1 %v633_v53  ;;  %1749 = vmatprep.mubr.f32.mxu0 %v127_v54  ;;  %v642_v53 = vld [vmem:[%s6115_s1 + $0xba0] sm:$0xff] }
  0xf9   :  { %3094 = vmatpush3.msra.mxu0 %v600_v56  ;;  %3149 = vmatprep.subr.mxu1 %v648_v57  ;;  %v4967_v2 = vpop.f32.mrf.mxu1  ;;  %v222_v54 = vld [vmem:[%s6116_s0 + $0x680] sm:$0xff]  ;;  %v225_v56 = vld [vmem:[%s6116_s0 + $0x698] sm:$0xff]  ;;  %v2557_v57 = vadd.f32 %v4821_v13, %v4805_v7  ;;  %v224_v7 = vld [vmem:[%s6116_s0 + $0x690] sm:$0xff] }
  0xfa   :  { %1750 = vmatmul.mubr.f32.gmra.mxu0 %v126_v58  ;;  %1854 = vmatprep.mubr.f32.mxu1 %v129_v59  ;;  %v593_v13 = vld [vmem:[%s6115_s1 + $0xa18] sm:$0xff] }
  0xfb   :  { %3095 = vmatprep.subr.mxu0 %v615_v62  ;;  %3150 = vmatpush3.msra.mxu1 %v632_v63  ;;  %v4981_v8 = vpop.f32.mrf.mxu0  ;;  %v609_v62 = vld [vmem:[%s6115_s1 + $0xa98] sm:$0xff]  ;;  %v626_v63 = vld [vmem:[%s6115_s1 + $0xb20] sm:$0xff] }
  0xfc   :  { %1855 = vmatmul.mubr.f32.gmra.mxu1 %v128_v0  ;;  %3096 = vmatpush3.msra.mxu0 %v599_v1  ;;  %v641_v1 = vld [vmem:[%s6115_s1 + $0xb98] sm:$0xff] }
  0xfd   :  { %3151 = vmatprep.subr.mxu1 %v647_v3  ;;  %3097 = vmatprep.subr.mxu0 %v614_v4  ;;  %v4995_v15 = vpop.f32.mrf.mxu1  ;;  %v4997_v16 = vpop.f32.mrf.mxu0  ;;  %v608_v3 = vld [vmem:[%s6115_s1 + $0xa90] sm:$0xff] }
  0xfe   :  { %3152 = vmatpush3.msra.mxu1 %v631_v5  ;;  %1754 = vmatprep.mubr.f32.mxu0 %v159_v6  ;;  %v625_v5 = vld [vmem:[%s6115_s1 + $0xb18] sm:$0xff]  ;;  %v255_v6 = vld [vmem:[%s6116_s0 + $0x788] sm:$0xff] }
  0xff   :  { %3098 = vmatpush3.msra.mxu0 %v598_v9  ;;  %3153 = vmatprep.subr.mxu1 %v646_v10  ;;  %v5011_v22 = vpop.f32.mrf.mxu1  ;;  %v2613_v9 = vadd.f32 %v4835_v18, %v4819_v12  ;;  %v257_v12 = vld [vmem:[%s6116_s0 + $0x798] sm:$0xff] }
 0x100   :  { %1755 = vmatmul.mubr.f32.gmra.mxu0 %v158_v11  ;;  %1859 = vmatprep.mubr.f32.mxu1 %v161_v14  ;;  %v592_v14 = vld [vmem:[%s6115_s1 + $0xa10] sm:$0xff] }
 0x101   :  { %3099 = vmatprep.subr.mxu0 %v613_v17  ;;  %3154 = vmatpush3.msra.mxu1 %v630_v19  ;;  %v5025_v30 = vpop.f32.mrf.mxu0  ;;  %v640_v17 = vld [vmem:[%s6115_s1 + $0xb90] sm:$0xff]  ;;  %v254_v19 = vld [vmem:[%s6116_s0 + $0x780] sm:$0xff] }
 0x102   :  { %1860 = vmatmul.mubr.f32.gmra.mxu1 %v160_v20  ;;  %3100 = vmatpush3.msra.mxu0 %v597_v21 }
 0x103   :  { %3155 = vmatprep.subr.mxu1 %v645_v24  ;;  %3101 = vmatprep.subr.mxu0 %v612_v25  ;;  %v5039_v36 = vpop.f32.mrf.mxu1  ;;  %v5041_v37 = vpop.f32.mrf.mxu0  ;;  %v607_v24 = vld [vmem:[%s6115_s1 + $0xa88] sm:$0xff]  ;;  %v624_v25 = vld [vmem:[%s6115_s1 + $0xb10] sm:$0xff] }
 0x104   :  { %3156 = vmatpush3.msra.mxu1 %v629_v26  ;;  %1759 = vmatprep.mubr.f32.mxu0 %v191_v27  ;;  %v2560_v26 = vadd.f32 %v4865_v29, %v4849_v23  ;;  %v256_v27 = vld [vmem:[%s6116_s0 + $0x790] sm:$0xff]  ;;  %v606_v23 = vld [vmem:[%s6115_s1 + $0xa80] sm:$0xff]  ;;  %v623_v29 = vld [vmem:[%s6115_s1 + $0xb08] sm:$0xff] }
 0x105   :  { %3102 = vmatpush3.msra.mxu0 %v596_v31  ;;  %3157 = vmatprep.subr.mxu1 %v644_v32  ;;  %v5055_v43 = vpop.f32.mrf.mxu1  ;;  %v591_v31 = vld [vmem:[%s6115_s1 + $0xa08] sm:$0xff] }
 0x106   :  { %1760 = vmatmul.mubr.f32.gmra.mxu0 %v190_v33  ;;  %1864 = vmatprep.mubr.f32.mxu1 %v193_v35  ;;  %v639_v33 = vld [vmem:[%s6115_s1 + $0xb88] sm:$0xff]  ;;  %v590_v35 = vld [vmem:[%s6115_s1 + $0xa00] sm:$0xff] }
 0x107   :  { %3103 = vmatprep.subr.mxu0 %v611_v38  ;;  %3158 = vmatpush3.msra.mxu1 %v628_v40  ;;  %v5069_v51 = vpop.f32.mrf.mxu0 }
 0x108   :  { %1865 = vmatmul.mubr.f32.gmra.mxu1 %v192_v41  ;;  %3104 = vmatpush3.msra.mxu0 %v595_v42  ;;  %v35_v41 = vld [vmem:[%s6116_s0 + $0xa8] sm:$0xff]  ;;  %v638_v42 = vld [vmem:[%s6115_s1 + $0xb80] sm:$0xff] }
 0x109   :  { %3159 = vmatprep.subr.mxu1 %v643_v46  ;;  %3105 = vmatprep.subr.mxu0 %v610_v47  ;;  %v5085_v58 = vpop.f32.mrf.mxu1  ;;  %v5087_v59 = vpop.f32.mrf.mxu0  ;;  %v2616_v46 = vadd.f32 %v4879_v34, %v4863_v28  ;;  %v685_v28 = vld [vmem:[%s6115_s1 + $0xcf8] sm:$0xff] }
 0x10a   :  { %3160 = vmatpush3.msra.mxu1 %v627_v48  ;;  %1764 = vmatprep.mubr.f32.mxu0 %v223_v49  ;;  %v34_v48 = vld [vmem:[%s6116_s0 + $0xa0] sm:$0xff] }
 0x10b   :  { %3106 = vmatpush3.msra.mxu0 %v594_v52  ;;  %3161 = vmatprep.subr.mxu1 %v642_v53  ;;  %v5101_v0 = vpop.f32.mrf.mxu1  ;;  %v622_v49 = vld [vmem:[%s6115_s1 + $0xb00] sm:$0xff] }
 0x10c   :  { %1765 = vmatmul.mubr.f32.gmra.mxu0 %v222_v54  ;;  %1869 = vmatprep.mubr.f32.mxu1 %v225_v56  ;;  %v793_v4 = vpop.permute.xlu0 %792  ;;  %v37_v54 = vld [vmem:[%s6116_s0 + $0xb8] sm:$0xff] }
 0x10d   :  { %3107 = vmatprep.subr.mxu0 %v609_v62  ;;  %3162 = vmatpush3.msra.mxu1 %v626_v63  ;;  %v897_v10 = vadd.f32 %v2557_v57, %v793_v4  ;;  %v5117_v11 = vpop.f32.mrf.mxu0  ;;  %v36_v57 = vld [vmem:[%s6116_s0 + $0xb0] sm:$0xff]  ;;  %v669_v62 = vld [vmem:[%s6115_s1 + $0xc78] sm:$0xff]  ;;  %v2563_v63 = vadd.f32 %v4909_v45, %v4893_v39  ;;  %v67_v39 = vld [vmem:[%s6116_s0 + $0x1a8] sm:$0xff] }
 0x10e   :  { %1870 = vmatmul.mubr.f32.gmra.mxu1 %v224_v7  ;;  %3108 = vmatpush3.msra.mxu0 %v593_v13  ;;  %v717_v13 = vld [vmem:[%s6115_s1 + $0xdf8] sm:$0xff] }
 0x10f   :  { %3163 = vmatprep.subr.mxu1 %v641_v1  ;;  %3109 = vmatprep.subr.mxu0 %v608_v3  ;;  %v1002_v18 = vadd.f32 %v2613_v9, %v897_v10  ;;  %v5131_v20 = vpop.f32.mrf.mxu1  ;;  %v5133_v21 = vpop.f32.mrf.mxu0  ;;  %v684_v1 = vld [vmem:[%s6115_s1 + $0xcf0] sm:$0xff] }
 0x110   :  { %3164 = vmatpush3.msra.mxu1 %v625_v5  ;;  %1769 = vmatprep.mubr.f32.mxu0 %v255_v6  ;;  %v701_v5 = vld [vmem:[%s6115_s1 + $0xd78] sm:$0xff]  ;;  %v668_v6 = vld [vmem:[%s6115_s1 + $0xc70] sm:$0xff] }
 0x111   :  { %3110 = vmatpush3.msra.mxu0 %v592_v14  ;;  %3165 = vmatprep.subr.mxu1 %v640_v17  ;;  %v5149_v32 = vpop.f32.mrf.mxu1  ;;  %v716_v9 = vld [vmem:[%s6115_s1 + $0xdf0] sm:$0xff]  ;;  %v66_v17 = vld [vmem:[%s6116_s0 + $0x1a0] sm:$0xff] }
 0x112   :  { %1770 = vmatmul.mubr.f32.gmra.mxu0 %v254_v19  ;;  %1874 = vmatprep.mubr.f32.mxu1 %v257_v12  ;;  %v69_v19 = vld [vmem:[%s6116_s0 + $0x1b8] sm:$0xff]  ;;  %v2619_v12 = vadd.f32 %v4923_v50, %v4907_v44  ;;  %v68_v44 = vld [vmem:[%s6116_s0 + $0x1b0] sm:$0xff]  ;;  %v667_v50 = vld [vmem:[%s6115_s1 + $0xc68] sm:$0xff] }
 0x113   :  { %3111 = vmatprep.subr.mxu0 %v607_v24  ;;  %3166 = vmatpush3.msra.mxu1 %v624_v25  ;;  %v798_v38 = vpop.permute.xlu0 %797  ;;  %v2667_v40 = vpop.f32.mrf.mxu0 }
 0x114   :  { %1875 = vmatmul.mubr.f32.gmra.mxu1 %v256_v27  ;;  %3112 = vmatpush3.msra.mxu0 %v591_v31  ;;  %v902_v47 = vadd.f32 %v2560_v26, %v798_v38  ;;  %v683_v26 = vld [vmem:[%s6115_s1 + $0xce8] sm:$0xff]  ;;  %v700_v27 = vld [vmem:[%s6115_s1 + $0xd70] sm:$0xff]  ;;  %v682_v38 = vld [vmem:[%s6115_s1 + $0xce0] sm:$0xff] }
 0x115   :  { %3167 = vmatprep.subr.mxu1 %v639_v33  ;;  %3113 = vmatprep.subr.mxu0 %v606_v23  ;;  %v2723_v52 = vpop.f32.mrf.mxu1  ;;  %v2668_v53 = vpop.f32.mrf.mxu0  ;;  %v2566_v23 = vadd.f32 %v4953_v61, %v4937_v55  ;;  %v99_v55 = vld [vmem:[%s6116_s0 + $0x2a8] sm:$0xff] }
 0x116   :  { %3168 = vmatpush3.msra.mxu1 %v623_v29  ;;  %3114 = vmatpush3.msra.mxu0 %v590_v35  ;;  %v1007_v34 = vadd.f32 %v2616_v46, %v902_v47  ;;  %v2669_v56 = vadd.f32 %v2668_v53, %v2667_v40  ;;  %v715_v35 = vld [vmem:[%s6115_s1 + $0xde8] sm:$0xff]  ;;  %v666_v46 = vld [vmem:[%s6115_s1 + $0xc60] sm:$0xff]  ;;  %v101_v53 = vld [vmem:[%s6116_s0 + $0x2b8] sm:$0xff] }
 0x117   :  { %1944 = vmatprep.mubr.f32.mxu0 %v35_v41  ;;  %3169 = vmatprep.subr.mxu1 %v638_v42  ;;  %v2724_v7 = vpop.f32.mrf.mxu1  ;;  %v699_v42 = vld [vmem:[%s6115_s1 + $0xd68] sm:$0xff]  ;;  %v714_v47 = vld [vmem:[%s6115_s1 + $0xde0] sm:$0xff] }
 0x118   :  { %1945 = vmatmul.mubr.f32.vlgmr.msra.gmra.mxu0 %v34_v48  ;;  %3170 = vmatpush3.msra.mxu1 %v622_v49  ;;  %v1107_v3 = vadd.f32 %v2669_v56, %v1002_v18  ;;  %v2725_v4 = vadd.f32 %v2724_v7, %v2723_v52  ;;  %v98_v52 = vld [vmem:[%s6116_s0 + $0x2a0] sm:$0xff] }
 0x119   :  { %2049 = vmatprep.mubr.f32.mxu1 %v37_v54  ;;  %3195 = vmatprep.subr.mxu0 %v685_v28  ;;  %v2670_v45 = vpop.f32.mrf.mxu0  ;;  %v2622_v54 = vadd.f32 %v4967_v2, %v4951_v60  ;;  %v100_v60 = vld [vmem:[%s6116_s0 + $0x2b0] sm:$0xff]  ;;  %v665_v2 = vld [vmem:[%s6115_s1 + $0xc58] sm:$0xff] }
 0x11a   :  { %2050 = vmatmul.mubr.f32.vlgmr.msra.gmra.mxu1 %v36_v57  ;;  %3196 = vmatpush3.msra.mxu0 %v669_v62  ;;  %v803_v10 = vpop.permute.xlu1 %802  ;;  %v5209_v14 = vadd.f32 %v2725_v4, %v1107_v3  ;;  %v681_v57 = vld [vmem:[%s6115_s1 + $0xcd8] sm:$0xff]  ;;  %v698_v62 = vld [vmem:[%s6115_s1 + $0xd60] sm:$0xff]  ;;  %v680_v3 = vld [vmem:[%s6115_s1 + $0xcd0] sm:$0xff]  ;;  %v2569_v4 = vadd.f32 %v4997_v16, %v4981_v8 }
 0x11b   :  { %3251 = vmatprep.subr.mxu1 %v717_v13  ;;  %3197 = vmatprep.subr.mxu0 %v684_v1  ;;  %v907_v18 = vadd.f32 %v2563_v63, %v803_v10  ;;  %v2726_v24 = vpop.f32.mrf.mxu1  ;;  %v2671_v25 = vpop.f32.mrf.mxu0  ;;  %v713_v1 = vld [vmem:[%s6115_s1 + $0xdd8] sm:$0xff]  ;;  %v664_v10 = vld [vmem:[%s6115_s1 + $0xc50] sm:$0xff] }
 0x11c   :  { %3252 = vmatpush3.msra.mxu1 %v701_v5  ;;  %1949 = vmatprep.mubr.f32.mxu0 %v67_v39  ;;  %v2672_v31 = vadd.f32 %v2671_v25, %v2670_v45  ;;  %v697_v45 = vld [vmem:[%s6115_s1 + $0xd58] sm:$0xff]  ;;  %v712_v8 = vld [vmem:[%s6115_s1 + $0xdd0] sm:$0xff] }
 0x11d   :  { %3198 = vmatpush3.msra.mxu0 %v668_v6  ;;  %3253 = vmatprep.subr.mxu1 %v716_v9  ;;  %v1012_v33 = vadd.f32 %v2619_v12, %v907_v18  ;;  %v2727_v29 = vpop.f32.mrf.mxu1  ;;  %v131_v6 = vld [vmem:[%s6116_s0 + $0x3a8] sm:$0xff]  ;;  %v696_v25 = vld [vmem:[%s6115_s1 + $0xd50] sm:$0xff] }
 0x11e   :  { %1950 = vmatmul.mubr.f32.gmra.mxu0 %v66_v17  ;;  %2054 = vmatprep.mubr.f32.mxu1 %v69_v19  ;;  %v1112_v40 = vadd.f32 %v2672_v31, %v1007_v34  ;;  %v2728_v41 = vadd.f32 %v2727_v29, %v2726_v24  ;;  %v130_v17 = vld [vmem:[%s6116_s0 + $0x3a0] sm:$0xff]  ;;  %v133_v19 = vld [vmem:[%s6116_s0 + $0x3b8] sm:$0xff]  ;;  %v679_v24 = vld [vmem:[%s6115_s1 + $0xcc8] sm:$0xff] }
 0x11f   :  { %3199 = vmatprep.subr.mxu0 %v683_v26  ;;  %3254 = vmatpush3.msra.mxu1 %v700_v27  ;;  %v2673_v61 = vpop.f32.mrf.mxu0  ;;  %v2625_v26 = vadd.f32 %v5011_v22, %v4995_v15  ;;  %v711_v15 = vld [vmem:[%s6115_s1 + $0xdc8] sm:$0xff]  ;;  %v678_v22 = vld [vmem:[%s6115_s1 + $0xcc0] sm:$0xff] }
 0x120   :  { %2055 = vmatmul.mubr.f32.gmra.mxu1 %v68_v44  ;;  %3200 = vmatpush3.msra.mxu0 %v667_v50  ;;  %v808_v48 = vpop.permute.xlu1 %807  ;;  %v5251_v49 = vadd.f32 %v2728_v41, %v1112_v40  ;;  %v132_v44 = vld [vmem:[%s6116_s0 + $0x3b0] sm:$0xff]  ;;  %v663_v50 = vld [vmem:[%s6115_s1 + $0xc48] sm:$0xff] }
 0x121   :  { %3255 = vmatprep.subr.mxu1 %v715_v35  ;;  %3201 = vmatprep.subr.mxu0 %v682_v38  ;;  %v912_v28 = vadd.f32 %v2566_v23, %v808_v48  ;;  %v2729_v34 = vpop.f32.mrf.mxu1  ;;  %v2674_v56 = vpop.f32.mrf.mxu0  ;;  %v2572_v35 = vadd.f32 %v5041_v37, %v5025_v30  ;;  %v695_v40 = vld [vmem:[%s6115_s1 + $0xd48] sm:$0xff]  ;;  %v710_v30 = vld [vmem:[%s6115_s1 + $0xdc0] sm:$0xff] }
 0x122   :  { %3256 = vmatpush3.msra.mxu1 %v699_v42  ;;  %1954 = vmatprep.mubr.f32.mxu0 %v99_v55  ;;  %v2675_v63 = vadd.f32 %v2674_v56, %v2673_v61  ;;  %v163_v41 = vld [vmem:[%s6116_s0 + $0x4a8] sm:$0xff]  ;;  %v662_v61 = vld [vmem:[%s6115_s1 + $0xc40] sm:$0xff] }
 0x123   :  { %3202 = vmatpush3.msra.mxu0 %v666_v46  ;;  %3257 = vmatprep.subr.mxu1 %v714_v47  ;;  %v1017_v7 = vadd.f32 %v2622_v54, %v912_v28  ;;  %v2730_v13 = vpop.f32.mrf.mxu1  ;;  %v162_v37 = vld [vmem:[%s6116_s0 + $0x4a0] sm:$0xff]  ;;  %v165_v46 = vld [vmem:[%s6116_s0 + $0x4b8] sm:$0xff]  ;;  %v2628_v28 = vadd.f32 %v5055_v43, %v5039_v36  ;;  %v676_v43 = vld [vmem:[%s6115_s1 + $0xcb0] sm:$0xff] }
 0x124   :  { %1955 = vmatmul.mubr.f32.gmra.mxu0 %v98_v52  ;;  %2059 = vmatprep.mubr.f32.mxu1 %v101_v53  ;;  %v1117_v5 = vadd.f32 %v2675_v63, %v1012_v33  ;;  %v2731_v39 = vadd.f32 %v2730_v13, %v2729_v34  ;;  %v677_v53 = vld [vmem:[%s6115_s1 + $0xcb8] sm:$0xff]  ;;  %v694_v54 = vld [vmem:[%s6115_s1 + $0xd40] sm:$0xff] }
 0x125   :  { %3203 = vmatprep.subr.mxu0 %v681_v57  ;;  %3258 = vmatpush3.msra.mxu1 %v698_v62  ;;  %v2676_v9 = vpop.f32.mrf.mxu0  ;;  %v164_v57 = vld [vmem:[%s6116_s0 + $0x4b0] sm:$0xff]  ;;  %v661_v62 = vld [vmem:[%s6115_s1 + $0xc38] sm:$0xff] }
 0x126   :  { %2060 = vmatmul.mubr.f32.gmra.mxu1 %v100_v60  ;;  %3204 = vmatpush3.msra.mxu0 %v665_v2  ;;  %v5293_v16 = vadd.f32 %v2731_v39, %v1117_v5  ;;  %v709_v36 = vld [vmem:[%s6115_s1 + $0xdb8] sm:$0xff]  ;;  %v660_v39 = vld [vmem:[%s6115_s1 + $0xc30] sm:$0xff] }
 0x127   :  { %3259 = vmatprep.subr.mxu1 %v713_v1  ;;  %3205 = vmatprep.subr.mxu0 %v680_v3  ;;  %v813_v12 = vpop.permute.xlu0 %812  ;;  %v2732_v18 = vpop.f32.mrf.mxu1  ;;  %v693_v13 = vld [vmem:[%s6115_s1 + $0xd38] sm:$0xff]  ;;  %v195_v1 = vld [vmem:[%s6116_s0 + $0x5a8] sm:$0xff]  ;;  %v2575_v3 = vadd.f32 %v5087_v59, %v5069_v51 }
 0x128   :  { %3260 = vmatpush3.msra.mxu1 %v697_v45  ;;  %1959 = vmatprep.mubr.f32.mxu0 %v131_v6  ;;  %v917_v27 = vadd.f32 %v2569_v4, %v813_v12  ;;  %v2677_v31 = vpop.f32.mrf.mxu0  ;;  %v708_v45 = vld [vmem:[%s6115_s1 + $0xdb0] sm:$0xff]  ;;  %v194_v6 = vld [vmem:[%s6116_s0 + $0x5a0] sm:$0xff]  ;;  %v197_v51 = vld [vmem:[%s6116_s0 + $0x5b8] sm:$0xff] }
 0x129   :  { %3206 = vmatpush3.msra.mxu0 %v664_v10  ;;  %3261 = vmatprep.subr.mxu1 %v712_v8  ;;  %v2678_v33 = vadd.f32 %v2677_v31, %v2676_v9  ;;  %v2733_v23 = vpop.f32.mrf.mxu1  ;;  %v675_v8 = vld [vmem:[%s6115_s1 + $0xca8] sm:$0xff] }
 0x12a   :  { %1960 = vmatmul.mubr.f32.gmra.mxu0 %v130_v17  ;;  %2064 = vmatprep.mubr.f32.mxu1 %v133_v19  ;;  %v1022_v29 = vadd.f32 %v2625_v26, %v917_v27  ;;  %v2734_v38 = vadd.f32 %v2733_v23, %v2732_v18  ;;  %v692_v17 = vld [vmem:[%s6115_s1 + $0xd30] sm:$0xff]  ;;  %v707_v31 = vld [vmem:[%s6115_s1 + $0xda8] sm:$0xff] }
 0x12b   :  { %3207 = vmatprep.subr.mxu0 %v679_v24  ;;  %3262 = vmatpush3.msra.mxu1 %v696_v25  ;;  %v1122_v42 = vadd.f32 %v2678_v33, %v1017_v7  ;;  %v2679_v55 = vpop.f32.mrf.mxu0  ;;  %v196_v18 = vld [vmem:[%s6116_s0 + $0x5b0] sm:$0xff]  ;;  %v659_v24 = vld [vmem:[%s6115_s1 + $0xc28] sm:$0xff]  ;;  %v2631_v25 = vadd.f32 %v5101_v0, %v5085_v58 }
 0x12c   :  { %2065 = vmatmul.mubr.f32.gmra.mxu1 %v132_v44  ;;  %3208 = vmatpush3.msra.mxu0 %v663_v50  ;;  %v674_v44 = vld [vmem:[%s6115_s1 + $0xca0] sm:$0xff]  ;;  %v691_v58 = vld [vmem:[%s6115_s1 + $0xd28] sm:$0xff] }
 0x12d   :  { %3263 = vmatprep.subr.mxu1 %v711_v15  ;;  %3209 = vmatprep.subr.mxu0 %v678_v22  ;;  %v818_v47 = vpop.permute.xlu1 %817  ;;  %v5341_v48 = vadd.f32 %v2734_v38, %v1122_v42  ;;  %v2735_v52 = vpop.f32.mrf.mxu1  ;;  %v227_v0 = vld [vmem:[%s6116_s0 + $0x6a8] sm:$0xff]  ;;  %v2578_v15 = vadd.f32 %v5133_v21, %v5117_v11  ;;  %v229_v11 = vld [vmem:[%s6116_s0 + $0x6b8] sm:$0xff] }
 0x12e   :  { %3264 = vmatpush3.msra.mxu1 %v695_v40  ;;  %1964 = vmatprep.mubr.f32.mxu0 %v163_v41  ;;  %v922_v34 = vadd.f32 %v2572_v35, %v818_v47  ;;  %v2680_v56 = vpop.f32.mrf.mxu0  ;;  %v706_v35 = vld [vmem:[%s6115_s1 + $0xda0] sm:$0xff]  ;;  %v673_v42 = vld [vmem:[%s6115_s1 + $0xc98] sm:$0xff]  ;;  %v2634_v47 = vadd.f32 %v5149_v32, %v5131_v20  ;;  %v259_v32 = vld [vmem:[%s6116_s0 + $0x7a8] sm:$0xff] }
 0x12f   :  { %3210 = vmatpush3.msra.mxu0 %v662_v61  ;;  %3265 = vmatprep.subr.mxu1 %v710_v30  ;;  %v2681_v63 = vadd.f32 %v2680_v56, %v2679_v55  ;;  %v2736_v60 = vpop.f32.mrf.mxu1  ;;  %v226_v40 = vld [vmem:[%s6116_s0 + $0x6a0] sm:$0xff]  ;;  %v689_v20 = vld [vmem:[%s6115_s1 + $0xd18] sm:$0xff] }
 0x130   :  { %1965 = vmatmul.mubr.f32.gmra.mxu0 %v162_v37  ;;  %2069 = vmatprep.mubr.f32.mxu1 %v165_v46  ;;  %v1027_v2 = vadd.f32 %v2628_v28, %v922_v34  ;;  %v2737_v7 = vadd.f32 %v2736_v60, %v2735_v52  ;;  %v690_v55 = vld [vmem:[%s6115_s1 + $0xd20] sm:$0xff]  ;;  %v228_v37 = vld [vmem:[%s6116_s0 + $0x6b0] sm:$0xff]  ;;  %v657_v46 = vld [vmem:[%s6115_s1 + $0xc18] sm:$0xff] }
 0x131   :  { %3211 = vmatprep.subr.mxu0 %v677_v53  ;;  %3266 = vmatpush3.msra.mxu1 %v694_v54  ;;  %v1127_v4 = vadd.f32 %v2681_v63, %v1022_v29  ;;  %v2682_v5 = vpop.f32.mrf.mxu0  ;;  %v658_v29 = vld [vmem:[%s6115_s1 + $0xc20] sm:$0xff]  ;;  %v705_v54 = vld [vmem:[%s6115_s1 + $0xd98] sm:$0xff]  ;;  %v672_v28 = vld [vmem:[%s6115_s1 + $0xc90] sm:$0xff] }
 0x132   :  { %2070 = vmatmul.mubr.f32.gmra.mxu1 %v164_v57  ;;  %3212 = vmatpush3.msra.mxu0 %v661_v62  ;;  %v656_v63 = vld [vmem:[%s6115_s1 + $0xc10] sm:$0xff] }
 0x133   :  { %3267 = vmatprep.subr.mxu1 %v709_v36  ;;  %3213 = vmatprep.subr.mxu0 %v676_v43  ;;  %v5383_v59 = vadd.f32 %v2737_v7, %v1127_v4  ;;  %v2738_v9 = vpop.f32.mrf.mxu1  ;;  %v2683_v10 = vpop.f32.mrf.mxu0  ;;  %v704_v60 = vld [vmem:[%s6115_s1 + $0xd90] sm:$0xff]  ;;  %v258_v43 = vld [vmem:[%s6116_s0 + $0x7a0] sm:$0xff] }
 0x134   :  { %3268 = vmatpush3.msra.mxu1 %v693_v13  ;;  %1969 = vmatprep.mubr.f32.mxu0 %v195_v1  ;;  %v823_v19 = vpop.permute.xlu0 %822  ;;  %v2684_v12 = vadd.f32 %v2683_v10, %v2682_v5  ;;  %v671_v1 = vld [vmem:[%s6115_s1 + $0xc88] sm:$0xff]  ;;  %v260_v5 = vld [vmem:[%s6116_s0 + $0x7b0] sm:$0xff] }
 0x135   :  { %3214 = vmatpush3.msra.mxu0 %v660_v39  ;;  %3269 = vmatprep.subr.mxu1 %v708_v45  ;;  %v927_v26 = vadd.f32 %v2575_v3, %v823_v19  ;;  %v2739_v27 = vpop.f32.mrf.mxu1  ;;  %v688_v3 = vld [vmem:[%s6115_s1 + $0xd10] sm:$0xff]  ;;  %v655_v39 = vld [vmem:[%s6115_s1 + $0xc08] sm:$0xff] }
 0x136   :  { %1970 = vmatmul.mubr.f32.gmra.mxu0 %v194_v6  ;;  %2074 = vmatprep.mubr.f32.mxu1 %v197_v51  ;;  %v1132_v50 = vadd.f32 %v2684_v12, %v1027_v2  ;;  %v2740_v33 = vadd.f32 %v2739_v27, %v2738_v9  ;;  %v261_v2 = vld [vmem:[%s6116_s0 + $0x7b8] sm:$0xff]  ;;  %v703_v6 = vld [vmem:[%s6115_s1 + $0xd88] sm:$0xff]  ;;  %v670_v51 = vld [vmem:[%s6115_s1 + $0xc80] sm:$0xff] }
 0x137   :  { %3215 = vmatprep.subr.mxu0 %v675_v8  ;;  %3270 = vmatpush3.msra.mxu1 %v692_v17  ;;  %v1032_v23 = vadd.f32 %v2631_v25, %v927_v26  ;;  %v2685_v22 = vpop.f32.mrf.mxu0  ;;  %v687_v8 = vld [vmem:[%s6115_s1 + $0xd08] sm:$0xff]  ;;  %v654_v17 = vld [vmem:[%s6115_s1 + $0xc00] sm:$0xff] }
 0x138   :  { %2075 = vmatmul.mubr.f32.gmra.mxu1 %v196_v18  ;;  %3216 = vmatpush3.msra.mxu0 %v659_v24  ;;  %v5419_v38 = vadd.f32 %v2740_v33, %v1132_v50  ;;  %v39_v12 = vld [vmem:[%s6116_s0 + $0xc8] sm:$0xff]  ;;  %v702_v18 = vld [vmem:[%s6115_s1 + $0xd80] sm:$0xff]  ;;  %v749_v50 = vld [vmem:[%s6115_s1 + $0xef8] sm:$0xff] }
 0x139   :  { %3271 = vmatprep.subr.mxu1 %v707_v31  ;;  %3217 = vmatprep.subr.mxu0 %v674_v44  ;;  %v2741_v21 = vpop.f32.mrf.mxu1  ;;  %v2686_v41 = vpop.f32.mrf.mxu0  ;;  %v38_v25 = vld [vmem:[%s6116_s0 + $0xc0] sm:$0xff]  ;;  %v41_v44 = vld [vmem:[%s6116_s0 + $0xd8] sm:$0xff] }
 0x13a   :  { %3272 = vmatpush3.msra.mxu1 %v691_v58  ;;  %1974 = vmatprep.mubr.f32.mxu0 %v227_v0  ;;  %v828_v61 = vpop.permute.xlu1 %827  ;;  %v2687_v30 = vadd.f32 %v2686_v41, %v2685_v22  ;;  %v686_v26 = vld [vmem:[%s6115_s1 + $0xd00] sm:$0xff]  ;;  %v40_v58 = vld [vmem:[%s6116_s0 + $0xd0] sm:$0xff]  ;;  %v733_v0 = vld [vmem:[%s6115_s1 + $0xe78] sm:$0xff] }
 0x13b   :  { %3218 = vmatpush3.msra.mxu0 %v658_v29  ;;  %3273 = vmatprep.subr.mxu1 %v706_v35  ;;  %v932_v52 = vadd.f32 %v2578_v15, %v828_v61  ;;  %v2742_v53 = vpop.f32.mrf.mxu1  ;;  %v781_v15 = vld [vmem:[%s6115_s1 + $0xff8] sm:$0xff]  ;;  %v748_v22 = vld [vmem:[%s6115_s1 + $0xef0] sm:$0xff] }
 0x13c   :  { %1975 = vmatmul.mubr.f32.gmra.mxu0 %v226_v40  ;;  %2079 = vmatprep.mubr.f32.mxu1 %v229_v11  ;;  %v1137_v34 = vadd.f32 %v2687_v30, %v1032_v23  ;;  %v2743_v56 = vadd.f32 %v2742_v53, %v2741_v21  ;;  %v765_v40 = vld [vmem:[%s6115_s1 + $0xf78] sm:$0xff]  ;;  %v71_v11 = vld [vmem:[%s6116_s0 + $0x1c8] sm:$0xff]  ;;  %v732_v41 = vld [vmem:[%s6115_s1 + $0xe70] sm:$0xff] }
 0x13d   :  { %3219 = vmatprep.subr.mxu0 %v673_v42  ;;  %3274 = vmatpush3.msra.mxu1 %v690_v55  ;;  %v1037_v57 = vadd.f32 %v2634_v47, %v932_v52  ;;  %v2688_v62 = vpop.f32.mrf.mxu0  ;;  %v70_v55 = vld [vmem:[%s6116_s0 + $0x1c0] sm:$0xff]  ;;  %v73_v61 = vld [vmem:[%s6116_s0 + $0x1d8] sm:$0xff]  ;;  %v764_v47 = vld [vmem:[%s6115_s1 + $0xf70] sm:$0xff] }
 0x13e   :  { %2080 = vmatmul.mubr.f32.gmra.mxu1 %v228_v37  ;;  %3220 = vmatpush3.msra.mxu0 %v657_v46  ;;  %v5459_v36 = vadd.f32 %v2743_v56, %v1137_v34  ;;  %v747_v46 = vld [vmem:[%s6115_s1 + $0xee8] sm:$0xff]  ;;  %v72_v53 = vld [vmem:[%s6116_s0 + $0x1d0] sm:$0xff]  ;;  %v746_v56 = vld [vmem:[%s6115_s1 + $0xee0] sm:$0xff] }
 0x13f   :  { %3275 = vmatprep.subr.mxu1 %v705_v54  ;;  %3221 = vmatprep.subr.mxu0 %v672_v28  ;;  %v2744_v7 = vpop.f32.mrf.mxu1  ;;  %v2689_v13 = vpop.f32.mrf.mxu0  ;;  %v731_v54 = vld [vmem:[%s6115_s1 + $0xe68] sm:$0xff] }
 0x140   :  { %3276 = vmatpush3.msra.mxu1 %v689_v20  ;;  %1979 = vmatprep.mubr.f32.mxu0 %v259_v32  ;;  %v2690_v4 = vadd.f32 %v2689_v13, %v2688_v62  ;;  %v779_v34 = vld [vmem:[%s6115_s1 + $0xfe8] sm:$0xff] }
 0x141   :  { %3222 = vmatpush3.msra.mxu0 %v656_v63  ;;  %3277 = vmatprep.subr.mxu1 %v704_v60  ;;  %v2745_v45 = vpop.f32.mrf.mxu1  ;;  %v103_v62 = vld [vmem:[%s6116_s0 + $0x2c8] sm:$0xff]  ;;  %v730_v60 = vld [vmem:[%s6115_s1 + $0xe60] sm:$0xff] }
 0x142   :  { %1980 = vmatmul.mubr.f32.gmra.mxu0 %v258_v43  ;;  %2084 = vmatprep.mubr.f32.mxu1 %v261_v2  ;;  %v1142_v9 = vadd.f32 %v2690_v4, %v1037_v57  ;;  %v2746_v10 = vadd.f32 %v2745_v45, %v2744_v7  ;;  %v763_v57 = vld [vmem:[%s6115_s1 + $0xf68] sm:$0xff]  ;;  %v102_v2 = vld [vmem:[%s6116_s0 + $0x2c0] sm:$0xff]  ;;  %v105_v7 = vld [vmem:[%s6116_s0 + $0x2d8] sm:$0xff] }
 0x143   :  { %3223 = vmatprep.subr.mxu0 %v671_v1  ;;  %3278 = vmatpush3.msra.mxu1 %v688_v3  ;;  %v2779_v19 = vpop.f32.mrf.mxu0  ;;  %v745_v1 = vld [vmem:[%s6115_s1 + $0xed8] sm:$0xff]  ;;  %v762_v3 = vld [vmem:[%s6115_s1 + $0xf60] sm:$0xff] }
 0x144   :  { %2085 = vmatmul.mubr.f32.gmra.mxu1 %v260_v5  ;;  %3224 = vmatpush3.msra.mxu0 %v655_v39  ;;  %v5497_v24 = vadd.f32 %v2746_v10, %v1142_v9  ;;  %v104_v39 = vld [vmem:[%s6116_s0 + $0x2d0] sm:$0xff]  ;;  %v729_v45 = vld [vmem:[%s6115_s1 + $0xe58] sm:$0xff] }
 0x145   :  { %3279 = vmatprep.subr.mxu1 %v703_v6  ;;  %3225 = vmatprep.subr.mxu0 %v670_v51  ;;  %v2835_v27 = vpop.f32.mrf.mxu1  ;;  %v2780_v31 = vpop.f32.mrf.mxu0  ;;  %v777_v6 = vld [vmem:[%s6115_s1 + $0xfd8] sm:$0xff]  ;;  %v744_v51 = vld [vmem:[%s6115_s1 + $0xed0] sm:$0xff] }
 0x146   :  { %3280 = vmatpush3.msra.mxu1 %v687_v8  ;;  %3226 = vmatpush3.msra.mxu0 %v654_v17  ;;  %v2781_v33 = vadd.f32 %v2780_v31, %v2779_v19  ;;  %v761_v8 = vld [vmem:[%s6115_s1 + $0xf58] sm:$0xff]  ;;  %v135_v17 = vld [vmem:[%s6116_s0 + $0x3c8] sm:$0xff] }
 0x147   :  { %2154 = vmatprep.mubr.f32.mxu0 %v39_v12  ;;  %3281 = vmatprep.subr.mxu1 %v702_v18  ;;  %v2836_v23 = vpop.f32.mrf.mxu1  ;;  %v728_v12 = vld [vmem:[%s6115_s1 + $0xe50] sm:$0xff]  ;;  %v743_v31 = vld [vmem:[%s6115_s1 + $0xec8] sm:$0xff] }
 0x148   :  { %2155 = vmatmul.mubr.f32.vlgmr.msra.gmra.mxu0 %v38_v25  ;;  %3282 = vmatpush3.msra.mxu1 %v686_v26  ;;  %v1317_v29 = vadd.f32 %v2781_v33, %v5209_v14  ;;  %v2837_v35 = vadd.f32 %v2836_v23, %v2835_v27  ;;  %v780_v14 = vld [vmem:[%s6115_s1 + $0xff0] sm:$0xff]  ;;  %v134_v25 = vld [vmem:[%s6116_s0 + $0x3c0] sm:$0xff]  ;;  %v137_v26 = vld [vmem:[%s6116_s0 + $0x3d8] sm:$0xff] }
 0x149   :  { %2259 = vmatprep.mubr.f32.mxu1 %v41_v44  ;;  %3307 = vmatprep.subr.mxu0 %v749_v50  ;;  %v2782_v21 = vpop.f32.mrf.mxu0  ;;  %v760_v44 = vld [vmem:[%s6115_s1 + $0xf50] sm:$0xff] }
 0x14a   :  { %2260 = vmatmul.mubr.f32.vlgmr.msra.gmra.mxu1 %v40_v58  ;;  %3308 = vmatpush3.msra.mxu0 %v733_v0  ;;  %v5536_v42 = vadd.f32 %v2837_v35, %v1317_v29  ;;  %v136_v58 = vld [vmem:[%s6116_s0 + $0x3d0] sm:$0xff]  ;;  %v727_v0 = vld [vmem:[%s6115_s1 + $0xe48] sm:$0xff] }
 0x14b   :  { %3363 = vmatprep.subr.mxu1 %v781_v15  ;;  %3309 = vmatprep.subr.mxu0 %v748_v22  ;;  %v2838_v30 = vpop.f32.mrf.mxu1  ;;  %v2783_v37 = vpop.f32.mrf.mxu0  ;;  %v775_v15 = vld [vmem:[%s6115_s1 + $0xfc8] sm:$0xff]  ;;  %v742_v22 = vld [vmem:[%s6115_s1 + $0xec0] sm:$0xff] }
 0x14c   :  { %3364 = vmatpush3.msra.mxu1 %v765_v40  ;;  %2159 = vmatprep.mubr.f32.mxu0 %v71_v11  ;;  %v2784_v52 = vadd.f32 %v2783_v37, %v2782_v21  ;;  %v759_v35 = vld [vmem:[%s6115_s1 + $0xf48] sm:$0xff]  ;;  %v741_v37 = vld [vmem:[%s6115_s1 + $0xeb8] sm:$0xff] }
 0x14d   :  { %3310 = vmatpush3.msra.mxu0 %v732_v41  ;;  %3365 = vmatprep.subr.mxu1 %v780_v14  ;;  %v2839_v28 = vpop.f32.mrf.mxu1  ;;  %v167_v40 = vld [vmem:[%s6116_s0 + $0x4c8] sm:$0xff]  ;;  %v726_v41 = vld [vmem:[%s6115_s1 + $0xe40] sm:$0xff] }
 0x14e   :  { %2160 = vmatmul.mubr.f32.gmra.mxu0 %v70_v55  ;;  %2264 = vmatprep.mubr.f32.mxu1 %v73_v61  ;;  %v1322_v20 = vadd.f32 %v2784_v52, %v5251_v49  ;;  %v2840_v32 = vadd.f32 %v2839_v28, %v2838_v30  ;;  %v778_v49 = vld [vmem:[%s6115_s1 + $0xfe0] sm:$0xff]  ;;  %v725_v52 = vld [vmem:[%s6115_s1 + $0xe38] sm:$0xff] }
 0x14f   :  { %3311 = vmatprep.subr.mxu0 %v747_v46  ;;  %3366 = vmatpush3.msra.mxu1 %v764_v47  ;;  %v2785_v63 = vpop.f32.mrf.mxu0  ;;  %v774_v14 = vld [vmem:[%s6115_s1 + $0xfc0] sm:$0xff]  ;;  %v168_v47 = vld [vmem:[%s6116_s0 + $0x4d0] sm:$0xff]  ;;  %v773_v28 = vld [vmem:[%s6115_s1 + $0xfb8] sm:$0xff] }
 0x150   :  { %2265 = vmatmul.mubr.f32.gmra.mxu1 %v72_v53  ;;  %3312 = vmatpush3.msra.mxu0 %v731_v54  ;;  %v5575_v43 = vadd.f32 %v2840_v32, %v1322_v20  ;;  %v166_v55 = vld [vmem:[%s6116_s0 + $0x4c0] sm:$0xff]  ;;  %v757_v20 = vld [vmem:[%s6115_s1 + $0xf38] sm:$0xff]  ;;  %v199_v32 = vld [vmem:[%s6116_s0 + $0x5c8] sm:$0xff] }
 0x151   :  { %3367 = vmatprep.subr.mxu1 %v779_v34  ;;  %3313 = vmatprep.subr.mxu0 %v746_v56  ;;  %v2786_v13 = vpop.f32.mrf.mxu0  ;;  %v758_v46 = vld [vmem:[%s6115_s1 + $0xf40] sm:$0xff]  ;;  %v740_v34 = vld [vmem:[%s6115_s1 + $0xeb0] sm:$0xff] }
 0x152   :  { %3368 = vmatpush3.msra.mxu1 %v763_v57  ;;  %2164 = vmatprep.mubr.f32.mxu0 %v103_v62  ;;  %v2841_v4 = vpop.f32.mrf.mxu1  ;;  %v2787_v5 = vadd.f32 %v2786_v13, %v2785_v63  ;;  %v724_v62 = vld [vmem:[%s6115_s1 + $0xe30] sm:$0xff] }
 0x153   :  { %3314 = vmatpush3.msra.mxu0 %v730_v60  ;;  %3369 = vmatprep.subr.mxu1 %v778_v49  ;;  %v772_v63 = vld [vmem:[%s6115_s1 + $0xfb0] sm:$0xff] }
 0x154   :  { %2165 = vmatmul.mubr.f32.gmra.mxu0 %v102_v2  ;;  %2269 = vmatprep.mubr.f32.mxu1 %v105_v7  ;;  %v1327_v9 = vadd.f32 %v2787_v5, %v5293_v16  ;;  %v2842_v10 = vpop.f32.mrf.mxu1  ;;  %v776_v16 = vld [vmem:[%s6115_s1 + $0xfd0] sm:$0xff]  ;;  %v198_v2 = vld [vmem:[%s6116_s0 + $0x5c0] sm:$0xff]  ;;  %v201_v7 = vld [vmem:[%s6116_s0 + $0x5d8] sm:$0xff] }
 0x155   :  { %3315 = vmatprep.subr.mxu0 %v745_v1  ;;  %3370 = vmatpush3.msra.mxu1 %v762_v3  ;;  %v2843_v19 = vadd.f32 %v2842_v10, %v2841_v4  ;;  %v739_v1 = vld [vmem:[%s6115_s1 + $0xea8] sm:$0xff]  ;;  %v200_v4 = vld [vmem:[%s6116_s0 + $0x5d0] sm:$0xff] }
 0x156   :  { %2270 = vmatmul.mubr.f32.gmra.mxu1 %v104_v39  ;;  %3316 = vmatpush3.msra.mxu0 %v729_v45  ;;  %v2788_v18 = vpop.f32.mrf.mxu0  ;;  %v723_v5 = vld [vmem:[%s6115_s1 + $0xe28] sm:$0xff] }
 0x157   :  { %3371 = vmatprep.subr.mxu1 %v777_v6  ;;  %3317 = vmatprep.subr.mxu0 %v744_v51  ;;  %v5620_v27 = vadd.f32 %v2843_v19, %v1327_v9  ;;  %v771_v45 = vld [vmem:[%s6115_s1 + $0xfa8] sm:$0xff]  ;;  %v738_v6 = vld [vmem:[%s6115_s1 + $0xea0] sm:$0xff] }
 0x158   :  { %3372 = vmatpush3.msra.mxu1 %v761_v8  ;;  %2169 = vmatprep.mubr.f32.mxu0 %v135_v17  ;;  %v2844_v50 = vpop.f32.mrf.mxu1  ;;  %v2789_v33 = vpop.f32.mrf.mxu0  ;;  %v755_v10 = vld [vmem:[%s6115_s1 + $0xf28] sm:$0xff]  ;;  %v722_v17 = vld [vmem:[%s6115_s1 + $0xe20] sm:$0xff] }
 0x159   :  { %3318 = vmatpush3.msra.mxu0 %v728_v12  ;;  %3373 = vmatprep.subr.mxu1 %v776_v16  ;;  %v2790_v23 = vadd.f32 %v2789_v33, %v2788_v18  ;;  %v231_v8 = vld [vmem:[%s6116_s0 + $0x6c8] sm:$0xff]  ;;  %v770_v19 = vld [vmem:[%s6115_s1 + $0xfa0] sm:$0xff]  ;;  %v721_v33 = vld [vmem:[%s6115_s1 + $0xe18] sm:$0xff] }
 0x15a   :  { %2170 = vmatmul.mubr.f32.gmra.mxu0 %v134_v25  ;;  %2274 = vmatprep.mubr.f32.mxu1 %v137_v26  ;;  %v2845_v29 = vpop.f32.mrf.mxu1  ;;  %v230_v18 = vld [vmem:[%s6116_s0 + $0x6c0] sm:$0xff]  ;;  %v233_v25 = vld [vmem:[%s6116_s0 + $0x6d8] sm:$0xff] }
 0x15b   :  { %3319 = vmatprep.subr.mxu0 %v743_v31  ;;  %3374 = vmatpush3.msra.mxu1 %v760_v44  ;;  %v1332_v11 = vadd.f32 %v2790_v23, %v5341_v48  ;;  %v2846_v21 = vadd.f32 %v2845_v29, %v2844_v50  ;;  %v169_v48 = vld [vmem:[%s6116_s0 + $0x4d8] sm:$0xff]  ;;  %v232_v50 = vld [vmem:[%s6116_s0 + $0x6d0] sm:$0xff] }
 0x15c   :  { %2275 = vmatmul.mubr.f32.gmra.mxu1 %v136_v58  ;;  %3320 = vmatpush3.msra.mxu0 %v727_v0  ;;  %v737_v31 = vld [vmem:[%s6115_s1 + $0xe98] sm:$0xff]  ;;  %v736_v23 = vld [vmem:[%s6115_s1 + $0xe90] sm:$0xff] }
 0x15d   :  { %3375 = vmatprep.subr.mxu1 %v775_v15  ;;  %3321 = vmatprep.subr.mxu0 %v742_v22  ;;  %v5659_v61 = vadd.f32 %v2846_v21, %v1332_v11  ;;  %v2791_v30 = vpop.f32.mrf.mxu0  ;;  %v769_v0 = vld [vmem:[%s6115_s1 + $0xf98] sm:$0xff]  ;;  %v720_v11 = vld [vmem:[%s6115_s1 + $0xe10] sm:$0xff] }
 0x15e   :  { %3376 = vmatpush3.msra.mxu1 %v759_v35  ;;  %2174 = vmatprep.mubr.f32.mxu0 %v167_v40  ;;  %v753_v29 = vld [vmem:[%s6115_s1 + $0xf18] sm:$0xff]  ;;  %v263_v35 = vld [vmem:[%s6116_s0 + $0x7c8] sm:$0xff]  ;;  %v768_v21 = vld [vmem:[%s6115_s1 + $0xf90] sm:$0xff] }
 0x15f   :  { %3322 = vmatpush3.msra.mxu0 %v726_v41  ;;  %3377 = vmatprep.subr.mxu1 %v774_v14  ;;  %v2847_v53 = vpop.f32.mrf.mxu1  ;;  %v2792_v54 = vpop.f32.mrf.mxu0  ;;  %v262_v14 = vld [vmem:[%s6116_s0 + $0x7c0] sm:$0xff] }
 0x160   :  { %2175 = vmatmul.mubr.f32.gmra.mxu0 %v166_v55  ;;  %2279 = vmatprep.mubr.f32.mxu1 %v169_v48  ;;  %v2793_v56 = vadd.f32 %v2792_v54, %v2791_v30  ;;  %v265_v55 = vld [vmem:[%s6116_s0 + $0x7d8] sm:$0xff]  ;;  %v767_v54 = vld [vmem:[%s6115_s1 + $0xf88] sm:$0xff] }
 0x161   :  { %3323 = vmatprep.subr.mxu0 %v741_v37  ;;  %3378 = vmatpush3.msra.mxu1 %v758_v46  ;;  %v2848_v57 = vpop.f32.mrf.mxu1  ;;  %v735_v37 = vld [vmem:[%s6115_s1 + $0xe88] sm:$0xff]  ;;  %v752_v46 = vld [vmem:[%s6115_s1 + $0xf10] sm:$0xff] }
 0x162   :  { %2280 = vmatmul.mubr.f32.gmra.mxu1 %v168_v47  ;;  %3324 = vmatpush3.msra.mxu0 %v725_v52  ;;  %v1337_v60 = vadd.f32 %v2793_v56, %v5383_v59  ;;  %v2849_v49 = vadd.f32 %v2848_v57, %v2847_v53  ;;  %v756_v59 = vld [vmem:[%s6115_s1 + $0xf30] sm:$0xff]  ;;  %v751_v56 = vld [vmem:[%s6115_s1 + $0xf08] sm:$0xff] }
 0x163   :  { %3379 = vmatprep.subr.mxu1 %v773_v28  ;;  %3325 = vmatprep.subr.mxu0 %v740_v34  ;;  %v2794_v13 = vpop.f32.mrf.mxu0  ;;  %v264_v52 = vld [vmem:[%s6116_s0 + $0x7d0] sm:$0xff]  ;;  %v734_v28 = vld [vmem:[%s6115_s1 + $0xe80] sm:$0xff] }
 0x164   :  { %3380 = vmatpush3.msra.mxu1 %v757_v20  ;;  %2179 = vmatprep.mubr.f32.mxu0 %v199_v32  ;;  %v5704_v3 = vadd.f32 %v2849_v49, %v1337_v60  ;;  %v718_v20 = vld [vmem:[%s6115_s1 + $0xe00] sm:$0xff] }
 0x165   :  { %3326 = vmatpush3.msra.mxu0 %v724_v62  ;;  %3381 = vmatprep.subr.mxu1 %v772_v63  ;;  %v2795_v39 = vpop.f32.mrf.mxu0  ;;  %v43_v62 = vld [vmem:[%s6116_s0 + $0xe8] sm:$0xff]  ;;  %v766_v63 = vld [vmem:[%s6115_s1 + $0xf80] sm:$0xff] }
 0x166   :  { %2180 = vmatmul.mubr.f32.gmra.mxu0 %v198_v2  ;;  %2284 = vmatprep.mubr.f32.mxu1 %v201_v7  ;;  %v2850_v51 = vpop.f32.mrf.mxu1  ;;  %v2796_v9 = vadd.f32 %v2795_v39, %v2794_v13  ;;  %v42_v60 = vld [vmem:[%s6116_s0 + $0xe0] sm:$0xff]  ;;  %v45_v13 = vld [vmem:[%s6116_s0 + $0xf8] sm:$0xff] }
 0x167   :  { %3327 = vmatprep.subr.mxu0 %v739_v1  ;;  %3382 = vmatpush3.msra.mxu1 %v756_v59  ;;  %v750_v49 = vld [vmem:[%s6115_s1 + $0xf00] sm:$0xff]  ;;  %v75_v1 = vld [vmem:[%s6116_s0 + $0x1e8] sm:$0xff] }
 0x168   :  { %2285 = vmatmul.mubr.f32.gmra.mxu1 %v200_v4  ;;  %3328 = vmatpush3.msra.mxu0 %v723_v5  ;;  %v1342_v12 = vadd.f32 %v2796_v9, %v5419_v38  ;;  %v2851_v16 = vpop.f32.mrf.mxu1  ;;  %v754_v38 = vld [vmem:[%s6115_s1 + $0xf20] sm:$0xff]  ;;  %v44_v4 = vld [vmem:[%s6116_s0 + $0xf0] sm:$0xff]  ;;  %v107_v9 = vld [vmem:[%s6116_s0 + $0x2e8] sm:$0xff] }
 0x169   :  { %3383 = vmatprep.subr.mxu1 %v771_v45  ;;  %3329 = vmatprep.subr.mxu0 %v738_v6  ;;  %v2852_v26 = vadd.f32 %v2851_v16, %v2850_v51  ;;  %v74_v45 = vld [vmem:[%s6116_s0 + $0x1e0] sm:$0xff] }
 0x16a   :  { %3384 = vmatpush3.msra.mxu1 %v755_v10  ;;  %2184 = vmatprep.mubr.f32.mxu0 %v231_v8  ;;  %v2797_v44 = vpop.f32.mrf.mxu0  ;;  %v76_v8 = vld [vmem:[%s6116_s0 + $0x1f0] sm:$0xff] }
 0x16b   :  { %3330 = vmatpush3.msra.mxu0 %v722_v17  ;;  %3385 = vmatprep.subr.mxu1 %v770_v19  ;;  %v5749_v58 = vadd.f32 %v2852_v26, %v1342_v12  ;;  %v109_v19 = vld [vmem:[%s6116_s0 + $0x2f8] sm:$0xff]  ;;  %v139_v26 = vld [vmem:[%s6116_s0 + $0x3e8] sm:$0xff] }
 0x16c   :  { %2185 = vmatmul.mubr.f32.gmra.mxu0 %v230_v18  ;;  %2289 = vmatprep.mubr.f32.mxu1 %v233_v25  ;;  %v2853_v15 = vpop.f32.mrf.mxu1  ;;  %v2798_v22 = vpop.f32.mrf.mxu0  ;;  %v106_v18 = vld [vmem:[%s6116_s0 + $0x2e0] sm:$0xff] }
 0x16d   :  { %3331 = vmatprep.subr.mxu0 %v737_v31  ;;  %3386 = vmatpush3.msra.mxu1 %v754_v38  ;;  %v2799_v40 = vadd.f32 %v2798_v22, %v2797_v44  ;;  %v108_v38 = vld [vmem:[%s6116_s0 + $0x2f0] sm:$0xff]  ;;  %v141_v44 = vld [vmem:[%s6116_s0 + $0x3f8] sm:$0xff] }
 0x16e   :  { %2290 = vmatmul.mubr.f32.gmra.mxu1 %v232_v50  ;;  %3332 = vmatpush3.msra.mxu0 %v721_v33  ;;  %v2854_v41 = vpop.f32.mrf.mxu1 }
 0x16f   :  { %3387 = vmatprep.subr.mxu1 %v769_v0  ;;  %3333 = vmatprep.subr.mxu0 %v736_v23  ;;  %v1347_v48 = vadd.f32 %v2799_v40, %v5459_v36  ;;  %v2855_v30 = vadd.f32 %v2854_v41, %v2853_v15  ;;  %v719_v36 = vld [vmem:[%s6115_s1 + $0xe08] sm:$0xff]  ;;  %v138_v0 = vld [vmem:[%s6116_s0 + $0x3e0] sm:$0xff]  ;;  %v173_v40 = vld [vmem:[%s6116_s0 + $0x4f8] sm:$0xff] }
 0x170   :  { %3388 = vmatpush3.msra.mxu1 %v753_v29  ;;  %2189 = vmatprep.mubr.f32.mxu0 %v263_v35  ;;  %v2800_v47 = vpop.f32.mrf.mxu0  ;;  %v171_v23 = vld [vmem:[%s6116_s0 + $0x4e8] sm:$0xff]  ;;  %v140_v29 = vld [vmem:[%s6116_s0 + $0x3f0] sm:$0xff] }
 0x171   :  { %3334 = vmatpush3.msra.mxu0 %v720_v11  ;;  %3389 = vmatprep.subr.mxu1 %v768_v21  ;;  %v5788_v53 = vadd.f32 %v2855_v30, %v1347_v48  ;;  %v170_v21 = vld [vmem:[%s6116_s0 + $0x4e0] sm:$0xff]  ;;  %v172_v48 = vld [vmem:[%s6116_s0 + $0x4f0] sm:$0xff] }
 0x172   :  { %2190 = vmatmul.mubr.f32.gmra.mxu0 %v262_v14  ;;  %2294 = vmatprep.mubr.f32.mxu1 %v265_v55  ;;  %v2801_v34 = vpop.f32.mrf.mxu0 }
 0x173   :  { %3335 = vmatprep.subr.mxu0 %v735_v37  ;;  %3390 = vmatpush3.msra.mxu1 %v752_v46  ;;  %v2856_v32 = vpop.f32.mrf.mxu1  ;;  %v2802_v57 = vadd.f32 %v2801_v34, %v2800_v47  ;;  %v205_v37 = vld [vmem:[%s6116_s0 + $0x5f8] sm:$0xff]  ;;  %v202_v47 = vld [vmem:[%s6116_s0 + $0x5e0] sm:$0xff]  ;;  %v204_v34 = vld [vmem:[%s6116_s0 + $0x5f0] sm:$0xff] }
 0x174   :  { %2295 = vmatmul.mubr.f32.gmra.mxu1 %v264_v52  ;;  %3336 = vmatpush3.msra.mxu0 %v719_v36 }
 0x175   :  { %3391 = vmatprep.subr.mxu1 %v767_v54  ;;  %3337 = vmatprep.subr.mxu0 %v734_v28  ;;  %v1352_v2 = vadd.f32 %v2802_v57, %v5497_v24  ;;  %v2857_v7 = vpop.f32.mrf.mxu1  ;;  %v77_v24 = vld [vmem:[%s6116_s0 + $0x1f8] sm:$0xff]  ;;  %v235_v54 = vld [vmem:[%s6116_s0 + $0x6e8] sm:$0xff]  ;;  %v234_v57 = vld [vmem:[%s6116_s0 + $0x6e0] sm:$0xff] }
 0x176   :  { %3392 = vmatpush3.msra.mxu1 %v751_v56  ;;  %3338 = vmatpush3.msra.mxu0 %v718_v20  ;;  %v2858_v59 = vadd.f32 %v2857_v7, %v2856_v32  ;;  %v237_v20 = vld [vmem:[%s6116_s0 + $0x6f8] sm:$0xff] }
 0x177   :  { %2364 = vmatprep.mubr.f32.mxu0 %v43_v62  ;;  %3393 = vmatprep.subr.mxu1 %v766_v63  ;;  %v2891_v5 = vpop.f32.mrf.mxu0  ;;  %v267_v63 = vld [vmem:[%s6116_s0 + $0x7e8] sm:$0xff] }
 0x178   :  { %2365 = vmatmul.mubr.f32.vlgmr.msra.gmra.mxu0 %v42_v60  ;;  %3394 = vmatpush3.msra.mxu1 %v750_v49  ;;  %v5827_v39 = vadd.f32 %v2858_v59, %v1352_v2  ;;  %v236_v49 = vld [vmem:[%s6116_s0 + $0x6f0] sm:$0xff]  ;;  %v266_v59 = vld [vmem:[%s6116_s0 + $0x7e0] sm:$0xff] }
 0x179   :  { %2469 = vmatprep.mubr.f32.mxu1 %v45_v13  ;;  %2369 = vmatprep.mubr.f32.mxu0 %v75_v1  ;;  %v2947_v6 = vpop.f32.mrf.mxu1  ;;  %v2892_v51 = vpop.f32.mrf.mxu0  ;;  %v269_v13 = vld [vmem:[%s6116_s0 + $0x7f8] sm:$0xff] }
 0x17a   :  { %2470 = vmatmul.mubr.f32.vlgmr.msra.gmra.mxu1 %v44_v4  ;;  %v2893_v10 = vadd.f32 %v2892_v51, %v2891_v5 }
 0x17b   :  { %2474 = vmatprep.mubr.f32.mxu1 %v77_v24  ;;  %v2948_v17 = vpop.f32.mrf.mxu1 }
 0x17c   :  { %2370 = vmatmul.mubr.f32.gmra.mxu0 %v74_v45  ;;  %v1527_v12 = vadd.f32 %v2893_v10, %v5536_v42  ;;  %v2949_v16 = vadd.f32 %v2948_v17, %v2947_v6 }
 0x17d   :  { %2374 = vmatprep.mubr.f32.mxu0 %v107_v9  ;;  %v2894_v25 = vpop.f32.mrf.mxu0 }
 0x17e   :  { %2475 = vmatmul.mubr.f32.gmra.mxu1 %v76_v8  ;;  %v5848_v31 = vadd.f32 %v2949_v16, %v1527_v12 }
 0x17f   :  { %2479 = vmatprep.mubr.f32.mxu1 %v109_v19  ;;  %v2895_v42 = vpop.f32.mrf.mxu0 }
 0x180   :  { %2375 = vmatmul.mubr.f32.gmra.mxu0 %v106_v18  ;;  %v2950_v50 = vpop.f32.mrf.mxu1  ;;  %v2896_v33 = vadd.f32 %v2895_v42, %v2894_v25 }
 0x181   :  { %2379 = vmatprep.mubr.f32.mxu0 %v139_v26 }
 0x182   :  { %2480 = vmatmul.mubr.f32.gmra.mxu1 %v108_v38  ;;  %v1532_v15 = vadd.f32 %v2896_v33, %v5575_v43  ;;  %v2951_v22 = vpop.f32.mrf.mxu1  ;;  %v203_v43 = vld [vmem:[%s6116_s0 + $0x5e8] sm:$0xff] }
 0x183   :  { %2484 = vmatprep.mubr.f32.mxu1 %v141_v44  ;;  %v2952_v35 = vadd.f32 %v2951_v22, %v2950_v50 }
 0x184   :  { %2380 = vmatmul.mubr.f32.gmra.mxu0 %v138_v0  ;;  %v2897_v11 = vpop.f32.mrf.mxu0 }
 0x185   :  { %2384 = vmatprep.mubr.f32.mxu0 %v171_v23  ;;  %v5872_v41 = vadd.f32 %v2952_v35, %v1532_v15 }
 0x186   :  { %2485 = vmatmul.mubr.f32.gmra.mxu1 %v140_v29  ;;  %v2953_v14 = vpop.f32.mrf.mxu1  ;;  %v2898_v55 = vpop.f32.mrf.mxu0 }
 0x187   :  { %2489 = vmatprep.mubr.f32.mxu1 %v173_v40  ;;  %v2899_v30 = vadd.f32 %v2898_v55, %v2897_v11 }
 0x188   :  { %2385 = vmatmul.mubr.f32.gmra.mxu0 %v170_v21  ;;  %v2954_v46 = vpop.f32.mrf.mxu1 }
 0x189   :  { %2389 = vmatprep.mubr.f32.mxu0 %v203_v43  ;;  %v1537_v52 = vadd.f32 %v2899_v30, %v5620_v27  ;;  %v2955_v36 = vadd.f32 %v2954_v46, %v2953_v14 }
 0x18a   :  { %2490 = vmatmul.mubr.f32.gmra.mxu1 %v172_v48  ;;  %v2900_v28 = vpop.f32.mrf.mxu0 }
 0x18b   :  { %2494 = vmatprep.mubr.f32.mxu1 %v205_v37  ;;  %v5893_v56 = vadd.f32 %v2955_v36, %v1537_v52 }
 0x18c   :  { %2390 = vmatmul.mubr.f32.gmra.mxu0 %v202_v47  ;;  %v2956_v27 = vpop.f32.mrf.mxu1  ;;  %v2901_v32 = vpop.f32.mrf.mxu0 }
 0x18d   :  { %2394 = vmatprep.mubr.f32.mxu0 %v235_v54  ;;  %v2902_v62 = vadd.f32 %v2901_v32, %v2900_v28 }
 0x18e   :  { %2495 = vmatmul.mubr.f32.gmra.mxu1 %v204_v34  ;;  %v2957_v60 = vpop.f32.mrf.mxu1 }
 0x18f   :  { %2499 = vmatprep.mubr.f32.mxu1 %v237_v20  ;;  %v1542_v2 = vadd.f32 %v2902_v62, %v5659_v61  ;;  %v2958_v7 = vadd.f32 %v2957_v60, %v2956_v27  ;;  %v268_v61 = vld [vmem:[%s6116_s0 + $0x7f0] sm:$0xff] }
 0x190   :  { %2395 = vmatmul.mubr.f32.gmra.mxu0 %v234_v57  ;;  %v2903_v1 = vpop.f32.mrf.mxu0 }
 0x191   :  { %2399 = vmatprep.mubr.f32.mxu0 %v267_v63  ;;  %v5914_v4 = vadd.f32 %v2958_v7, %v1542_v2 }
 0x192   :  { %2500 = vmatmul.mubr.f32.gmra.mxu1 %v236_v49  ;;  %v2959_v5 = vpop.f32.mrf.mxu1  ;;  %v2904_v24 = vpop.f32.mrf.mxu0 }
 0x193   :  { %2504 = vmatprep.mubr.f32.mxu1 %v269_v13  ;;  %v2905_v45 = vadd.f32 %v2904_v24, %v2903_v1 }
 0x194   :  { %2400 = vmatmul.mubr.f32.gmra.mxu0 %v266_v59  ;;  %v2960_v6 = vpop.f32.mrf.mxu1 }
 0x195   :  { %v1547_v51 = vadd.f32 %v2905_v45, %v5704_v3  ;;  %v2961_v9 = vadd.f32 %v2960_v6, %v2959_v5 }
 0x196   :  { %2505 = vmatmul.mubr.f32.gmra.mxu1 %v268_v61  ;;  %v2906_v10 = vpop.f32.mrf.mxu0 }
 0x197   :  { %v1652_v8 = vadd.f32 %v2961_v9, %v1547_v51 }
 0x198   :  { %v2962_v17 = vpop.f32.mrf.mxu1  ;;  %v2907_v19 = vpop.f32.mrf.mxu0 }
 0x199   :  { %v2908_v12 = vadd.f32 %v2907_v19, %v2906_v10 }
 0x19a   :  { %v2963_v16 = vpop.f32.mrf.mxu1 }
 0x19b   :  { %v1552_v18 = vadd.f32 %v2908_v12, %v5749_v58  ;;  %v2964_v25 = vadd.f32 %v2963_v16, %v2962_v17 }
 0x19c   :  { %v2909_v26 = vpop.f32.mrf.mxu0 }
 0x19d   :  { %v1657_v38 = vadd.f32 %v2964_v25, %v1552_v18 }
 0x19e   :  { %v2965_v42 = vpop.f32.mrf.mxu1  ;;  %v2910_v44 = vpop.f32.mrf.mxu0 }
 0x19f   :  { %v2911_v50 = vadd.f32 %v2910_v44, %v2909_v26 }
 0x1a0   :  { %v2966_v33 = vpop.f32.mrf.mxu1 }
 0x1a1   :  { %v1557_v0 = vadd.f32 %v2911_v50, %v5788_v53  ;;  %v2967_v3 = vadd.f32 %v2966_v33, %v2965_v42 }
 0x1a2   :  { %v2912_v23 = vpop.f32.mrf.mxu0 }
 0x1a3   :  { %v1662_v15 = vadd.f32 %v2967_v3, %v1557_v0 }
 0x1a4   :  { %v2968_v22 = vpop.f32.mrf.mxu1  ;;  %v2913_v29 = vpop.f32.mrf.mxu0 }
 0x1a5   :  { %v2914_v35 = vadd.f32 %v2913_v29, %v2912_v23 }
 0x1a6   :  { %v2969_v40 = vpop.f32.mrf.mxu1 }
 0x1a7   :  { %v1562_v11 = vadd.f32 %v2914_v35, %v5827_v39  ;;  %v2970_v21 = vadd.f32 %v2969_v40, %v2968_v22 }
 0x1a8   :  { %v3003_v58 = vpop.f32.mrf.mxu0 }
 0x1a9   :  { %v1667_v43 = vadd.f32 %v2970_v21, %v1562_v11 }
 0x1aa   :  { %v3059_v14 = vpop.f32.mrf.mxu1  ;;  %v3004_v55 = vpop.f32.mrf.mxu0 }
 0x1ab   :  { %v3005_v48 = vadd.f32 %v3004_v55, %v3003_v58 }
 0x1ac   :  { %v3060_v30 = vpop.f32.mrf.mxu1 }
 0x1ad   :  { %v1737_v37 = vadd.f32 %v3005_v48, %v5848_v31  ;;  %v3061_v46 = vadd.f32 %v3060_v30, %v3059_v14 }
 0x1ae   :  { %v3006_v53 = vpop.f32.mrf.mxu0 }
 0x1af   :  { %v5924_v47 = vadd.f32 %v3061_v46, %v1737_v37 }
 0x1b0   :  { %v3062_v52 = vpop.f32.mrf.mxu1  ;;  %v3007_v36 = vpop.f32.mrf.mxu0 }
 0x1b1   :  { %v3008_v54 = vadd.f32 %v3007_v36, %v3006_v53 }
 0x1b2   :  { %v3063_v28 = vpop.f32.mrf.mxu1 }
 0x1b3   :  { %v1742_v34 = vadd.f32 %v3008_v54, %v5872_v41  ;;  %v3064_v39 = vadd.f32 %v3063_v28, %v3062_v52 }
 0x1b4   :  { %v3009_v20 = vpop.f32.mrf.mxu0 }
 0x1b5   :  { %v5927_v27 = vadd.f32 %v3064_v39, %v1742_v34 }
 0x1b6   :  { %v3065_v32 = vpop.f32.mrf.mxu1  ;;  %v3010_v57 = vpop.f32.mrf.mxu0 }
 0x1b7   :  { %v3011_v62 = vadd.f32 %v3010_v57, %v3009_v20 }
 0x1b8   :  { %v3066_v63 = vpop.f32.mrf.mxu1 }
 0x1b9   :  { %v1747_v31 = vadd.f32 %v3011_v62, %v5893_v56  ;;  %v3067_v60 = vadd.f32 %v3066_v63, %v3065_v32 }
 0x1ba   :  { %v3012_v49 = vpop.f32.mrf.mxu0 }
 0x1bb   :  { %v5930_v2 = vadd.f32 %v3067_v60, %v1747_v31 }
 0x1bc   :  { %v3068_v7 = vpop.f32.mrf.mxu1  ;;  %v3013_v13 = vpop.f32.mrf.mxu0 }
 0x1bd   :  { %v3014_v1 = vadd.f32 %v3013_v13, %v3012_v49 }
 0x1be   :  { %v3069_v59 = vpop.f32.mrf.mxu1 }
 0x1bf   :  { %v1752_v41 = vadd.f32 %v3014_v1, %v5914_v4  ;;  %v3070_v5 = vadd.f32 %v3069_v59, %v3068_v7 }
 0x1c0   :  { %v3015_v24 = vpop.f32.mrf.mxu0 }
 0x1c1   :  { %v5933_v61 = vadd.f32 %v3070_v5, %v1752_v41 }
 0x1c2   :  { %v3071_v45 = vpop.f32.mrf.mxu1  ;;  %v3016_v6 = vpop.f32.mrf.mxu0 }
 0x1c3   :  { %v3017_v51 = vadd.f32 %v3016_v6, %v3015_v24 }
 0x1c4   :  { %v3072_v9 = vpop.f32.mrf.mxu1 }
 0x1c5   :  { %v1757_v10 = vadd.f32 %v3017_v51, %v1652_v8  ;;  %v3073_v56 = vadd.f32 %v3072_v9, %v3071_v45 }
 0x1c6   :  { %v3018_v17 = vpop.f32.mrf.mxu0 }
 0x1c7   :  { %v5935_v19 = vadd.f32 %v3073_v56, %v1757_v10 }
 0x1c8   :  { %v3074_v12 = vpop.f32.mrf.mxu1  ;;  %v3019_v16 = vpop.f32.mrf.mxu0 }
 0x1c9   :  { %v3020_v18 = vadd.f32 %v3019_v16, %v3018_v17 }
 0x1ca   :  { %v3075_v25 = vpop.f32.mrf.mxu1 }
 0x1cb   :  { %v1762_v26 = vadd.f32 %v3020_v18, %v1657_v38  ;;  %v3076_v42 = vadd.f32 %v3075_v25, %v3074_v12 }
 0x1cc   :  { %v3021_v4 = vpop.f32.mrf.mxu0 }
 0x1cd   :  { %v5937_v44 = vadd.f32 %v3076_v42, %v1762_v26 }
 0x1ce   :  { %v3077_v50 = vpop.f32.mrf.mxu1  ;;  %v3022_v33 = vpop.f32.mrf.mxu0 }
 0x1cf   :  { %v3023_v0 = vadd.f32 %v3022_v33, %v3021_v4 }
 0x1d0   :  { %v3078_v3 = vpop.f32.mrf.mxu1 }
 0x1d1   :  { %v1767_v23 = vadd.f32 %v3023_v0, %v1662_v15  ;;  %v3079_v22 = vadd.f32 %v3078_v3, %v3077_v50 }
 0x1d2   :  { %v3024_v8 = vpop.f32.mrf.mxu0 }
 0x1d3   :  { %v5939_v29 = vadd.f32 %v3079_v22, %v1767_v23 }
 0x1d4   :  { %v3080_v35 = vpop.f32.mrf.mxu1  ;;  %v3025_v40 = vpop.f32.mrf.mxu0 }
 0x1d5   :  { %6119 = vst [vmem:[#allocation2_spill] sm:$0xff] %v5939_v29  ;;  %v3026_v11 = vadd.f32 %v3025_v40, %v3024_v8 }
 0x1d6   :  { %v3081_v21 = vpop.f32.mrf.mxu1 }
 0x1d7   :  { %v1772_v58 = vadd.f32 %v3026_v11, %v1667_v43  ;;  %v3082_v14 = vadd.f32 %v3081_v21, %v3080_v35 }
 0x1d8   :  { %v3115_v38 = vpop.f32.mrf.mxu0 }
 0x1d9   :  { %v5941_v55 = vadd.f32 %v3082_v14, %v1772_v58 }
 0x1da   :  { %v5943_v48 = vpop.f32.mrf.mxu1  ;;  %v3116_v30 = vpop.f32.mrf.mxu0 }
 0x1db   :  { %6120 = vst [vmem:[#allocation3_spill] sm:$0xff] %v5941_v55 }
 0x1dc   :  { %v3172_v37 = vpop.f32.mrf.mxu1 }
 0x1de   :  { %v3118_v46 = vpop.f32.mrf.mxu0 }
 0x1e0   :  { %v5945_v53 = vpop.f32.mrf.mxu1  ;;  %v3119_v15 = vpop.f32.mrf.mxu0 }
 0x1e2   :  { %v5947_v52 = vpop.f32.mrf.mxu1 }
 0x1e4   :  { %v3121_v36 = vpop.f32.mrf.mxu0 }
 0x1e6   :  { %v5949_v54 = vpop.f32.mrf.mxu1  ;;  %v3122_v28 = vpop.f32.mrf.mxu0 }
 0x1e7   :  { %v3123_v29 = vadd.f32 %v3122_v28, %v3121_v36 }
 0x1e8   :  { %v5951_v34 = vpop.f32.mrf.mxu1 }
 0x1ea   :  { %v5953_v43 = vpop.f32.mrf.mxu0 }
 0x1ec   :  { %v5955_v39 = vpop.f32.mrf.mxu1  ;;  %v3125_v20 = vpop.f32.mrf.mxu0 }
 0x1ee   :  { %v5957_v32 = vpop.f32.mrf.mxu1 }
 0x1f0   :  { %v5959_v57 = vpop.f32.mrf.mxu0 }
 0x1f2   :  { %v5961_v62 = vpop.f32.mrf.mxu1  ;;  %v5963_v63 = vpop.f32.mrf.mxu0 }
 0x1f4   :  { %v5965_v31 = vpop.f32.mrf.mxu1 }
 0x1f6   :  { %v5967_v60 = vpop.f32.mrf.mxu0 }
 0x1f8   :  { %v5969_v49 = vpop.f32.mrf.mxu1  ;;  %v5971_v7 = vpop.f32.mrf.mxu0 }
 0x1fa   :  { %v5973_v13 = vpop.f32.mrf.mxu1 }
 0x1fc   :  { %v5975_v1 = vpop.f32.mrf.mxu0 }
 0x1fe   :  { %v5977_v59 = vpop.f32.mrf.mxu1  ;;  %v5979_v41 = vpop.f32.mrf.mxu0 }
 0x1ff   :  { %6121 = vst [vmem:[#allocation4_spill] sm:$0xff] %v5977_v59 }
 0x200   :  { %v5981_v5 = vpop.f32.mrf.mxu1 }
 0x201   :  { %6122 = vst [vmem:[#allocation5_spill] sm:$0xff] %v5981_v5 }
 0x202   :  { %v5983_v24 = vpop.f32.mrf.mxu0 }
 0x203   :  { %6123 = vst [vmem:[#allocation6_spill] sm:$0xff] %v5983_v24 }
 0x204   :  { %v5985_v45 = vpop.f32.mrf.mxu1  ;;  %v5987_v6 = vpop.f32.mrf.mxu0 }
 0x205   :  { %6124 = vst [vmem:[#allocation7_spill] sm:$0xff] %v5985_v45  ;;  %6125 = vst [vmem:[#allocation8_spill] sm:$0xff] %v5987_v6  ;;  %v3117_v45 = vadd.f32 %v3116_v30, %v3115_v38 }
 0x206   :  { %v5989_v51 = vpop.f32.mrf.mxu1 }
 0x207   :  { %6126 = vst [vmem:[#allocation9_spill] sm:$0xff] %v5989_v51 }
 0x208   :  { %v3227_v9 = vpop.f32.mrf.mxu0 }
 0x20a   :  { %v3283_v10 = vpop.f32.mrf.mxu1  ;;  %v3228_v56 = vpop.f32.mrf.mxu0 }
 0x20b   :  { %v3229_v24 = vadd.f32 %v3228_v56, %v3227_v9 }
 0x20c   :  { %v3284_v17 = vpop.f32.mrf.mxu1 }
 0x20d   :  { %v3285_v28 = vadd.f32 %v3284_v17, %v3283_v10 }
 0x20e   :  { %v3230_v12 = vpop.f32.mrf.mxu0 }
 0x210   :  { %v3286_v16 = vpop.f32.mrf.mxu1  ;;  %v3231_v18 = vpop.f32.mrf.mxu0 }
 0x212   :  { %v3287_v25 = vpop.f32.mrf.mxu1 }
 0x214   :  { %v3233_v26 = vpop.f32.mrf.mxu0 }
 0x216   :  { %v5991_v42 = vpop.f32.mrf.mxu1  ;;  %v3234_v4 = vpop.f32.mrf.mxu0 }
 0x217   :  { %v3235_v9 = vadd.f32 %v3234_v4, %v3233_v26 }
 0x218   :  { %v5993_v50 = vpop.f32.mrf.mxu1 }
 0x21a   :  { %v3236_v33 = vpop.f32.mrf.mxu0 }
 0x21c   :  { %v5995_v0 = vpop.f32.mrf.mxu1  ;;  %v3237_v3 = vpop.f32.mrf.mxu0 }
 0x21e   :  { %v5997_v23 = vpop.f32.mrf.mxu1 }
 0x220   :  { %v5999_v22 = vpop.f32.mrf.mxu0 }
 0x222   :  { %v6001_v8 = vpop.f32.mrf.mxu1  ;;  %v6003_v35 = vpop.f32.mrf.mxu0 }
 0x223   :  { %6127 = vst [vmem:[#allocation10_spill] sm:$0xff] %v6001_v8  ;;  %v1947_v8 = vadd.f32 %v3117_v45, %v5924_v47  ;;  %v3179_v45 = vadd.f32 %v5951_v34, %v5949_v54  ;;  %v3182_v54 = vadd.f32 %v5957_v32, %v5955_v39  ;;  %v3185_v32 = vadd.f32 %v5965_v31, %v5961_v62 }
 0x224   :  { %v6005_v40 = vpop.f32.mrf.mxu1  ;;  %v3294_v62 = vadd.f32 %v5997_v23, %v5995_v0  ;;  %v6136_v23 = vld [vmem:[#allocation2_spill] sm:$0xff] }
 0x225   :  { %6128 = vst [vmem:[#allocation11_spill] sm:$0xff] %v6005_v40  ;;  %v3120_v40 = vadd.f32 %v3119_v15, %v3118_v46  ;;  %v3232_v46 = vadd.f32 %v3231_v18, %v3230_v12  ;;  %v1957_v15 = vadd.f32 %v3123_v29, %v5930_v2  ;;  %v3129_v2 = vadd.f32 %v5963_v63, %v5959_v57 }
 0x226   :  { %v6007_v11 = vpop.f32.mrf.mxu0  ;;  %v3288_v29 = vadd.f32 %v3287_v25, %v3286_v16  ;;  %v3238_v12 = vadd.f32 %v3237_v3, %v3236_v33  ;;  %v3291_v57 = vadd.f32 %v5993_v50, %v5991_v42  ;;  %v3241_v42 = vadd.f32 %v6003_v35, %v5999_v22 }
 0x227   :  { %v1952_v30 = vadd.f32 %v3120_v40, %v5927_v27  ;;  %v1967_v4 = vadd.f32 %v3129_v2, %v5935_v19  ;;  %v3188_v35 = vadd.f32 %v5973_v13, %v5969_v49  ;;  %v6142_v2 = vld [vmem:[#allocation5_spill] sm:$0xff] }
 0x228   :  { %v6009_v21 = vpop.f32.mrf.mxu1  ;;  %v6011_v58 = vpop.f32.mrf.mxu0 }
 0x229   :  { %6129 = vst [vmem:[#allocation12_spill] sm:$0xff] %v6009_v21  ;;  %6130 = vst [vmem:[#allocation13_spill] sm:$0xff] %v6011_v58  ;;  %v3173_v21 = vadd.f32 %v3172_v37, %v5943_v48  ;;  %v3126_v48 = vadd.f32 %v3125_v20, %v5953_v43 }
 0x22a   :  { %v6013_v14 = vpop.f32.mrf.mxu1 }
 0x22b   :  { %6131 = vst [vmem:[#allocation14_spill] sm:$0xff] %v6013_v14  ;;  %v2052_v38 = vadd.f32 %v3173_v21, %v1947_v8 }
 0x22c   :  { %v6015_v51 = vpop.f32.mrf.mxu0 }
 0x22d   :  { %v2157_v47 = vadd.f32 %v3229_v24, %v2052_v38 }
 0x22e   :  { %v6017_v55 = vpop.f32.mrf.mxu1  ;;  %v6019_v5 = vpop.f32.mrf.mxu0 }
 0x22f   :  { %6132 = vst [vmem:[#allocation15_spill] sm:$0xff] %v6017_v55  ;;  %v2262_v8 = vadd.f32 %v3285_v28, %v2157_v47 }
 0x230   :  { %v6021_v59 = vpop.f32.mrf.mxu1 }
 0x231   :  { %6133 = vst [vmem:[#allocation16_spill] sm:$0xff] %v6021_v59  ;;  %v3176_v59 = vadd.f32 %v5947_v52, %v5945_v53  ;;  %v1962_v53 = vadd.f32 %v3126_v48, %v5933_v61  ;;  %v3132_v61 = vadd.f32 %v5971_v7, %v5967_v60 }
 0x232   :  { %v6024_v6 = vpop.f32.mrf.mxu0 }
 0x233   :  { %v2057_v36 = vadd.f32 %v3176_v59, %v1952_v30  ;;  %v2067_v25 = vadd.f32 %v3182_v54, %v1962_v53  ;;  %v1972_v19 = vadd.f32 %v3132_v61, %v5937_v44  ;;  %v3135_v30 = vadd.f32 %v5979_v41, %v5975_v1  ;;  %v6135_v44 = vld [vmem:[#allocation13_spill] sm:$0xff]  ;;  %v6139_v53 = vld [vmem:[#allocation10_spill] sm:$0xff] }
 0x234   :  { %v6027_v58 = vpop.f32.mrf.mxu1  ;;  %v6029_v14 = vpop.f32.mrf.mxu0  ;;  %v3244_v48 = vadd.f32 %v6135_v44, %v6007_v11 }
 0x235   :  { %v2162_v40 = vadd.f32 %v3232_v46, %v2057_v36  ;;  %v2172_v3 = vadd.f32 %v3238_v12, %v2067_v25  ;;  %v2077_v0 = vadd.f32 %v3188_v35, %v1972_v19  ;;  %v6143_v12 = vld [vmem:[#allocation12_spill] sm:$0xff] }
 0x236   :  { %v6032_v55 = vpop.f32.mrf.mxu1 }
 0x237   :  { %6134 = vst [vmem:[#allocation17_spill] sm:$0xff] %v6032_v55  ;;  %v2062_v55 = vadd.f32 %v3179_v45, %v1957_v15  ;;  %v2267_v17 = vadd.f32 %v3288_v29, %v2162_v40  ;;  %v2072_v15 = vadd.f32 %v3185_v32, %v1967_v4  ;;  %v6138_v40 = vld [vmem:[#allocation8_spill] sm:$0xff]  ;;  %v6147_v32 = vld [vmem:[#allocation9_spill] sm:$0xff] }
 0x238   :  { %v3339_v37 = vpop.f32.mrf.mxu0 }
 0x239   :  { %v2167_v34 = vadd.f32 %v3235_v9, %v2062_v55  ;;  %v2177_v36 = vadd.f32 %v3241_v42, %v2072_v15  ;;  %v1977_v9 = vadd.f32 %v3135_v30, %v6136_v23 }
 0x23a   :  { %v3395_v56 = vpop.f32.mrf.mxu1  ;;  %v3340_v27 = vpop.f32.mrf.mxu0 }
 0x23b   :  { %v3341_v21 = vadd.f32 %v3340_v27, %v3339_v37  ;;  %v2272_v33 = vadd.f32 %v3291_v57, %v2167_v34  ;;  %v2277_v37 = vadd.f32 %v3294_v62, %v2172_v3  ;;  %v3250_v3 = vadd.f32 %v6029_v14, %v6024_v6 }
 0x23c   :  { %v3396_v52 = vpop.f32.mrf.mxu1  ;;  %v3342_v24 = vpop.f32.mrf.mxu0 }
 0x23d   :  { %v2367_v43 = vadd.f32 %v3341_v21, %v2262_v8  ;;  %v3397_v20 = vadd.f32 %v3396_v52, %v3395_v56  ;;  %v6137_v8 = vld [vmem:[#allocation6_spill] sm:$0xff]  ;;  %v6140_v52 = vld [vmem:[#allocation11_spill] sm:$0xff] }
 0x23e   :  { %v3398_v59 = vpop.f32.mrf.mxu1  ;;  %v3343_v10 = vpop.f32.mrf.mxu0  ;;  %v3138_v21 = vadd.f32 %v6138_v40, %v6137_v8  ;;  %v3297_v49 = vadd.f32 %v6140_v52, %v6139_v53 }
 0x23f   :  { %v2472_v18 = vadd.f32 %v3397_v20, %v2367_v43  ;;  %v3344_v26 = vadd.f32 %v3343_v10, %v3342_v24  ;;  %v6141_v24 = vld [vmem:[#allocation4_spill] sm:$0xff]  ;;  %v2182_v43 = vadd.f32 %v3244_v48, %v2077_v0 }
 0x240   :  { %v3399_v63 = vpop.f32.mrf.mxu1  ;;  %v3345_v16 = vpop.f32.mrf.mxu0  ;;  %v3191_v29 = vadd.f32 %v6142_v2, %v6141_v24  ;;  %v2282_v34 = vadd.f32 %v3297_v49, %v2177_v36 }
 0x241   :  { %2511 = vst.msk [vmem:[%s6118_s3] sm:$0xff] %vm2510_vm0, %v2472_v18  ;;  %v2372_v55 = vadd.f32 %v3344_v26, %v2267_v17  ;;  %v3400_v39 = vadd.f32 %v3399_v63, %v3398_v59  ;;  %v3247_v59 = vadd.f32 %v6019_v5, %v6015_v51  ;;  %v6144_v18 = vld [vmem:[#allocation14_spill] sm:$0xff] }
 0x242   :  { %v3401_v60 = vpop.f32.mrf.mxu1  ;;  %v3346_v7 = vpop.f32.mrf.mxu0  ;;  %v3300_v26 = vadd.f32 %v6144_v18, %v6143_v12  ;;  %v2082_v63 = vadd.f32 %v3191_v29, %v1977_v9 }
 0x243   :  { %v2477_v50 = vadd.f32 %v3400_v39, %v2372_v55  ;;  %v3347_v38 = vadd.f32 %v3346_v7, %v3345_v16  ;;  %v6145_v16 = vld [vmem:[#allocation3_spill] sm:$0xff] }
 0x244   :  { %v3402_v47 = vpop.f32.mrf.mxu1  ;;  %v3348_v46 = vpop.f32.mrf.mxu0  ;;  %v1982_v25 = vadd.f32 %v3138_v21, %v6145_v16  ;;  %v6146_v39 = vld [vmem:[#allocation7_spill] sm:$0xff]  ;;  %v2287_v51 = vadd.f32 %v3300_v26, %v2182_v43  ;;  %v2187_v7 = vadd.f32 %v3247_v59, %v2082_v63 }
 0x245   :  { %2512 = vst.msk [vmem:[%s6118_s3 + $0x8] sm:$0xff] %vm2510_vm0, %v2477_v50  ;;  %v2377_v31 = vadd.f32 %v3347_v38, %v2272_v33  ;;  %v3403_v22 = vadd.f32 %v3402_v47, %v3401_v60  ;;  %v3194_v5 = vadd.f32 %v6147_v32, %v6146_v39  ;;  %v6148_v47 = vld [vmem:[#allocation15_spill] sm:$0xff] }
 0x246   :  { %v3404_v1 = vpop.f32.mrf.mxu1  ;;  %v3349_v41 = vpop.f32.mrf.mxu0 }
 0x247   :  { %v2482_v28 = vadd.f32 %v3403_v22, %v2377_v31  ;;  %v3350_v45 = vadd.f32 %v3349_v41, %v3348_v46  ;;  %v2087_v30 = vadd.f32 %v3194_v5, %v1982_v25  ;;  %v6149_v46 = vld [vmem:[#allocation16_spill] sm:$0xff] }
 0x248   :  { %v3405_v56 = vpop.f32.mrf.mxu1  ;;  %v3351_v27 = vpop.f32.mrf.mxu0  ;;  %v3303_v15 = vadd.f32 %v6149_v46, %v6148_v47 }
 0x249   :  { %2513 = vst.msk [vmem:[%s6118_s3 + $0x10] sm:$0xff] %vm2510_vm0, %v2482_v28  ;;  %v2382_v13 = vadd.f32 %v3350_v45, %v2277_v37  ;;  %v3406_v11 = vadd.f32 %v3405_v56, %v3404_v1  ;;  %v2192_v48 = vadd.f32 %v3250_v3, %v2087_v30  ;;  %v6150_v37 = vld [vmem:[#allocation17_spill] sm:$0xff] }
 0x24a   :  { %v3407_v20 = vpop.f32.mrf.mxu1  ;;  %v3352_v54 = vpop.f32.mrf.mxu0  ;;  %v2292_v44 = vadd.f32 %v3303_v15, %v2187_v7  ;;  %v3306_v36 = vadd.f32 %v6150_v37, %v6027_v58 }
 0x24b   :  { %v2487_v10 = vadd.f32 %v3406_v11, %v2382_v13  ;;  %v3353_v17 = vadd.f32 %v3352_v54, %v3351_v27 }
 0x24c   :  { %v3408_v61 = vpop.f32.mrf.mxu1  ;;  %v3354_v57 = vpop.f32.mrf.mxu0  ;;  %v2297_v9 = vadd.f32 %v3306_v36, %v2192_v48 }
 0x24d   :  { %2514 = vst.msk [vmem:[%s6118_s3 + $0x18] sm:$0xff] %vm2510_vm0, %v2487_v10  ;;  %v2387_v4 = vadd.f32 %v3353_v17, %v2282_v34  ;;  %v3409_v55 = vadd.f32 %v3408_v61, %v3407_v20 }
 0x24e   :  { %v3410_v33 = vpop.f32.mrf.mxu1  ;;  %v3355_v60 = vpop.f32.mrf.mxu0 }
 0x24f   :  { %v2492_v42 = vadd.f32 %v3409_v55, %v2387_v4  ;;  %v3356_v50 = vadd.f32 %v3355_v60, %v3354_v57 }
 0x250   :  { %v3411_v38 = vpop.f32.mrf.mxu1  ;;  %v3357_v19 = vpop.f32.mrf.mxu0 }
 0x251   :  { %2515 = vst.msk [vmem:[%s6118_s3 + $0x20] sm:$0xff] %vm2510_vm0, %v2492_v42  ;;  %v2392_v62 = vadd.f32 %v3356_v50, %v2287_v51  ;;  %v3412_v31 = vadd.f32 %v3411_v38, %v3410_v33 }
 0x252   :  { %v3413_v22 = vpop.f32.mrf.mxu1  ;;  %v3358_v35 = vpop.f32.mrf.mxu0 }
 0x253   :  { %v2497_v6 = vadd.f32 %v3412_v31, %v2392_v62  ;;  %v3359_v14 = vadd.f32 %v3358_v35, %v3357_v19 }
 0x254   :  { %v3414_v1 = vpop.f32.mrf.mxu1  ;;  %v3360_v41 = vpop.f32.mrf.mxu0 }
 0x255   :  { %2516 = vst.msk [vmem:[%s6118_s3 + $0x28] sm:$0xff] %vm2510_vm0, %v2497_v6  ;;  %v2397_v28 = vadd.f32 %v3359_v14, %v2292_v44  ;;  %v3415_v45 = vadd.f32 %v3414_v1, %v3413_v22 }
 0x256   :  { %v3416_v0 = vpop.f32.mrf.mxu1  ;;  %v3361_v23 = vpop.f32.mrf.mxu0 }
 0x257   :  { %v2502_v56 = vadd.f32 %v3415_v45, %v2397_v28  ;;  %v3362_v27 = vadd.f32 %v3361_v23, %v3360_v41 }
 0x258   :  { %v3417_v8 = vpop.f32.mrf.mxu1 }
 0x259   :  { %2517 = vst.msk [vmem:[%s6118_s3 + $0x30] sm:$0xff] %vm2510_vm0, %v2502_v56  ;;  %v2402_v40 = vadd.f32 %v3362_v27, %v2297_v9  ;;  %v3418_v58 = vadd.f32 %v3417_v8, %v3416_v0 }
 0x25b   :  { %v2507_v21 = vadd.f32 %v3418_v58, %v2402_v40 }
 0x25d   :  { %2518 = vst.msk [vmem:[%s6118_s3 + $0x38] sm:$0xff] %vm2510_vm0, %v2507_v21 }

</bundles_post_ra>
